<compile_context>
chip_gen: v7x
topology: tpu7x:2x2x1
jax: 0.10.0
libtpu: 0.0.40
codegen_flags: <defaults>
</compile_context>

<pallas_src>
import functools

import jax
import jax.numpy as jnp
from jax.experimental import pallas as pl
from jax.experimental.pallas import tpu as pltpu


VMEM_LIMIT = 32 * 1024 * 1024  # safe on v7x (64 MiB physical); v5e/v6e headroom


# ---------------------------------------------------------------------------
# Static planning helpers (run at build time)
# ---------------------------------------------------------------------------
def _round_up(x, m):
    return ((x + m - 1) // m) * m


def _plan_tiles(K, N, tk_cap=2048, tn_cap=512):
    """Padded sizes + tile sizes for a (K, N) weight matrix.

    Single-K-tile layers pad K only to the bf16 sublane multiple (32) instead
    of 128; multi-K-tile layers use 128-aligned tiles.
    """
    Nr = _round_up(N, 128)
    nn = max(1, -(-Nr // tn_cap))
    tn = _round_up(-(-Nr // nn), 128)
    Np = nn * tn
    if K <= tk_cap:
        Kp = _round_up(K, 32)
        tk = Kp
    else:
        Kr = _round_up(K, 128)
        nk = -(-Kr // tk_cap)
        tk = _round_up(-(-Kr // nk), 128)
        Kp = nk * tk
    return Kp, tk, Np, tn


def _contributing_taps(H, W, k=3, s=2, p=1):
    """3x3 / stride-2 / pad-1 taps that can ever read a real pixel."""
    Ho = (H + 2 * p - k) // s + 1
    Wo = (W + 2 * p - k) // s + 1
    taps = []
    for kh in range(k):
        rows_ok = any(0 <= kh - p + s * oh < H for oh in range(Ho))
        for kw in range(k):
            cols_ok = any(0 <= kw - p + s * ow < W for ow in range(Wo))
            if rows_ok and cols_ok:
                taps.append((kh, kw))
    return taps, Ho, Wo


def _elu(r):
    # ELU(alpha=1): x if x > 0 else exp(x) - 1 (overflow-safe)
    return jnp.where(r > 0, r, jnp.exp(jnp.minimum(r, 0.0)) - 1.0)


# ---------------------------------------------------------------------------
# Pallas kernels
# ---------------------------------------------------------------------------
def _matmul_bias_act_kernel(x_ref, w_ref, b_ref, o_ref, acc_ref, *, apply_elu):
    """o = act(x @ w + b); grid = (N tiles [parallel], K tiles [arbitrary])."""
    k = pl.program_id(1)

    @pl.when(k == 0)
    def _():
        acc_ref[...] = jnp.zeros_like(acc_ref)

    acc_ref[...] += jnp.dot(x_ref[...], w_ref[...],
                            preferred_element_type=jnp.float32)

    @pl.when(k == pl.num_programs(1) - 1)
    def _():
        r = acc_ref[...] + b_ref[...]
        if apply_elu:
            r = _elu(r)
        o_ref[...] = r.astype(o_ref.dtype)


def matmul_bias_act(x, w, b, *, tk, tn, apply_elu):
    """x: (M, Kp) bf16; w: (Kp, Np) bf16; b: (1, Np) f32 -> (M, Np) bf16."""
    M, Kp = x.shape
    Kp2, Np = w.shape
    assert Kp == Kp2, (Kp, Kp2)
    grid = (Np // tn, Kp // tk)
    flops = 2 * M * Kp * Np + M * Np
    bytes_accessed = 2 * (M * Kp + Kp * Np + M * Np) + 4 * Np
    return pl.pallas_call(
        functools.partial(_matmul_bias_act_kernel, apply_elu=apply_elu),
        out_shape=jax.ShapeDtypeStruct((M, Np), jnp.bfloat16),
        grid_spec=pltpu.PrefetchScalarGridSpec(
            num_scalar_prefetch=0,
            grid=grid,
            in_specs=[pl.BlockSpec((M, tk), lambda j, k: (0, k)),
                      pl.BlockSpec((tk, tn), lambda j, k: (k, j)),
                      pl.BlockSpec((1, tn), lambda j, k: (0, j))],
            out_specs=pl.BlockSpec((M, tn), lambda j, k: (0, j)),
            scratch_shapes=[pltpu.VMEM((M, tn), jnp.float32)]),
        compiler_params=pltpu.CompilerParams(
            dimension_semantics=("parallel", "arbitrary"),
            vmem_limit_bytes=VMEM_LIMIT),
        cost_estimate=pl.CostEstimate(
            flops=flops,
            transcendentals=M * Np if apply_elu else 0,
            bytes_accessed=bytes_accessed),
    )(x, w, b)


def _fused_tail_kernel(*refs, n_layers, elu_flags, latent):
    """Chain: [tail convs (1x1 spatial)] -> fc -> fused mu/log_var head + KL.

    refs = (x, w0, b0, ..., w{n-1}, b{n-1}, ml_out, kl_out).  All weights are
    VMEM-resident; intermediates stay in vregs/VMEM as bf16; f32 accumulation.
    """
    x_ref = refs[0]
    ml_ref = refs[1 + 2 * n_layers]
    kl_ref = refs[2 + 2 * n_layers]

    h = x_ref[...]
    for i in range(n_layers):
        w = refs[1 + 2 * i][...]
        b = refs[2 + 2 * i][...]
        r = jnp.dot(h, w, preferred_element_type=jnp.float32) + b
        if elu_flags[i]:
            r = _elu(r)
        h = r if i + 1 == n_layers else r.astype(jnp.bfloat16)

    ml_ref[...] = h                               # (B, Np_head) f32, lane-dense
    mu = h[:, :latent]
    lv = h[:, latent:2 * latent]
    kl_ref[0, 0] = 0.5 * jnp.sum(jnp.exp(lv) + mu * mu - 1.0 - lv)


def fused_tail(patches, weights, biases, *, elu_flags, latent):
    """Single pallas_call for the whole 1x1-spatial tail (+ KL in SMEM)."""
    B = patches.shape[0]
    n_layers = len(weights)
    np_head = weights[-1].shape[1]

    inputs = [patches]
    flops, trans = 0, 0
    bytes_accessed = patches.size * 2
    k_dim = patches.shape[1]
    for w, b, e in zip(weights, biases, elu_flags):
        inputs += [w, b]
        n_dim = w.shape[1]
        flops += 2 * B * k_dim * n_dim + B * n_dim
        bytes_accessed += w.size * 2 + b.size * 4
        if e:
            trans += B * n_dim
        k_dim = n_dim
    trans += 2 * B * latent                        # exp in KL
    bytes_accessed += B * np_head * 4 + 4

    ml, kl = pl.pallas_call(
        functools.partial(_fused_tail_kernel, n_layers=n_layers,
                          elu_flags=tuple(elu_flags), latent=latent),
        out_shape=(jax.ShapeDtypeStruct((B, np_head), jnp.float32),
                   jax.ShapeDtypeStruct((1, 1), jnp.float32)),
        in_specs=[pl.BlockSpec(memory_space=pltpu.MemorySpace.VMEM)] * len(inputs),
        out_specs=(pl.BlockSpec(memory_space=pltpu.MemorySpace.VMEM),
                   pl.BlockSpec(memory_space=pltpu.MemorySpace.SMEM)),
        compiler_params=pltpu.CompilerParams(vmem_limit_bytes=VMEM_LIMIT),
        cost_estimate=pl.CostEstimate(flops=flops, transcendentals=trans,
                                      bytes_accessed=bytes_accessed),
    )(*inputs)
    return ml, kl


# ---------------------------------------------------------------------------
# im2col glue (bf16, only the contributing taps)
# ---------------------------------------------------------------------------
def _im2col_taps(x, taps, k=3, s=2, p=1):
    N, H, W, C = x.shape
    Ho = (H + 2 * p - k) // s + 1
    Wo = (W + 2 * p - k) // s + 1
    xp = jnp.pad(x, ((0, 0), (p, p), (p, p), (0, 0)))
    cols = [xp[:, kh:kh + s * (Ho - 1) + 1:s, kw:kw + s * (Wo - 1) + 1:s, :]
            for (kh, kw) in taps]
    pt = jnp.stack(cols, axis=3)                   # (N, Ho, Wo, T, C)
    return pt.reshape(N * Ho * Wo, len(taps) * C), Ho, Wo


# ---------------------------------------------------------------------------
# Encoder: build (init + weight baking) and forward
# ---------------------------------------------------------------------------
def build_encoder(key, *, image_size, num_channels, latent_dim):
    chans = [num_channels, 192, 256, 384, 512, 768, 1024]
    n_convs = 6

    # -- raw (PyTorch-layout) parameters ------------------------------------
    raw_convs = []
    for i in range(n_convs):
        key, k1, k2 = jax.random.split(key, 3)
        cin, cout = chans[i], chans[i + 1]
        w = jax.random.normal(k1, (cout, cin, 3, 3), jnp.float32) / jnp.sqrt(9.0 * cin)
        b = jax.random.normal(k2, (cout,), jnp.float32) * 0.01
        raw_convs.append((w, b))

    def lin(k, din, dout):
        k1, k2 = jax.random.split(k)
        w = jax.random.normal(k1, (din, dout), jnp.float32) / jnp.sqrt(float(din))
        b = jax.random.normal(k2, (dout,), jnp.float32) * 0.01
        return w, b

    key, kf, km, kv = jax.random.split(key, 4)
    raw_fc = lin(kf, 1024, 1024)
    raw_mu = lin(km, 1024, latent_dim)
    raw_lv = lin(kv, 1024, latent_dim)

    # -- static shape plan: find first conv with 1x1 output (tail fusion) ----
    sizes = []
    H = W = image_size
    for i in range(n_convs):
        taps, Ho, Wo = _contributing_taps(H, W)
        sizes.append((H, W, taps, Ho, Wo))
        H, W = Ho, Wo
    tail_start = n_convs
    for i in range(n_convs):
        if sizes[i][3] == 1 and sizes[i][4] == 1:
            tail_start = i
            break
    assert tail_start < n_convs, "image_size too large for Linear(1024,1024)"

    params = {"convs": [], "tail": {}}
    plan = {"convs": [], "tail": {}}

    # -- streamed convs (spatial output > 1x1): bake to matmul layout --------
    for i in range(tail_start):
        w, b = raw_convs[i]
        cin, cout = chans[i], chans[i + 1]
        _, _, taps, _, _ = sizes[i]
        K = len(taps) * cin
        Kp, tk, Np, tn = _plan_tiles(K, cout)
        rows = [jnp.transpose(w[:, :, kh, kw], (1, 0)) for (kh, kw) in taps]
        wmat = jnp.concatenate(rows, axis=0)       # (K, cout), tap-major
        wmat = jnp.pad(wmat, ((0, Kp - K), (0, Np - cout))).astype(jnp.bfloat16)
        bias = jnp.pad(b, (0, Np - cout)).reshape(1, Np).astype(jnp.float32)
        params["convs"].append({"w": wmat, "b": bias})
        plan["convs"].append({"taps": taps, "K": K, "Kp": Kp, "tk": tk, "tn": tn,
                              "cout": cout, "apply_elu": i < n_convs - 1})

    # -- fused tail: remaining convs + fc + mu/log_var head ------------------
    tail_ws, tail_bs, tail_elu = [], [], []
    for i in range(tail_start, n_convs):
        w, b = raw_convs[i]
        _, _, taps, _, _ = sizes[i]
        rows = [jnp.transpose(w[:, :, kh, kw], (1, 0)) for (kh, kw) in taps]
        tail_ws.append(jnp.concatenate(rows, axis=0).astype(jnp.bfloat16))
        tail_bs.append(b.reshape(1, -1).astype(jnp.float32))
        tail_elu.append(i < n_convs - 1)           # conv5 has no ELU

    wf, bf = raw_fc                                # Linear(1024, 1024), no act
    tail_ws.append(wf.astype(jnp.bfloat16))
    tail_bs.append(bf.reshape(1, -1).astype(jnp.float32))
    tail_elu.append(False)

    wm, bm = raw_mu                                # fused mu / log_var head
    wv, bv = raw_lv
    np_head = _round_up(2 * latent_dim, 128)       # lane-dense head output
    wh = jnp.concatenate([wm, wv], axis=1)
    bh = jnp.concatenate([bm, bv], axis=0)
    wh = jnp.pad(wh, ((0, 0), (0, np_head - 2 * latent_dim))).astype(jnp.bfloat16)
    bh = jnp.pad(bh, (0, np_head - 2 * latent_dim)).reshape(1, np_head).astype(jnp.float32)
    tail_ws.append(wh)
    tail_bs.append(bh)
    tail_elu.append(False)

    params["tail"] = {"ws": tail_ws, "bs": tail_bs}
    plan["tail"] = {"taps": sizes[tail_start][2], "elu": tuple(tail_elu),
                    "latent": latent_dim}

    def forward(p, x_nchw):
        # NCHW (PyTorch) -> NHWC, cast to bf16 ONCE (kernels accumulate in f32)
        x = jnp.transpose(x_nchw, (0, 2, 3, 1)).astype(jnp.bfloat16)
        B = x.shape[0]

        # streamed convs: im2col + fused matmul/bias/ELU kernel
        for lp, cp in zip(plan["convs"], p["convs"]):
            patches, Ho, Wo = _im2col_taps(x, lp["taps"])
            if lp["Kp"] != lp["K"]:
                patches = jnp.pad(patches, ((0, 0), (0, lp["Kp"] - lp["K"])))
            out = matmul_bias_act(patches, cp["w"], cp["b"],
                                  tk=lp["tk"], tn=lp["tn"],
                                  apply_elu=lp["apply_elu"])
            x = out[:, :lp["cout"]].reshape(B, Ho, Wo, lp["cout"])

        # fused tail: conv{tail_start..5} + Flatten + fc + mu/log_var + KL
        tp = plan["tail"]
        patches, _, _ = _im2col_taps(x, tp["taps"])
        ml, kl = fused_tail(patches, p["tail"]["ws"], p["tail"]["bs"],
                            elu_flags=tp["elu"], latent=tp["latent"])
        L = tp["latent"]
        mu = ml[:, :L]
        log_var = ml[:, L:2 * L]
        # kl_divergence stored as attribute in torch; returned here
        return mu, log_var, kl[0, 0]

    return params, forward


if __name__ == "__main__":
    batch, num_channels, image_size = 2, 3, 16   # 16 -> 8 -> 4 -> 2 -> 1 -> 1 -> 1
    latent_dim, hidden_dim = 32, 64              # hidden_dim unused in forward (as in module)

    key = jax.random.PRNGKey(0)
    key, kx, kp = jax.random.split(key, 3)
    x = jax.random.normal(kx, (batch, num_channels, image_size, image_size),
                          dtype=jnp.float32)
    params, forward = build_encoder(kp, image_size=image_size,
                                    num_channels=num_channels,
                                    latent_dim=latent_dim)

    mu, log_var, kl = jax.jit(forward)(params, x)
    jax.block_until_ready((mu, log_var, kl))

    assert mu.shape == (batch, latent_dim)
    assert log_var.shape == (batch, latent_dim)
    assert kl.shape == ()
    assert bool(jnp.isfinite(kl))
    print("KERNEL_OK")
</pallas_src>

<mosaic_0001>
module attributes {stable_mosaic.version = 11 : i64} {
  func.func @_matmul_bias_act_kernel(%arg0: i32, %arg1: i32, %arg2: memref<128x32xbf16, #tpu.memory_space<vmem>>, %arg3: memref<32x256xbf16, #tpu.memory_space<vmem>>, %arg4: memref<1x256xf32, #tpu.memory_space<vmem>>, %arg5: memref<128x256xbf16, #tpu.memory_space<vmem>>, %arg6: memref<128x256xf32, #tpu.memory_space<vmem>>) attributes {dimension_semantics = [#tpu.dimension_semantics<parallel>, #tpu.dimension_semantics<arbitrary>], iteration_bounds = array<i64: 1, 1>, scalar_prefetch = 0 : i64, scratch_operands = 1 : i64, tpu.core_type = #tpu.core_type<tc>, window_params = [{transform_indices = @transform_0, window_bounds = array<i64: 128, 32>}, {transform_indices = @transform_1, window_bounds = array<i64: 32, 256>}, {transform_indices = @transform_2, window_bounds = array<i64: 1, 256>}, {transform_indices = @transform_3, window_bounds = array<i64: 128, 256>}]} {
    %c0_i32 = arith.constant 0 : i32
    %0 = arith.cmpi eq, %arg1, %c0_i32 : i32
    %1 = arith.extui %0 : i1 to i32
    %c0_i32_0 = arith.constant 0 : i32
    %2 = arith.cmpi ne, %1, %c0_i32_0 : i32
    scf.if %2 {
      %cst_10 = arith.constant 0.000000e+00 : f32
      %12 = vector.broadcast %cst_10 : f32 to vector<128x256xf32>
      %c0_11 = arith.constant 0 : index
      %c0_12 = arith.constant 0 : index
      %13 = vector.load %arg6[%c0_11, %c0_12] : memref<128x256xf32, #tpu.memory_space<vmem>>, vector<128x256xf32>
      tpu.vector_store %arg6[%c0_11, %c0_12], %12 {strides = array<i32>} : memref<128x256xf32, #tpu.memory_space<vmem>>, vector<128x256xf32>,
    } else {
    }
    %c0 = arith.constant 0 : index
    %c0_1 = arith.constant 0 : index
    %3 = vector.load %arg6[%c0, %c0_1] : memref<128x256xf32, #tpu.memory_space<vmem>>, vector<128x256xf32>
    %c0_2 = arith.constant 0 : index
    %c0_3 = arith.constant 0 : index
    %4 = vector.load %arg2[%c0_2, %c0_3] : memref<128x32xbf16, #tpu.memory_space<vmem>>, vector<128x32xbf16>
    %c0_4 = arith.constant 0 : index
    %c0_5 = arith.constant 0 : index
    %5 = vector.load %arg3[%c0_4, %c0_5] : memref<32x256xbf16, #tpu.memory_space<vmem>>, vector<32x256xbf16>
    %cst = arith.constant dense<0.000000e+00> : vector<128x256xf32>
    %6 = tpu.matmul %4, %5, %cst {dimension_numbers = #tpu.dot_dimension_numbers<[1], [0], [0], [1], [0, 0, 1, 1], [], []>} : vector<128x32xbf16>, vector<32x256xbf16>, vector<128x256xf32> -> vector<128x256xf32>
    %7 = arith.addf %3, %6 : vector<128x256xf32>
    %c0_6 = arith.constant 0 : index
    %c0_7 = arith.constant 0 : index
    %8 = vector.load %arg6[%c0_6, %c0_7] : memref<128x256xf32, #tpu.memory_space<vmem>>, vector<128x256xf32>
    tpu.vector_store %arg6[%c0_6, %c0_7], %7 {strides = array<i32>} : memref<128x256xf32, #tpu.memory_space<vmem>>, vector<128x256xf32>,
    %c0_i32_8 = arith.constant 0 : i32
    %9 = arith.cmpi eq, %arg1, %c0_i32_8 : i32
    %10 = arith.extui %9 : i1 to i32
    %c0_i32_9 = arith.constant 0 : i32
    %11 = arith.cmpi ne, %10, %c0_i32_9 : i32
    scf.if %11 {
      %c0_10 = arith.constant 0 : index
      %c0_11 = arith.constant 0 : index
      %12 = vector.load %arg6[%c0_10, %c0_11] : memref<128x256xf32, #tpu.memory_space<vmem>>, vector<128x256xf32>
      %c0_12 = arith.constant 0 : index
      %c0_13 = arith.constant 0 : index
      %13 = vector.load %arg4[%c0_12, %c0_13] : memref<1x256xf32, #tpu.memory_space<vmem>>, vector<1x256xf32>
      %14 = vector.broadcast %13 : vector<1x256xf32> to vector<128x256xf32>
      %15 = arith.addf %12, %14 : vector<128x256xf32>
      %cst_14 = arith.constant 0.000000e+00 : f32
      %16 = vector.broadcast %cst_14 : f32 to vector<128x256xf32>
      %17 = arith.cmpf ogt, %15, %16 : vector<128x256xf32>
      %cst_15 = arith.constant 0.000000e+00 : f32
      %18 = vector.broadcast %cst_15 : f32 to vector<128x256xf32>
      %19 = arith.minimumf %15, %18 : vector<128x256xf32>
      %20 = math.exp %19 : vector<128x256xf32>
      %cst_16 = arith.constant 1.000000e+00 : f32
      %21 = vector.broadcast %cst_16 : f32 to vector<128x256xf32>
      %22 = arith.subf %20, %21 : vector<128x256xf32>
      %23 = arith.select %17, %15, %22 : vector<128x256xi1>, vector<128x256xf32>
      %24 = arith.truncf %23 : vector<128x256xf32> to vector<128x256xbf16>
      %c0_17 = arith.constant 0 : index
      %c0_18 = arith.constant 0 : index
      %25 = vector.load %arg5[%c0_17, %c0_18] : memref<128x256xbf16, #tpu.memory_space<vmem>>, vector<128x256xbf16>
      tpu.vector_store %arg5[%c0_17, %c0_18], %24 {strides = array<i32>} : memref<128x256xbf16, #tpu.memory_space<vmem>>, vector<128x256xbf16>,
    } else {
    }
    return
  }
  func.func @transform_0(%arg0: i32, %arg1: i32) -> (i32, i32) {
    %c0_i32 = arith.constant 0 : i32
    %c0_i32_0 = arith.constant 0 : i32
    return %c0_i32, %arg1 : i32, i32
  }
  func.func @transform_1(%arg0: i32, %arg1: i32) -> (i32, i32) {
    %c0_i32 = arith.constant 0 : i32
    return %arg1, %arg0 : i32, i32
  }
  func.func @transform_2(%arg0: i32, %arg1: i32) -> (i32, i32) {
    %c0_i32 = arith.constant 0 : i32
    %c0_i32_0 = arith.constant 0 : i32
    return %c0_i32, %arg0 : i32, i32
  }
  func.func @transform_3(%arg0: i32, %arg1: i32) -> (i32, i32) {
    %c0_i32 = arith.constant 0 : i32
    %c0_i32_0 = arith.constant 0 : i32
    return %c0_i32, %arg0 : i32, i32
  }
}

module attributes {stable_mosaic.version = 11 : i64} {
  func.func @_matmul_bias_act_kernel(%arg0: i32, %arg1: i32, %arg2: memref<32x1728xbf16, #tpu.memory_space<vmem>>, %arg3: memref<1728x256xbf16, #tpu.memory_space<vmem>>, %arg4: memref<1x256xf32, #tpu.memory_space<vmem>>, %arg5: memref<32x256xbf16, #tpu.memory_space<vmem>>, %arg6: memref<32x256xf32, #tpu.memory_space<vmem>>) attributes {dimension_semantics = [#tpu.dimension_semantics<parallel>, #tpu.dimension_semantics<arbitrary>], iteration_bounds = array<i64: 1, 1>, scalar_prefetch = 0 : i64, scratch_operands = 1 : i64, tpu.core_type = #tpu.core_type<tc>, window_params = [{transform_indices = @transform_0, window_bounds = array<i64: 32, 1728>}, {transform_indices = @transform_1, window_bounds = array<i64: 1728, 256>}, {transform_indices = @transform_2, window_bounds = array<i64: 1, 256>}, {transform_indices = @transform_3, window_bounds = array<i64: 32, 256>}]} {
    %c0_i32 = arith.constant 0 : i32
    %0 = arith.cmpi eq, %arg1, %c0_i32 : i32
    %1 = arith.extui %0 : i1 to i32
    %c0_i32_0 = arith.constant 0 : i32
    %2 = arith.cmpi ne, %1, %c0_i32_0 : i32
    scf.if %2 {
      %cst_10 = arith.constant 0.000000e+00 : f32
      %12 = vector.broadcast %cst_10 : f32 to vector<32x256xf32>
      %c0_11 = arith.constant 0 : index
      %c0_12 = arith.constant 0 : index
      %13 = vector.load %arg6[%c0_11, %c0_12] : memref<32x256xf32, #tpu.memory_space<vmem>>, vector<32x256xf32>
      tpu.vector_store %arg6[%c0_11, %c0_12], %12 {strides = array<i32>} : memref<32x256xf32, #tpu.memory_space<vmem>>, vector<32x256xf32>,
    } else {
    }
    %c0 = arith.constant 0 : index
    %c0_1 = arith.constant 0 : index
    %3 = vector.load %arg6[%c0, %c0_1] : memref<32x256xf32, #tpu.memory_space<vmem>>, vector<32x256xf32>
    %c0_2 = arith.constant 0 : index
    %c0_3 = arith.constant 0 : index
    %4 = vector.load %arg2[%c0_2, %c0_3] : memref<32x1728xbf16, #tpu.memory_space<vmem>>, vector<32x1728xbf16>
    %c0_4 = arith.constant 0 : index
    %c0_5 = arith.constant 0 : index
    %5 = vector.load %arg3[%c0_4, %c0_5] : memref<1728x256xbf16, #tpu.memory_space<vmem>>, vector<1728x256xbf16>
    %cst = arith.constant dense<0.000000e+00> : vector<32x256xf32>
    %6 = tpu.matmul %4, %5, %cst {dimension_numbers = #tpu.dot_dimension_numbers<[1], [0], [0], [1], [0, 0, 1, 1], [], []>} : vector<32x1728xbf16>, vector<1728x256xbf16>, vector<32x256xf32> -> vector<32x256xf32>
    %7 = arith.addf %3, %6 : vector<32x256xf32>
    %c0_6 = arith.constant 0 : index
    %c0_7 = arith.constant 0 : index
    %8 = vector.load %arg6[%c0_6, %c0_7] : memref<32x256xf32, #tpu.memory_space<vmem>>, vector<32x256xf32>
    tpu.vector_store %arg6[%c0_6, %c0_7], %7 {strides = array<i32>} : memref<32x256xf32, #tpu.memory_space<vmem>>, vector<32x256xf32>,
    %c0_i32_8 = arith.constant 0 : i32
    %9 = arith.cmpi eq, %arg1, %c0_i32_8 : i32
    %10 = arith.extui %9 : i1 to i32
    %c0_i32_9 = arith.constant 0 : i32
    %11 = arith.cmpi ne, %10, %c0_i32_9 : i32
    scf.if %11 {
      %c0_10 = arith.constant 0 : index
      %c0_11 = arith.constant 0 : index
      %12 = vector.load %arg6[%c0_10, %c0_11] : memref<32x256xf32, #tpu.memory_space<vmem>>, vector<32x256xf32>
      %c0_12 = arith.constant 0 : index
      %c0_13 = arith.constant 0 : index
      %13 = vector.load %arg4[%c0_12, %c0_13] : memref<1x256xf32, #tpu.memory_space<vmem>>, vector<1x256xf32>
      %14 = vector.broadcast %13 : vector<1x256xf32> to vector<32x256xf32>
      %15 = arith.addf %12, %14 : vector<32x256xf32>
      %cst_14 = arith.constant 0.000000e+00 : f32
      %16 = vector.broadcast %cst_14 : f32 to vector<32x256xf32>
      %17 = arith.cmpf ogt, %15, %16 : vector<32x256xf32>
      %cst_15 = arith.constant 0.000000e+00 : f32
      %18 = vector.broadcast %cst_15 : f32 to vector<32x256xf32>
      %19 = arith.minimumf %15, %18 : vector<32x256xf32>
      %20 = math.exp %19 : vector<32x256xf32>
      %cst_16 = arith.constant 1.000000e+00 : f32
      %21 = vector.broadcast %cst_16 : f32 to vector<32x256xf32>
      %22 = arith.subf %20, %21 : vector<32x256xf32>
      %23 = arith.select %17, %15, %22 : vector<32x256xi1>, vector<32x256xf32>
      %24 = arith.truncf %23 : vector<32x256xf32> to vector<32x256xbf16>
      %c0_17 = arith.constant 0 : index
      %c0_18 = arith.constant 0 : index
      %25 = vector.load %arg5[%c0_17, %c0_18] : memref<32x256xbf16, #tpu.memory_space<vmem>>, vector<32x256xbf16>
      tpu.vector_store %arg5[%c0_17, %c0_18], %24 {strides = array<i32>} : memref<32x256xbf16, #tpu.memory_space<vmem>>, vector<32x256xbf16>,
    } else {
    }
    return
  }
  func.func @transform_0(%arg0: i32, %arg1: i32) -> (i32, i32) {
    %c0_i32 = arith.constant 0 : i32
    %c0_i32_0 = arith.constant 0 : i32
    return %c0_i32, %arg1 : i32, i32
  }
  func.func @transform_1(%arg0: i32, %arg1: i32) -> (i32, i32) {
    %c0_i32 = arith.constant 0 : i32
    return %arg1, %arg0 : i32, i32
  }
  func.func @transform_2(%arg0: i32, %arg1: i32) -> (i32, i32) {
    %c0_i32 = arith.constant 0 : i32
    %c0_i32_0 = arith.constant 0 : i32
    return %c0_i32, %arg0 : i32, i32
  }
  func.func @transform_3(%arg0: i32, %arg1: i32) -> (i32, i32) {
    %c0_i32 = arith.constant 0 : i32
    %c0_i32_0 = arith.constant 0 : i32
    return %c0_i32, %arg0 : i32, i32
  }
}

module attributes {stable_mosaic.version = 11 : i64} {
  func.func @_matmul_bias_act_kernel(%arg0: i32, %arg1: i32, %arg2: memref<8x1152xbf16, #tpu.memory_space<vmem>>, %arg3: memref<1152x384xbf16, #tpu.memory_space<vmem>>, %arg4: memref<1x384xf32, #tpu.memory_space<vmem>>, %arg5: memref<8x384xbf16, #tpu.memory_space<vmem>>, %arg6: memref<8x384xf32, #tpu.memory_space<vmem>>) attributes {dimension_semantics = [#tpu.dimension_semantics<parallel>, #tpu.dimension_semantics<arbitrary>], iteration_bounds = array<i64: 1, 2>, scalar_prefetch = 0 : i64, scratch_operands = 1 : i64, tpu.core_type = #tpu.core_type<tc>, window_params = [{transform_indices = @transform_0, window_bounds = array<i64: 8, 1152>}, {transform_indices = @transform_1, window_bounds = array<i64: 1152, 384>}, {transform_indices = @transform_2, window_bounds = array<i64: 1, 384>}, {transform_indices = @transform_3, window_bounds = array<i64: 8, 384>}]} {
    %c0_i32 = arith.constant 0 : i32
    %0 = arith.cmpi eq, %arg1, %c0_i32 : i32
    %1 = arith.extui %0 : i1 to i32
    %c0_i32_0 = arith.constant 0 : i32
    %2 = arith.cmpi ne, %1, %c0_i32_0 : i32
    scf.if %2 {
      %cst_9 = arith.constant 0.000000e+00 : f32
      %12 = vector.broadcast %cst_9 : f32 to vector<8x384xf32>
      %c0_10 = arith.constant 0 : index
      %c0_11 = arith.constant 0 : index
      %13 = vector.load %arg6[%c0_10, %c0_11] : memref<8x384xf32, #tpu.memory_space<vmem>>, vector<8x384xf32>
      tpu.vector_store %arg6[%c0_10, %c0_11], %12 {strides = array<i32>} : memref<8x384xf32, #tpu.memory_space<vmem>>, vector<8x384xf32>,
    } else {
    }
    %c0 = arith.constant 0 : index
    %c0_1 = arith.constant 0 : index
    %3 = vector.load %arg6[%c0, %c0_1] : memref<8x384xf32, #tpu.memory_space<vmem>>, vector<8x384xf32>
    %c0_2 = arith.constant 0 : index
    %c0_3 = arith.constant 0 : index
    %4 = vector.load %arg2[%c0_2, %c0_3] : memref<8x1152xbf16, #tpu.memory_space<vmem>>, vector<8x1152xbf16>
    %c0_4 = arith.constant 0 : index
    %c0_5 = arith.constant 0 : index
    %5 = vector.load %arg3[%c0_4, %c0_5] : memref<1152x384xbf16, #tpu.memory_space<vmem>>, vector<1152x384xbf16>
    %cst = arith.constant dense<0.000000e+00> : vector<8x384xf32>
    %6 = tpu.matmul %4, %5, %cst {dimension_numbers = #tpu.dot_dimension_numbers<[1], [0], [0], [1], [0, 0, 1, 1], [], []>} : vector<8x1152xbf16>, vector<1152x384xbf16>, vector<8x384xf32> -> vector<8x384xf32>
    %7 = arith.addf %3, %6 : vector<8x384xf32>
    %c0_6 = arith.constant 0 : index
    %c0_7 = arith.constant 0 : index
    %8 = vector.load %arg6[%c0_6, %c0_7] : memref<8x384xf32, #tpu.memory_space<vmem>>, vector<8x384xf32>
    tpu.vector_store %arg6[%c0_6, %c0_7], %7 {strides = array<i32>} : memref<8x384xf32, #tpu.memory_space<vmem>>, vector<8x384xf32>,
    %c1_i32 = arith.constant 1 : i32
    %9 = arith.cmpi eq, %arg1, %c1_i32 : i32
    %10 = arith.extui %9 : i1 to i32
    %c0_i32_8 = arith.constant 0 : i32
    %11 = arith.cmpi ne, %10, %c0_i32_8 : i32
    scf.if %11 {
      %c0_9 = arith.constant 0 : index
      %c0_10 = arith.constant 0 : index
      %12 = vector.load %arg6[%c0_9, %c0_10] : memref<8x384xf32, #tpu.memory_space<vmem>>, vector<8x384xf32>
      %c0_11 = arith.constant 0 : index
      %c0_12 = arith.constant 0 : index
      %13 = vector.load %arg4[%c0_11, %c0_12] : memref<1x384xf32, #tpu.memory_space<vmem>>, vector<1x384xf32>
      %14 = vector.broadcast %13 : vector<1x384xf32> to vector<8x384xf32>
      %15 = arith.addf %12, %14 : vector<8x384xf32>
      %cst_13 = arith.constant 0.000000e+00 : f32
      %16 = vector.broadcast %cst_13 : f32 to vector<8x384xf32>
      %17 = arith.cmpf ogt, %15, %16 : vector<8x384xf32>
      %cst_14 = arith.constant 0.000000e+00 : f32
      %18 = vector.broadcast %cst_14 : f32 to vector<8x384xf32>
      %19 = arith.minimumf %15, %18 : vector<8x384xf32>
      %20 = math.exp %19 : vector<8x384xf32>
      %cst_15 = arith.constant 1.000000e+00 : f32
      %21 = vector.broadcast %cst_15 : f32 to vector<8x384xf32>
      %22 = arith.subf %20, %21 : vector<8x384xf32>
      %23 = arith.select %17, %15, %22 : vector<8x384xi1>, vector<8x384xf32>
      %24 = arith.truncf %23 : vector<8x384xf32> to vector<8x384xbf16>
      %c0_16 = arith.constant 0 : index
      %c0_17 = arith.constant 0 : index
      %25 = vector.load %arg5[%c0_16, %c0_17] : memref<8x384xbf16, #tpu.memory_space<vmem>>, vector<8x384xbf16>
      tpu.vector_store %arg5[%c0_16, %c0_17], %24 {strides = array<i32>} : memref<8x384xbf16, #tpu.memory_space<vmem>>, vector<8x384xbf16>,
    } else {
    }
    return
  }
  func.func @transform_0(%arg0: i32, %arg1: i32) -> (i32, i32) {
    %c0_i32 = arith.constant 0 : i32
    %c0_i32_0 = arith.constant 0 : i32
    return %c0_i32, %arg1 : i32, i32
  }
  func.func @transform_1(%arg0: i32, %arg1: i32) -> (i32, i32) {
    %c0_i32 = arith.constant 0 : i32
    return %arg1, %arg0 : i32, i32
  }
  func.func @transform_2(%arg0: i32, %arg1: i32) -> (i32, i32) {
    %c0_i32 = arith.constant 0 : i32
    %c0_i32_0 = arith.constant 0 : i32
    return %c0_i32, %arg0 : i32, i32
  }
  func.func @transform_3(%arg0: i32, %arg1: i32) -> (i32, i32) {
    %c0_i32 = arith.constant 0 : i32
    %c0_i32_0 = arith.constant 0 : i32
    return %c0_i32, %arg0 : i32, i32
  }
}

module attributes {stable_mosaic.version = 11 : i64} {
  func.func @_fused_tail_kernel(%arg0: memref<2x1536xbf16, #tpu.memory_space<vmem>>, %arg1: memref<1536x512xbf16, #tpu.memory_space<vmem>>, %arg2: memref<1x512xf32, #tpu.memory_space<vmem>>, %arg3: memref<512x768xbf16, #tpu.memory_space<vmem>>, %arg4: memref<1x768xf32, #tpu.memory_space<vmem>>, %arg5: memref<768x1024xbf16, #tpu.memory_space<vmem>>, %arg6: memref<1x1024xf32, #tpu.memory_space<vmem>>, %arg7: memref<1024x1024xbf16, #tpu.memory_space<vmem>>, %arg8: memref<1x1024xf32, #tpu.memory_space<vmem>>, %arg9: memref<1024x128xbf16, #tpu.memory_space<vmem>>, %arg10: memref<1x128xf32, #tpu.memory_space<vmem>>, %arg11: memref<2x128xf32, #tpu.memory_space<vmem>>, %arg12: memref<1x1xf32, #tpu.memory_space<smem>>) attributes {dimension_semantics = [], scalar_prefetch = 0 : i64, scratch_operands = 0 : i64, tpu.core_type = #tpu.core_type<tc>} {
    %c0 = arith.constant 0 : index
    %c0_0 = arith.constant 0 : index
    %0 = vector.load %arg0[%c0, %c0_0] : memref<2x1536xbf16, #tpu.memory_space<vmem>>, vector<2x1536xbf16>
    %c0_1 = arith.constant 0 : index
    %c0_2 = arith.constant 0 : index
    %1 = vector.load %arg1[%c0_1, %c0_2] : memref<1536x512xbf16, #tpu.memory_space<vmem>>, vector<1536x512xbf16>
    %c0_3 = arith.constant 0 : index
    %c0_4 = arith.constant 0 : index
    %2 = vector.load %arg2[%c0_3, %c0_4] : memref<1x512xf32, #tpu.memory_space<vmem>>, vector<1x512xf32>
    %cst = arith.constant dense<0.000000e+00> : vector<2x512xf32>
    %3 = tpu.matmul %0, %1, %cst {dimension_numbers = #tpu.dot_dimension_numbers<[1], [0], [0], [1], [0, 0, 1, 1], [], []>} : vector<2x1536xbf16>, vector<1536x512xbf16>, vector<2x512xf32> -> vector<2x512xf32>
    %4 = vector.broadcast %2 : vector<1x512xf32> to vector<2x512xf32>
    %5 = arith.addf %3, %4 : vector<2x512xf32>
    %cst_5 = arith.constant 0.000000e+00 : f32
    %6 = vector.broadcast %cst_5 : f32 to vector<2x512xf32>
    %7 = arith.cmpf ogt, %5, %6 : vector<2x512xf32>
    %cst_6 = arith.constant 0.000000e+00 : f32
    %8 = vector.broadcast %cst_6 : f32 to vector<2x512xf32>
    %9 = arith.minimumf %5, %8 : vector<2x512xf32>
    %10 = math.exp %9 : vector<2x512xf32>
    %cst_7 = arith.constant 1.000000e+00 : f32
    %11 = vector.broadcast %cst_7 : f32 to vector<2x512xf32>
    %12 = arith.subf %10, %11 : vector<2x512xf32>
    %13 = arith.select %7, %5, %12 : vector<2x512xi1>, vector<2x512xf32>
    %14 = arith.truncf %13 : vector<2x512xf32> to vector<2x512xbf16>
    %c0_8 = arith.constant 0 : index
    %c0_9 = arith.constant 0 : index
    %15 = vector.load %arg3[%c0_8, %c0_9] : memref<512x768xbf16, #tpu.memory_space<vmem>>, vector<512x768xbf16>
    %c0_10 = arith.constant 0 : index
    %c0_11 = arith.constant 0 : index
    %16 = vector.load %arg4[%c0_10, %c0_11] : memref<1x768xf32, #tpu.memory_space<vmem>>, vector<1x768xf32>
    %cst_12 = arith.constant dense<0.000000e+00> : vector<2x768xf32>
    %17 = tpu.matmul %14, %15, %cst_12 {dimension_numbers = #tpu.dot_dimension_numbers<[1], [0], [0], [1], [0, 0, 1, 1], [], []>} : vector<2x512xbf16>, vector<512x768xbf16>, vector<2x768xf32> -> vector<2x768xf32>
    %18 = vector.broadcast %16 : vector<1x768xf32> to vector<2x768xf32>
    %19 = arith.addf %17, %18 : vector<2x768xf32>
    %cst_13 = arith.constant 0.000000e+00 : f32
    %20 = vector.broadcast %cst_13 : f32 to vector<2x768xf32>
    %21 = arith.cmpf ogt, %19, %20 : vector<2x768xf32>
    %cst_14 = arith.constant 0.000000e+00 : f32
    %22 = vector.broadcast %cst_14 : f32 to vector<2x768xf32>
    %23 = arith.minimumf %19, %22 : vector<2x768xf32>
    %24 = math.exp %23 : vector<2x768xf32>
    %cst_15 = arith.constant 1.000000e+00 : f32
    %25 = vector.broadcast %cst_15 : f32 to vector<2x768xf32>
    %26 = arith.subf %24, %25 : vector<2x768xf32>
    %27 = arith.select %21, %19, %26 : vector<2x768xi1>, vector<2x768xf32>
    %28 = arith.truncf %27 : vector<2x768xf32> to vector<2x768xbf16>
    %c0_16 = arith.constant 0 : index
    %c0_17 = arith.constant 0 : index
    %29 = vector.load %arg5[%c0_16, %c0_17] : memref<768x1024xbf16, #tpu.memory_space<vmem>>, vector<768x1024xbf16>
    %c0_18 = arith.constant 0 : index
    %c0_19 = arith.constant 0 : index
    %30 = vector.load %arg6[%c0_18, %c0_19] : memref<1x1024xf32, #tpu.memory_space<vmem>>, vector<1x1024xf32>
    %cst_20 = arith.constant dense<0.000000e+00> : vector<2x1024xf32>
    %31 = tpu.matmul %28, %29, %cst_20 {dimension_numbers = #tpu.dot_dimension_numbers<[1], [0], [0], [1], [0, 0, 1, 1], [], []>} : vector<2x768xbf16>, vector<768x1024xbf16>, vector<2x1024xf32> -> vector<2x1024xf32>
    %32 = vector.broadcast %30 : vector<1x1024xf32> to vector<2x1024xf32>
    %33 = arith.addf %31, %32 : vector<2x1024xf32>
    %34 = arith.truncf %33 : vector<2x1024xf32> to vector<2x1024xbf16>
    %c0_21 = arith.constant 0 : index
    %c0_22 = arith.constant 0 : index
    %35 = vector.load %arg7[%c0_21, %c0_22] : memref<1024x1024xbf16, #tpu.memory_space<vmem>>, vector<1024x1024xbf16>
    %c0_23 = arith.constant 0 : index
    %c0_24 = arith.constant 0 : index
    %36 = vector.load %arg8[%c0_23, %c0_24] : memref<1x1024xf32, #tpu.memory_space<vmem>>, vector<1x1024xf32>
    %cst_25 = arith.constant dense<0.000000e+00> : vector<2x1024xf32>
    %37 = tpu.matmul %34, %35, %cst_25 {dimension_numbers = #tpu.dot_dimension_numbers<[1], [0], [0], [1], [0, 0, 1, 1], [], []>} : vector<2x1024xbf16>, vector<1024x1024xbf16>, vector<2x1024xf32> -> vector<2x1024xf32>
    %38 = vector.broadcast %36 : vector<1x1024xf32> to vector<2x1024xf32>
    %39 = arith.addf %37, %38 : vector<2x1024xf32>
    %40 = arith.truncf %39 : vector<2x1024xf32> to vector<2x1024xbf16>
    %c0_26 = arith.constant 0 : index
    %c0_27 = arith.constant 0 : index
    %41 = vector.load %arg9[%c0_26, %c0_27] : memref<1024x128xbf16, #tpu.memory_space<vmem>>, vector<1024x128xbf16>
    %c0_28 = arith.constant 0 : index
    %c0_29 = arith.constant 0 : index
    %42 = vector.load %arg10[%c0_28, %c0_29] : memref<1x128xf32, #tpu.memory_space<vmem>>, vector<1x128xf32>
    %cst_30 = arith.constant dense<0.000000e+00> : vector<2x128xf32>
    %43 = tpu.matmul %40, %41, %cst_30 {dimension_numbers = #tpu.dot_dimension_numbers<[1], [0], [0], [1], [0, 0, 1, 1], [], []>} : vector<2x1024xbf16>, vector<1024x128xbf16>, vector<2x128xf32> -> vector<2x128xf32>
    %44 = vector.broadcast %42 : vector<1x128xf32> to vector<2x128xf32>
    %45 = arith.addf %43, %44 : vector<2x128xf32>
    %c0_31 = arith.constant 0 : index
    %c0_32 = arith.constant 0 : index
    %46 = vector.load %arg11[%c0_31, %c0_32] : memref<2x128xf32, #tpu.memory_space<vmem>>, vector<2x128xf32>
    tpu.vector_store %arg11[%c0_31, %c0_32], %45 {strides = array<i32>} : memref<2x128xf32, #tpu.memory_space<vmem>>, vector<2x128xf32>,
    %47 = vector.extract_strided_slice %45 {offsets = [0, 0], sizes = [2, 32], strides = [1, 1]} : vector<2x128xf32> to vector<2x32xf32>
    %48 = vector.extract_strided_slice %45 {offsets = [0, 32], sizes = [2, 32], strides = [1, 1]} : vector<2x128xf32> to vector<2x32xf32>
    %49 = math.exp %48 : vector<2x32xf32>
    %50 = arith.mulf %47, %47 : vector<2x32xf32>
    %51 = arith.addf %49, %50 : vector<2x32xf32>
    %cst_33 = arith.constant 1.000000e+00 : f32
    %52 = vector.broadcast %cst_33 : f32 to vector<2x32xf32>
    %53 = arith.subf %51, %52 : vector<2x32xf32>
    %54 = arith.subf %53, %48 : vector<2x32xf32>
    %55 = vector.shape_cast %54 : vector<2x32xf32> to vector<1x2x32xf32>
    %cst_34 = arith.constant dense<0.000000e+00> : vector<1xf32>
    %56 = vector.multi_reduction <add>, %55, %cst_34 [1, 2] : vector<1x2x32xf32> to vector<1xf32>
    %57 = vector.shape_cast %56 : vector<1xf32> to vector<1x1x1xf32>
    %58 = vector.extract %57[0, 0, 0] : f32 from vector<1x1x1xf32>
    %cst_35 = arith.constant 5.000000e-01 : f32
    %59 = arith.mulf %cst_35, %58 : f32
    %c0_36 = arith.constant 0 : index
    %c0_37 = arith.constant 0 : index
    %60 = memref.load %arg12[%c0_36, %c0_37] : memref<1x1xf32, #tpu.memory_space<smem>>
    memref.store %59, %arg12[%c0_36, %c0_37] : memref<1x1xf32, #tpu.memory_space<smem>>
    return
  }
}

</mosaic_0001>

<bundles_post_ra>
// kernel: forward.4
= control target key start
LH: loop header
LB: loop body
LE: loop exit
PB: predicated region body
PF: predicated region fallthrough
CT: control target
= control target key end

     0   :  { %8 = vsyncpa [#allocation4], 0  ;;  %s1387_s0 = inlined_call_operand.vmem [shape: bf16[128,32], index: 0, kind: input, shape index: {}]   ;;  %s1388_s1 = inlined_call_operand.hbm [shape: bf16[32,256], index: 1, kind: input, shape index: {}]   ;;  %s1389_s2 = inlined_call_operand.hbm [shape: f32[1,256], index: 2, kind: input, shape index: {}]   ;;  %s1390_s3 = inlined_call_operand.vmem [shape: bf16[128,256], index: 3, kind: output, shape index: {}]  }
   0x1   :  { %9 = vsyncpa [#allocation6], 0  ;;  %s999_s12 = smov [#allocation3]   ;;  %s951_s16 = scalar_lea.hbm %s1388_s1, 512 }
   0x2   :  { %s17_s13 = sshll.u32 %s999_s12, 4  ;;  %p952_p0 = scmp.ne.s32.totalorder %s1388_s1, %s951_s16  ;;  %s18_s13 = int_to_ptr.vmem [resolvable:$true] %s17_s13 }
   0x3   :  { %p955_p1 = scmp.lt.u32.totalorder %s951_s16, %s1388_s1 }
   0x5   :  { %p957_p2 = pnand %p955_p1, %p952_p0 }
   0x7   :  { %960 = shalt.err (!%p957_p2)
}
   0x8   :  { %s961_s21 = scalar_lea.vmem %s18_s13, 512  ;;  %p966_p4 = scmp.lt.s32.totalorder %s18_s13, %s18_s13 }
   0x9   :  { %p962_p3 = scmp.ne.s32.totalorder %s18_s13, %s961_s21  ;;  %p967_p5 = scmp.lt.s32.totalorder %s961_s21, %s961_s21 }
   0xb   :  { %p968_p6 = por %p967_p5, %p966_p4 }
   0xd   :  { %p969_p7 = pnand %p968_p6, %p962_p3 }
   0xf   :  { %972 = shalt.err (!%p969_p7)
}
  0x10   :  { %s1000_s22 = smov 128   ;;  %s1001_s23 = smov 8  }
  0x11   :  { %23 = dma.hbm_to_vmem [thread:$0]  %s1388_s1, 512, %s18_s13, [#allocation4], %s1000_s22, %s1000_s22, %s1001_s23  }
  0x12   :  { %s1002_s26 = smov [#allocation5]   ;;  %s973_s30 = scalar_lea.hbm %s1389_s2, 32 }
  0x13   :  { %s30_s27 = sshll.u32 %s1002_s26, 4  ;;  %p974_p8 = scmp.ne.s32.totalorder %s1389_s2, %s973_s30  ;;  %s31_s27 = int_to_ptr.vmem [resolvable:$true] %s30_s27 }
  0x14   :  { %p977_p9 = scmp.lt.u32.totalorder %s973_s30, %s1389_s2 }
  0x16   :  { %p979_p10 = pnand %p977_p9, %p974_p8 }
  0x18   :  { %982 = shalt.err (!%p979_p10)
}
  0x19   :  { %s983_s8 = scalar_lea.vmem %s31_s27, 32  ;;  %p988_p12 = scmp.lt.s32.totalorder %s31_s27, %s31_s27 }
  0x1a   :  { %p984_p11 = scmp.ne.s32.totalorder %s31_s27, %s983_s8  ;;  %p989_p13 = scmp.lt.s32.totalorder %s983_s8, %s983_s8 }
  0x1c   :  { %p990_p0 = por %p989_p13, %p988_p12 }
  0x1e   :  { %p991_p1 = pnand %p990_p0, %p984_p11 }
  0x20   :  { %994 = shalt.err (!%p991_p1)
}
  0x21   :  { %33 = dma.hbm_to_vmem [thread:$0]  %s1389_s2, 32, %s31_s27, [#allocation6]  }
  0x22   :  { %995 = dma.done.wait [#allocation4], 512  }
  0x23   :  { %996 = vsyncadd [#allocation4], 4294966784 }
  0x24   :  { %997 = dma.done.wait [#allocation6], 32  }
  0x25   :  { %998 = vsyncadd [#allocation6], 4294967264  ;;  %v1003_v0 = vmov 0   ;;  %v873_v1 = vld [vmem:[#allocation3 + $0x4] ss:$8 sps:$4 sm:$0xff]   ;;  %vm189_vm0 = vcmask 261120   ;;  %v428_v13 = vlaneseq }
  0x26   :  { %246 = vmatprep.mubr.bf16.mxu0 %v1003_v0  ;;  %286 = vmatprep.mubr.bf16.mxu1 %v1003_v0  ;;  %v875_v2 = vld [vmem:[#allocation3] ss:$8 sps:$4 sm:$0xff]   ;;  %v876_v3 = vld [vmem:[#allocation3 + $0x14] ss:$8 sps:$4 sm:$0xff]   ;;  %v878_v4 = vld [vmem:[#allocation3 + $0x10] ss:$8 sps:$4 sm:$0xff]  }
  0x27   :  { %214 = vmatprep.subr.bf16.mxu0 %v873_v1  ;;  %864 = vmatprep.subr.bf16.mxu1 %v873_v1  ;;  %v879_v5 = vld [vmem:[%s1387_s0] sm:$0xff]   ;;  %v881_v7 = vld [vmem:[%s1387_s0 + $0x8] sm:$0xff]   ;;  %v883_v9 = vld [vmem:[%s1387_s0 + $0x10] sm:$0xff]   ;;  %v429_v14 = vshrl.u32 %v428_v13, 7 }
  0x28   :  { %215 = vmatpush1.bf16.msra.mxu0 %v875_v2  ;;  %866 = vmatpush1.bf16.msra.mxu1 %v875_v2  ;;  %v880_v6 = vld [vmem:[%s1387_s0 + $0x20] sm:$0xff]   ;;  %v882_v8 = vld [vmem:[%s1387_s0 + $0x28] sm:$0xff]   ;;  %v884_v10 = vld [vmem:[%s1387_s0 + $0x30] sm:$0xff]  }
  0x29   :  { %216 = vmatprep.subr.bf16.mxu0 %v876_v3  ;;  %865 = vmatprep.subr.bf16.mxu1 %v876_v3  ;;  %v885_v11 = vld [vmem:[%s1387_s0 + $0x18] sm:$0xff]   ;;  %v430_v15 = vsub.s32 0, %v429_v14  ;;  %v426_v16 = vld [vmem:[#allocation5] sm:$0x3]  ;;  %v434_v17 = vsub.s32 1, %v429_v14 }
  0x2a   :  { %v886_v12 = vld [vmem:[%s1387_s0 + $0x38] sm:$0xff]  }
  0x2b   :  { %v1080_v18 = vrot.slane %v426_v16, %v430_v15  ;;  %v1082_v19 = vrot.slane %v426_v16, %v434_v17 }
  0x2c   :  { %217 = vmatpush1.bf16.msra.mxu0 %v878_v4  ;;  %867 = vmatpush1.bf16.msra.mxu1 %v878_v4 }
  0x2f   :  { %792 = vmatmul.mubr.msk.bf16.vlgmr.msra.gmra.mrb[0].mxu0 %vm189_vm0, %v879_v5  ;;  %796 = vmatmul.mubr.msk.bf16.vlgmr.msra.gmra.mrb[0].mxu1 %vm189_vm0, %v880_v6 }
  0x30   :  { %256 = vmatprep.mubr.bf16.mxu0 %v1003_v0  ;;  %296 = vmatprep.mubr.bf16.mxu1 %v1003_v0 }
  0x37   :  { %793 = vmatmul.mubr.msk.bf16.gmra.mrb[4].mxu0 %vm189_vm0, %v881_v7  ;;  %797 = vmatmul.mubr.msk.bf16.gmra.mrb[4].mxu1 %vm189_vm0, %v882_v8 }
  0x38   :  { %266 = vmatprep.mubr.bf16.mxu0 %v1003_v0  ;;  %306 = vmatprep.mubr.bf16.mxu1 %v1003_v0 }
  0x3f   :  { %794 = vmatmul.mubr.msk.bf16.gmra.mrb[8].mxu0 %vm189_vm0, %v883_v9  ;;  %798 = vmatmul.mubr.msk.bf16.gmra.mrb[8].mxu1 %vm189_vm0, %v884_v10 }
  0x40   :  { %276 = vmatprep.mubr.bf16.mxu0 %v1003_v0  ;;  %316 = vmatprep.mubr.bf16.mxu1 %v1003_v0 }
  0x47   :  { %795 = vmatmul.mubr.msk.bf16.gmra.mrb[12].mxu0 %vm189_vm0, %v885_v11  ;;  %799 = vmatmul.mubr.msk.bf16.gmra.mrb[12].mxu1 %vm189_vm0, %v886_v12 }
 0x102   :  { %v248_v20 = vpop.f32.mrb[0].mxu0  ;;  %v288_v21 = vpop.f32.mrb[0].mxu1 }
 0x103   :  { %v1085_v22 = vadd.f32 %v1080_v18, %v248_v20  ;;  %v1088_v23 = vadd.f32 %v1080_v18, %v288_v21  ;;  %v250_v24 = vpop.f32.mrb[1].mxu0  ;;  %v290_v25 = vpop.f32.mrb[1].mxu1 }
 0x104   :  { %v1091_v26 = vadd.f32 %v1082_v19, %v250_v24  ;;  %v1094_v27 = vadd.f32 %v1082_v19, %v290_v25  ;;  %v252_v28 = vpop.f32.mrb[2].mxu0  ;;  %v292_v29 = vpop.f32.mrb[2].mxu1 }
 0x105   :  { %v502_v30 = vmin.f32 %v1085_v22, 0.0  ;;  %v518_v31 = vmin.f32 %v1088_v23, 0.0  ;;  %v254_v32 = vpop.f32.mrb[3].mxu0  ;;  %v294_v33 = vpop.f32.mrb[3].mxu1  ;;  %v1101_v38 = vadd.f32 %v1080_v18, %v252_v28  ;;  %v1104_v39 = vadd.f32 %v1080_v18, %v292_v29 }
 0x106   :  { %v503_v34 = vmin.f32 %v1091_v26, 0.0  ;;  %v519_v35 = vmin.f32 %v1094_v27, 0.0  ;;  %v1107_v42 = vadd.f32 %v1082_v19, %v254_v32  ;;  %v1110_v43 = vadd.f32 %v1082_v19, %v294_v33 }
 0x107   :  { %v534_v36 = vmul.f32 1.442695, %v502_v30  ;;  %v566_v37 = vmul.f32 1.442695, %v518_v31  ;;  %v504_v44 = vmin.f32 %v1101_v38, 0.0  ;;  %v520_v45 = vmin.f32 %v1104_v39, 0.0 }
 0x108   :  { %v536_v40 = vmul.f32 1.442695, %v503_v34  ;;  %v568_v41 = vmul.f32 1.442695, %v519_v35  ;;  %v505_v46 = vmin.f32 %v1107_v42, 0.0  ;;  %v521_v50 = vmin.f32 %v1110_v43, 0.0 }
 0x109   :  { %887 = vpow2.f32 %v534_v36  ;;  %v538_v49 = vmul.f32 1.442695, %v504_v44  ;;  %v570_v53 = vmul.f32 1.442695, %v520_v45  ;;  %vm470_vm1 = vcmp.gt.f32.partialorder %v1085_v22, 0.0 }
 0x10a   :  { %889 = vpow2.f32 %v566_v37  ;;  %v258_v47 = vpop.f32.mrb[4].mxu0  ;;  %v298_v48 = vpop.f32.mrb[4].mxu1  ;;  %v540_v54 = vmul.f32 1.442695, %v505_v46  ;;  %v572_v58 = vmul.f32 1.442695, %v521_v50 }
 0x10b   :  { %891 = vpow2.f32 %v536_v40  ;;  %v260_v51 = vpop.f32.mrb[5].mxu0  ;;  %v300_v52 = vpop.f32.mrb[5].mxu1  ;;  %v1117_v55 = vadd.f32 %v1080_v18, %v258_v47  ;;  %v1120_v59 = vadd.f32 %v1080_v18, %v298_v48  ;;  %vm486_vm2 = vcmp.gt.f32.partialorder %v1088_v23, 0.0 }
 0x10c   :  { %893 = vpow2.f32 %v568_v41  ;;  %v262_v56 = vpop.f32.mrb[6].mxu0  ;;  %v302_v57 = vpop.f32.mrb[6].mxu1  ;;  %v1123_v60 = vadd.f32 %v1082_v19, %v260_v51  ;;  %v1128_v0 = vadd.f32 %v1082_v19, %v300_v52  ;;  %vm471_vm3 = vcmp.gt.f32.partialorder %v1091_v26, 0.0 }
 0x10d   :  { %895 = vpow2.f32 %v538_v49  ;;  %v264_v61 = vpop.f32.mrb[7].mxu0  ;;  %v304_v62 = vpop.f32.mrb[7].mxu1  ;;  %v506_v63 = vmin.f32 %v1117_v55, 0.0  ;;  %v522_v1 = vmin.f32 %v1120_v59, 0.0  ;;  %vm487_vm4 = vcmp.gt.f32.partialorder %v1094_v27, 0.0 }
 0x10e   :  { %897 = vpow2.f32 %v570_v53  ;;  %v507_v3 = vmin.f32 %v1123_v60, 0.0  ;;  %vm472_vm5 = vcmp.gt.f32.partialorder %v1101_v38, 0.0  ;;  %v523_v5 = vmin.f32 %v1128_v0, 0.0 }
 0x10f   :  { %899 = vpow2.f32 %v540_v54  ;;  %v542_v2 = vmul.f32 1.442695, %v506_v63  ;;  %v574_v4 = vmul.f32 1.442695, %v522_v1  ;;  %v1138_v6 = vadd.f32 %v1080_v18, %v262_v56 }
 0x110   :  { %901 = vpow2.f32 %v572_v58  ;;  %v1141_v7 = vadd.f32 %v1080_v18, %v302_v57  ;;  %vm488_vm6 = vcmp.gt.f32.partialorder %v1104_v39, 0.0  ;;  %v544_v8 = vmul.f32 1.442695, %v507_v3 }
 0x111   :  { %903 = vpow2.f32 %v542_v2  ;;  %v1145_v9 = vadd.f32 %v1082_v19, %v264_v61  ;;  %vm473_vm7 = vcmp.gt.f32.partialorder %v1107_v42, 0.0  ;;  %v576_v13 = vmul.f32 1.442695, %v523_v5 }
 0x112   :  { %v268_v10 = vpop.f32.mrb[8].mxu0  ;;  %v308_v11 = vpop.f32.mrb[8].mxu1  ;;  %905 = vpow2.f32 %v574_v4  ;;  %v508_v14 = vmin.f32 %v1138_v6, 0.0  ;;  %vm489_vm8 = vcmp.gt.f32.partialorder %v1110_v43, 0.0  ;;  %v524_v21 = vmin.f32 %v1141_v7, 0.0 }
 0x113   :  { %v888_v12 = vpop.eup %887  ;;  %v270_v15 = vpop.f32.mrb[9].mxu0  ;;  %907 = vpow2.f32 %v544_v8  ;;  %v1158_v31 = vadd.f32 %v1082_v19, %v304_v62  ;;  %v509_v40 = vmin.f32 %v1145_v9, 0.0  ;;  %vm474_vm9 = vcmp.gt.f32.partialorder %v1117_v55, 0.0 }
 0x114   :  { %v1149_v16 = vpop.f32.mrb[9].mxu1  ;;  %v890_v17 = vpop.eup %889  ;;  %v800_v20 = vadd.f32 -1.0, %v888_v12  ;;  %909 = vpow2.f32 %v576_v13  ;;  %v546_v30 = vmul.f32 1.442695, %v508_v14  ;;  %v578_v37 = vmul.f32 1.442695, %v524_v21 }
 0x115   :  { %v1153_v24 = vpop.f32.mrb[10].mxu0  ;;  %v1155_v25 = vpop.f32.mrb[10].mxu1  ;;  %v816_v29 = vadd.f32 -1.0, %v890_v17  ;;  %v1193_v63 = vadd.f32 %v1080_v18, %v268_v10  ;;  %vm490_vm10 = vcmp.gt.f32.partialorder %v1120_v59, 0.0  ;;  %v1210_v4 = vadd.f32 %v1082_v19, %v270_v15 }
 0x116   :  { %v892_v28 = vpop.eup %891  ;;  %v1160_v32 = vpop.f32.mrb[11].mxu0  ;;  %v630_v35 = vsel %vm470_vm1, %v1085_v22, %v800_v20  ;;  %911 = vpow2.f32 %v546_v30  ;;  %v548_v22 = vmul.f32 1.442695, %v509_v40  ;;  %vm475_vm11 = vcmp.gt.f32.partialorder %v1123_v60, 0.0 }
 0x117   :  { %v1162_v33 = vpop.f32.mrb[11].mxu1  ;;  %v894_v34 = vpop.eup %893  ;;  %v801_v36 = vadd.f32 -1.0, %v892_v28  ;;  %v646_v44 = vsel %vm486_vm2, %v1088_v23, %v816_v29  ;;  %913 = vpow2.f32 %v578_v37  ;;  %v525_v23 = vmin.f32 %v1158_v31, 0.0 }
 0x118   :  { %v896_v41 = vpop.eup %895  ;;  %v817_v45 = vadd.f32 -1.0, %v894_v34  ;;  %915 = vpow2.f32 %v548_v22  ;;  %v510_v21 = vmin.f32 %v1193_v63, 0.0  ;;  %vm491_vm12 = vcmp.gt.f32.partialorder %v1128_v0, 0.0 }
 0x119   :  { %v898_v46 = vpop.eup %897  ;;  %v631_v47 = vsel %vm471_vm3, %v1091_v26, %v801_v36  ;;  %v802_v48 = vadd.f32 -1.0, %v896_v41  ;;  %v580_v62 = vmul.f32 1.442695, %v525_v23  ;;  %v1241_v37 = vadd.f32 %v1082_v19, %v1149_v16 }
 0x11a   :  { %v900_v49 = vpop.eup %899  ;;  %v848_v50 = vpack.c.bf16 %v631_v47, %v630_v35  ;;  %v647_v51 = vsel %vm487_vm4, %v1094_v27, %v817_v45  ;;  %v818_v52 = vadd.f32 -1.0, %v898_v46  ;;  %v1182_v26 = vpop.f32.mrb[12].mxu0  ;;  %v550_v36 = vmul.f32 1.442695, %v510_v21 }
 0x11b   :  { %v902_v53 = vpop.eup %901  ;;  %v856_v54 = vpack.c.bf16 %v647_v51, %v646_v44  ;;  %v632_v56 = vsel %vm472_vm5, %v1101_v38, %v802_v48  ;;  %v803_v57 = vadd.f32 -1.0, %v900_v49  ;;  %v1184_v58 = vpop.f32.mrb[12].mxu1  ;;  %917 = vpow2.f32 %v580_v62 }
 0x11c   :  { %758 = vst [vmem:[%s1390_s3] sm:$0xff] %v848_v50  ;;  %v648_v27 = vsel %vm488_vm6, %v1104_v39, %v818_v52  ;;  %v819_v61 = vadd.f32 -1.0, %v902_v53  ;;  %v1195_v38 = vpop.f32.mrb[13].mxu0  ;;  %v1197_v1 = vpop.f32.mrb[13].mxu1  ;;  %v1207_v39 = vadd.f32 %v1080_v18, %v308_v11  ;;  %vm476_vm13 = vcmp.gt.f32.partialorder %v1138_v6, 0.0 }
 0x11d   :  { %v904_v2 = vpop.eup %903  ;;  %766 = vst [vmem:[%s1390_s3 + $0x40] sm:$0xff] %v856_v54  ;;  %v633_v3 = vsel %vm473_vm7, %v1107_v42, %v803_v57  ;;  %v1212_v5 = vpop.f32.mrb[14].mxu0  ;;  %v511_v44 = vmin.f32 %v1210_v4, 0.0  ;;  %919 = vpow2.f32 %v550_v36  ;;  %vm492_vm14 = vcmp.gt.f32.partialorder %v1141_v7, 0.0 }
 0x11e   :  { %v1214_v8 = vpop.f32.mrb[14].mxu1  ;;  %v906_v10 = vpop.eup %905  ;;  %v849_v12 = vpack.c.bf16 %v633_v3, %v632_v56  ;;  %v649_v13 = vsel %vm489_vm8, %v1110_v43, %v819_v61  ;;  %v804_v14 = vadd.f32 -1.0, %v904_v2  ;;  %v526_v30 = vmin.f32 %v1207_v39, 0.0 }
 0x11f   :  { %v1219_v42 = vpop.f32.mrb[15].mxu0  ;;  %v1221_v17 = vpop.f32.mrb[15].mxu1  ;;  %v857_v20 = vpack.c.bf16 %v649_v13, %v648_v27  ;;  %v820_v15 = vadd.f32 -1.0, %v906_v10  ;;  %v552_v49 = vmul.f32 1.442695, %v511_v44  ;;  %v1254_v50 = vadd.f32 %v1080_v18, %v1153_v24 }
 0x120   :  { %v908_v11 = vpop.eup %907  ;;  %759 = vst [vmem:[%s1390_s3 + $0x8] sm:$0xff] %v849_v12  ;;  %v634_v43 = vsel %vm474_vm9, %v1117_v55, %v804_v14  ;;  %v582_v41 = vmul.f32 1.442695, %v526_v30  ;;  %v1268_v23 = vadd.f32 %v1082_v19, %v1160_v32  ;;  %vm477_vm15 = vcmp.gt.f32.partialorder %v1145_v9, 0.0 }
 0x121   :  { %v910_v28 = vpop.eup %909  ;;  %v805_v29 = vadd.f32 -1.0, %v908_v11  ;;  %767 = vst [vmem:[%s1390_s3 + $0x48] sm:$0xff] %v857_v20  ;;  %v650_v34 = vsel %vm490_vm10, %v1120_v59, %v820_v15  ;;  %vm493_vm0 = vcmp.gt.f32.partialorder %v1158_v31, 0.0  ;;  %v1279_v3 = vadd.f32 %v1082_v19, %v1162_v33 }
 0x122   :  { %v821_v35 = vadd.f32 -1.0, %v910_v28  ;;  %v912_v55 = vpop.eup %911  ;;  %921 = vpow2.f32 %v582_v41  ;;  %v513_v57 = vmin.f32 %v1268_v23, 0.0  ;;  %v1283_v10 = vadd.f32 %v1080_v18, %v1182_v26 }
 0x123   :  { %v635_v40 = vsel %vm475_vm11, %v1123_v60, %v805_v29  ;;  %v914_v45 = vpop.eup %913  ;;  %v806_v48 = vadd.f32 -1.0, %v912_v55  ;;  %v527_v60 = vmin.f32 %v1241_v37, 0.0  ;;  %923 = vpow2.f32 %v552_v49 }
 0x124   :  { %v850_v46 = vpack.c.bf16 %v635_v40, %v634_v43  ;;  %v651_v47 = vsel %vm491_vm12, %v1128_v0, %v821_v35  ;;  %v822_v22 = vadd.f32 -1.0, %v914_v45  ;;  %v916_v16 = vpop.eup %915  ;;  %v1258_v0 = vadd.f32 %v1080_v18, %v1155_v25 }
 0x125   :  { %v858_v59 = vpack.c.bf16 %v651_v47, %v650_v34  ;;  %v636_v51 = vsel %vm476_vm13, %v1138_v6, %v806_v48  ;;  %v807_v52 = vadd.f32 -1.0, %v916_v16  ;;  %v584_v24 = vmul.f32 1.442695, %v527_v60  ;;  %v918_v53 = vpop.eup %917 }
 0x126   :  { %760 = vst [vmem:[%s1390_s3 + $0x10] sm:$0xff] %v850_v46  ;;  %v512_v25 = vmin.f32 %v1254_v50, 0.0  ;;  %v652_v54 = vsel %vm492_vm14, %v1141_v7, %v822_v22  ;;  %v528_v6 = vmin.f32 %v1258_v0, 0.0  ;;  %v823_v61 = vadd.f32 -1.0, %v918_v53 }
 0x127   :  { %768 = vst [vmem:[%s1390_s3 + $0x50] sm:$0xff] %v858_v59  ;;  %v637_v56 = vsel %vm477_vm15, %v1145_v9, %v807_v52  ;;  %925 = vpow2.f32 %v584_v24  ;;  %v556_v2 = vmul.f32 1.442695, %v513_v57  ;;  %v1293_v9 = vadd.f32 %v1080_v18, %v1184_v58  ;;  %v920_v13 = vpop.eup %919 }
 0x128   :  { %v851_v27 = vpack.c.bf16 %v637_v56, %v636_v51  ;;  %v554_v32 = vmul.f32 1.442695, %v512_v25  ;;  %v586_v62 = vmul.f32 1.442695, %v528_v6  ;;  %v653_v7 = vsel %vm493_vm0, %v1158_v31, %v823_v61 }
 0x129   :  { %v1297_v33 = vadd.f32 %v1082_v19, %v1195_v38  ;;  %v859_v12 = vpack.c.bf16 %v653_v7, %v652_v54  ;;  %v529_v26 = vmin.f32 %v1279_v3, 0.0  ;;  %v514_v14 = vmin.f32 %v1283_v10, 0.0 }
 0x12a   :  { %761 = vst [vmem:[%s1390_s3 + $0x18] sm:$0xff] %v851_v27  ;;  %927 = vpow2.f32 %v554_v32  ;;  %vm478_vm1 = vcmp.gt.f32.partialorder %v1193_v63, 0.0  ;;  %v808_v31 = vadd.f32 -1.0, %v920_v13  ;;  %v530_v38 = vmin.f32 %v1293_v9, 0.0 }
 0x12b   :  { %929 = vpow2.f32 %v586_v62  ;;  %769 = vst [vmem:[%s1390_s3 + $0x58] sm:$0xff] %v859_v12  ;;  %v588_v58 = vmul.f32 1.442695, %v529_v26  ;;  %v558_v15 = vmul.f32 1.442695, %v514_v14  ;;  %v515_v21 = vmin.f32 %v1297_v33, 0.0 }
 0x12c   :  { %931 = vpow2.f32 %v556_v2  ;;  %v922_v11 = vpop.eup %921  ;;  %v1309_v28 = vadd.f32 %v1082_v19, %v1197_v1  ;;  %vm494_vm2 = vcmp.gt.f32.partialorder %v1207_v39, 0.0  ;;  %v590_v29 = vmul.f32 1.442695, %v530_v38 }
 0x12d   :  { %v824_v20 = vadd.f32 -1.0, %v922_v11  ;;  %v924_v43 = vpop.eup %923  ;;  %933 = vpow2.f32 %v588_v58  ;;  %v1314_v30 = vadd.f32 %v1080_v18, %v1212_v5  ;;  %v638_v34 = vsel %vm478_vm1, %v1193_v63, %v808_v31 }
 0x12e   :  { %v809_v35 = vadd.f32 -1.0, %v924_v43  ;;  %935 = vpow2.f32 %v558_v15  ;;  %v560_v36 = vmul.f32 1.442695, %v515_v21  ;;  %vm479_vm3 = vcmp.gt.f32.partialorder %v1210_v4, 0.0 }
 0x12f   :  { %v654_v55 = vsel %vm494_vm2, %v1207_v39, %v824_v20  ;;  %937 = vpow2.f32 %v590_v29  ;;  %v531_v1 = vmin.f32 %v1309_v28, 0.0  ;;  %v516_v44 = vmin.f32 %v1314_v30, 0.0 }
 0x130   :  { %v639_v41 = vsel %vm479_vm3, %v1210_v4, %v809_v35  ;;  %939 = vpow2.f32 %v560_v36  ;;  %v1324_v5 = vadd.f32 %v1080_v18, %v1214_v8  ;;  %v1328_v39 = vadd.f32 %v1082_v19, %v1219_v42 }
 0x131   :  { %v926_v40 = vpop.eup %925  ;;  %v852_v63 = vpack.c.bf16 %v639_v41, %v638_v34  ;;  %v592_v46 = vmul.f32 1.442695, %v531_v1  ;;  %vm495_vm4 = vcmp.gt.f32.partialorder %v1241_v37, 0.0  ;;  %v562_v48 = vmul.f32 1.442695, %v516_v44 }
 0x132   :  { %v825_v45 = vadd.f32 -1.0, %v926_v40  ;;  %v532_v4 = vmin.f32 %v1324_v5, 0.0  ;;  %v1334_v59 = vadd.f32 %v1082_v19, %v1221_v17  ;;  %vm480_vm5 = vcmp.gt.f32.partialorder %v1254_v50, 0.0 }
 0x133   :  { %762 = vst [vmem:[%s1390_s3 + $0x20] sm:$0xff] %v852_v63  ;;  %941 = vpow2.f32 %v592_v46  ;;  %v517_v17 = vmin.f32 %v1328_v39, 0.0  ;;  %vm481_vm6 = vcmp.gt.f32.partialorder %v1268_v23, 0.0  ;;  %vm496_vm7 = vcmp.gt.f32.partialorder %v1258_v0, 0.0 }
 0x134   :  { %v928_v47 = vpop.eup %927  ;;  %v655_v18 = vsel %vm495_vm4, %v1241_v37, %v825_v45  ;;  %943 = vpow2.f32 %v562_v48  ;;  %v594_v60 = vmul.f32 1.442695, %v532_v4  ;;  %v533_v37 = vmin.f32 %v1334_v59, 0.0 }
 0x135   :  { %v930_v22 = vpop.eup %929  ;;  %v810_v8 = vadd.f32 -1.0, %v928_v47  ;;  %v860_v49 = vpack.c.bf16 %v655_v18, %v654_v55  ;;  %v564_v25 = vmul.f32 1.442695, %v517_v17  ;;  %vm497_vm8 = vcmp.gt.f32.partialorder %v1279_v3, 0.0 }
 0x136   :  { %v932_v42 = vpop.eup %931  ;;  %v826_v16 = vadd.f32 -1.0, %v930_v22  ;;  %945 = vpow2.f32 %v594_v60  ;;  %v596_v6 = vmul.f32 1.442695, %v533_v37  ;;  %vm482_vm9 = vcmp.gt.f32.partialorder %v1283_v10, 0.0 }
 0x137   :  { %v640_v51 = vsel %vm480_vm5, %v1254_v50, %v810_v8  ;;  %v811_v19 = vadd.f32 -1.0, %v932_v42  ;;  %770 = vst [vmem:[%s1390_s3 + $0x60] sm:$0xff] %v860_v49  ;;  %v934_v52 = vpop.eup %933  ;;  %947 = vpow2.f32 %v564_v25  ;;  %vm483_vm10 = vcmp.gt.f32.partialorder %v1297_v33, 0.0 }
 0x138   :  { %v936_v53 = vpop.eup %935  ;;  %v656_v50 = vsel %vm496_vm7, %v1258_v0, %v826_v16  ;;  %v827_v56 = vadd.f32 -1.0, %v934_v52  ;;  %949 = vpow2.f32 %v596_v6  ;;  %vm498_vm11 = vcmp.gt.f32.partialorder %v1293_v9, 0.0 }
 0x139   :  { %v641_v24 = vsel %vm481_vm6, %v1268_v23, %v811_v19  ;;  %v938_v57 = vpop.eup %937  ;;  %v812_v27 = vadd.f32 -1.0, %v936_v53  ;;  %vm499_vm12 = vcmp.gt.f32.partialorder %v1309_v28, 0.0  ;;  %vm484_vm13 = vcmp.gt.f32.partialorder %v1314_v30, 0.0 }
 0x13a   :  { %v853_v54 = vpack.c.bf16 %v641_v24, %v640_v51  ;;  %v940_v61 = vpop.eup %939  ;;  %v657_v32 = vsel %vm497_vm8, %v1279_v3, %v827_v56  ;;  %v828_v23 = vadd.f32 -1.0, %v938_v57  ;;  %vm500_vm14 = vcmp.gt.f32.partialorder %v1324_v5, 0.0 }
 0x13b   :  { %v861_v0 = vpack.c.bf16 %v657_v32, %v656_v50  ;;  %v642_v62 = vsel %vm482_vm9, %v1283_v10, %v812_v27  ;;  %v813_v2 = vadd.f32 -1.0, %v940_v61  ;;  %vm485_vm15 = vcmp.gt.f32.partialorder %v1328_v39, 0.0 }
 0x13c   :  { %763 = vst [vmem:[%s1390_s3 + $0x28] sm:$0xff] %v853_v54  ;;  %v658_v26 = vsel %vm498_vm11, %v1293_v9, %v828_v23  ;;  %vm501_vm0 = vcmp.gt.f32.partialorder %v1334_v59, 0.0 }
 0x13d   :  { %v942_v7 = vpop.eup %941  ;;  %771 = vst [vmem:[%s1390_s3 + $0x68] sm:$0xff] %v861_v0  ;;  %v643_v12 = vsel %vm483_vm10, %v1297_v33, %v813_v2 }
 0x13e   :  { %v944_v3 = vpop.eup %943  ;;  %v854_v13 = vpack.c.bf16 %v643_v12, %v642_v62  ;;  %v829_v14 = vadd.f32 -1.0, %v942_v7 }
 0x13f   :  { %v814_v31 = vadd.f32 -1.0, %v944_v3 }
 0x140   :  { %v946_v10 = vpop.eup %945  ;;  %764 = vst [vmem:[%s1390_s3 + $0x30] sm:$0xff] %v854_v13  ;;  %v659_v11 = vsel %vm499_vm12, %v1309_v28, %v829_v14 }
 0x141   :  { %v862_v58 = vpack.c.bf16 %v659_v11, %v658_v26  ;;  %v830_v38 = vadd.f32 -1.0, %v946_v10  ;;  %v948_v20 = vpop.eup %947  ;;  %v644_v33 = vsel %vm484_vm13, %v1314_v30, %v814_v31 }
 0x142   :  { %v950_v9 = vpop.eup %949  ;;  %v815_v15 = vadd.f32 -1.0, %v948_v20 }
 0x143   :  { %772 = vst [vmem:[%s1390_s3 + $0x70] sm:$0xff] %v862_v58  ;;  %v660_v21 = vsel %vm500_vm14, %v1324_v5, %v830_v38  ;;  %v831_v28 = vadd.f32 -1.0, %v950_v9 }
 0x144   :  { %v645_v43 = vsel %vm485_vm15, %v1328_v39, %v815_v15 }
 0x145   :  { %v855_v29 = vpack.c.bf16 %v645_v43, %v644_v33  ;;  %v661_v34 = vsel %vm501_vm0, %v1334_v59, %v831_v28 }
 0x146   :  { %v863_v35 = vpack.c.bf16 %v661_v34, %v660_v21 }
 0x147   :  { %765 = vst [vmem:[%s1390_s3 + $0x38] sm:$0xff] %v855_v29 }
 0x148   :  { %773 = vst [vmem:[%s1390_s3 + $0x78] sm:$0xff] %v863_v35 }
 0x149   :  { %778 = vsyncpa [#allocation4], 1 }
 0x14a   :  { %779 = vsyncpa [#allocation6], 1 }

// kernel: forward.5
= control target key start
LH: loop header
LB: loop body
LE: loop exit
PB: predicated region body
PF: predicated region fallthrough
CT: control target
= control target key end

     0   :  { %8 = vsyncpa [#allocation4], 0  ;;  %s2760_s12 = smov [#allocation3]   ;;  %s2894_s0 = inlined_call_operand.vmem [shape: bf16[32,1728], index: 0, kind: input, shape index: {}]   ;;  %s2895_s1 = inlined_call_operand.hbm [shape: bf16[1728,256], index: 1, kind: input, shape index: {}]   ;;  %s2896_s2 = inlined_call_operand.vmem [shape: f32[1,256], index: 2, kind: input, shape index: {}]   ;;  %s2897_s3 = inlined_call_operand.vmem [shape: bf16[32,256], index: 3, kind: output, shape index: {}]  }
   0x1   :  { %s16_s13 = sshll.u32 %s2760_s12, 4  ;;  %s2736_s16 = scalar_lea.hbm %s2895_s1, 27648  ;;  %s17_s13 = int_to_ptr.vmem [resolvable:$true] %s16_s13 }
   0x2   :  { %p2737_p0 = scmp.ne.s32.totalorder %s2895_s1, %s2736_s16  ;;  %p2740_p1 = scmp.lt.u32.totalorder %s2736_s16, %s2895_s1 }
   0x4   :  { %p2742_p2 = pnand %p2740_p1, %p2737_p0 }
   0x6   :  { %2745 = shalt.err (!%p2742_p2)
}
   0x7   :  { %s2746_s21 = scalar_lea.vmem %s17_s13, 27648  ;;  %p2751_p4 = scmp.lt.s32.totalorder %s17_s13, %s17_s13 }
   0x8   :  { %p2747_p3 = scmp.ne.s32.totalorder %s17_s13, %s2746_s21  ;;  %p2752_p5 = scmp.lt.s32.totalorder %s2746_s21, %s2746_s21 }
   0xa   :  { %p2753_p6 = por %p2752_p5, %p2751_p4 }
   0xc   :  { %p2754_p7 = pnand %p2753_p6, %p2747_p3 }
   0xe   :  { %2757 = shalt.err (!%p2754_p7)
}
   0xf   :  { %s2761_s22 = smov 128   ;;  %s2762_s23 = smov 8  }
  0x10   :  { %22 = dma.hbm_to_vmem [thread:$0]  %s2895_s1, 27648, %s17_s13, [#allocation4], %s2761_s22, %s2761_s22, %s2762_s23  }
  0x11   :  { %2758 = dma.done.wait [#allocation4], 27648  }
  0x12   :  { %2759 = vsyncadd [#allocation4], 4294939648  ;;  %v2354_v0 = vld [vmem:[#allocation3 + $0x4] ss:$8 sps:$4 sm:$0xff]   ;;  %v2358_v2 = vld [vmem:[#allocation3] ss:$8 sps:$4 sm:$0xff]  }
  0x13   :  { %v2356_v1 = vld [vmem:[#allocation3 + $0x304] ss:$8 sps:$4 sm:$0xff]   ;;  %1518 = vmatprep.subr.bf16.mxu1 %v2354_v0  ;;  %v2359_v3 = vld [vmem:[#allocation3 + $0x300] ss:$8 sps:$4 sm:$0xff]   ;;  %v2360_v4 = vld [vmem:[#allocation3 + $0x14] ss:$8 sps:$4 sm:$0xff]  }
  0x14   :  { %1677 = vmatprep.subr.bf16.mxu0 %v2356_v1  ;;  %1519 = vmatpush1.bf16.msra.mxu1 %v2358_v2  ;;  %v2362_v5 = vld [vmem:[#allocation3 + $0x314] ss:$8 sps:$4 sm:$0xff]   ;;  %v2364_v6 = vld [vmem:[#allocation3 + $0x10] ss:$8 sps:$4 sm:$0xff]   ;;  %v2366_v8 = vld [vmem:[#allocation3 + $0x24] ss:$8 sps:$4 sm:$0xff]  }
  0x15   :  { %1678 = vmatpush1.bf16.msra.mxu0 %v2359_v3  ;;  %1520 = vmatprep.subr.bf16.mxu1 %v2360_v4  ;;  %v2365_v7 = vld [vmem:[#allocation3 + $0x310] ss:$8 sps:$4 sm:$0xff]   ;;  %v2368_v9 = vld [vmem:[#allocation3 + $0x324] ss:$8 sps:$4 sm:$0xff]   ;;  %v2370_v10 = vld [vmem:[#allocation3 + $0x20] ss:$8 sps:$4 sm:$0xff]  }
  0x16   :  { %1679 = vmatprep.subr.bf16.mxu0 %v2362_v5  ;;  %v2371_v11 = vld [vmem:[#allocation3 + $0x320] ss:$8 sps:$4 sm:$0xff]   ;;  %v2372_v12 = vld [vmem:[#allocation3 + $0x34] ss:$8 sps:$4 sm:$0xff]   ;;  %v2376_v14 = vld [vmem:[#allocation3 + $0x30] ss:$8 sps:$4 sm:$0xff]  }
  0x17   :  { %v2374_v13 = vld [vmem:[#allocation3 + $0x334] ss:$8 sps:$4 sm:$0xff]   ;;  %v2377_v15 = vld [vmem:[#allocation3 + $0x330] ss:$8 sps:$4 sm:$0xff]   ;;  %v2378_v16 = vld [vmem:[#allocation3 + $0x44] ss:$8 sps:$4 sm:$0xff]  }
  0x18   :  { %1521 = vmatpush1.bf16.msra.mxu1 %v2364_v6  ;;  %v2380_v17 = vld [vmem:[#allocation3 + $0x344] ss:$8 sps:$4 sm:$0xff]   ;;  %v2382_v18 = vld [vmem:[#allocation3 + $0x40] ss:$8 sps:$4 sm:$0xff]   ;;  %v2384_v20 = vld [vmem:[#allocation3 + $0x54] ss:$8 sps:$4 sm:$0xff]  }
  0x19   :  { %1680 = vmatpush1.bf16.msra.mxu0 %v2365_v7  ;;  %1522 = vmatprep.subr.bf16.mxu1 %v2366_v8  ;;  %v2383_v19 = vld [vmem:[#allocation3 + $0x340] ss:$8 sps:$4 sm:$0xff]   ;;  %v2386_v21 = vld [vmem:[#allocation3 + $0x354] ss:$8 sps:$4 sm:$0xff]   ;;  %v2388_v22 = vld [vmem:[#allocation3 + $0x50] ss:$8 sps:$4 sm:$0xff]  }
  0x1a   :  { %1681 = vmatprep.subr.bf16.mxu0 %v2368_v9  ;;  %v2389_v23 = vld [vmem:[#allocation3 + $0x350] ss:$8 sps:$4 sm:$0xff]   ;;  %v2390_v24 = vld [vmem:[#allocation3 + $0x64] ss:$8 sps:$4 sm:$0xff]   ;;  %v2394_v26 = vld [vmem:[#allocation3 + $0x60] ss:$8 sps:$4 sm:$0xff]  }
  0x1b   :  { %v2392_v25 = vld [vmem:[#allocation3 + $0x364] ss:$8 sps:$4 sm:$0xff]   ;;  %v2395_v27 = vld [vmem:[#allocation3 + $0x360] ss:$8 sps:$4 sm:$0xff]   ;;  %v2396_v28 = vld [vmem:[#allocation3 + $0x74] ss:$8 sps:$4 sm:$0xff]  }
  0x1c   :  { %1523 = vmatpush1.bf16.msra.mxu1 %v2370_v10  ;;  %v2398_v29 = vld [vmem:[#allocation3 + $0x374] ss:$8 sps:$4 sm:$0xff]   ;;  %v2400_v30 = vld [vmem:[#allocation3 + $0x70] ss:$8 sps:$4 sm:$0xff]   ;;  %v2402_v32 = vld [vmem:[#allocation3 + $0x84] ss:$8 sps:$4 sm:$0xff]  }
  0x1d   :  { %1682 = vmatpush1.bf16.msra.mxu0 %v2371_v11  ;;  %1524 = vmatprep.subr.bf16.mxu1 %v2372_v12  ;;  %v2401_v31 = vld [vmem:[#allocation3 + $0x370] ss:$8 sps:$4 sm:$0xff]   ;;  %v2404_v33 = vld [vmem:[#allocation3 + $0x384] ss:$8 sps:$4 sm:$0xff]   ;;  %v2406_v34 = vld [vmem:[#allocation3 + $0x80] ss:$8 sps:$4 sm:$0xff]  }
  0x1e   :  { %1683 = vmatprep.subr.bf16.mxu0 %v2374_v13  ;;  %v2407_v35 = vld [vmem:[#allocation3 + $0x380] ss:$8 sps:$4 sm:$0xff]   ;;  %v2408_v36 = vld [vmem:[#allocation3 + $0x94] ss:$8 sps:$4 sm:$0xff]   ;;  %v2412_v38 = vld [vmem:[#allocation3 + $0x90] ss:$8 sps:$4 sm:$0xff]  }
  0x1f   :  { %v2410_v37 = vld [vmem:[#allocation3 + $0x394] ss:$8 sps:$4 sm:$0xff]   ;;  %v2413_v39 = vld [vmem:[#allocation3 + $0x390] ss:$8 sps:$4 sm:$0xff]   ;;  %v2414_v40 = vld [vmem:[#allocation3 + $0xa4] ss:$8 sps:$4 sm:$0xff]  }
  0x20   :  { %1525 = vmatpush1.bf16.msra.mxu1 %v2376_v14  ;;  %v2416_v41 = vld [vmem:[#allocation3 + $0x3a4] ss:$8 sps:$4 sm:$0xff]   ;;  %v2418_v42 = vld [vmem:[#allocation3 + $0xa0] ss:$8 sps:$4 sm:$0xff]   ;;  %v2420_v44 = vld [vmem:[#allocation3 + $0xb4] ss:$8 sps:$4 sm:$0xff]  }
  0x21   :  { %1684 = vmatpush1.bf16.msra.mxu0 %v2377_v15  ;;  %1526 = vmatprep.subr.bf16.mxu1 %v2378_v16  ;;  %v2419_v43 = vld [vmem:[#allocation3 + $0x3a0] ss:$8 sps:$4 sm:$0xff]   ;;  %v2422_v45 = vld [vmem:[#allocation3 + $0x3b4] ss:$8 sps:$4 sm:$0xff]   ;;  %v2424_v46 = vld [vmem:[#allocation3 + $0xb0] ss:$8 sps:$4 sm:$0xff]  }
  0x22   :  { %1685 = vmatprep.subr.bf16.mxu0 %v2380_v17  ;;  %v2425_v47 = vld [vmem:[#allocation3 + $0x3b0] ss:$8 sps:$4 sm:$0xff]   ;;  %v2452_v48 = vld [vmem:[%s2894_s0 + $0x4] ss:$56 sps:$4 sm:$0xff]   ;;  %v2430_v52 = vld [vmem:[#allocation3 + $0xc0] ss:$8 sps:$4 sm:$0xff]  }
  0x23   :  { %v2426_v49 = vld [vmem:[#allocation3 + $0xc4] ss:$8 sps:$4 sm:$0xff]   ;;  %1550 = vmatprep.mubr.bf16.mxu1 %v2452_v48  ;;  %v2458_v51 = vld [vmem:[%s2894_s0 + $0x1c] ss:$56 sps:$4 sm:$0xff]   ;;  %v2431_v53 = vld [vmem:[#allocation3 + $0x3c0] ss:$8 sps:$4 sm:$0xff]  }
  0x24   :  { %1527 = vmatpush1.bf16.msra.mxu1 %v2382_v18  ;;  %v2428_v50 = vld [vmem:[#allocation3 + $0x3c4] ss:$8 sps:$4 sm:$0xff]   ;;  %v2432_v54 = vld [vmem:[#allocation3 + $0xd4] ss:$8 sps:$4 sm:$0xff]   ;;  %1709 = vmatprep.mubr.bf16.mxu0 %v2458_v51  ;;  %v2436_v56 = vld [vmem:[#allocation3 + $0xd0] ss:$8 sps:$4 sm:$0xff]  }
  0x25   :  { %1686 = vmatpush1.bf16.msra.mxu0 %v2383_v19  ;;  %1528 = vmatprep.subr.bf16.mxu1 %v2384_v20  ;;  %v2434_v55 = vld [vmem:[#allocation3 + $0x3d4] ss:$8 sps:$4 sm:$0xff]   ;;  %v2437_v57 = vld [vmem:[#allocation3 + $0x3d0] ss:$8 sps:$4 sm:$0xff]   ;;  %v2438_v58 = vld [vmem:[#allocation3 + $0xe4] ss:$8 sps:$4 sm:$0xff]  }
  0x26   :  { %1687 = vmatprep.subr.bf16.mxu0 %v2386_v21  ;;  %v2440_v59 = vld [vmem:[#allocation3 + $0x3e4] ss:$8 sps:$4 sm:$0xff]   ;;  %v2442_v60 = vld [vmem:[#allocation3 + $0xe0] ss:$8 sps:$4 sm:$0xff]   ;;  %v2444_v62 = vld [vmem:[#allocation3 + $0xf4] ss:$8 sps:$4 sm:$0xff]  }
  0x27   :  { %v2443_v61 = vld [vmem:[#allocation3 + $0x3e0] ss:$8 sps:$4 sm:$0xff]   ;;  %v2446_v63 = vld [vmem:[#allocation3 + $0x3f4] ss:$8 sps:$4 sm:$0xff]   ;;  %v2448_v0 = vld [vmem:[#allocation3 + $0xf0] ss:$8 sps:$4 sm:$0xff]  }
  0x28   :  { %1529 = vmatpush1.bf16.msra.mxu1 %v2388_v22  ;;  %v2449_v1 = vld [vmem:[#allocation3 + $0x3f0] ss:$8 sps:$4 sm:$0xff]   ;;  %v2455_v2 = vld [vmem:[#allocation3 + $0x104] ss:$8 sps:$4 sm:$0xff]   ;;  %v2453_v5 = vld [vmem:[#allocation3 + $0x100] ss:$8 sps:$4 sm:$0xff]  }
  0x29   :  { %1688 = vmatpush1.bf16.msra.mxu0 %v2389_v23  ;;  %1530 = vmatprep.subr.bf16.mxu1 %v2390_v24  ;;  %v2461_v3 = vld [vmem:[#allocation3 + $0x404] ss:$8 sps:$4 sm:$0xff]   ;;  %v2450_v4 = vld [vmem:[%s2894_s0] ss:$56 sps:$4 sm:$0xff]   ;;  %v2464_v8 = vld [vmem:[#allocation3 + $0x114] ss:$8 sps:$4 sm:$0xff]  }
  0x2a   :  { %1689 = vmatprep.subr.bf16.mxu0 %v2392_v25  ;;  %v2456_v6 = vld [vmem:[%s2894_s0 + $0x18] ss:$56 sps:$4 sm:$0xff]   ;;  %v2459_v7 = vld [vmem:[#allocation3 + $0x400] ss:$8 sps:$4 sm:$0xff]   ;;  %v2467_v9 = vld [vmem:[#allocation3 + $0x414] ss:$8 sps:$4 sm:$0xff]  }
  0x2b   :  { %v2462_v10 = vld [vmem:[#allocation3 + $0x110] ss:$8 sps:$4 sm:$0xff]   ;;  %v2470_v12 = vld [vmem:[#allocation3 + $0x124] ss:$8 sps:$4 sm:$0xff]   ;;  %v2468_v14 = vld [vmem:[#allocation3 + $0x120] ss:$8 sps:$4 sm:$0xff]  }
  0x2c   :  { %1531 = vmatpush1.bf16.msra.mxu1 %v2394_v26  ;;  %v2465_v11 = vld [vmem:[#allocation3 + $0x410] ss:$8 sps:$4 sm:$0xff]   ;;  %v2473_v13 = vld [vmem:[#allocation3 + $0x424] ss:$8 sps:$4 sm:$0xff]   ;;  %v2471_v15 = vld [vmem:[#allocation3 + $0x420] ss:$8 sps:$4 sm:$0xff]  }
  0x2d   :  { %1690 = vmatpush1.bf16.msra.mxu0 %v2395_v27  ;;  %1532 = vmatprep.subr.bf16.mxu1 %v2396_v28  ;;  %v2476_v16 = vld [vmem:[#allocation3 + $0x134] ss:$8 sps:$4 sm:$0xff]   ;;  %v2474_v18 = vld [vmem:[#allocation3 + $0x130] ss:$8 sps:$4 sm:$0xff]   ;;  %v2482_v20 = vld [vmem:[#allocation3 + $0x144] ss:$8 sps:$4 sm:$0xff]  }
  0x2e   :  { %1691 = vmatprep.subr.bf16.mxu0 %v2398_v29  ;;  %v2479_v17 = vld [vmem:[#allocation3 + $0x434] ss:$8 sps:$4 sm:$0xff]   ;;  %v2477_v19 = vld [vmem:[#allocation3 + $0x430] ss:$8 sps:$4 sm:$0xff]   ;;  %v2485_v21 = vld [vmem:[#allocation3 + $0x444] ss:$8 sps:$4 sm:$0xff]  }
  0x2f   :  { %v2480_v22 = vld [vmem:[#allocation3 + $0x140] ss:$8 sps:$4 sm:$0xff]   ;;  %v2488_v24 = vld [vmem:[#allocation3 + $0x154] ss:$8 sps:$4 sm:$0xff]   ;;  %v2486_v26 = vld [vmem:[#allocation3 + $0x150] ss:$8 sps:$4 sm:$0xff]  }
  0x30   :  { %1533 = vmatpush1.bf16.msra.mxu1 %v2400_v30  ;;  %v2483_v23 = vld [vmem:[#allocation3 + $0x440] ss:$8 sps:$4 sm:$0xff]   ;;  %v2491_v25 = vld [vmem:[#allocation3 + $0x454] ss:$8 sps:$4 sm:$0xff]   ;;  %v2489_v27 = vld [vmem:[#allocation3 + $0x450] ss:$8 sps:$4 sm:$0xff]  }
  0x31   :  { %1692 = vmatpush1.bf16.msra.mxu0 %v2401_v31  ;;  %1534 = vmatprep.subr.bf16.mxu1 %v2402_v32  ;;  %v2540_v28 = vld [vmem:[%s2894_s0 + $0x74] ss:$56 sps:$4 sm:$0xff]   ;;  %v2492_v32 = vld [vmem:[#allocation3 + $0x160] ss:$8 sps:$4 sm:$0xff]   ;;  %v2510_v48 = vld [vmem:[#allocation3 + $0x190] ss:$8 sps:$4 sm:$0xff]  }
  0x32   :  { %1693 = vmatprep.subr.bf16.mxu0 %v2404_v33  ;;  %v2494_v29 = vld [vmem:[#allocation3 + $0x164] ss:$8 sps:$4 sm:$0xff]   ;;  %v2495_v33 = vld [vmem:[#allocation3 + $0x460] ss:$8 sps:$4 sm:$0xff]   ;;  %vm1511_vm0 = vcmask 523264  }
  0x33   :  { %v2497_v30 = vld [vmem:[#allocation3 + $0x464] ss:$8 sps:$4 sm:$0xff]  }
  0x34   :  { %1535 = vmatpush1.bf16.msra.mxu1 %v2406_v34  ;;  %v2545_v31 = vld [vmem:[%s2894_s0 + $0x8c] ss:$56 sps:$4 sm:$0xff]   ;;  %v2550_v34 = vld [vmem:[%s2894_s0 + $0x70] ss:$56 sps:$4 sm:$0xff]  }
  0x35   :  { %1694 = vmatpush1.bf16.msra.mxu0 %v2407_v35  ;;  %1536 = vmatprep.subr.bf16.mxu1 %v2408_v36  ;;  %v2551_v35 = vld [vmem:[%s2894_s0 + $0x88] ss:$56 sps:$4 sm:$0xff]   ;;  %v2500_v36 = vld [vmem:[#allocation3 + $0x174] ss:$8 sps:$4 sm:$0xff]   ;;  %v2521_v51 = vld [vmem:[#allocation3 + $0x4a4] ss:$8 sps:$4 sm:$0xff]  }
  0x36   :  { %1695 = vmatprep.subr.bf16.mxu0 %v2410_v37  ;;  %v2503_v37 = vld [vmem:[#allocation3 + $0x474] ss:$8 sps:$4 sm:$0xff]  }
  0x38   :  { %1537 = vmatpush1.bf16.msra.mxu1 %v2412_v38  ;;  %v2498_v38 = vld [vmem:[#allocation3 + $0x170] ss:$8 sps:$4 sm:$0xff]  }
  0x39   :  { %1696 = vmatpush1.bf16.msra.mxu0 %v2413_v39  ;;  %1538 = vmatprep.subr.bf16.mxu1 %v2414_v40  ;;  %v2501_v39 = vld [vmem:[#allocation3 + $0x470] ss:$8 sps:$4 sm:$0xff]   ;;  %v2560_v40 = vld [vmem:[%s2894_s0 + $0xc] ss:$56 sps:$4 sm:$0xff]  }
  0x3a   :  { %1697 = vmatprep.subr.bf16.mxu0 %v2416_v41  ;;  %v2506_v41 = vld [vmem:[#allocation3 + $0x184] ss:$8 sps:$4 sm:$0xff]  }
  0x3c   :  { %1539 = vmatpush1.bf16.msra.mxu1 %v2418_v42  ;;  %v2509_v42 = vld [vmem:[#allocation3 + $0x484] ss:$8 sps:$4 sm:$0xff]  }
  0x3d   :  { %1698 = vmatpush1.bf16.msra.mxu0 %v2419_v43  ;;  %1540 = vmatprep.subr.bf16.mxu1 %v2420_v44  ;;  %v2566_v43 = vld [vmem:[%s2894_s0 + $0x24] ss:$56 sps:$4 sm:$0xff]   ;;  %v2504_v44 = vld [vmem:[#allocation3 + $0x180] ss:$8 sps:$4 sm:$0xff]  }
  0x3e   :  { %1699 = vmatprep.subr.bf16.mxu0 %v2422_v45  ;;  %v2507_v45 = vld [vmem:[#allocation3 + $0x480] ss:$8 sps:$4 sm:$0xff]  }
  0x40   :  { %1541 = vmatpush1.bf16.msra.mxu1 %v2424_v46  ;;  %v2512_v46 = vld [vmem:[#allocation3 + $0x194] ss:$8 sps:$4 sm:$0xff]  }
  0x41   :  { %1700 = vmatpush1.bf16.msra.mxu0 %v2425_v47  ;;  %1542 = vmatprep.subr.bf16.mxu1 %v2426_v49  ;;  %v2515_v47 = vld [vmem:[#allocation3 + $0x494] ss:$8 sps:$4 sm:$0xff]   ;;  %v2513_v49 = vld [vmem:[#allocation3 + $0x490] ss:$8 sps:$4 sm:$0xff]  }
  0x42   :  { %1701 = vmatprep.subr.bf16.mxu0 %v2428_v50  ;;  %v2518_v50 = vld [vmem:[#allocation3 + $0x1a4] ss:$8 sps:$4 sm:$0xff]  }
  0x44   :  { %1543 = vmatpush1.bf16.msra.mxu1 %v2430_v52  ;;  %v2516_v52 = vld [vmem:[#allocation3 + $0x1a0] ss:$8 sps:$4 sm:$0xff]  }
  0x45   :  { %1702 = vmatpush1.bf16.msra.mxu0 %v2431_v53  ;;  %1544 = vmatprep.subr.bf16.mxu1 %v2432_v54  ;;  %v2519_v53 = vld [vmem:[#allocation3 + $0x4a0] ss:$8 sps:$4 sm:$0xff]   ;;  %v2524_v54 = vld [vmem:[#allocation3 + $0x1b4] ss:$8 sps:$4 sm:$0xff]  }
  0x46   :  { %1703 = vmatprep.subr.bf16.mxu0 %v2434_v55  ;;  %v2527_v55 = vld [vmem:[#allocation3 + $0x4b4] ss:$8 sps:$4 sm:$0xff]  }
  0x48   :  { %1545 = vmatpush1.bf16.msra.mxu1 %v2436_v56  ;;  %v2522_v56 = vld [vmem:[#allocation3 + $0x1b0] ss:$8 sps:$4 sm:$0xff]  }
  0x49   :  { %1704 = vmatpush1.bf16.msra.mxu0 %v2437_v57  ;;  %1546 = vmatprep.subr.bf16.mxu1 %v2438_v58  ;;  %v2525_v57 = vld [vmem:[#allocation3 + $0x4b0] ss:$8 sps:$4 sm:$0xff]   ;;  %v2530_v58 = vld [vmem:[#allocation3 + $0x1c4] ss:$8 sps:$4 sm:$0xff]  }
  0x4a   :  { %1705 = vmatprep.subr.bf16.mxu0 %v2440_v59  ;;  %v2533_v59 = vld [vmem:[#allocation3 + $0x4c4] ss:$8 sps:$4 sm:$0xff]  }
  0x4c   :  { %1547 = vmatpush1.bf16.msra.mxu1 %v2442_v60  ;;  %v2528_v60 = vld [vmem:[#allocation3 + $0x1c0] ss:$8 sps:$4 sm:$0xff]  }
  0x4d   :  { %1706 = vmatpush1.bf16.msra.mxu0 %v2443_v61  ;;  %1548 = vmatprep.subr.bf16.mxu1 %v2444_v62  ;;  %v2531_v61 = vld [vmem:[#allocation3 + $0x4c0] ss:$8 sps:$4 sm:$0xff]   ;;  %v2536_v62 = vld [vmem:[#allocation3 + $0x1d4] ss:$8 sps:$4 sm:$0xff]  }
  0x4e   :  { %1707 = vmatprep.subr.bf16.mxu0 %v2446_v63  ;;  %v2539_v63 = vld [vmem:[#allocation3 + $0x4d4] ss:$8 sps:$4 sm:$0xff]  }
  0x50   :  { %1549 = vmatpush1.bf16.msra.mxu1 %v2448_v0  ;;  %v2534_v0 = vld [vmem:[#allocation3 + $0x1d0] ss:$8 sps:$4 sm:$0xff]  }
  0x51   :  { %1708 = vmatpush1.bf16.msra.mxu0 %v2449_v1  ;;  %1571 = vmatprep.subr.bf16.mxu1 %v2455_v2  ;;  %v2537_v1 = vld [vmem:[#allocation3 + $0x4d0] ss:$8 sps:$4 sm:$0xff]   ;;  %v2544_v2 = vld [vmem:[#allocation3 + $0x1e4] ss:$8 sps:$4 sm:$0xff]  }
  0x52   :  { %1730 = vmatprep.subr.bf16.mxu0 %v2461_v3  ;;  %v2549_v3 = vld [vmem:[#allocation3 + $0x4e4] ss:$8 sps:$4 sm:$0xff]  }
  0x53   :  { %1551 = vmatmul.mubr.bf16.vlgmr.msra.gmra.mrb[0].mxu1 %v2450_v4  ;;  %v2542_v4 = vld [vmem:[#allocation3 + $0x1e0] ss:$8 sps:$4 sm:$0xff]  }
  0x54   :  { %1710 = vmatmul.mubr.bf16.vlgmr.msra.gmra.mrb[0].mxu0 %v2456_v6  ;;  %1572 = vmatpush1.bf16.msra.mxu1 %v2453_v5  ;;  %v2547_v5 = vld [vmem:[#allocation3 + $0x4e0] ss:$8 sps:$4 sm:$0xff]   ;;  %v2554_v6 = vld [vmem:[#allocation3 + $0x1f4] ss:$8 sps:$4 sm:$0xff]  }
  0x55   :  { %1731 = vmatpush1.bf16.msra.mxu0 %v2459_v7  ;;  %1573 = vmatprep.subr.bf16.mxu1 %v2464_v8  ;;  %v2557_v7 = vld [vmem:[#allocation3 + $0x4f4] ss:$8 sps:$4 sm:$0xff]   ;;  %v2552_v8 = vld [vmem:[#allocation3 + $0x1f0] ss:$8 sps:$4 sm:$0xff]  }
  0x56   :  { %1732 = vmatprep.subr.bf16.mxu0 %v2467_v9  ;;  %1560 = vmatprep.mubr.bf16.mxu1 %v2540_v28  ;;  %v2555_v9 = vld [vmem:[#allocation3 + $0x4f0] ss:$8 sps:$4 sm:$0xff]   ;;  %v2584_v28 = vld [vmem:[#allocation3 + $0x234] ss:$8 sps:$4 sm:$0xff]  }
  0x57   :  { %1719 = vmatprep.mubr.bf16.mxu0 %v2545_v31  ;;  %v2585_v31 = vld [vmem:[#allocation3 + $0x530] ss:$8 sps:$4 sm:$0xff]  }
  0x58   :  { %1574 = vmatpush1.bf16.msra.mxu1 %v2462_v10  ;;  %v2563_v10 = vld [vmem:[#allocation3 + $0x204] ss:$8 sps:$4 sm:$0xff]  }
  0x59   :  { %1733 = vmatpush1.bf16.msra.mxu0 %v2465_v11  ;;  %1575 = vmatprep.subr.bf16.mxu1 %v2470_v12  ;;  %v2569_v11 = vld [vmem:[#allocation3 + $0x504] ss:$8 sps:$4 sm:$0xff]   ;;  %v2558_v12 = vld [vmem:[%s2894_s0 + $0x8] ss:$56 sps:$4 sm:$0xff]  }
  0x5a   :  { %1734 = vmatprep.subr.bf16.mxu0 %v2473_v13  ;;  %v2561_v13 = vld [vmem:[#allocation3 + $0x200] ss:$8 sps:$4 sm:$0xff]  }
  0x5b   :  { %1561 = vmatmul.mubr.bf16.gmra.mrb[4].mxu1 %v2550_v34  ;;  %v2593_v34 = vld [vmem:[#allocation3 + $0x544] ss:$8 sps:$4 sm:$0xff]  }
  0x5c   :  { %1576 = vmatpush1.bf16.msra.mxu1 %v2468_v14  ;;  %1720 = vmatmul.mubr.bf16.gmra.mrb[4].mxu0 %v2551_v35  ;;  %v2564_v14 = vld [vmem:[%s2894_s0 + $0x20] ss:$56 sps:$4 sm:$0xff]   ;;  %v2671_v35 = vld [vmem:[%s2894_s0 + $0x2c] ss:$56 sps:$4 sm:$0xff]  }
  0x5d   :  { %1735 = vmatpush1.bf16.msra.mxu0 %v2471_v15  ;;  %1577 = vmatprep.subr.bf16.mxu1 %v2476_v16  ;;  %v2567_v15 = vld [vmem:[#allocation3 + $0x500] ss:$8 sps:$4 sm:$0xff]   ;;  %v2572_v16 = vld [vmem:[#allocation3 + $0x214] ss:$8 sps:$4 sm:$0xff]  }
  0x5e   :  { %1736 = vmatprep.subr.bf16.mxu0 %v2479_v17  ;;  %1603 = vmatprep.mubr.bf16.mxu1 %v2560_v40  ;;  %v2575_v17 = vld [vmem:[#allocation3 + $0x514] ss:$8 sps:$4 sm:$0xff]   ;;  %v2594_v40 = vld [vmem:[#allocation3 + $0x250] ss:$8 sps:$4 sm:$0xff]  }
  0x5f   :  { %1762 = vmatprep.mubr.bf16.mxu0 %v2566_v43  ;;  %v2605_v43 = vld [vmem:[#allocation3 + $0x564] ss:$8 sps:$4 sm:$0xff]  }
  0x60   :  { %1578 = vmatpush1.bf16.msra.mxu1 %v2474_v18  ;;  %v2570_v18 = vld [vmem:[#allocation3 + $0x210] ss:$8 sps:$4 sm:$0xff]  }
  0x61   :  { %1737 = vmatpush1.bf16.msra.mxu0 %v2477_v19  ;;  %1579 = vmatprep.subr.bf16.mxu1 %v2482_v20  ;;  %v2573_v19 = vld [vmem:[#allocation3 + $0x510] ss:$8 sps:$4 sm:$0xff]   ;;  %v2648_v20 = vld [vmem:[%s2894_s0 + $0x7c] ss:$56 sps:$4 sm:$0xff]  }
  0x62   :  { %1738 = vmatprep.subr.bf16.mxu0 %v2485_v21  ;;  %v2578_v21 = vld [vmem:[#allocation3 + $0x224] ss:$8 sps:$4 sm:$0xff]  }
  0x64   :  { %1580 = vmatpush1.bf16.msra.mxu1 %v2480_v22  ;;  %v2650_v22 = vld [vmem:[%s2894_s0 + $0x94] ss:$56 sps:$4 sm:$0xff]  }
  0x65   :  { %1739 = vmatpush1.bf16.msra.mxu0 %v2483_v23  ;;  %1581 = vmatprep.subr.bf16.mxu1 %v2488_v24  ;;  %v2581_v23 = vld [vmem:[#allocation3 + $0x524] ss:$8 sps:$4 sm:$0xff]   ;;  %v2576_v24 = vld [vmem:[#allocation3 + $0x220] ss:$8 sps:$4 sm:$0xff]  }
  0x66   :  { %1740 = vmatprep.subr.bf16.mxu0 %v2491_v25  ;;  %v2579_v25 = vld [vmem:[#allocation3 + $0x520] ss:$8 sps:$4 sm:$0xff]  }
  0x68   :  { %1582 = vmatpush1.bf16.msra.mxu1 %v2486_v26  ;;  %v2652_v26 = vld [vmem:[%s2894_s0 + $0x78] ss:$56 sps:$4 sm:$0xff]  }
  0x69   :  { %1741 = vmatpush1.bf16.msra.mxu0 %v2489_v27  ;;  %1583 = vmatprep.subr.bf16.mxu1 %v2494_v29  ;;  %v2656_v27 = vld [vmem:[%s2894_s0 + $0x90] ss:$56 sps:$4 sm:$0xff]   ;;  %v2587_v29 = vld [vmem:[#allocation3 + $0x534] ss:$8 sps:$4 sm:$0xff]  }
  0x6a   :  { %1742 = vmatprep.subr.bf16.mxu0 %v2497_v30  ;;  %v2582_v30 = vld [vmem:[#allocation3 + $0x230] ss:$8 sps:$4 sm:$0xff]  }
  0x6c   :  { %1584 = vmatpush1.bf16.msra.mxu1 %v2492_v32  ;;  %v2590_v32 = vld [vmem:[#allocation3 + $0x244] ss:$8 sps:$4 sm:$0xff]  }
  0x6d   :  { %1743 = vmatpush1.bf16.msra.mxu0 %v2495_v33  ;;  %1585 = vmatprep.subr.bf16.mxu1 %v2500_v36  ;;  %v2668_v33 = vld [vmem:[%s2894_s0 + $0x14] ss:$56 sps:$4 sm:$0xff]   ;;  %v2588_v36 = vld [vmem:[#allocation3 + $0x240] ss:$8 sps:$4 sm:$0xff]  }
  0x6e   :  { %1744 = vmatprep.subr.bf16.mxu0 %v2503_v37  ;;  %v2591_v37 = vld [vmem:[#allocation3 + $0x540] ss:$8 sps:$4 sm:$0xff]  }
  0x70   :  { %1586 = vmatpush1.bf16.msra.mxu1 %v2498_v38  ;;  %v2596_v38 = vld [vmem:[#allocation3 + $0x254] ss:$8 sps:$4 sm:$0xff]  }
  0x71   :  { %1745 = vmatpush1.bf16.msra.mxu0 %v2501_v39  ;;  %1587 = vmatprep.subr.bf16.mxu1 %v2506_v41  ;;  %v2599_v39 = vld [vmem:[#allocation3 + $0x554] ss:$8 sps:$4 sm:$0xff]   ;;  %v2597_v41 = vld [vmem:[#allocation3 + $0x550] ss:$8 sps:$4 sm:$0xff]  }
  0x72   :  { %1746 = vmatprep.subr.bf16.mxu0 %v2509_v42  ;;  %v2602_v42 = vld [vmem:[#allocation3 + $0x264] ss:$8 sps:$4 sm:$0xff]  }
  0x74   :  { %1588 = vmatpush1.bf16.msra.mxu1 %v2504_v44  ;;  %v2600_v44 = vld [vmem:[#allocation3 + $0x260] ss:$8 sps:$4 sm:$0xff]  }
  0x75   :  { %1747 = vmatpush1.bf16.msra.mxu0 %v2507_v45  ;;  %1589 = vmatprep.subr.bf16.mxu1 %v2512_v46  ;;  %v2603_v45 = vld [vmem:[#allocation3 + $0x560] ss:$8 sps:$4 sm:$0xff]   ;;  %v2608_v46 = vld [vmem:[#allocation3 + $0x274] ss:$8 sps:$4 sm:$0xff]  }
  0x76   :  { %1748 = vmatprep.subr.bf16.mxu0 %v2515_v47  ;;  %v2611_v47 = vld [vmem:[#allocation3 + $0x574] ss:$8 sps:$4 sm:$0xff]  }
  0x78   :  { %1590 = vmatpush1.bf16.msra.mxu1 %v2510_v48  ;;  %v2606_v48 = vld [vmem:[#allocation3 + $0x270] ss:$8 sps:$4 sm:$0xff]  }
  0x79   :  { %1749 = vmatpush1.bf16.msra.mxu0 %v2513_v49  ;;  %1591 = vmatprep.subr.bf16.mxu1 %v2518_v50  ;;  %v2609_v49 = vld [vmem:[#allocation3 + $0x570] ss:$8 sps:$4 sm:$0xff]   ;;  %v2614_v50 = vld [vmem:[#allocation3 + $0x284] ss:$8 sps:$4 sm:$0xff]  }
  0x7a   :  { %1750 = vmatprep.subr.bf16.mxu0 %v2521_v51  ;;  %v2617_v51 = vld [vmem:[#allocation3 + $0x584] ss:$8 sps:$4 sm:$0xff]  }
  0x7c   :  { %1592 = vmatpush1.bf16.msra.mxu1 %v2516_v52  ;;  %v2612_v52 = vld [vmem:[#allocation3 + $0x280] ss:$8 sps:$4 sm:$0xff]  }
  0x7d   :  { %1751 = vmatpush1.bf16.msra.mxu0 %v2519_v53  ;;  %1593 = vmatprep.subr.bf16.mxu1 %v2524_v54  ;;  %v2615_v53 = vld [vmem:[#allocation3 + $0x580] ss:$8 sps:$4 sm:$0xff]   ;;  %v2620_v54 = vld [vmem:[#allocation3 + $0x294] ss:$8 sps:$4 sm:$0xff]  }
  0x7e   :  { %1752 = vmatprep.subr.bf16.mxu0 %v2527_v55  ;;  %v2623_v55 = vld [vmem:[#allocation3 + $0x594] ss:$8 sps:$4 sm:$0xff]  }
  0x80   :  { %1594 = vmatpush1.bf16.msra.mxu1 %v2522_v56  ;;  %v2618_v56 = vld [vmem:[#allocation3 + $0x290] ss:$8 sps:$4 sm:$0xff]  }
  0x81   :  { %1753 = vmatpush1.bf16.msra.mxu0 %v2525_v57  ;;  %1595 = vmatprep.subr.bf16.mxu1 %v2530_v58  ;;  %v2621_v57 = vld [vmem:[#allocation3 + $0x590] ss:$8 sps:$4 sm:$0xff]   ;;  %v2626_v58 = vld [vmem:[#allocation3 + $0x2a4] ss:$8 sps:$4 sm:$0xff]  }
  0x82   :  { %1754 = vmatprep.subr.bf16.mxu0 %v2533_v59  ;;  %v2629_v59 = vld [vmem:[#allocation3 + $0x5a4] ss:$8 sps:$4 sm:$0xff]  }
  0x84   :  { %1596 = vmatpush1.bf16.msra.mxu1 %v2528_v60  ;;  %v2624_v60 = vld [vmem:[#allocation3 + $0x2a0] ss:$8 sps:$4 sm:$0xff]  }
  0x85   :  { %1755 = vmatpush1.bf16.msra.mxu0 %v2531_v61  ;;  %1597 = vmatprep.subr.bf16.mxu1 %v2536_v62  ;;  %v2627_v61 = vld [vmem:[#allocation3 + $0x5a0] ss:$8 sps:$4 sm:$0xff]   ;;  %v2632_v62 = vld [vmem:[#allocation3 + $0x2b4] ss:$8 sps:$4 sm:$0xff]  }
  0x86   :  { %1756 = vmatprep.subr.bf16.mxu0 %v2539_v63  ;;  %v2635_v63 = vld [vmem:[#allocation3 + $0x5b4] ss:$8 sps:$4 sm:$0xff]  }
  0x88   :  { %1598 = vmatpush1.bf16.msra.mxu1 %v2534_v0  ;;  %v2630_v0 = vld [vmem:[#allocation3 + $0x2b0] ss:$8 sps:$4 sm:$0xff]  }
  0x89   :  { %1757 = vmatpush1.bf16.msra.mxu0 %v2537_v1  ;;  %1599 = vmatprep.subr.bf16.mxu1 %v2544_v2  ;;  %v2633_v1 = vld [vmem:[#allocation3 + $0x5b0] ss:$8 sps:$4 sm:$0xff]   ;;  %v2638_v2 = vld [vmem:[#allocation3 + $0x2c4] ss:$8 sps:$4 sm:$0xff]  }
  0x8a   :  { %1758 = vmatprep.subr.bf16.mxu0 %v2549_v3  ;;  %v2641_v3 = vld [vmem:[#allocation3 + $0x5c4] ss:$8 sps:$4 sm:$0xff]  }
  0x8c   :  { %1600 = vmatpush1.bf16.msra.mxu1 %v2542_v4  ;;  %v2636_v4 = vld [vmem:[#allocation3 + $0x2c0] ss:$8 sps:$4 sm:$0xff]  }
  0x8d   :  { %1759 = vmatpush1.bf16.msra.mxu0 %v2547_v5  ;;  %1601 = vmatprep.subr.bf16.mxu1 %v2554_v6  ;;  %v2639_v5 = vld [vmem:[#allocation3 + $0x5c0] ss:$8 sps:$4 sm:$0xff]   ;;  %v2644_v6 = vld [vmem:[#allocation3 + $0x2d4] ss:$8 sps:$4 sm:$0xff]  }
  0x8e   :  { %1760 = vmatprep.subr.bf16.mxu0 %v2557_v7  ;;  %v2647_v7 = vld [vmem:[#allocation3 + $0x5d4] ss:$8 sps:$4 sm:$0xff]  }
  0x90   :  { %1602 = vmatpush1.bf16.msra.mxu1 %v2552_v8  ;;  %v2642_v8 = vld [vmem:[#allocation3 + $0x2d0] ss:$8 sps:$4 sm:$0xff]  }
  0x91   :  { %1761 = vmatpush1.bf16.msra.mxu0 %v2555_v9  ;;  %1624 = vmatprep.subr.bf16.mxu1 %v2563_v10  ;;  %v2645_v9 = vld [vmem:[#allocation3 + $0x5d0] ss:$8 sps:$4 sm:$0xff]   ;;  %v2655_v10 = vld [vmem:[#allocation3 + $0x2e4] ss:$8 sps:$4 sm:$0xff]  }
  0x92   :  { %1783 = vmatprep.subr.bf16.mxu0 %v2569_v11  ;;  %v2659_v11 = vld [vmem:[#allocation3 + $0x5e4] ss:$8 sps:$4 sm:$0xff]  }
  0x93   :  { %1604 = vmatmul.mubr.bf16.vlgmr.msra.gmra.mrb[0].mxu1 %v2558_v12  ;;  %v2653_v12 = vld [vmem:[#allocation3 + $0x2e0] ss:$8 sps:$4 sm:$0xff]  }
  0x94   :  { %1763 = vmatmul.mubr.bf16.vlgmr.msra.gmra.mrb[0].mxu0 %v2564_v14  ;;  %1625 = vmatpush1.bf16.msra.mxu1 %v2561_v13  ;;  %v2657_v13 = vld [vmem:[#allocation3 + $0x5e0] ss:$8 sps:$4 sm:$0xff]   ;;  %v2662_v14 = vld [vmem:[#allocation3 + $0x2f4] ss:$8 sps:$4 sm:$0xff]  }
  0x95   :  { %1784 = vmatpush1.bf16.msra.mxu0 %v2567_v15  ;;  %1626 = vmatprep.subr.bf16.mxu1 %v2572_v16  ;;  %v2665_v15 = vld [vmem:[#allocation3 + $0x5f4] ss:$8 sps:$4 sm:$0xff]   ;;  %v2660_v16 = vld [vmem:[#allocation3 + $0x2f0] ss:$8 sps:$4 sm:$0xff]  }
  0x96   :  { %1785 = vmatprep.subr.bf16.mxu0 %v2575_v17  ;;  %1613 = vmatprep.mubr.bf16.mxu1 %v2648_v20  ;;  %v2663_v17 = vld [vmem:[#allocation3 + $0x5f0] ss:$8 sps:$4 sm:$0xff]   ;;  %v2669_v20 = vld [vmem:[%s2894_s0 + $0x28] ss:$56 sps:$4 sm:$0xff]  }
  0x97   :  { %1772 = vmatprep.mubr.bf16.mxu0 %v2650_v22  ;;  %v2677_v22 = vld [vmem:[#allocation3 + $0x614] ss:$8 sps:$4 sm:$0xff]  }
  0x98   :  { %1627 = vmatpush1.bf16.msra.mxu1 %v2570_v18  ;;  %v2674_v18 = vld [vmem:[#allocation3 + $0x604] ss:$8 sps:$4 sm:$0xff]  }
  0x99   :  { %1786 = vmatpush1.bf16.msra.mxu0 %v2573_v19  ;;  %1628 = vmatprep.subr.bf16.mxu1 %v2578_v21  ;;  %v2666_v19 = vld [vmem:[%s2894_s0 + $0x10] ss:$56 sps:$4 sm:$0xff]  }
  0x9a   :  { %1787 = vmatprep.subr.bf16.mxu0 %v2581_v23  ;;  %v2672_v21 = vld [vmem:[#allocation3 + $0x600] ss:$8 sps:$4 sm:$0xff]   ;;  %v2678_v23 = vld [vmem:[%s2894_s0 + $0x84] ss:$56 sps:$4 sm:$0xff]  }
  0x9b   :  { %1614 = vmatmul.mubr.bf16.gmra.mrb[4].mxu1 %v2652_v26  ;;  %v2686_v26 = vld [vmem:[#allocation3 + $0x624] ss:$8 sps:$4 sm:$0xff]  }
  0x9c   :  { %1773 = vmatmul.mubr.bf16.gmra.mrb[4].mxu0 %v2656_v27  ;;  %1629 = vmatpush1.bf16.msra.mxu1 %v2576_v24  ;;  %v2680_v24 = vld [vmem:[%s2894_s0 + $0x9c] ss:$56 sps:$4 sm:$0xff]   ;;  %v2682_v27 = vld [vmem:[%s2894_s0 + $0x80] ss:$56 sps:$4 sm:$0xff]  }
  0x9d   :  { %1788 = vmatpush1.bf16.msra.mxu0 %v2579_v25  ;;  %1630 = vmatprep.subr.bf16.mxu1 %v2584_v28  ;;  %v2675_v25 = vld [vmem:[#allocation3 + $0x610] ss:$8 sps:$4 sm:$0xff]  }
  0x9e   :  { %1789 = vmatprep.subr.bf16.mxu0 %v2587_v29  ;;  %1656 = vmatprep.mubr.bf16.mxu1 %v2668_v33  ;;  %v2683_v28 = vld [vmem:[%s2894_s0 + $0x98] ss:$56 sps:$4 sm:$0xff]   ;;  %v2684_v29 = vld [vmem:[#allocation3 + $0x620] ss:$8 sps:$4 sm:$0xff]  }
  0x9f   :  { %1815 = vmatprep.mubr.bf16.mxu0 %v2671_v35  ;;  %v2687_v33 = vld [vmem:[#allocation3 + $0x630] ss:$8 sps:$4 sm:$0xff]   ;;  %v2690_v35 = vld [vmem:[#allocation3 + $0x640] ss:$8 sps:$4 sm:$0xff]  }
  0xa0   :  { %1631 = vmatpush1.bf16.msra.mxu1 %v2582_v30  ;;  %v2689_v30 = vld [vmem:[#allocation3 + $0x634] ss:$8 sps:$4 sm:$0xff]  }
  0xa1   :  { %1790 = vmatpush1.bf16.msra.mxu0 %v2585_v31  ;;  %1632 = vmatprep.subr.bf16.mxu1 %v2590_v32  ;;  %v2716_v31 = vld [vmem:[%s2894_s0 + $0x34] ss:$56 sps:$4 sm:$0xff]   ;;  %v2719_v32 = vld [vmem:[%s2894_s0 + $0xa4] ss:$56 sps:$4 sm:$0xff]  }
  0xa2   :  { %1791 = vmatprep.subr.bf16.mxu0 %v2593_v34  ;;  %v2692_v34 = vld [vmem:[#allocation3 + $0x644] ss:$8 sps:$4 sm:$0xff]  }
  0xa4   :  { %1633 = vmatpush1.bf16.msra.mxu1 %v2588_v36  ;;  %v2695_v36 = vld [vmem:[#allocation3 + $0x654] ss:$8 sps:$4 sm:$0xff]  }
  0xa5   :  { %1792 = vmatpush1.bf16.msra.mxu0 %v2591_v37  ;;  %1634 = vmatprep.subr.bf16.mxu1 %v2596_v38  ;;  %v2693_v37 = vld [vmem:[#allocation3 + $0x650] ss:$8 sps:$4 sm:$0xff]   ;;  %v2698_v38 = vld [vmem:[#allocation3 + $0x664] ss:$8 sps:$4 sm:$0xff]  }
  0xa6   :  { %1793 = vmatprep.subr.bf16.mxu0 %v2599_v39  ;;  %v2696_v39 = vld [vmem:[#allocation3 + $0x660] ss:$8 sps:$4 sm:$0xff]  }
  0xa8   :  { %1635 = vmatpush1.bf16.msra.mxu1 %v2594_v40  ;;  %v2701_v40 = vld [vmem:[#allocation3 + $0x674] ss:$8 sps:$4 sm:$0xff]  }
  0xa9   :  { %1794 = vmatpush1.bf16.msra.mxu0 %v2597_v41  ;;  %1636 = vmatprep.subr.bf16.mxu1 %v2602_v42  ;;  %v2699_v41 = vld [vmem:[#allocation3 + $0x670] ss:$8 sps:$4 sm:$0xff]   ;;  %v2704_v42 = vld [vmem:[#allocation3 + $0x684] ss:$8 sps:$4 sm:$0xff]  }
  0xaa   :  { %1795 = vmatprep.subr.bf16.mxu0 %v2605_v43  ;;  %v2702_v43 = vld [vmem:[#allocation3 + $0x680] ss:$8 sps:$4 sm:$0xff]  }
  0xac   :  { %1637 = vmatpush1.bf16.msra.mxu1 %v2600_v44  ;;  %v2707_v44 = vld [vmem:[#allocation3 + $0x694] ss:$8 sps:$4 sm:$0xff]  }
  0xad   :  { %1796 = vmatpush1.bf16.msra.mxu0 %v2603_v45  ;;  %1638 = vmatprep.subr.bf16.mxu1 %v2608_v46  ;;  %v2705_v45 = vld [vmem:[#allocation3 + $0x690] ss:$8 sps:$4 sm:$0xff]   ;;  %v2710_v46 = vld [vmem:[#allocation3 + $0x6a4] ss:$8 sps:$4 sm:$0xff]  }
  0xae   :  { %1797 = vmatprep.subr.bf16.mxu0 %v2611_v47  ;;  %v2708_v47 = vld [vmem:[#allocation3 + $0x6a0] ss:$8 sps:$4 sm:$0xff]  }
  0xb0   :  { %1639 = vmatpush1.bf16.msra.mxu1 %v2606_v48  ;;  %v2713_v48 = vld [vmem:[#allocation3 + $0x6b4] ss:$8 sps:$4 sm:$0xff]  }
  0xb1   :  { %1798 = vmatpush1.bf16.msra.mxu0 %v2609_v49  ;;  %1640 = vmatprep.subr.bf16.mxu1 %v2614_v50  ;;  %v2711_v49 = vld [vmem:[#allocation3 + $0x6b0] ss:$8 sps:$4 sm:$0xff]  }
  0xb2   :  { %1799 = vmatprep.subr.bf16.mxu0 %v2617_v51  ;;  %v2714_v50 = vld [vmem:[%s2894_s0 + $0x30] ss:$56 sps:$4 sm:$0xff]   ;;  %v2717_v51 = vld [vmem:[%s2894_s0 + $0xa0] ss:$56 sps:$4 sm:$0xff]  }
  0xb4   :  { %1641 = vmatpush1.bf16.msra.mxu1 %v2612_v52 }
  0xb5   :  { %1800 = vmatpush1.bf16.msra.mxu0 %v2615_v53  ;;  %1642 = vmatprep.subr.bf16.mxu1 %v2620_v54 }
  0xb6   :  { %1801 = vmatprep.subr.bf16.mxu0 %v2623_v55 }
  0xb8   :  { %1643 = vmatpush1.bf16.msra.mxu1 %v2618_v56 }
  0xb9   :  { %1802 = vmatpush1.bf16.msra.mxu0 %v2621_v57  ;;  %1644 = vmatprep.subr.bf16.mxu1 %v2626_v58 }
  0xba   :  { %1803 = vmatprep.subr.bf16.mxu0 %v2629_v59 }
  0xbc   :  { %1645 = vmatpush1.bf16.msra.mxu1 %v2624_v60 }
  0xbd   :  { %1804 = vmatpush1.bf16.msra.mxu0 %v2627_v61  ;;  %1646 = vmatprep.subr.bf16.mxu1 %v2632_v62 }
  0xbe   :  { %1805 = vmatprep.subr.bf16.mxu0 %v2635_v63 }
  0xc0   :  { %1647 = vmatpush1.bf16.msra.mxu1 %v2630_v0 }
  0xc1   :  { %1806 = vmatpush1.bf16.msra.mxu0 %v2633_v1  ;;  %1648 = vmatprep.subr.bf16.mxu1 %v2638_v2 }
  0xc2   :  { %1807 = vmatprep.subr.bf16.mxu0 %v2641_v3 }
  0xc4   :  { %1649 = vmatpush1.bf16.msra.mxu1 %v2636_v4  ;;  %v1918_v4 = vlaneseq }
  0xc5   :  { %1808 = vmatpush1.bf16.msra.mxu0 %v2639_v5  ;;  %1650 = vmatprep.subr.bf16.mxu1 %v2644_v6 }
  0xc6   :  { %1809 = vmatprep.subr.bf16.mxu0 %v2647_v7  ;;  %v1919_v5 = vshrl.u32 %v1918_v4, 7  ;;  %v1916_v7 = vld [vmem:[%s2896_s2] sm:$0x3] }
  0xc8   :  { %1651 = vmatpush1.bf16.msra.mxu1 %v2642_v8  ;;  %v1920_v6 = vsub.s32 0, %v1919_v5  ;;  %v1924_v8 = vsub.s32 1, %v1919_v5 }
  0xc9   :  { %1810 = vmatpush1.bf16.msra.mxu0 %v2645_v9  ;;  %1652 = vmatprep.subr.bf16.mxu1 %v2655_v10 }
  0xca   :  { %1811 = vmatprep.subr.bf16.mxu0 %v2659_v11  ;;  %v1921_v9 = vrot.slane %v1916_v7, %v1920_v6 }
  0xcc   :  { %1653 = vmatpush1.bf16.msra.mxu1 %v2653_v12  ;;  %v1925_v12 = vrot.slane %v1916_v7, %v1924_v8 }
  0xcd   :  { %1812 = vmatpush1.bf16.msra.mxu0 %v2657_v13  ;;  %1654 = vmatprep.subr.bf16.mxu1 %v2662_v14 }
  0xce   :  { %1813 = vmatprep.subr.bf16.mxu0 %v2665_v15 }
  0xd0   :  { %1655 = vmatpush1.bf16.msra.mxu1 %v2660_v16 }
  0xd1   :  { %1814 = vmatpush1.bf16.msra.mxu0 %v2663_v17  ;;  %2279 = vmatprep.subr.bf16.mxu1 %v2674_v18 }
  0xd2   :  { %1836 = vmatprep.subr.bf16.mxu0 %v2674_v18 }
  0xd3   :  { %1657 = vmatmul.mubr.bf16.vlgmr.msra.gmra.mrb[0].mxu1 %v2666_v19 }
  0xd4   :  { %1816 = vmatmul.mubr.bf16.vlgmr.msra.gmra.mrb[0].mxu0 %v2669_v20  ;;  %2291 = vmatpush1.bf16.msra.mxu1 %v2672_v21 }
  0xd5   :  { %1837 = vmatpush1.bf16.msra.mxu0 %v2672_v21  ;;  %2280 = vmatprep.subr.bf16.mxu1 %v2677_v22 }
  0xd6   :  { %1838 = vmatprep.subr.bf16.mxu0 %v2677_v22  ;;  %1666 = vmatprep.mubr.bf16.mxu1 %v2678_v23 }
  0xd7   :  { %1825 = vmatprep.mubr.bf16.mxu0 %v2680_v24 }
  0xd8   :  { %2292 = vmatpush1.bf16.msra.mxu1 %v2675_v25 }
  0xd9   :  { %1839 = vmatpush1.bf16.msra.mxu0 %v2675_v25  ;;  %2281 = vmatprep.subr.bf16.mxu1 %v2686_v26 }
  0xda   :  { %1840 = vmatprep.subr.bf16.mxu0 %v2686_v26 }
  0xdb   :  { %1667 = vmatmul.mubr.bf16.gmra.mrb[4].mxu1 %v2682_v27 }
  0xdc   :  { %1826 = vmatmul.mubr.bf16.gmra.mrb[4].mxu0 %v2683_v28  ;;  %2293 = vmatpush1.bf16.msra.mxu1 %v2684_v29 }
  0xdd   :  { %1841 = vmatpush1.bf16.msra.mxu0 %v2684_v29  ;;  %2282 = vmatprep.subr.bf16.mxu1 %v2689_v30 }
  0xde   :  { %1842 = vmatprep.subr.bf16.mxu0 %v2689_v30  ;;  %2261 = vmatprep.mubr.msk.bf16.mxu0 %vm1511_vm0, %v2716_v31 }
  0xdf   :  { %2262 = vmatprep.mubr.msk.bf16.mxu1 %vm1511_vm0, %v2719_v32 }
  0xe0   :  { %2294 = vmatpush1.bf16.msra.mxu1 %v2687_v33 }
  0xe1   :  { %1843 = vmatpush1.bf16.msra.mxu0 %v2687_v33  ;;  %2283 = vmatprep.subr.bf16.mxu1 %v2692_v34 }
  0xe2   :  { %1844 = vmatprep.subr.bf16.mxu0 %v2692_v34 }
  0xe4   :  { %2295 = vmatpush1.bf16.msra.mxu1 %v2690_v35 }
  0xe5   :  { %1845 = vmatpush1.bf16.msra.mxu0 %v2690_v35  ;;  %2284 = vmatprep.subr.bf16.mxu1 %v2695_v36 }
  0xe6   :  { %1846 = vmatprep.subr.bf16.mxu0 %v2695_v36 }
  0xe8   :  { %2296 = vmatpush1.bf16.msra.mxu1 %v2693_v37 }
  0xe9   :  { %1847 = vmatpush1.bf16.msra.mxu0 %v2693_v37  ;;  %2285 = vmatprep.subr.bf16.mxu1 %v2698_v38 }
  0xea   :  { %1848 = vmatprep.subr.bf16.mxu0 %v2698_v38 }
  0xec   :  { %2297 = vmatpush1.bf16.msra.mxu1 %v2696_v39 }
  0xed   :  { %1849 = vmatpush1.bf16.msra.mxu0 %v2696_v39  ;;  %2286 = vmatprep.subr.bf16.mxu1 %v2701_v40 }
  0xee   :  { %1850 = vmatprep.subr.bf16.mxu0 %v2701_v40 }
  0xf0   :  { %2298 = vmatpush1.bf16.msra.mxu1 %v2699_v41 }
  0xf1   :  { %1851 = vmatpush1.bf16.msra.mxu0 %v2699_v41  ;;  %2287 = vmatprep.subr.bf16.mxu1 %v2704_v42 }
  0xf2   :  { %1852 = vmatprep.subr.bf16.mxu0 %v2704_v42 }
  0xf4   :  { %2299 = vmatpush1.bf16.msra.mxu1 %v2702_v43 }
  0xf5   :  { %1853 = vmatpush1.bf16.msra.mxu0 %v2702_v43  ;;  %2288 = vmatprep.subr.bf16.mxu1 %v2707_v44 }
  0xf6   :  { %1854 = vmatprep.subr.bf16.mxu0 %v2707_v44 }
  0xf8   :  { %2300 = vmatpush1.bf16.msra.mxu1 %v2705_v45 }
  0xf9   :  { %1855 = vmatpush1.bf16.msra.mxu0 %v2705_v45  ;;  %2289 = vmatprep.subr.bf16.mxu1 %v2710_v46 }
  0xfa   :  { %1856 = vmatprep.subr.bf16.mxu0 %v2710_v46 }
  0xfc   :  { %2301 = vmatpush1.bf16.msra.mxu1 %v2708_v47 }
  0xfd   :  { %1857 = vmatpush1.bf16.msra.mxu0 %v2708_v47  ;;  %2290 = vmatprep.subr.bf16.mxu1 %v2713_v48 }
  0xfe   :  { %1858 = vmatprep.subr.bf16.mxu0 %v2713_v48 }
 0x100   :  { %2302 = vmatpush1.bf16.msra.mxu1 %v2711_v49 }
 0x101   :  { %1859 = vmatpush1.bf16.msra.mxu0 %v2711_v49 }
 0x103   :  { %1879 = vmatmul.mubr.bf16.vlgmr.msra.gmra.mrb[8].mxu1 %v2717_v51 }
 0x104   :  { %1869 = vmatmul.mubr.bf16.vlgmr.msra.gmra.mrb[0].mxu0 %v2714_v50 }
 0x1a6   :  { %v1658_v52 = vpop.f32.mrb[0].mxu1 }
 0x1a7   :  { %v1660_v53 = vpop.f32.mrb[1].mxu1 }
 0x1a8   :  { %v1662_v54 = vpop.f32.mrb[2].mxu1 }
 0x1a9   :  { %v1664_v55 = vpop.f32.mrb[3].mxu1 }
 0x1ae   :  { %v1668_v56 = vpop.f32.mrb[4].mxu1 }
 0x1af   :  { %v1827_v57 = vpop.f32.mrb[4].mxu0  ;;  %v1670_v59 = vpop.f32.mrb[5].mxu1 }
 0x1b0   :  { %v2307_v58 = vadd.f32 %v1827_v57, %v1668_v56  ;;  %v1829_v60 = vpop.f32.mrb[5].mxu0  ;;  %v1672_v62 = vpop.f32.mrb[6].mxu1 }
 0x1b1   :  { %v2309_v61 = vadd.f32 %v1829_v60, %v1670_v59  ;;  %v1831_v63 = vpop.f32.mrb[6].mxu0  ;;  %v1674_v1 = vpop.f32.mrb[7].mxu1 }
 0x1b2   :  { %v2311_v0 = vadd.f32 %v1831_v63, %v1672_v62  ;;  %v1833_v2 = vpop.f32.mrb[7].mxu0 }
 0x1b3   :  { %v2313_v3 = vadd.f32 %v1833_v2, %v1674_v1 }
 0x1d6   :  { %v1880_v11 = vpop.f32.mrb[8].mxu1 }
 0x1d7   :  { %v1870_v10 = vpop.f32.mrb[0].mxu0  ;;  %v2308_v14 = vadd.f32 %v2307_v58, %v1880_v11  ;;  %v1882_v16 = vpop.f32.mrb[9].mxu1 }
 0x1d8   :  { %v2303_v13 = vadd.f32 %v1870_v10, %v1658_v52  ;;  %v1872_v15 = vpop.f32.mrb[1].mxu0  ;;  %v2310_v18 = vadd.f32 %v2309_v61, %v1882_v16  ;;  %v1884_v20 = vpop.f32.mrb[10].mxu1 }
 0x1d9   :  { %v2304_v17 = vadd.f32 %v1872_v15, %v1660_v53  ;;  %v1874_v19 = vpop.f32.mrb[2].mxu0  ;;  %v1932_v22 = vadd.f32 %v2308_v14, %v1921_v9  ;;  %v2312_v24 = vadd.f32 %v2311_v0, %v1884_v20  ;;  %v1886_v26 = vpop.f32.mrb[11].mxu1 }
 0x1da   :  { %v1928_v21 = vadd.f32 %v2303_v13, %v1921_v9  ;;  %v2305_v23 = vadd.f32 %v1874_v19, %v1662_v54  ;;  %v1876_v25 = vpop.f32.mrb[3].mxu0  ;;  %v1933_v28 = vadd.f32 %v2310_v18, %v1925_v12  ;;  %v2314_v30 = vadd.f32 %v2313_v3, %v1886_v26 }
 0x1db   :  { %v1929_v27 = vadd.f32 %v2304_v17, %v1925_v12  ;;  %v2306_v29 = vadd.f32 %v1876_v25, %v1664_v55  ;;  %v1948_v32 = vmin.f32 %v1932_v22, 0.0  ;;  %v1934_v38 = vadd.f32 %v2312_v24, %v1921_v9 }
 0x1dc   :  { %v1944_v31 = vmin.f32 %v1928_v21, 0.0  ;;  %v1949_v34 = vmin.f32 %v1933_v28, 0.0  ;;  %v1930_v37 = vadd.f32 %v2305_v23, %v1921_v9  ;;  %v1935_v42 = vadd.f32 %v2314_v30, %v1925_v12 }
 0x1dd   :  { %v1945_v33 = vmin.f32 %v1929_v27, 0.0  ;;  %v1960_v36 = vmul.f32 1.442695, %v1948_v32  ;;  %v1931_v41 = vadd.f32 %v2306_v29, %v1925_v12  ;;  %v1950_v44 = vmin.f32 %v1934_v38, 0.0 }
 0x1de   :  { %v1952_v35 = vmul.f32 1.442695, %v1944_v31  ;;  %v1962_v40 = vmul.f32 1.442695, %v1949_v34  ;;  %v1946_v43 = vmin.f32 %v1930_v37, 0.0  ;;  %v1951_v47 = vmin.f32 %v1935_v42, 0.0 }
 0x1df   :  { %v1954_v39 = vmul.f32 1.442695, %v1945_v33  ;;  %v1947_v45 = vmin.f32 %v1931_v41, 0.0  ;;  %v1964_v48 = vmul.f32 1.442695, %v1950_v44  ;;  %vm1936_vm1 = vcmp.gt.f32.partialorder %v1928_v21, 0.0 }
 0x1e0   :  { %2720 = vpow2.f32 %v1952_v35  ;;  %v1956_v46 = vmul.f32 1.442695, %v1946_v43  ;;  %v1966_v50 = vmul.f32 1.442695, %v1951_v47  ;;  %vm1940_vm2 = vcmp.gt.f32.partialorder %v1932_v22, 0.0 }
 0x1e1   :  { %2722 = vpow2.f32 %v1960_v36  ;;  %v1958_v49 = vmul.f32 1.442695, %v1947_v45  ;;  %vm1937_vm3 = vcmp.gt.f32.partialorder %v1929_v27, 0.0  ;;  %vm1941_vm4 = vcmp.gt.f32.partialorder %v1933_v28, 0.0 }
 0x1e2   :  { %2724 = vpow2.f32 %v1954_v39  ;;  %vm1938_vm5 = vcmp.gt.f32.partialorder %v1930_v37, 0.0  ;;  %vm1942_vm6 = vcmp.gt.f32.partialorder %v1934_v38, 0.0  ;;  %vm1939_vm7 = vcmp.gt.f32.partialorder %v1931_v41, 0.0 }
 0x1e3   :  { %2726 = vpow2.f32 %v1962_v40  ;;  %vm1943_vm8 = vcmp.gt.f32.partialorder %v1935_v42, 0.0 }
 0x1e4   :  { %2728 = vpow2.f32 %v1956_v46 }
 0x1e5   :  { %2730 = vpow2.f32 %v1964_v48 }
 0x1e6   :  { %2732 = vpow2.f32 %v1958_v49 }
 0x1e7   :  { %2734 = vpow2.f32 %v1966_v50 }
 0x1ea   :  { %v2721_v51 = vpop.eup %2720 }
 0x1eb   :  { %v2723_v52 = vpop.eup %2722  ;;  %v2263_v53 = vadd.f32 -1.0, %v2721_v51 }
 0x1ec   :  { %v2725_v54 = vpop.eup %2724  ;;  %v2267_v55 = vadd.f32 -1.0, %v2723_v52 }
 0x1ed   :  { %v2727_v56 = vpop.eup %2726  ;;  %v1976_v57 = vsel %vm1936_vm1, %v1928_v21, %v2263_v53  ;;  %v2264_v58 = vadd.f32 -1.0, %v2725_v54 }
 0x1ee   :  { %v2729_v59 = vpop.eup %2728  ;;  %v1980_v60 = vsel %vm1940_vm2, %v1932_v22, %v2267_v55  ;;  %v2268_v61 = vadd.f32 -1.0, %v2727_v56 }
 0x1ef   :  { %v2731_v62 = vpop.eup %2730  ;;  %v1977_v63 = vsel %vm1937_vm3, %v1929_v27, %v2264_v58  ;;  %v2265_v0 = vadd.f32 -1.0, %v2729_v59 }
 0x1f0   :  { %v2733_v1 = vpop.eup %2732  ;;  %v2275_v2 = vpack.c.bf16 %v1977_v63, %v1976_v57  ;;  %v1981_v3 = vsel %vm1941_vm4, %v1933_v28, %v2268_v61  ;;  %v2269_v4 = vadd.f32 -1.0, %v2731_v62 }
 0x1f1   :  { %v2735_v5 = vpop.eup %2734  ;;  %v2277_v6 = vpack.c.bf16 %v1981_v3, %v1980_v60  ;;  %v1978_v7 = vsel %vm1938_vm5, %v1930_v37, %v2265_v0  ;;  %v2266_v8 = vadd.f32 -1.0, %v2733_v1 }
 0x1f2   :  { %2008 = vst [vmem:[%s2897_s3] sm:$0xff] %v2275_v2  ;;  %v1982_v9 = vsel %vm1942_vm6, %v1934_v38, %v2269_v4  ;;  %v2270_v10 = vadd.f32 -1.0, %v2735_v5 }
 0x1f3   :  { %2010 = vst [vmem:[%s2897_s3 + $0x10] sm:$0xff] %v2277_v6  ;;  %v1979_v11 = vsel %vm1939_vm7, %v1931_v41, %v2266_v8 }
 0x1f4   :  { %v2276_v12 = vpack.c.bf16 %v1979_v11, %v1978_v7  ;;  %v1983_v13 = vsel %vm1943_vm8, %v1935_v42, %v2270_v10 }
 0x1f5   :  { %v2278_v14 = vpack.c.bf16 %v1983_v13, %v1982_v9 }
 0x1f6   :  { %2009 = vst [vmem:[%s2897_s3 + $0x8] sm:$0xff] %v2276_v12 }
 0x1f7   :  { %2011 = vst [vmem:[%s2897_s3 + $0x18] sm:$0xff] %v2278_v14 }
 0x1f8   :  { %2016 = vsyncpa [#allocation4], 1 }

// kernel: forward.6
= control target key start
LH: loop header
LB: loop body
LE: loop exit
PB: predicated region body
PF: predicated region fallthrough
CT: control target
= control target key end

     0   :  { %s3039_s12 = smov 0   ;;  %s3041_s13 = smov 0   ;;  %s3360_s0 = inlined_call_operand.vmem [shape: bf16[8,2304], index: 0, kind: input, shape index: {}]   ;;  %s3361_s1 = inlined_call_operand.vmem [shape: bf16[2304,384], index: 1, kind: input, shape index: {}]   ;;  %s3362_s2 = inlined_call_operand.vmem [shape: f32[1,384], index: 2, kind: input, shape index: {}]   ;;  %s3363_s3 = inlined_call_operand.vmem [shape: bf16[8,384], index: 3, kind: output, shape index: {}]  }
   0x1   :  { %s3043_s14 = smov 0  }
   0x2 LB: > { %s22_s15 = sadd.s32 1, %s3009_s13  ;;  %p2301_p0 = scmp.ge.s32.totalorder %s3013_s14, 1  ;;  %s3013_s14 = sphi %s3043_s14, %s13_s14   ;;  %s3009_s13 = sphi %s3041_s13, %s3365_s13   ;;  %s3005_s12 = sphi %s3039_s12, %s3364_s12  }
   0x3   : > { %p23_p1 = scmp.ge.s32.totalorder %s22_s15, 2  ;;  %p179_p2 = scmp.lt.s32.totalorder %s3013_s14, 3 }
   0x5   : > { %s3367_s15 = smov (%p23_p1, %s22_s15), 0  ;;  %p180_p3 = pnand %p2301_p0, %p179_p2 }
   0x6   : > { %s217_s16 = smul.u32 (!%p180_p3), 9, %s3005_s12  ;;  %p2304_p6 = scmp.ne.s32.totalorder (!%p180_p3), %s3005_s12, 0 }
   0x7   : > { %183 = sbr.rel (%p180_p3) target bundleno = 500 (0x1f4), region = 32 }
   0x8   : > { %s223_s17 = smul.u32 (!%p180_p3), 144, %s3005_s12  ;;  %p218_p4 = scmp.lt.s32.totalorder (!%p180_p3), %s217_s16, 17 }
   0xa   : > { %p225_p5 = scmp.lt.s32.totalorder (!%p180_p3), %s223_s17, 287 }
   0xe   : > { %s3369_s16 = smov (!%p218_p4, %s217_s16), 17  ;;  %s3371_s17 = smov (!%p225_p5, %s223_s17), 287 }
   0xf   : > { %s2302_s18 = sshll.u32 %s3369_s16, 2  ;;  %s2659_s22 = smul.u32 12, %s3371_s17  ;;  %v3015_v0 = vmov (!%p2304_p6), 0.0  }
  0x10   : > { %s3064_s21 = scalar_lea.vmem %s3360_s0, %s2302_s18  ;;  %250 = sbr.rel (%p2304_p6) target bundleno = 23 (0x17), region = 36  ;;  %251 = vst [vmem:[#allocation2] sm:$0xff] (!%p2304_p6), %v3015_v0  ;;  %252 = vst [vmem:[#allocation2 + $0x8] sm:$0xff] (!%p2304_p6), %v3015_v0 }
  0x11   : > { %s3069_s25 = scalar_lea.vmem %s3361_s1, %s2659_s22  ;;  %253 = vst [vmem:[#allocation2 + $0x10] sm:$0xff] (!%p2304_p6), %v3015_v0 }
  0x17 PF: > { %v2688_v1 = vld [vmem:[%s3069_s25 + $0x4] ss:$12 sps:$4 sm:$0xff]   ;;  %v2692_v3 = vld [vmem:[%s3069_s25] ss:$12 sps:$4 sm:$0xff]   ;;  %v2694_v5 = vld [vmem:[%s3069_s25 + $0x1c] ss:$12 sps:$4 sm:$0xff]  }
  0x18   : > { %v2690_v2 = vld [vmem:[%s3069_s25 + $0x184] ss:$12 sps:$4 sm:$0xff]   ;;  %1734 = vmatprep.subr.bf16.mxu0 %v2688_v1  ;;  %v2693_v4 = vld [vmem:[%s3069_s25 + $0x180] ss:$12 sps:$4 sm:$0xff]   ;;  %v2696_v6 = vld [vmem:[%s3069_s25 + $0x19c] ss:$12 sps:$4 sm:$0xff]  }
  0x19   : > { %1775 = vmatprep.subr.bf16.mxu1 %v2690_v2  ;;  %1735 = vmatpush1.bf16.msra.mxu0 %v2692_v3  ;;  %v2698_v7 = vld [vmem:[%s3069_s25 + $0x18] ss:$12 sps:$4 sm:$0xff]   ;;  %v2700_v9 = vld [vmem:[%s3069_s25 + $0x34] ss:$12 sps:$4 sm:$0xff]   ;;  %v2704_v11 = vld [vmem:[%s3069_s25 + $0x30] ss:$12 sps:$4 sm:$0xff]  }
  0x1a   : > { %1776 = vmatpush1.bf16.msra.mxu1 %v2693_v4  ;;  %1736 = vmatprep.subr.bf16.mxu0 %v2694_v5  ;;  %v2699_v8 = vld [vmem:[%s3069_s25 + $0x198] ss:$12 sps:$4 sm:$0xff]   ;;  %v2702_v10 = vld [vmem:[%s3069_s25 + $0x1b4] ss:$12 sps:$4 sm:$0xff]   ;;  %v2705_v12 = vld [vmem:[%s3069_s25 + $0x1b0] ss:$12 sps:$4 sm:$0xff]  }
  0x1b   : > { %1777 = vmatprep.subr.bf16.mxu1 %v2696_v6  ;;  %v2706_v13 = vld [vmem:[%s3069_s25 + $0x4c] ss:$12 sps:$4 sm:$0xff]   ;;  %v2710_v15 = vld [vmem:[%s3069_s25 + $0x48] ss:$12 sps:$4 sm:$0xff]   ;;  %v2712_v17 = vld [vmem:[%s3069_s25 + $0x64] ss:$12 sps:$4 sm:$0xff]  }
  0x1c   : > { %v2708_v14 = vld [vmem:[%s3069_s25 + $0x1cc] ss:$12 sps:$4 sm:$0xff]   ;;  %v2711_v16 = vld [vmem:[%s3069_s25 + $0x1c8] ss:$12 sps:$4 sm:$0xff]   ;;  %v2714_v18 = vld [vmem:[%s3069_s25 + $0x1e4] ss:$12 sps:$4 sm:$0xff]  }
  0x1d   : > { %1737 = vmatpush1.bf16.msra.mxu0 %v2698_v7  ;;  %v2716_v19 = vld [vmem:[%s3069_s25 + $0x60] ss:$12 sps:$4 sm:$0xff]   ;;  %v2718_v21 = vld [vmem:[%s3069_s25 + $0x7c] ss:$12 sps:$4 sm:$0xff]   ;;  %v2722_v23 = vld [vmem:[%s3069_s25 + $0x78] ss:$12 sps:$4 sm:$0xff]  }
  0x1e   : > { %1778 = vmatpush1.bf16.msra.mxu1 %v2699_v8  ;;  %1738 = vmatprep.subr.bf16.mxu0 %v2700_v9  ;;  %v2717_v20 = vld [vmem:[%s3069_s25 + $0x1e0] ss:$12 sps:$4 sm:$0xff]   ;;  %v2720_v22 = vld [vmem:[%s3069_s25 + $0x1fc] ss:$12 sps:$4 sm:$0xff]   ;;  %v2723_v24 = vld [vmem:[%s3069_s25 + $0x1f8] ss:$12 sps:$4 sm:$0xff]  }
  0x1f   : > { %1779 = vmatprep.subr.bf16.mxu1 %v2702_v10  ;;  %v2724_v25 = vld [vmem:[%s3069_s25 + $0x94] ss:$12 sps:$4 sm:$0xff]   ;;  %v2728_v27 = vld [vmem:[%s3069_s25 + $0x90] ss:$12 sps:$4 sm:$0xff]   ;;  %v2730_v29 = vld [vmem:[%s3069_s25 + $0xac] ss:$12 sps:$4 sm:$0xff]  }
  0x20   : > { %v2726_v26 = vld [vmem:[%s3069_s25 + $0x214] ss:$12 sps:$4 sm:$0xff]   ;;  %v2729_v28 = vld [vmem:[%s3069_s25 + $0x210] ss:$12 sps:$4 sm:$0xff]   ;;  %v2732_v30 = vld [vmem:[%s3069_s25 + $0x22c] ss:$12 sps:$4 sm:$0xff]  }
  0x21   : > { %1739 = vmatpush1.bf16.msra.mxu0 %v2704_v11  ;;  %v2734_v31 = vld [vmem:[%s3069_s25 + $0xa8] ss:$12 sps:$4 sm:$0xff]   ;;  %v2736_v33 = vld [vmem:[%s3069_s25 + $0xc4] ss:$12 sps:$4 sm:$0xff]   ;;  %v2740_v35 = vld [vmem:[%s3069_s25 + $0xc0] ss:$12 sps:$4 sm:$0xff]  }
  0x22   : > { %1780 = vmatpush1.bf16.msra.mxu1 %v2705_v12  ;;  %1740 = vmatprep.subr.bf16.mxu0 %v2706_v13  ;;  %v2735_v32 = vld [vmem:[%s3069_s25 + $0x228] ss:$12 sps:$4 sm:$0xff]   ;;  %v2738_v34 = vld [vmem:[%s3069_s25 + $0x244] ss:$12 sps:$4 sm:$0xff]   ;;  %v2741_v36 = vld [vmem:[%s3069_s25 + $0x240] ss:$12 sps:$4 sm:$0xff]  }
  0x23   : > { %1781 = vmatprep.subr.bf16.mxu1 %v2708_v14  ;;  %v2742_v37 = vld [vmem:[%s3069_s25 + $0xdc] ss:$12 sps:$4 sm:$0xff]   ;;  %v2746_v39 = vld [vmem:[%s3069_s25 + $0xd8] ss:$12 sps:$4 sm:$0xff]   ;;  %v2748_v41 = vld [vmem:[%s3069_s25 + $0xf4] ss:$12 sps:$4 sm:$0xff]  }
  0x24   : > { %v2744_v38 = vld [vmem:[%s3069_s25 + $0x25c] ss:$12 sps:$4 sm:$0xff]   ;;  %v2747_v40 = vld [vmem:[%s3069_s25 + $0x258] ss:$12 sps:$4 sm:$0xff]   ;;  %v2750_v42 = vld [vmem:[%s3069_s25 + $0x274] ss:$12 sps:$4 sm:$0xff]  }
  0x25   : > { %1741 = vmatpush1.bf16.msra.mxu0 %v2710_v15  ;;  %v2752_v43 = vld [vmem:[%s3069_s25 + $0xf0] ss:$12 sps:$4 sm:$0xff]   ;;  %v2754_v45 = vld [vmem:[%s3069_s25 + $0x10c] ss:$12 sps:$4 sm:$0xff]   ;;  %v257_v47 = vld [vmem:[%s3064_s21] sm:$0xff]  ;;  %vm3018_vm0 = vmmov 0  }
  0x26   : > { %1782 = vmatpush1.bf16.msra.mxu1 %v2711_v16  ;;  %1742 = vmatprep.subr.bf16.mxu0 %v2712_v17  ;;  %v2753_v44 = vld [vmem:[%s3069_s25 + $0x270] ss:$12 sps:$4 sm:$0xff]   ;;  %v2756_v46 = vld [vmem:[%s3069_s25 + $0x28c] ss:$12 sps:$4 sm:$0xff]   ;;  %v3119_v48 = vcombine.high %v257_v47, %v257_v47  ;;  %v2758_v50 = vld [vmem:[%s3069_s25 + $0x108] ss:$12 sps:$4 sm:$0xff]   ;;  %v3146_v7 = vcombine.low %v257_v47, %v257_v47 }
  0x27   : > { %1783 = vmatprep.subr.bf16.mxu1 %v2714_v18  ;;  %v258_v49 = vld [vmem:[%s3064_s21 + $0x8] sm:$0xff]  ;;  %v2760_v53 = vld [vmem:[%s3069_s25 + $0x124] ss:$12 sps:$4 sm:$0xff]   ;;  %v2772_v61 = vld [vmem:[%s3069_s25 + $0x154] ss:$12 sps:$4 sm:$0xff]   ;;  %p2530_p7 = scmp.ne.s32.totalorder %s3005_s12, 1 }
  0x28   : > { %v2759_v51 = vld [vmem:[%s3069_s25 + $0x288] ss:$12 sps:$4 sm:$0xff]   ;;  %v3124_v52 = vcombine.high %v258_v49, %v258_v49  ;;  %v2762_v54 = vld [vmem:[%s3069_s25 + $0x2a4] ss:$12 sps:$4 sm:$0xff]   ;;  %1766 = vmatprep.mubr.bf16.mxu0 %v3119_v48  ;;  %v2764_v55 = vld [vmem:[%s3069_s25 + $0x120] ss:$12 sps:$4 sm:$0xff]   ;;  %v3148_v8 = vcombine.low %v258_v49, %v258_v49 }
  0x29   : > { %1743 = vmatpush1.bf16.msra.mxu0 %v2716_v19  ;;  %v2765_v56 = vld [vmem:[%s3069_s25 + $0x2a0] ss:$12 sps:$4 sm:$0xff]   ;;  %v2766_v57 = vld [vmem:[%s3069_s25 + $0x13c] ss:$12 sps:$4 sm:$0xff]   ;;  %v2770_v59 = vld [vmem:[%s3069_s25 + $0x138] ss:$12 sps:$4 sm:$0xff]  }
  0x2a   : > { %1784 = vmatpush1.bf16.msra.mxu1 %v2717_v20  ;;  %1744 = vmatprep.subr.bf16.mxu0 %v2718_v21  ;;  %v2768_v58 = vld [vmem:[%s3069_s25 + $0x2bc] ss:$12 sps:$4 sm:$0xff]   ;;  %v2771_v60 = vld [vmem:[%s3069_s25 + $0x2b8] ss:$12 sps:$4 sm:$0xff]   ;;  %v2774_v62 = vld [vmem:[%s3069_s25 + $0x2d4] ss:$12 sps:$4 sm:$0xff]  }
  0x2b   : > { %1785 = vmatprep.subr.bf16.mxu1 %v2720_v22  ;;  %1807 = vmatprep.mubr.bf16.mxu1 %v3124_v52  ;;  %v2776_v63 = vld [vmem:[%s3069_s25 + $0x150] ss:$12 sps:$4 sm:$0xff]   ;;  %v2778_v1 = vld [vmem:[%s3069_s25 + $0x16c] ss:$12 sps:$4 sm:$0xff]   ;;  %v2782_v3 = vld [vmem:[%s3069_s25 + $0x168] ss:$12 sps:$4 sm:$0xff]  }
  0x2c   : > { %v2777_v0 = vld [vmem:[%s3069_s25 + $0x2d0] ss:$12 sps:$4 sm:$0xff]   ;;  %v2780_v2 = vld [vmem:[%s3069_s25 + $0x2ec] ss:$12 sps:$4 sm:$0xff]   ;;  %v2783_v4 = vld [vmem:[%s3069_s25 + $0x2e8] ss:$12 sps:$4 sm:$0xff]  }
  0x2d   : > { %1745 = vmatpush1.bf16.msra.mxu0 %v2722_v23  ;;  %v2790_v5 = vld [vmem:[%s3069_s25 + $0x304] ss:$12 sps:$4 sm:$0xff]   ;;  %v2788_v9 = vld [vmem:[%s3069_s25 + $0x300] ss:$12 sps:$4 sm:$0xff]   ;;  %v2796_v11 = vld [vmem:[%s3069_s25 + $0x31c] ss:$12 sps:$4 sm:$0xff]  }
  0x2e   : > { %1786 = vmatpush1.bf16.msra.mxu1 %v2723_v24  ;;  %1746 = vmatprep.subr.bf16.mxu0 %v2724_v25  ;;  %v2793_v6 = vld [vmem:[%s3069_s25 + $0x484] ss:$12 sps:$4 sm:$0xff]   ;;  %v2791_v10 = vld [vmem:[%s3069_s25 + $0x480] ss:$12 sps:$4 sm:$0xff]   ;;  %v2799_v12 = vld [vmem:[%s3069_s25 + $0x49c] ss:$12 sps:$4 sm:$0xff]  }
  0x2f   : > { %1787 = vmatprep.subr.bf16.mxu1 %v2726_v26  ;;  %v2794_v13 = vld [vmem:[%s3069_s25 + $0x318] ss:$12 sps:$4 sm:$0xff]   ;;  %v2802_v15 = vld [vmem:[%s3069_s25 + $0x334] ss:$12 sps:$4 sm:$0xff]   ;;  %v2800_v17 = vld [vmem:[%s3069_s25 + $0x330] ss:$12 sps:$4 sm:$0xff]  }
  0x30   : > { %v2797_v14 = vld [vmem:[%s3069_s25 + $0x498] ss:$12 sps:$4 sm:$0xff]   ;;  %v2805_v16 = vld [vmem:[%s3069_s25 + $0x4b4] ss:$12 sps:$4 sm:$0xff]   ;;  %v2803_v18 = vld [vmem:[%s3069_s25 + $0x4b0] ss:$12 sps:$4 sm:$0xff]  }
  0x31   : > { %1747 = vmatpush1.bf16.msra.mxu0 %v2728_v27  ;;  %v2808_v19 = vld [vmem:[%s3069_s25 + $0x34c] ss:$12 sps:$4 sm:$0xff]   ;;  %v2806_v21 = vld [vmem:[%s3069_s25 + $0x348] ss:$12 sps:$4 sm:$0xff]   ;;  %v2814_v23 = vld [vmem:[%s3069_s25 + $0x364] ss:$12 sps:$4 sm:$0xff]  }
  0x32   : > { %1788 = vmatpush1.bf16.msra.mxu1 %v2729_v28  ;;  %1748 = vmatprep.subr.bf16.mxu0 %v2730_v29  ;;  %v2811_v20 = vld [vmem:[%s3069_s25 + $0x4cc] ss:$12 sps:$4 sm:$0xff]   ;;  %v2809_v22 = vld [vmem:[%s3069_s25 + $0x4c8] ss:$12 sps:$4 sm:$0xff]   ;;  %v2817_v24 = vld [vmem:[%s3069_s25 + $0x4e4] ss:$12 sps:$4 sm:$0xff]  }
  0x33   : > { %1789 = vmatprep.subr.bf16.mxu1 %v2732_v30  ;;  %v2812_v25 = vld [vmem:[%s3069_s25 + $0x360] ss:$12 sps:$4 sm:$0xff]   ;;  %v2820_v27 = vld [vmem:[%s3069_s25 + $0x37c] ss:$12 sps:$4 sm:$0xff]   ;;  %v2818_v29 = vld [vmem:[%s3069_s25 + $0x378] ss:$12 sps:$4 sm:$0xff]  }
  0x34   : > { %v2815_v26 = vld [vmem:[%s3069_s25 + $0x4e0] ss:$12 sps:$4 sm:$0xff]   ;;  %v2823_v28 = vld [vmem:[%s3069_s25 + $0x4fc] ss:$12 sps:$4 sm:$0xff]   ;;  %v2821_v30 = vld [vmem:[%s3069_s25 + $0x4f8] ss:$12 sps:$4 sm:$0xff]  }
  0x35   : > { %1749 = vmatpush1.bf16.msra.mxu0 %v2734_v31  ;;  %v2826_v31 = vld [vmem:[%s3069_s25 + $0x394] ss:$12 sps:$4 sm:$0xff]   ;;  %v2844_v47 = vld [vmem:[%s3069_s25 + $0x3dc] ss:$12 sps:$4 sm:$0xff]  }
  0x36   : > { %1790 = vmatpush1.bf16.msra.mxu1 %v2735_v32  ;;  %1750 = vmatprep.subr.bf16.mxu0 %v2736_v33  ;;  %v2829_v32 = vld [vmem:[%s3069_s25 + $0x514] ss:$12 sps:$4 sm:$0xff]   ;;  %v2847_v49 = vld [vmem:[%s3069_s25 + $0x55c] ss:$12 sps:$4 sm:$0xff]  }
  0x37   : > { %1791 = vmatprep.subr.bf16.mxu1 %v2738_v34  ;;  %v3177_v33 = vld [vmem:[%s3064_s21 + $0x10] sm:$0xff] }
  0x38   : > { %v2824_v34 = vld [vmem:[%s3069_s25 + $0x390] ss:$12 sps:$4 sm:$0xff]  }
  0x39   : > { %1751 = vmatpush1.bf16.msra.mxu0 %v2740_v35  ;;  %v2827_v35 = vld [vmem:[%s3069_s25 + $0x510] ss:$12 sps:$4 sm:$0xff]  }
  0x3a   : > { %1792 = vmatpush1.bf16.msra.mxu1 %v2741_v36  ;;  %1752 = vmatprep.subr.bf16.mxu0 %v2742_v37  ;;  %v3183_v36 = vcombine.high %v3177_v33, %v3177_v33  ;;  %v3186_v37 = vld [vmem:[%s3064_s21 + $0x18] sm:$0xff] }
  0x3b   : > { %1793 = vmatprep.subr.bf16.mxu1 %v2744_v38  ;;  %v2832_v38 = vld [vmem:[%s3069_s25 + $0x3ac] ss:$12 sps:$4 sm:$0xff]  }
  0x3d   : > { %1753 = vmatpush1.bf16.msra.mxu0 %v2746_v39  ;;  %v3191_v39 = vcombine.high %v3186_v37, %v3186_v37 }
  0x3e   : > { %1794 = vmatpush1.bf16.msra.mxu1 %v2747_v40  ;;  %1754 = vmatprep.subr.bf16.mxu0 %v2748_v41  ;;  %v2835_v40 = vld [vmem:[%s3069_s25 + $0x52c] ss:$12 sps:$4 sm:$0xff]   ;;  %v2830_v41 = vld [vmem:[%s3069_s25 + $0x3a8] ss:$12 sps:$4 sm:$0xff]  }
  0x3f   : > { %1795 = vmatprep.subr.bf16.mxu1 %v2750_v42  ;;  %v2833_v42 = vld [vmem:[%s3069_s25 + $0x528] ss:$12 sps:$4 sm:$0xff]  }
  0x41   : > { %1755 = vmatpush1.bf16.msra.mxu0 %v2752_v43  ;;  %v2838_v43 = vld [vmem:[%s3069_s25 + $0x3c4] ss:$12 sps:$4 sm:$0xff]  }
  0x42   : > { %1796 = vmatpush1.bf16.msra.mxu1 %v2753_v44  ;;  %1756 = vmatprep.subr.bf16.mxu0 %v2754_v45  ;;  %v2841_v44 = vld [vmem:[%s3069_s25 + $0x544] ss:$12 sps:$4 sm:$0xff]   ;;  %v2836_v45 = vld [vmem:[%s3069_s25 + $0x3c0] ss:$12 sps:$4 sm:$0xff]  }
  0x43   : > { %1797 = vmatprep.subr.bf16.mxu1 %v2756_v46  ;;  %v2839_v46 = vld [vmem:[%s3069_s25 + $0x540] ss:$12 sps:$4 sm:$0xff]  }
  0x45   : > { %1757 = vmatpush1.bf16.msra.mxu0 %v2758_v50  ;;  %v2842_v50 = vld [vmem:[%s3069_s25 + $0x3d8] ss:$12 sps:$4 sm:$0xff]  }
  0x46   : > { %1798 = vmatpush1.bf16.msra.mxu1 %v2759_v51  ;;  %1758 = vmatprep.subr.bf16.mxu0 %v2760_v53  ;;  %v2845_v51 = vld [vmem:[%s3069_s25 + $0x558] ss:$12 sps:$4 sm:$0xff]   ;;  %v2850_v53 = vld [vmem:[%s3069_s25 + $0x3f4] ss:$12 sps:$4 sm:$0xff]  }
  0x47   : > { %1799 = vmatprep.subr.bf16.mxu1 %v2762_v54  ;;  %v2853_v54 = vld [vmem:[%s3069_s25 + $0x574] ss:$12 sps:$4 sm:$0xff]  }
  0x49   : > { %1759 = vmatpush1.bf16.msra.mxu0 %v2764_v55  ;;  %v2848_v55 = vld [vmem:[%s3069_s25 + $0x3f0] ss:$12 sps:$4 sm:$0xff]  }
  0x4a   : > { %1800 = vmatpush1.bf16.msra.mxu1 %v2765_v56  ;;  %1760 = vmatprep.subr.bf16.mxu0 %v2766_v57  ;;  %v2851_v56 = vld [vmem:[%s3069_s25 + $0x570] ss:$12 sps:$4 sm:$0xff]   ;;  %v2856_v57 = vld [vmem:[%s3069_s25 + $0x40c] ss:$12 sps:$4 sm:$0xff]  }
  0x4b   : > { %1801 = vmatprep.subr.bf16.mxu1 %v2768_v58  ;;  %v2859_v58 = vld [vmem:[%s3069_s25 + $0x58c] ss:$12 sps:$4 sm:$0xff]  }
  0x4d   : > { %1761 = vmatpush1.bf16.msra.mxu0 %v2770_v59  ;;  %v2854_v59 = vld [vmem:[%s3069_s25 + $0x408] ss:$12 sps:$4 sm:$0xff]  }
  0x4e   : > { %1802 = vmatpush1.bf16.msra.mxu1 %v2771_v60  ;;  %1762 = vmatprep.subr.bf16.mxu0 %v2772_v61  ;;  %v2857_v60 = vld [vmem:[%s3069_s25 + $0x588] ss:$12 sps:$4 sm:$0xff]   ;;  %v2862_v61 = vld [vmem:[%s3069_s25 + $0x424] ss:$12 sps:$4 sm:$0xff]  }
  0x4f   : > { %1803 = vmatprep.subr.bf16.mxu1 %v2774_v62  ;;  %v2865_v62 = vld [vmem:[%s3069_s25 + $0x5a4] ss:$12 sps:$4 sm:$0xff]  }
  0x51   : > { %1763 = vmatpush1.bf16.msra.mxu0 %v2776_v63  ;;  %v2860_v63 = vld [vmem:[%s3069_s25 + $0x420] ss:$12 sps:$4 sm:$0xff]  }
  0x52   : > { %1804 = vmatpush1.bf16.msra.mxu1 %v2777_v0  ;;  %1764 = vmatprep.subr.bf16.mxu0 %v2778_v1  ;;  %v2863_v0 = vld [vmem:[%s3069_s25 + $0x5a0] ss:$12 sps:$4 sm:$0xff]   ;;  %v2868_v1 = vld [vmem:[%s3069_s25 + $0x43c] ss:$12 sps:$4 sm:$0xff]  }
  0x53   : > { %1805 = vmatprep.subr.bf16.mxu1 %v2780_v2  ;;  %v2871_v2 = vld [vmem:[%s3069_s25 + $0x5bc] ss:$12 sps:$4 sm:$0xff]  }
  0x55   : > { %1765 = vmatpush1.bf16.msra.mxu0 %v2782_v3  ;;  %v2866_v3 = vld [vmem:[%s3069_s25 + $0x438] ss:$12 sps:$4 sm:$0xff]  }
  0x56   : > { %1806 = vmatpush1.bf16.msra.mxu1 %v2783_v4  ;;  %1816 = vmatprep.subr.bf16.mxu0 %v2790_v5  ;;  %v2869_v4 = vld [vmem:[%s3069_s25 + $0x5b8] ss:$12 sps:$4 sm:$0xff]   ;;  %v2874_v5 = vld [vmem:[%s3069_s25 + $0x454] ss:$12 sps:$4 sm:$0xff]  }
  0x57   : > { %1857 = vmatprep.subr.bf16.mxu1 %v2793_v6  ;;  %v2877_v6 = vld [vmem:[%s3069_s25 + $0x5d4] ss:$12 sps:$4 sm:$0xff]  }
  0x58   : > { %1767 = vmatmul.mubr.bf16.vlgmr.msra.gmra.mrb[0].mxu0 %v3146_v7 }
  0x59   : > { %1808 = vmatmul.mubr.bf16.vlgmr.msra.gmra.mrb[0].mxu1 %v3148_v8  ;;  %1817 = vmatpush1.bf16.msra.mxu0 %v2788_v9  ;;  %v2872_v9 = vld [vmem:[%s3069_s25 + $0x450] ss:$12 sps:$4 sm:$0xff]  }
  0x5a   : > { %1858 = vmatpush1.bf16.msra.mxu1 %v2791_v10  ;;  %1818 = vmatprep.subr.bf16.mxu0 %v2796_v11  ;;  %v2875_v10 = vld [vmem:[%s3069_s25 + $0x5d0] ss:$12 sps:$4 sm:$0xff]   ;;  %v2880_v11 = vld [vmem:[%s3069_s25 + $0x46c] ss:$12 sps:$4 sm:$0xff]  }
  0x5b   : > { %1859 = vmatprep.subr.bf16.mxu1 %v2799_v12  ;;  %1848 = vmatprep.mubr.bf16.mxu0 %v3183_v36  ;;  %v2883_v12 = vld [vmem:[%s3069_s25 + $0x5ec] ss:$12 sps:$4 sm:$0xff]  }
  0x5c   : > { %1889 = vmatprep.mubr.bf16.mxu1 %v3191_v39 }
  0x5d   : > { %1819 = vmatpush1.bf16.msra.mxu0 %v2794_v13  ;;  %v2878_v13 = vld [vmem:[%s3069_s25 + $0x468] ss:$12 sps:$4 sm:$0xff]  }
  0x5e   : > { %1860 = vmatpush1.bf16.msra.mxu1 %v2797_v14  ;;  %1820 = vmatprep.subr.bf16.mxu0 %v2802_v15  ;;  %v2881_v14 = vld [vmem:[%s3069_s25 + $0x5e8] ss:$12 sps:$4 sm:$0xff]   ;;  %v2888_v15 = vld [vmem:[%s3069_s25 + $0x604] ss:$12 sps:$4 sm:$0xff]  }
  0x5f   : > { %1861 = vmatprep.subr.bf16.mxu1 %v2805_v16  ;;  %v2891_v16 = vld [vmem:[%s3069_s25 + $0xc8] ss:$12 sps:$4 sm:$0xff]  }
  0x61   : > { %1821 = vmatpush1.bf16.msra.mxu0 %v2800_v17  ;;  %v2886_v17 = vld [vmem:[%s3069_s25 + $0x600] ss:$12 sps:$4 sm:$0xff]  }
  0x62   : > { %1862 = vmatpush1.bf16.msra.mxu1 %v2803_v18  ;;  %1822 = vmatprep.subr.bf16.mxu0 %v2808_v19  ;;  %v3235_v18 = vcombine.low %v3177_v33, %v3177_v33  ;;  %v3239_v19 = vcombine.low %v3186_v37, %v3186_v37  ;;  %v2907_v33 = vld [vmem:[%s3069_s25 + $0x50] ss:$12 sps:$4 sm:$0xff]   ;;  %v2912_v37 = vld [vmem:[%s3069_s25 + $0x68] ss:$12 sps:$4 sm:$0xff]  }
  0x63   : > { %1863 = vmatprep.subr.bf16.mxu1 %v2811_v20  ;;  %v2892_v20 = vld [vmem:[%s3069_s25 + $0x8] ss:$12 sps:$4 sm:$0xff]  }
  0x65   : > { %1823 = vmatpush1.bf16.msra.mxu0 %v2806_v21  ;;  %v2895_v21 = vld [vmem:[%s3069_s25 + $0x61c] ss:$12 sps:$4 sm:$0xff]  }
  0x66   : > { %1864 = vmatpush1.bf16.msra.mxu1 %v2809_v22  ;;  %1824 = vmatprep.subr.bf16.mxu0 %v2814_v23  ;;  %v2896_v22 = vld [vmem:[%s3069_s25 + $0xe0] ss:$12 sps:$4 sm:$0xff]   ;;  %v2893_v23 = vld [vmem:[%s3069_s25 + $0x618] ss:$12 sps:$4 sm:$0xff]  }
  0x67   : > { %1865 = vmatprep.subr.bf16.mxu1 %v2817_v24  ;;  %v2897_v24 = vld [vmem:[%s3069_s25 + $0x20] ss:$12 sps:$4 sm:$0xff]  }
  0x69   : > { %1825 = vmatpush1.bf16.msra.mxu0 %v2812_v25  ;;  %v2900_v25 = vld [vmem:[%s3069_s25 + $0x634] ss:$12 sps:$4 sm:$0xff]  }
  0x6a   : > { %1866 = vmatpush1.bf16.msra.mxu1 %v2815_v26  ;;  %1826 = vmatprep.subr.bf16.mxu0 %v2820_v27  ;;  %v2901_v26 = vld [vmem:[%s3069_s25 + $0xf8] ss:$12 sps:$4 sm:$0xff]   ;;  %v2898_v27 = vld [vmem:[%s3069_s25 + $0x630] ss:$12 sps:$4 sm:$0xff]  }
  0x6b   : > { %1867 = vmatprep.subr.bf16.mxu1 %v2823_v28  ;;  %v3016_v28 = vmov 0  }
  0x6d   : > { %1827 = vmatpush1.bf16.msra.mxu0 %v2818_v29  ;;  %v2902_v29 = vld [vmem:[%s3069_s25 + $0x38] ss:$12 sps:$4 sm:$0xff]  }
  0x6e   : > { %1868 = vmatpush1.bf16.msra.mxu1 %v2821_v30  ;;  %1828 = vmatprep.subr.bf16.mxu0 %v2826_v31  ;;  %v2905_v30 = vld [vmem:[%s3069_s25 + $0x64c] ss:$12 sps:$4 sm:$0xff]   ;;  %v2906_v31 = vld [vmem:[%s3069_s25 + $0x110] ss:$12 sps:$4 sm:$0xff]  }
  0x6f   : > { %1869 = vmatprep.subr.bf16.mxu1 %v2829_v32  ;;  %v2903_v32 = vld [vmem:[%s3069_s25 + $0x648] ss:$12 sps:$4 sm:$0xff]  }
  0x71   : > { %1829 = vmatpush1.bf16.msra.mxu0 %v2824_v34  ;;  %v2910_v34 = vld [vmem:[%s3069_s25 + $0x664] ss:$12 sps:$4 sm:$0xff]  }
  0x72   : > { %1870 = vmatpush1.bf16.msra.mxu1 %v2827_v35  ;;  %1830 = vmatprep.subr.bf16.mxu0 %v2832_v38  ;;  %v2908_v35 = vld [vmem:[%s3069_s25 + $0x660] ss:$12 sps:$4 sm:$0xff]   ;;  %v2915_v38 = vld [vmem:[%s3069_s25 + $0x67c] ss:$12 sps:$4 sm:$0xff]  }
  0x73   : > { %1871 = vmatprep.subr.bf16.mxu1 %v2835_v40  ;;  %v2916_v40 = vld [vmem:[%s3069_s25 + $0x140] ss:$12 sps:$4 sm:$0xff]  }
  0x75   : > { %1831 = vmatpush1.bf16.msra.mxu0 %v2830_v41  ;;  %v2913_v41 = vld [vmem:[%s3069_s25 + $0x678] ss:$12 sps:$4 sm:$0xff]  }
  0x76   : > { %1872 = vmatpush1.bf16.msra.mxu1 %v2833_v42  ;;  %1832 = vmatprep.subr.bf16.mxu0 %v2838_v43  ;;  %v2917_v42 = vld [vmem:[%s3069_s25 + $0x80] ss:$12 sps:$4 sm:$0xff]  }
  0x77   : > { %1873 = vmatprep.subr.bf16.mxu1 %v2841_v44  ;;  %v2920_v43 = vld [vmem:[%s3069_s25 + $0x694] ss:$12 sps:$4 sm:$0xff]   ;;  %v2921_v44 = vld [vmem:[%s3069_s25 + $0x158] ss:$12 sps:$4 sm:$0xff]  }
  0x79   : > { %1833 = vmatpush1.bf16.msra.mxu0 %v2836_v45  ;;  %v2918_v45 = vld [vmem:[%s3069_s25 + $0x690] ss:$12 sps:$4 sm:$0xff]  }
  0x7a   : > { %1874 = vmatpush1.bf16.msra.mxu1 %v2839_v46  ;;  %1834 = vmatprep.subr.bf16.mxu0 %v2844_v47  ;;  %v2922_v46 = vld [vmem:[%s3069_s25 + $0x98] ss:$12 sps:$4 sm:$0xff]  }
  0x7b   : > { %1875 = vmatprep.subr.bf16.mxu1 %v2847_v49  ;;  %v2925_v47 = vld [vmem:[%s3069_s25 + $0x6ac] ss:$12 sps:$4 sm:$0xff]   ;;  %v2926_v49 = vld [vmem:[%s3069_s25 + $0x170] ss:$12 sps:$4 sm:$0xff]  }
  0x7d   : > { %1835 = vmatpush1.bf16.msra.mxu0 %v2842_v50  ;;  %v2923_v50 = vld [vmem:[%s3069_s25 + $0x6a8] ss:$12 sps:$4 sm:$0xff]  }
  0x7e   : > { %1876 = vmatpush1.bf16.msra.mxu1 %v2845_v51  ;;  %1836 = vmatprep.subr.bf16.mxu0 %v2850_v53  ;;  %v2927_v51 = vld [vmem:[%s3069_s25 + $0xb0] ss:$12 sps:$4 sm:$0xff]   ;;  %v2929_v53 = vld [vmem:[%s3069_s25 + $0x248] ss:$12 sps:$4 sm:$0xff]  }
  0x7f   : > { %1877 = vmatprep.subr.bf16.mxu1 %v2853_v54  ;;  %v3275_v54 = vld [vmem:[%s3064_s21 + $0x20] ss:$0 sps:$4 sm:$0xff]  }
  0x81   : > { %1837 = vmatpush1.bf16.msra.mxu0 %v2848_v55  ;;  %v2931_v55 = vld [vmem:[%s3069_s25 + $0x3c8] ss:$12 sps:$4 sm:$0xff]  }
  0x82   : > { %1878 = vmatpush1.bf16.msra.mxu1 %v2851_v56  ;;  %1838 = vmatprep.subr.bf16.mxu0 %v2856_v57  ;;  %v2930_v56 = vld [vmem:[%s3069_s25 + $0x188] ss:$12 sps:$4 sm:$0xff]  }
  0x83   : > { %1879 = vmatprep.subr.bf16.mxu1 %v2859_v58  ;;  %v2932_v57 = vld [vmem:[%s3069_s25 + $0x308] ss:$12 sps:$4 sm:$0xff]   ;;  %v2933_v58 = vld [vmem:[%s3069_s25 + $0x260] ss:$12 sps:$4 sm:$0xff]  }
  0x85   : > { %1839 = vmatpush1.bf16.msra.mxu0 %v2854_v59  ;;  %v2935_v59 = vld [vmem:[%s3069_s25 + $0x3e0] ss:$12 sps:$4 sm:$0xff]  }
  0x86   : > { %1880 = vmatpush1.bf16.msra.mxu1 %v2857_v60  ;;  %1840 = vmatprep.subr.bf16.mxu0 %v2862_v61  ;;  %v2934_v60 = vld [vmem:[%s3069_s25 + $0x1a0] ss:$12 sps:$4 sm:$0xff]  }
  0x87   : > { %1881 = vmatprep.subr.bf16.mxu1 %v2865_v62  ;;  %v2936_v61 = vld [vmem:[%s3069_s25 + $0x320] ss:$12 sps:$4 sm:$0xff]   ;;  %v2937_v62 = vld [vmem:[%s3069_s25 + $0x278] ss:$12 sps:$4 sm:$0xff]  }
  0x89   : > { %1841 = vmatpush1.bf16.msra.mxu0 %v2860_v63  ;;  %v2939_v63 = vld [vmem:[%s3069_s25 + $0x3f8] ss:$12 sps:$4 sm:$0xff]  }
  0x8a   : > { %1882 = vmatpush1.bf16.msra.mxu1 %v2863_v0  ;;  %1842 = vmatprep.subr.bf16.mxu0 %v2868_v1  ;;  %v2938_v0 = vld [vmem:[%s3069_s25 + $0x1b8] ss:$12 sps:$4 sm:$0xff]  }
  0x8b   : > { %1883 = vmatprep.subr.bf16.mxu1 %v2871_v2  ;;  %v2940_v1 = vld [vmem:[%s3069_s25 + $0x338] ss:$12 sps:$4 sm:$0xff]   ;;  %v2943_v2 = vld [vmem:[%s3069_s25 + $0x410] ss:$12 sps:$4 sm:$0xff]  }
  0x8d   : > { %1843 = vmatpush1.bf16.msra.mxu0 %v2866_v3  ;;  %v2942_v3 = vld [vmem:[%s3069_s25 + $0x1d0] ss:$12 sps:$4 sm:$0xff]  }
  0x8e   : > { %1884 = vmatpush1.bf16.msra.mxu1 %v2869_v4  ;;  %1844 = vmatprep.subr.bf16.mxu0 %v2874_v5  ;;  %v2944_v4 = vld [vmem:[%s3069_s25 + $0x350] ss:$12 sps:$4 sm:$0xff]   ;;  %v2946_v5 = vld [vmem:[%s3069_s25 + $0x1e8] ss:$12 sps:$4 sm:$0xff]  }
  0x8f   : > { %1885 = vmatprep.subr.bf16.mxu1 %v2877_v6  ;;  %v2948_v6 = vld [vmem:[%s3069_s25 + $0x368] ss:$12 sps:$4 sm:$0xff]  }
  0x91   : > { %1845 = vmatpush1.bf16.msra.mxu0 %v2872_v9  ;;  %v2949_v9 = vld [vmem:[%s3069_s25 + $0x2c0] ss:$12 sps:$4 sm:$0xff]  }
  0x92   : > { %1886 = vmatpush1.bf16.msra.mxu1 %v2875_v10  ;;  %1846 = vmatprep.subr.bf16.mxu0 %v2880_v11  ;;  %v2951_v10 = vld [vmem:[%s3069_s25 + $0x440] ss:$12 sps:$4 sm:$0xff]  }
  0x93   : > { %1887 = vmatprep.subr.bf16.mxu1 %v2883_v12  ;;  %v2950_v11 = vld [vmem:[%s3069_s25 + $0x200] ss:$12 sps:$4 sm:$0xff]  }
  0x94   : > { %v2952_v12 = vld [vmem:[%s3069_s25 + $0x380] ss:$12 sps:$4 sm:$0xff]  }
  0x95   : > { %1847 = vmatpush1.bf16.msra.mxu0 %v2878_v13  ;;  %v2953_v13 = vld [vmem:[%s3069_s25 + $0x2d8] ss:$12 sps:$4 sm:$0xff]  }
  0x96   : > { %1888 = vmatpush1.bf16.msra.mxu1 %v2881_v14  ;;  %1898 = vmatprep.subr.bf16.mxu0 %v2888_v15  ;;  %v2955_v14 = vld [vmem:[%s3069_s25 + $0x458] ss:$12 sps:$4 sm:$0xff]  }
  0x97   : > { %2542 = vmatprep.subr.bf16.mxu1 %v2891_v16  ;;  %v2954_v15 = vld [vmem:[%s3069_s25 + $0x218] ss:$12 sps:$4 sm:$0xff]  }
  0x98   : > { %1849 = vmatmul.mubr.bf16.vlgmr.msra.gmra.mrb[4].mxu0 %v3235_v18  ;;  %v2956_v16 = vld [vmem:[%s3069_s25 + $0x398] ss:$12 sps:$4 sm:$0xff]  }
  0x99   : > { %1890 = vmatmul.mubr.bf16.vlgmr.msra.gmra.mrb[4].mxu1 %v3239_v19  ;;  %1899 = vmatpush1.bf16.msra.mxu0 %v2886_v17  ;;  %v2957_v17 = vld [vmem:[%s3069_s25 + $0x2f0] ss:$12 sps:$4 sm:$0xff]  }
  0x9a   : > { %2543 = vmatpush3.bf16.msra.mxu1 %v2892_v20  ;;  %1900 = vmatprep.subr.bf16.mxu0 %v2895_v21  ;;  %v2959_v20 = vld [vmem:[%s3069_s25 + $0x470] ss:$12 sps:$4 sm:$0xff]  }
  0x9b   : > { %2544 = vmatprep.subr.bf16.mxu1 %v2896_v22  ;;  %1930 = vmatprep.mubr.bf16.mxu0 %v3016_v28  ;;  %v2958_v21 = vld [vmem:[%s3069_s25 + $0x230] ss:$12 sps:$4 sm:$0xff]   ;;  %v2965_v28 = vld [vmem:[%s3069_s25 + $0x4a0] ss:$12 sps:$4 sm:$0xff]  }
  0x9c   : > { %1971 = vmatprep.mubr.bf16.mxu1 %v3119_v48  ;;  %v2911_v48 = vld [vmem:[%s3069_s25 + $0x128] ss:$12 sps:$4 sm:$0xff]   ;;  %v2960_v22 = vld [vmem:[%s3069_s25 + $0x3b0] ss:$12 sps:$4 sm:$0xff]  }
  0x9d   : > { %1901 = vmatpush1.bf16.msra.mxu0 %v2893_v23  ;;  %v2961_v23 = vld [vmem:[%s3069_s25 + $0x548] ss:$12 sps:$4 sm:$0xff]  }
  0x9e   : > { %2545 = vmatpush3.bf16.msra.mxu1 %v2897_v24  ;;  %1902 = vmatprep.subr.bf16.mxu0 %v2900_v25  ;;  %v2962_v24 = vld [vmem:[%s3069_s25 + $0x488] ss:$12 sps:$4 sm:$0xff]  }
  0x9f   : > { %2546 = vmatprep.subr.bf16.mxu1 %v2901_v26  ;;  %v2963_v25 = vld [vmem:[%s3069_s25 + $0x608] ss:$12 sps:$4 sm:$0xff]   ;;  %v3017_v26 = vmov 0.0  }
  0xa1   : > { %1903 = vmatpush1.bf16.msra.mxu0 %v2898_v27  ;;  %v2964_v27 = vld [vmem:[%s3069_s25 + $0x560] ss:$12 sps:$4 sm:$0xff]  }
  0xa2   : > { %2547 = vmatpush3.bf16.msra.mxu1 %v2902_v29  ;;  %1904 = vmatprep.subr.bf16.mxu0 %v2905_v30  ;;  %v2966_v29 = vld [vmem:[%s3069_s25 + $0x620] ss:$12 sps:$4 sm:$0xff]   ;;  %v2967_v30 = vld [vmem:[%s3069_s25 + $0x578] ss:$12 sps:$4 sm:$0xff]  }
  0xa3   : > { %2548 = vmatprep.subr.bf16.mxu1 %v2906_v31  ;;  %v2970_v31 = vld [vmem:[%s3069_s25 + $0x590] ss:$12 sps:$4 sm:$0xff]  }
  0xa5   : > { %1905 = vmatpush1.bf16.msra.mxu0 %v2903_v32  ;;  %v2971_v32 = vld [vmem:[%s3069_s25 + $0x4d0] ss:$12 sps:$4 sm:$0xff]  }
  0xa6   : > { %2549 = vmatpush3.bf16.msra.mxu1 %v2907_v33  ;;  %1906 = vmatprep.subr.bf16.mxu0 %v2910_v34  ;;  %v2972_v33 = vld [vmem:[%s3069_s25 + $0x650] ss:$12 sps:$4 sm:$0xff]   ;;  %v2974_v34 = vld [vmem:[%s3069_s25 + $0x4e8] ss:$12 sps:$4 sm:$0xff]  }
  0xa7   : > { %2550 = vmatprep.subr.bf16.mxu1 %v2911_v48  ;;  %v2975_v48 = vld [vmem:[%s3069_s25 + $0x668] ss:$12 sps:$4 sm:$0xff]  }
  0xa9   : > { %1907 = vmatpush1.bf16.msra.mxu0 %v2908_v35  ;;  %v2976_v35 = vld [vmem:[%s3069_s25 + $0x5c0] ss:$12 sps:$4 sm:$0xff]  }
  0xaa   : > { %2551 = vmatpush3.bf16.msra.mxu1 %v2912_v37  ;;  %1908 = vmatprep.subr.bf16.mxu0 %v2915_v38  ;;  %v2977_v37 = vld [vmem:[%s3069_s25 + $0x500] ss:$12 sps:$4 sm:$0xff]  }
  0xab   : > { %2552 = vmatprep.subr.bf16.mxu1 %v2916_v40  ;;  %v2978_v38 = vld [vmem:[%s3069_s25 + $0x680] ss:$12 sps:$4 sm:$0xff]   ;;  %v2979_v40 = vld [vmem:[%s3069_s25 + $0x5d8] ss:$12 sps:$4 sm:$0xff]  }
  0xad   : > { %1909 = vmatpush1.bf16.msra.mxu0 %v2913_v41  ;;  %v2980_v41 = vld [vmem:[%s3069_s25 + $0x518] ss:$12 sps:$4 sm:$0xff]  }
  0xae   : > { %2553 = vmatpush3.bf16.msra.mxu1 %v2917_v42  ;;  %1910 = vmatprep.subr.bf16.mxu0 %v2920_v43  ;;  %v2981_v42 = vld [vmem:[%s3069_s25 + $0x698] ss:$12 sps:$4 sm:$0xff]   ;;  %v2982_v43 = vld [vmem:[%s3069_s25 + $0x5f0] ss:$12 sps:$4 sm:$0xff]  }
  0xaf   : > { %2554 = vmatprep.subr.bf16.mxu1 %v2921_v44  ;;  %v2983_v44 = vld [vmem:[%s3069_s25 + $0x530] ss:$12 sps:$4 sm:$0xff]  }
  0xb1   : > { %1911 = vmatpush1.bf16.msra.mxu0 %v2918_v45  ;;  %v2984_v45 = vld [vmem:[%s3069_s25 + $0x6b0] ss:$12 sps:$4 sm:$0xff]  }
  0xb2   : > { %2555 = vmatpush3.bf16.msra.mxu1 %v2922_v46  ;;  %1912 = vmatprep.subr.bf16.mxu0 %v2925_v47 }
  0xb3   : > { %2556 = vmatprep.subr.bf16.mxu1 %v2926_v49 }
  0xb5   : > { %1913 = vmatpush1.bf16.msra.mxu0 %v2923_v50 }
  0xb6   : > { %2557 = vmatpush3.bf16.msra.mxu1 %v2927_v51  ;;  %2564 = vmatprep.subr.bf16.mxu0 %v2929_v53 }
  0xb7   : > { %2586 = vmatprep.subr.bf16.mxu1 %v2931_v55 }
  0xb8   : > { %1931 = vmatmul.mubr.bf16.vlgmr.msra.gmra.mrb[8].mxu0 %v3275_v54 }
  0xb9   : > { %1972 = vmatmul.mubr.bf16.vlgmr.msra.gmra.mrb[8].mxu1 %v3146_v7  ;;  %2565 = vmatpush3.bf16.msra.mxu0 %v2930_v56  ;;  %v2941_v7 = vld [vmem:[%s3069_s25 + $0x290] ss:$12 sps:$4 sm:$0xff]  }
  0xba   : > { %2587 = vmatpush3.bf16.msra.mxu1 %v2932_v57  ;;  %2566 = vmatprep.subr.bf16.mxu0 %v2933_v58 }
  0xbb   : > { %2588 = vmatprep.subr.bf16.mxu1 %v2935_v59  ;;  %2011 = vmatprep.mubr.bf16.mxu0 %v3124_v52  ;;  %v2945_v52 = vld [vmem:[%s3069_s25 + $0x2a8] ss:$12 sps:$4 sm:$0xff]  }
  0xbc   : > { %2051 = vmatprep.mubr.bf16.mxu1 %v3183_v36  ;;  %v2947_v36 = vld [vmem:[%s3069_s25 + $0x428] ss:$12 sps:$4 sm:$0xff]  }
  0xbd   : > { %2567 = vmatpush3.bf16.msra.mxu0 %v2934_v60 }
  0xbe   : > { %2589 = vmatpush3.bf16.msra.mxu1 %v2936_v61  ;;  %2568 = vmatprep.subr.bf16.mxu0 %v2937_v62 }
  0xbf   : > { %2590 = vmatprep.subr.bf16.mxu1 %v2939_v63 }
  0xc1   : > { %2569 = vmatpush3.bf16.msra.mxu0 %v2938_v0 }
  0xc2   : > { %2591 = vmatpush3.bf16.msra.mxu1 %v2940_v1  ;;  %2570 = vmatprep.subr.bf16.mxu0 %v2941_v7 }
  0xc3   : > { %2592 = vmatprep.subr.bf16.mxu1 %v2943_v2 }
  0xc5   : > { %2571 = vmatpush3.bf16.msra.mxu0 %v2942_v3 }
  0xc6   : > { %2593 = vmatpush3.bf16.msra.mxu1 %v2944_v4  ;;  %2572 = vmatprep.subr.bf16.mxu0 %v2945_v52  ;;  %v254_v4 = vld [vmem:[#allocation2] sm:$0xff] }
  0xc7   : > { %2594 = vmatprep.subr.bf16.mxu1 %v2947_v36 }
  0xc9   : > { %2573 = vmatpush3.bf16.msra.mxu0 %v2946_v5 }
  0xca   : > { %2595 = vmatpush3.bf16.msra.mxu1 %v2948_v6  ;;  %2574 = vmatprep.subr.bf16.mxu0 %v2949_v9  ;;  %v255_v6 = vld [vmem:[#allocation2 + $0x8] sm:$0xff] }
  0xcb   : > { %2596 = vmatprep.subr.bf16.mxu1 %v2951_v10 }
  0xcd   : > { %2575 = vmatpush3.bf16.msra.mxu0 %v2950_v11 }
  0xce   : > { %2597 = vmatpush3.bf16.msra.mxu1 %v2952_v12  ;;  %2576 = vmatprep.subr.bf16.mxu0 %v2953_v13 }
  0xcf   : > { %2598 = vmatprep.subr.bf16.mxu1 %v2955_v14 }
  0xd1   : > { %2577 = vmatpush3.bf16.msra.mxu0 %v2954_v15 }
  0xd2   : > { %2599 = vmatpush3.bf16.msra.mxu1 %v2956_v16  ;;  %2578 = vmatprep.subr.bf16.mxu0 %v2957_v17 }
  0xd3   : > { %2600 = vmatprep.subr.bf16.mxu1 %v2959_v20 }
  0xd5   : > { %2579 = vmatpush3.bf16.msra.mxu0 %v2958_v21 }
  0xd6   : > { %2601 = vmatpush3.bf16.msra.mxu1 %v2960_v22  ;;  %2608 = vmatprep.subr.bf16.mxu0 %v2961_v23 }
  0xd7   : > { %2639 = vmatprep.subr.bf16.mxu1 %v3017_v26 }
  0xd8   : > { %2012 = vmatmul.mubr.bf16.vlgmr.msra.gmra.mrb[12].mxu0 %v3148_v8  ;;  %v2968_v8 = vld [vmem:[%s3069_s25 + $0x4b8] ss:$12 sps:$4 sm:$0xff]  }
  0xd9   : > { %2052 = vmatmul.mubr.bf16.vlgmr.msra.gmra.mrb[12].mxu1 %v3235_v18  ;;  %2609 = vmatpush3.bf16.msra.mxu0 %v2962_v24  ;;  %v2969_v18 = vld [vmem:[%s3069_s25 + $0x638] ss:$12 sps:$4 sm:$0xff]  }
  0xda   : > { %2640 = vmatpush3.bf16.msra.mxu1 %v2963_v25  ;;  %2610 = vmatprep.subr.bf16.mxu0 %v2964_v27 }
  0xdb   : > { %2641 = vmatprep.subr.bf16.mxu1 %v3017_v26  ;;  %2091 = vmatprep.mubr.bf16.mxu0 %v3191_v39  ;;  %v2973_v39 = vld [vmem:[%s3069_s25 + $0x5a8] ss:$12 sps:$4 sm:$0xff]  }
  0xdc   : > { %2655 = vmatprep.mubr.msk.bf16.mxu1 %vm3018_vm0, %v3017_v26 }
  0xdd   : > { %2611 = vmatpush3.bf16.msra.mxu0 %v2965_v28 }
  0xde   : > { %2642 = vmatpush3.bf16.msra.mxu1 %v2966_v29  ;;  %2612 = vmatprep.subr.bf16.mxu0 %v2967_v30 }
  0xdf   : > { %2643 = vmatprep.subr.bf16.mxu1 %v3017_v26 }
  0xe1   : > { %2613 = vmatpush3.bf16.msra.mxu0 %v2968_v8 }
  0xe2   : > { %2644 = vmatpush3.bf16.msra.mxu1 %v2969_v18  ;;  %2614 = vmatprep.subr.bf16.mxu0 %v2970_v31 }
  0xe3   : > { %2645 = vmatprep.subr.bf16.mxu1 %v3017_v26 }
  0xe5   : > { %2615 = vmatpush3.bf16.msra.mxu0 %v2971_v32 }
  0xe6   : > { %2646 = vmatpush3.bf16.msra.mxu1 %v2972_v33  ;;  %2616 = vmatprep.subr.bf16.mxu0 %v2973_v39 }
  0xe7   : > { %2647 = vmatprep.subr.bf16.mxu1 %v3017_v26 }
  0xe9   : > { %2617 = vmatpush3.bf16.msra.mxu0 %v2974_v34 }
  0xea   : > { %2648 = vmatpush3.bf16.msra.mxu1 %v2975_v48  ;;  %2618 = vmatprep.subr.bf16.mxu0 %v2976_v35 }
  0xeb   : > { %2649 = vmatprep.subr.bf16.mxu1 %v3017_v26 }
  0xed   : > { %2619 = vmatpush3.bf16.msra.mxu0 %v2977_v37 }
  0xee   : > { %2650 = vmatpush3.bf16.msra.mxu1 %v2978_v38  ;;  %2620 = vmatprep.subr.bf16.mxu0 %v2979_v40 }
  0xef   : > { %2651 = vmatprep.subr.bf16.mxu1 %v3017_v26 }
  0xf1   : > { %2621 = vmatpush3.bf16.msra.mxu0 %v2980_v41  ;;  %v256_v41 = vld [vmem:[#allocation2 + $0x10] sm:$0xff] }
  0xf2   : > { %2652 = vmatpush3.bf16.msra.mxu1 %v2981_v42  ;;  %2622 = vmatprep.subr.bf16.mxu0 %v2982_v43 }
  0xf3   : > { %2653 = vmatprep.subr.bf16.mxu1 %v3017_v26 }
  0xf5   : > { %2623 = vmatpush3.bf16.msra.mxu0 %v2983_v44  ;;  %v2154_v44 = vlaneseq (!%p2530_p7) }
  0xf6   : > { %2654 = vmatpush3.bf16.msra.mxu1 %v2984_v45 }
  0xf7   : > { %v2155_v45 = vshrl.u32 (!%p2530_p7), %v2154_v44, 7 }
  0xf8   : > { %2092 = vmatmul.mubr.bf16.vlgmr.msra.gmra.mrb[16].mxu0 %v3239_v19 }
  0xf9   : > { %2656 = vmatmul.mubr.bf16.vlgmr.msra.gmra.mrb[16].mxu1 %v3275_v54 }
 0x12b   : > { %v1768_v46 = vpop.f32.mrb[0].mxu0 }
 0x12c   : > { %v1809_v47 = vpop.f32.mrb[0].mxu1  ;;  %v1770_v50 = vpop.f32.mrb[1].mxu0 }
 0x12d   : > { %v1810_v49 = vadd.f32 %v1809_v47, %v1768_v46  ;;  %v1811_v51 = vpop.f32.mrb[1].mxu1  ;;  %v1772_v55 = vpop.f32.mrb[2].mxu0  ;;  %v2152_v46 = vld [vmem:[%s3362_s2] sm:$0x7] (!%p2530_p7)  ;;  %v2156_v47 = vsub.s32 (!%p2530_p7), 0, %v2155_v45 }
 0x12e   : > { %v1812_v53 = vadd.f32 %v1811_v51, %v1770_v50  ;;  %v1813_v56 = vpop.f32.mrb[2].mxu1  ;;  %v1773_v57 = vpop.f32.mrb[3].mxu0  ;;  %v2164_v50 = vsub.s32 (!%p2530_p7), 2, %v2155_v45 }
 0x12f   : > { %v1814_v58 = vpop.f32.mrb[3].mxu1  ;;  %v2157_v56 = vrot.slane (!%p2530_p7), %v2152_v46, %v2156_v47 }
 0x130   : > { %v2165_v58 = vrot.slane (!%p2530_p7), %v2152_v46, %v2164_v50 }
 0x16b   : > { %v1850_v59 = vpop.f32.mrb[4].mxu0 }
 0x16c   : > { %v1891_v60 = vpop.f32.mrb[4].mxu1  ;;  %v1851_v61 = vadd.f32 %v1850_v59, %v1810_v49  ;;  %v1852_v62 = vpop.f32.mrb[5].mxu0  ;;  %v2160_v49 = vsub.s32 (!%p2530_p7), 1, %v2155_v45 }
 0x16d   : > { %v1893_v63 = vpop.f32.mrb[5].mxu1  ;;  %v1853_v0 = vadd.f32 %v1852_v62, %v1812_v53  ;;  %v1854_v1 = vpop.f32.mrb[6].mxu0 }
 0x16e   : > { %v1895_v19 = vpop.f32.mrb[6].mxu1  ;;  %v1892_v7 = vadd.f32 %v1891_v60, %v1851_v61  ;;  %v1855_v54 = vpop.f32.mrb[7].mxu0  ;;  %v2161_v57 = vrot.slane (!%p2530_p7), %v2152_v46, %v2160_v49 }
 0x16f   : > { %v1896_v2 = vpop.f32.mrb[7].mxu1  ;;  %v1894_v3 = vadd.f32 %v1893_v63, %v1853_v0 }
 0x18b   : > { %v1932_v52 = vpop.f32.mrb[8].mxu0 }
 0x18c   : > { %v2558_v36 = vpop.f32.mrb[8].mxu1  ;;  %v1933_v5 = vadd.f32 %v1932_v52, %v1892_v7  ;;  %v1934_v9 = vpop.f32.mrb[9].mxu0 }
 0x18d   : > { %v2559_v10 = vpop.f32.mrb[9].mxu1  ;;  %v1935_v11 = vadd.f32 %v1934_v9, %v1894_v3  ;;  %v1936_v12 = vpop.f32.mrb[10].mxu0 }
 0x18e   : > { %v2560_v13 = vadd.f32 %v2559_v10, %v2558_v36  ;;  %v2561_v14 = vpop.f32.mrb[10].mxu1  ;;  %v2139_v15 = vadd.f32 %v1933_v5, %v254_v4  ;;  %v1937_v16 = vpop.f32.mrb[11].mxu0 }
 0x18f   : > { %v2562_v17 = vpop.f32.mrb[11].mxu1  ;;  %v2140_v20 = vadd.f32 %v1935_v11, %v255_v6 }
 0x190   : > { %2142 = vst [vmem:[#allocation2] sm:$0xff] %v2139_v15 }
 0x191   : > { %2143 = vst [vmem:[#allocation2 + $0x8] sm:$0xff] %v2140_v20 }
 0x197   : > { %v2149_v51 = vld [vmem:[#allocation2] sm:$0xff] (!%p2530_p7) }
 0x198   : > { %v2150_v53 = vld [vmem:[#allocation2 + $0x8] sm:$0xff] (!%p2530_p7)  ;;  %v2169_v59 = vadd.f32 (!%p2530_p7), %v2157_v56, %v2149_v51 }
 0x199   : > { %v2170_v60 = vadd.f32 (!%p2530_p7), %v2161_v57, %v2150_v53 }
 0x19a   : > { %v2175_v62 = vmin.f32 (!%p2530_p7), %v2169_v59, 0.0  ;;  %vm2172_vm1 = vcmp.gt.f32.partialorder (!%p2530_p7), %v2169_v59, 0.0 }
 0x19b   : > { %v2176_v63 = vmin.f32 (!%p2530_p7), %v2170_v60, 0.0  ;;  %vm2173_vm2 = vcmp.gt.f32.partialorder (!%p2530_p7), %v2170_v60, 0.0 }
 0x19c   : > { %v2178_v1 = vmul.f32 (!%p2530_p7), 1.442695, %v2175_v62 }
 0x19d   : > { %v2180_v19 = vmul.f32 (!%p2530_p7), 1.442695, %v2176_v63 }
 0x19e   : > { %2985 = vpow2.f32 (!%p2530_p7), %v2178_v1 }
 0x19f   : > { %2987 = vpow2.f32 (!%p2530_p7), %v2180_v19 }
 0x1a8   : > { %v2986_v54 = vpop.eup (!%p2530_p7), %2985 }
 0x1a9   : > { %v2988_v2 = vpop.eup (!%p2530_p7), %2987  ;;  %v2531_v3 = vadd.f32 (!%p2530_p7), -1.0, %v2986_v54 }
 0x1aa   : > { %v2532_v52 = vadd.f32 (!%p2530_p7), -1.0, %v2988_v2 }
 0x1ab   : > { %v2580_v21 = vpop.f32.mrb[12].mxu0  ;;  %v2187_v36 = vsel (!%p2530_p7), %vm2172_vm1, %v2169_v59, %v2531_v3 }
 0x1ac   : > { %v2602_v22 = vpop.f32.mrb[12].mxu1  ;;  %v2581_v23 = vpop.f32.mrb[13].mxu0  ;;  %v2188_v6 = vsel (!%p2530_p7), %vm2173_vm2, %v2170_v60, %v2532_v52 }
 0x1ad   : > { %v2603_v24 = vpop.f32.mrb[13].mxu1  ;;  %v2582_v25 = vadd.f32 %v2581_v23, %v2580_v21  ;;  %v2583_v26 = vpop.f32.mrb[14].mxu0  ;;  %v2540_v9 = vpack.c.bf16 (!%p2530_p7), %v2188_v6, %v2187_v36 }
 0x1ae   : > { %v2604_v27 = vadd.f32 %v2603_v24, %v2602_v22  ;;  %v2605_v28 = vpop.f32.mrb[14].mxu1  ;;  %v2584_v29 = vpop.f32.mrb[15].mxu0 }
 0x1af   : > { %v2606_v30 = vpop.f32.mrb[15].mxu1  ;;  %v2014_v8 = vadd.f32 %v2582_v25, %v2560_v13  ;;  %2203 = vst [vmem:[%s3363_s3] sm:$0xff] (!%p2530_p7), %v2540_v9 }
 0x1b1   : > { %v2054_v18 = vadd.f32 %v2604_v27, %v2014_v8 }
 0x1cb   : > { %v2624_v31 = vpop.f32.mrb[16].mxu0 }
 0x1cc   : > { %v2133_v32 = vpop.f32.mrb[16].mxu1  ;;  %v2625_v33 = vpop.f32.mrb[17].mxu0 }
 0x1cd   : > { %v2657_v39 = vpop.f32.mrb[17].mxu1  ;;  %v2626_v34 = vadd.f32 %v2625_v33, %v2624_v31  ;;  %v2627_v48 = vpop.f32.mrb[18].mxu0 }
 0x1ce   : > { %v2136_v35 = vpop.f32.mrb[18].mxu1  ;;  %v2628_v37 = vpop.f32.mrb[19].mxu0 }
 0x1cf   : > { %v2658_v38 = vpop.f32.mrb[19].mxu1  ;;  %v2094_v40 = vadd.f32 %v2626_v34, %v2054_v18  ;;  %2148 = sbr.rel (%p2530_p7) target bundleno = 500 (0x1f4), region = 40 }
 0x1d1   : > { %v2134_v42 = vadd.f32 %v2133_v32, %v2094_v40 }
 0x1d3   : > { %v2141_v43 = vadd.f32 %v2134_v42, %v256_v41 }
 0x1d5   : > { %2144 = vst [vmem:[#allocation2 + $0x10] sm:$0xff] %v2141_v43 }
 0x1dc   : > { %v2151_v55 = vld [vmem:[#allocation2 + $0x10] sm:$0xff] }
 0x1dd   : > { %v2171_v61 = vadd.f32 %v2165_v58, %v2151_v55 }
 0x1df   : > { %v2177_v0 = vmin.f32 %v2171_v61, 0.0  ;;  %vm2174_vm3 = vcmp.gt.f32.partialorder %v2171_v61, 0.0 }
 0x1e1   : > { %v2182_v7 = vmul.f32 1.442695, %v2177_v0 }
 0x1e3   : > { %2989 = vpow2.f32 %v2182_v7 }
 0x1ed   : > { %v2990_v4 = vpop.eup %2989 }
 0x1ee   : > { %v2533_v5 = vadd.f32 -1.0, %v2990_v4 }
 0x1f0   : > { %v2189_v10 = vsel %vm2174_vm3, %v2171_v61, %v2533_v5 }
 0x1f1   : > { %v2541_v11 = vpack.c.bf16 %v2189_v10, %v2189_v10 }
 0x1f3   : > { %2204 = vst [vmem:[%s3363_s3 + $0x8] sm:$0xf] %v2541_v11 }
 0x1f4 PF: > { %s13_s14 = sadd.s32 1, %s3013_s14   ;;  %s3364_s12 = smov %s3009_s13 }
 0x1f5   : > { %p10_p8 = scmp.ge.s32.totalorder %s13_s14, 4   ;;  %s3365_s13 = smov %s3367_s15 }
 0x1f7   :  { %12 = sbr.rel (!%p10_p8) target bundleno = 2 (0x2), region = 76 }

// kernel: forward.7
= control target key start
LH: loop header
LB: loop body
LE: loop exit
PB: predicated region body
PF: predicated region fallthrough
CT: control target
= control target key end

     0   :  { %18 = vsyncpa [#allocation3], 0  ;;  %s17978_s0 = inlined_call_operand.vmem [shape: bf16[2,1536], index: 0, kind: input, shape index: {}]   ;;  %s17979_s1 = inlined_call_operand.vmem [shape: bf16[1536,512], index: 1, kind: input, shape index: {}]   ;;  %s17980_s2 = inlined_call_operand.vmem [shape: f32[1,512], index: 2, kind: input, shape index: {}]   ;;  %s17981_s3 = inlined_call_operand.hbm [shape: bf16[512,768], index: 3, kind: input, shape index: {}]   ;;  %s17982_s4 = inlined_call_operand.vmem [shape: f32[1,768], index: 4, kind: input, shape index: {}]   ;;  %s17983_s5 = inlined_call_operand.hbm [shape: bf16[768,1024], index: 5, kind: input, shape index: {}]   ;;  %s17984_s6 = inlined_call_operand.vmem [shape: f32[1,1024], index: 6, kind: input, shape index: {}]   ;;  %s17985_s7 = inlined_call_operand.vmem [shape: bf16[1024,1024], index: 7, kind: input, shape index: {}]   ;;  %s17986_s8 = inlined_call_operand.vmem [shape: f32[1,1024], index: 8, kind: input, shape index: {}]   ;;  %s17987_s9 = inlined_call_operand.vmem [shape: bf16[1024,128], index: 9, kind: input, shape index: {}]   ;;  %s17988_s10 = inlined_call_operand.vmem [shape: f32[1,128], index: 10, kind: input, shape index: {}]   ;;  %s17989_s11 = inlined_call_operand.vmem [shape: f32[2,128], index: 11, kind: output, shape index: {0}]   ;;  %s17990_s12 = inlined_call_operand.hbm [shape: f32[1,1], index: 12, kind: output, shape index: {1}]  }
   0x1   :  { %19 = vsyncpa [#allocation6], 0 }
   0x2   :  { %20 = vsyncpa [#allocation4], 0  ;;  %s14646_s21 = smov [#allocation2]   ;;  %s14586_s25 = scalar_lea.hbm %s17981_s3, 24576 }
   0x3   :  { %s32_s22 = sshll.u32 %s14646_s21, 4  ;;  %p14587_p0 = scmp.ne.s32.totalorder %s17981_s3, %s14586_s25  ;;  %s33_s22 = int_to_ptr.vmem [resolvable:$true] %s32_s22 }
   0x4   :  { %p14590_p1 = scmp.lt.u32.totalorder %s14586_s25, %s17981_s3 }
   0x6   :  { %p14592_p2 = pnand %p14590_p1, %p14587_p0 }
   0x8   :  { %14595 = shalt.err (!%p14592_p2)
}
   0x9   :  { %s14596_s30 = scalar_lea.vmem %s33_s22, 24576  ;;  %p14601_p4 = scmp.lt.s32.totalorder %s33_s22, %s33_s22 }
   0xa   :  { %p14597_p3 = scmp.ne.s32.totalorder %s33_s22, %s14596_s30  ;;  %p14602_p5 = scmp.lt.s32.totalorder %s14596_s30, %s14596_s30 }
   0xc   :  { %p14603_p6 = por %p14602_p5, %p14601_p4 }
   0xe   :  { %p14604_p7 = pnand %p14603_p6, %p14597_p3 }
  0x10   :  { %14607 = shalt.err (!%p14604_p7)
}
  0x11   :  { %s14647_s13 = smov 384   ;;  %s14648_s14 = smov 24  }
  0x12   :  { %38 = dma.hbm_to_vmem [thread:$0]  %s17981_s3, 24576, %s33_s22, [#allocation3], %s14647_s13, %s14647_s13, %s14648_s14  }
  0x13   :  { %s14649_s17 = smov [#allocation5]   ;;  %s14608_s21 = scalar_lea.hbm %s17983_s5, 49152 }
  0x14   :  { %s46_s18 = sshll.u32 %s14649_s17, 4  ;;  %p14609_p8 = scmp.ne.s32.totalorder %s17983_s5, %s14608_s21  ;;  %s47_s18 = int_to_ptr.vmem [resolvable:$true] %s46_s18 }
  0x15   :  { %p14612_p9 = scmp.lt.u32.totalorder %s14608_s21, %s17983_s5 }
  0x17   :  { %p14614_p10 = pnand %p14612_p9, %p14609_p8 }
  0x19   :  { %14617 = shalt.err (!%p14614_p10)
}
  0x1a   :  { %s14618_s27 = scalar_lea.vmem %s47_s18, 49152  ;;  %p14623_p12 = scmp.lt.s32.totalorder %s47_s18, %s47_s18 }
  0x1b   :  { %p14619_p11 = scmp.ne.s32.totalorder %s47_s18, %s14618_s27  ;;  %p14624_p13 = scmp.lt.s32.totalorder %s14618_s27, %s14618_s27 }
  0x1d   :  { %p14625_p0 = por %p14624_p13, %p14623_p12 }
  0x1f   :  { %p14626_p1 = pnand %p14625_p0, %p14619_p11 }
  0x21   :  { %14629 = shalt.err (!%p14626_p1)
}
  0x22   :  { %s14650_s3 = smov 512   ;;  %s14651_s22 = smov 32  }
  0x23   :  { %52 = dma.hbm_to_vmem [thread:$0]  %s17983_s5, 49152, %s47_s18, [#allocation6], %s14650_s3, %s14650_s3, %s14651_s22  }
  0x24   :  { %14640 = dma.done.wait [#allocation3], 24576  }
  0x25   :  { %14641 = vsyncadd [#allocation3], 4294942720 }
  0x26   :  { %14642 = dma.done.wait [#allocation6], 49152  }
  0x27   :  { %14643 = vsyncadd [#allocation6], 4294918144  ;;  %v13634_v0 = vld [vmem:[%s17979_s1 + $0x4] ss:$16 sps:$4 sm:$0xff]   ;;  %v13636_v1 = vld [vmem:[%s17979_s1 + $0xc] ss:$16 sps:$4 sm:$0xff]   ;;  %v458_v36 = vlaneseq }
  0x28   :  { %2485 = vmatprep.subr.bf16.mxu0 %v13634_v0  ;;  %v13638_v2 = vld [vmem:[%s17979_s1] ss:$16 sps:$4 sm:$0xff]   ;;  %v13639_v3 = vld [vmem:[%s17979_s1 + $0x8] ss:$16 sps:$4 sm:$0xff]   ;;  %2731 = vmatprep.subr.bf16.mxu1 %v13636_v1  ;;  %v13640_v4 = vld [vmem:[%s17979_s1 + $0x24] ss:$16 sps:$4 sm:$0xff]  }
  0x29   :  { %2486 = vmatpush1.bf16.msra.mxu0 %v13638_v2  ;;  %2732 = vmatpush1.bf16.msra.mxu1 %v13639_v3  ;;  %v13642_v5 = vld [vmem:[%s17979_s1 + $0x2c] ss:$16 sps:$4 sm:$0xff]   ;;  %v13644_v6 = vld [vmem:[%s17979_s1 + $0x20] ss:$16 sps:$4 sm:$0xff]   ;;  %v13645_v7 = vld [vmem:[%s17979_s1 + $0x28] ss:$16 sps:$4 sm:$0xff]  }
  0x2a   :  { %2487 = vmatprep.subr.bf16.mxu0 %v13640_v4  ;;  %2733 = vmatprep.subr.bf16.mxu1 %v13642_v5  ;;  %v13646_v8 = vld [vmem:[%s17979_s1 + $0x44] ss:$16 sps:$4 sm:$0xff]   ;;  %v13648_v9 = vld [vmem:[%s17979_s1 + $0x4c] ss:$16 sps:$4 sm:$0xff]   ;;  %v13650_v10 = vld [vmem:[%s17979_s1 + $0x40] ss:$16 sps:$4 sm:$0xff]  }
  0x2b   :  { %v13651_v11 = vld [vmem:[%s17979_s1 + $0x48] ss:$16 sps:$4 sm:$0xff]   ;;  %v13652_v12 = vld [vmem:[%s17979_s1 + $0x64] ss:$16 sps:$4 sm:$0xff]   ;;  %v13654_v13 = vld [vmem:[%s17979_s1 + $0x6c] ss:$16 sps:$4 sm:$0xff]  }
  0x2c   :  { %v13656_v14 = vld [vmem:[%s17979_s1 + $0x60] ss:$16 sps:$4 sm:$0xff]   ;;  %v13657_v15 = vld [vmem:[%s17979_s1 + $0x68] ss:$16 sps:$4 sm:$0xff]   ;;  %v13658_v16 = vld [vmem:[%s17979_s1 + $0x84] ss:$16 sps:$4 sm:$0xff]  }
  0x2d   :  { %2488 = vmatpush1.bf16.msra.mxu0 %v13644_v6  ;;  %2734 = vmatpush1.bf16.msra.mxu1 %v13645_v7  ;;  %v13660_v17 = vld [vmem:[%s17979_s1 + $0x8c] ss:$16 sps:$4 sm:$0xff]   ;;  %v13662_v18 = vld [vmem:[%s17979_s1 + $0x80] ss:$16 sps:$4 sm:$0xff]   ;;  %v13663_v19 = vld [vmem:[%s17979_s1 + $0x88] ss:$16 sps:$4 sm:$0xff]  }
  0x2e   :  { %2489 = vmatprep.subr.bf16.mxu0 %v13646_v8  ;;  %2735 = vmatprep.subr.bf16.mxu1 %v13648_v9  ;;  %v13664_v20 = vld [vmem:[%s17979_s1 + $0xa4] ss:$16 sps:$4 sm:$0xff]   ;;  %v13666_v21 = vld [vmem:[%s17979_s1 + $0xac] ss:$16 sps:$4 sm:$0xff]   ;;  %v13668_v22 = vld [vmem:[%s17979_s1 + $0xa0] ss:$16 sps:$4 sm:$0xff]  }
  0x2f   :  { %v13669_v23 = vld [vmem:[%s17979_s1 + $0xa8] ss:$16 sps:$4 sm:$0xff]   ;;  %v13670_v24 = vld [vmem:[%s17979_s1 + $0xc4] ss:$16 sps:$4 sm:$0xff]   ;;  %v13672_v25 = vld [vmem:[%s17979_s1 + $0xcc] ss:$16 sps:$4 sm:$0xff]  }
  0x30   :  { %v13674_v26 = vld [vmem:[%s17979_s1 + $0xc0] ss:$16 sps:$4 sm:$0xff]   ;;  %v13675_v27 = vld [vmem:[%s17979_s1 + $0xc8] ss:$16 sps:$4 sm:$0xff]   ;;  %v13676_v28 = vld [vmem:[%s17979_s1 + $0xe4] ss:$16 sps:$4 sm:$0xff]  }
  0x31   :  { %2490 = vmatpush1.bf16.msra.mxu0 %v13650_v10  ;;  %2736 = vmatpush1.bf16.msra.mxu1 %v13651_v11  ;;  %v13678_v29 = vld [vmem:[%s17979_s1 + $0xec] ss:$16 sps:$4 sm:$0xff]   ;;  %v13680_v30 = vld [vmem:[%s17979_s1 + $0xe0] ss:$16 sps:$4 sm:$0xff]   ;;  %v13681_v31 = vld [vmem:[%s17979_s1 + $0xe8] ss:$16 sps:$4 sm:$0xff]  }
  0x32   :  { %2491 = vmatprep.subr.bf16.mxu0 %v13652_v12  ;;  %2737 = vmatprep.subr.bf16.mxu1 %v13654_v13  ;;  %v13682_v32 = vld [vmem:[%s17979_s1 + $0x104] ss:$16 sps:$4 sm:$0xff]   ;;  %v13684_v33 = vld [vmem:[%s17979_s1 + $0x10c] ss:$16 sps:$4 sm:$0xff]   ;;  %v13686_v34 = vld [vmem:[%s17979_s1 + $0x100] ss:$16 sps:$4 sm:$0xff]  }
  0x33   :  { %v13687_v35 = vld [vmem:[%s17979_s1 + $0x108] ss:$16 sps:$4 sm:$0xff]   ;;  %v14652_v37 = vmov 1966171168   ;;  %v13688_v39 = vld [vmem:[%s17979_s1 + $0x124] ss:$16 sps:$4 sm:$0xff]  }
  0x34   :  { %v482_v38 = vunpack.c.l.s4 %v14652_v37  ;;  %v13690_v40 = vld [vmem:[%s17979_s1 + $0x12c] ss:$16 sps:$4 sm:$0xff]   ;;  %v13692_v41 = vld [vmem:[%s17979_s1 + $0x120] ss:$16 sps:$4 sm:$0xff]   ;;  %v14862_v42 = vshrl.u32 %v458_v36, 7  ;;  %vm11795_vm10 = vcmask 254976  }
  0x35   :  { %2492 = vmatpush1.bf16.msra.mxu0 %v13656_v14  ;;  %2738 = vmatpush1.bf16.msra.mxu1 %v13657_v15  ;;  %v13693_v44 = vld [vmem:[%s17979_s1 + $0x128] ss:$16 sps:$4 sm:$0xff]   ;;  %v13694_v45 = vld [vmem:[%s17979_s1 + $0x144] ss:$16 sps:$4 sm:$0xff]   ;;  %v13696_v46 = vld [vmem:[%s17979_s1 + $0x14c] ss:$16 sps:$4 sm:$0xff]  }
  0x36   :  { %2493 = vmatprep.subr.bf16.mxu0 %v13658_v16  ;;  %2739 = vmatprep.subr.bf16.mxu1 %v13660_v17  ;;  %v483_v43 = vunpack.c.0.s8 %v482_v38  ;;  %v13698_v47 = vld [vmem:[%s17979_s1 + $0x140] ss:$16 sps:$4 sm:$0xff]   ;;  %v13699_v48 = vld [vmem:[%s17979_s1 + $0x148] ss:$16 sps:$4 sm:$0xff]   ;;  %v13700_v50 = vld [vmem:[%s17979_s1 + $0x164] ss:$16 sps:$4 sm:$0xff]  }
  0x37   :  { %v13702_v51 = vld [vmem:[%s17979_s1 + $0x16c] ss:$16 sps:$4 sm:$0xff]   ;;  %v14891_v52 = vld [vmem:[%s17978_s0] sm:$0xff]  ;;  %v13705_v55 = vld [vmem:[%s17979_s1 + $0x168] ss:$16 sps:$4 sm:$0xff]   ;;  %s14630_s26 = scalar_lea.hbm %s17990_s12, 16 }
  0x38   :  { %v14880_v49 = vsub.s32 %v483_v43, %v14862_v42  ;;  %v13704_v53 = vld [vmem:[%s17979_s1 + $0x160] ss:$16 sps:$4 sm:$0xff]   ;;  %v13706_v56 = vld [vmem:[%s17979_s1 + $0x184] ss:$16 sps:$4 sm:$0xff]   ;;  %v13708_v57 = vld [vmem:[%s17979_s1 + $0x18c] ss:$16 sps:$4 sm:$0xff]   ;;  %p14631_p2 = scmp.ne.s32.totalorder %s17990_s12, %s14630_s26  ;;  %p14634_p3 = scmp.lt.u32.totalorder %s14630_s26, %s17990_s12 }
  0x39   :  { %2494 = vmatpush1.bf16.msra.mxu0 %v13662_v18  ;;  %2740 = vmatpush1.bf16.msra.mxu1 %v13663_v19  ;;  %v13710_v59 = vld [vmem:[%s17979_s1 + $0x180] ss:$16 sps:$4 sm:$0xff]   ;;  %v13711_v61 = vld [vmem:[%s17979_s1 + $0x188] ss:$16 sps:$4 sm:$0xff]   ;;  %v13712_v62 = vld [vmem:[%s17979_s1 + $0x1a4] ss:$16 sps:$4 sm:$0xff]  }
  0x3a   :  { %2495 = vmatprep.subr.bf16.mxu0 %v13664_v20  ;;  %2741 = vmatprep.subr.bf16.mxu1 %v13666_v21  ;;  %v487_v54 = vrot.slane %v14891_v52, %v14880_v49  ;;  %v13714_v63 = vld [vmem:[%s17979_s1 + $0x1ac] ss:$16 sps:$4 sm:$0xff]   ;;  %v13716_v0 = vld [vmem:[%s17979_s1 + $0x1a0] ss:$16 sps:$4 sm:$0xff]   ;;  %v13717_v1 = vld [vmem:[%s17979_s1 + $0x1a8] ss:$16 sps:$4 sm:$0xff]   ;;  %p14636_p4 = pnand %p14634_p3, %p14631_p2 }
  0x3b   :  { %v13718_v2 = vld [vmem:[%s17979_s1 + $0x1c4] ss:$16 sps:$4 sm:$0xff]   ;;  %v13720_v3 = vld [vmem:[%s17979_s1 + $0x1cc] ss:$16 sps:$4 sm:$0xff]   ;;  %v13722_v4 = vld [vmem:[%s17979_s1 + $0x1c0] ss:$16 sps:$4 sm:$0xff]  }
  0x3c   :  { %v495_v58 = vcombine.high %v487_v54, %v487_v54  ;;  %v13723_v5 = vld [vmem:[%s17979_s1 + $0x1c8] ss:$16 sps:$4 sm:$0xff]   ;;  %v13724_v6 = vld [vmem:[%s17979_s1 + $0x1e4] ss:$16 sps:$4 sm:$0xff]   ;;  %v13726_v7 = vld [vmem:[%s17979_s1 + $0x1ec] ss:$16 sps:$4 sm:$0xff]   ;;  %v14960_v13 = vrot.slane %v487_v54, %v14880_v49 }
  0x3d   :  { %2496 = vmatpush1.bf16.msra.mxu0 %v13668_v22  ;;  %2742 = vmatpush1.bf16.msra.mxu1 %v13669_v23  ;;  %v13728_v8 = vld [vmem:[%s17979_s1 + $0x1e0] ss:$16 sps:$4 sm:$0xff]   ;;  %v13729_v9 = vld [vmem:[%s17979_s1 + $0x1e8] ss:$16 sps:$4 sm:$0xff]   ;;  %v13732_v10 = vld [vmem:[%s17979_s1 + $0x204] ss:$16 sps:$4 sm:$0xff]  }
  0x3e   :  { %2497 = vmatprep.subr.bf16.mxu0 %v13670_v24  ;;  %2743 = vmatprep.subr.bf16.mxu1 %v13672_v25  ;;  %v517_v60 = vrot.slane %v495_v58, %v14880_v49  ;;  %v13735_v11 = vld [vmem:[%s17979_s1 + $0x20c] ss:$16 sps:$4 sm:$0xff]   ;;  %v13730_v12 = vld [vmem:[%s17979_s1 + $0x200] ss:$16 sps:$4 sm:$0xff]   ;;  %v13733_v14 = vld [vmem:[%s17979_s1 + $0x208] ss:$16 sps:$4 sm:$0xff]  }
  0x3f   :  { %v13738_v15 = vld [vmem:[%s17979_s1 + $0x224] ss:$16 sps:$4 sm:$0xff]   ;;  %v13741_v16 = vld [vmem:[%s17979_s1 + $0x22c] ss:$16 sps:$4 sm:$0xff]   ;;  %v13736_v18 = vld [vmem:[%s17979_s1 + $0x220] ss:$16 sps:$4 sm:$0xff]  }
  0x40   :  { %2517 = vmatprep.mubr.bf16.mxu0 %v517_v60  ;;  %2763 = vmatprep.mubr.bf16.mxu1 %v517_v60  ;;  %v527_v17 = vcombine.high %v517_v60, %v517_v60  ;;  %v13739_v19 = vld [vmem:[%s17979_s1 + $0x228] ss:$16 sps:$4 sm:$0xff]   ;;  %v13744_v20 = vld [vmem:[%s17979_s1 + $0x244] ss:$16 sps:$4 sm:$0xff]   ;;  %v13747_v21 = vld [vmem:[%s17979_s1 + $0x24c] ss:$16 sps:$4 sm:$0xff]  }
  0x41   :  { %2498 = vmatpush1.bf16.msra.mxu0 %v13674_v26  ;;  %2744 = vmatpush1.bf16.msra.mxu1 %v13675_v27  ;;  %v13742_v22 = vld [vmem:[%s17979_s1 + $0x240] ss:$16 sps:$4 sm:$0xff]   ;;  %v13745_v23 = vld [vmem:[%s17979_s1 + $0x248] ss:$16 sps:$4 sm:$0xff]   ;;  %v13750_v24 = vld [vmem:[%s17979_s1 + $0x264] ss:$16 sps:$4 sm:$0xff]  }
  0x42   :  { %2499 = vmatprep.subr.bf16.mxu0 %v13676_v28  ;;  %2745 = vmatprep.subr.bf16.mxu1 %v13678_v29  ;;  %v13753_v25 = vld [vmem:[%s17979_s1 + $0x26c] ss:$16 sps:$4 sm:$0xff]   ;;  %v13748_v26 = vld [vmem:[%s17979_s1 + $0x260] ss:$16 sps:$4 sm:$0xff]   ;;  %v13751_v27 = vld [vmem:[%s17979_s1 + $0x268] ss:$16 sps:$4 sm:$0xff]  }
  0x43   :  { %v13756_v28 = vld [vmem:[%s17979_s1 + $0x284] ss:$16 sps:$4 sm:$0xff]   ;;  %v13759_v29 = vld [vmem:[%s17979_s1 + $0x28c] ss:$16 sps:$4 sm:$0xff]   ;;  %v13766_v38 = vld [vmem:[%s17979_s1 + $0x2c0] ss:$16 sps:$4 sm:$0xff]  }
  0x44   :  { %v13768_v36 = vld [vmem:[%s17979_s1 + $0x2c4] ss:$16 sps:$4 sm:$0xff]   ;;  %v13771_v37 = vld [vmem:[%s17979_s1 + $0x2cc] ss:$16 sps:$4 sm:$0xff]   ;;  %v13772_v43 = vld [vmem:[%s17979_s1 + $0x2e0] ss:$16 sps:$4 sm:$0xff]  }
  0x45   :  { %2500 = vmatpush1.bf16.msra.mxu0 %v13680_v30  ;;  %2746 = vmatpush1.bf16.msra.mxu1 %v13681_v31  ;;  %v13754_v30 = vld [vmem:[%s17979_s1 + $0x280] ss:$16 sps:$4 sm:$0xff]   ;;  %v13757_v31 = vld [vmem:[%s17979_s1 + $0x288] ss:$16 sps:$4 sm:$0xff]   ;;  %v13801_v60 = vld [vmem:[%s17979_s1 + $0x36c] ss:$16 sps:$4 sm:$0xff]  }
  0x46   :  { %2501 = vmatprep.subr.bf16.mxu0 %v13682_v32  ;;  %2747 = vmatprep.subr.bf16.mxu1 %v13684_v33  ;;  %v13762_v32 = vld [vmem:[%s17979_s1 + $0x2a4] ss:$16 sps:$4 sm:$0xff]   ;;  %v13765_v33 = vld [vmem:[%s17979_s1 + $0x2ac] ss:$16 sps:$4 sm:$0xff]   ;;  %v13787_v54 = vld [vmem:[%s17979_s1 + $0x328] ss:$16 sps:$4 sm:$0xff]  }
  0x47   :  { %v13793_v58 = vld [vmem:[%s17979_s1 + $0x348] ss:$16 sps:$4 sm:$0xff]  }
  0x49   :  { %2502 = vmatpush1.bf16.msra.mxu0 %v13686_v34  ;;  %2748 = vmatpush1.bf16.msra.mxu1 %v13687_v35  ;;  %v13760_v34 = vld [vmem:[%s17979_s1 + $0x2a0] ss:$16 sps:$4 sm:$0xff]   ;;  %v13763_v35 = vld [vmem:[%s17979_s1 + $0x2a8] ss:$16 sps:$4 sm:$0xff]  }
  0x4a   :  { %2503 = vmatprep.subr.bf16.mxu0 %v13688_v39  ;;  %2749 = vmatprep.subr.bf16.mxu1 %v13690_v40  ;;  %v13769_v39 = vld [vmem:[%s17979_s1 + $0x2c8] ss:$16 sps:$4 sm:$0xff]   ;;  %v13774_v40 = vld [vmem:[%s17979_s1 + $0x2e4] ss:$16 sps:$4 sm:$0xff]  }
  0x4d   :  { %2504 = vmatpush1.bf16.msra.mxu0 %v13692_v41  ;;  %2750 = vmatpush1.bf16.msra.mxu1 %v13693_v44  ;;  %v13777_v41 = vld [vmem:[%s17979_s1 + $0x2ec] ss:$16 sps:$4 sm:$0xff]   ;;  %v13775_v44 = vld [vmem:[%s17979_s1 + $0x2e8] ss:$16 sps:$4 sm:$0xff]  }
  0x4e   :  { %2505 = vmatprep.subr.bf16.mxu0 %v13694_v45  ;;  %2751 = vmatprep.subr.bf16.mxu1 %v13696_v46  ;;  %v13780_v45 = vld [vmem:[%s17979_s1 + $0x304] ss:$16 sps:$4 sm:$0xff]   ;;  %v13783_v46 = vld [vmem:[%s17979_s1 + $0x30c] ss:$16 sps:$4 sm:$0xff]  }
  0x51   :  { %2506 = vmatpush1.bf16.msra.mxu0 %v13698_v47  ;;  %2752 = vmatpush1.bf16.msra.mxu1 %v13699_v48  ;;  %v13778_v47 = vld [vmem:[%s17979_s1 + $0x300] ss:$16 sps:$4 sm:$0xff]   ;;  %v13781_v48 = vld [vmem:[%s17979_s1 + $0x308] ss:$16 sps:$4 sm:$0xff]  }
  0x52   :  { %2507 = vmatprep.subr.bf16.mxu0 %v13700_v50  ;;  %2753 = vmatprep.subr.bf16.mxu1 %v13702_v51  ;;  %v13786_v50 = vld [vmem:[%s17979_s1 + $0x324] ss:$16 sps:$4 sm:$0xff]   ;;  %v13789_v51 = vld [vmem:[%s17979_s1 + $0x32c] ss:$16 sps:$4 sm:$0xff]  }
  0x55   :  { %2508 = vmatpush1.bf16.msra.mxu0 %v13704_v53  ;;  %2754 = vmatpush1.bf16.msra.mxu1 %v13705_v55  ;;  %v13784_v53 = vld [vmem:[%s17979_s1 + $0x320] ss:$16 sps:$4 sm:$0xff]   ;;  %v13792_v55 = vld [vmem:[%s17979_s1 + $0x344] ss:$16 sps:$4 sm:$0xff]  }
  0x56   :  { %2509 = vmatprep.subr.bf16.mxu0 %v13706_v56  ;;  %2755 = vmatprep.subr.bf16.mxu1 %v13708_v57  ;;  %v13795_v56 = vld [vmem:[%s17979_s1 + $0x34c] ss:$16 sps:$4 sm:$0xff]   ;;  %v13790_v57 = vld [vmem:[%s17979_s1 + $0x340] ss:$16 sps:$4 sm:$0xff]  }
  0x59   :  { %2510 = vmatpush1.bf16.msra.mxu0 %v13710_v59  ;;  %2756 = vmatpush1.bf16.msra.mxu1 %v13711_v61  ;;  %v13798_v59 = vld [vmem:[%s17979_s1 + $0x364] ss:$16 sps:$4 sm:$0xff]   ;;  %v13796_v61 = vld [vmem:[%s17979_s1 + $0x360] ss:$16 sps:$4 sm:$0xff]  }
  0x5a   :  { %2511 = vmatprep.subr.bf16.mxu0 %v13712_v62  ;;  %2757 = vmatprep.subr.bf16.mxu1 %v13714_v63  ;;  %v13799_v62 = vld [vmem:[%s17979_s1 + $0x368] ss:$16 sps:$4 sm:$0xff]   ;;  %v13804_v63 = vld [vmem:[%s17979_s1 + $0x384] ss:$16 sps:$4 sm:$0xff]  }
  0x5d   :  { %2512 = vmatpush1.bf16.msra.mxu0 %v13716_v0  ;;  %2758 = vmatpush1.bf16.msra.mxu1 %v13717_v1  ;;  %v13807_v0 = vld [vmem:[%s17979_s1 + $0x38c] ss:$16 sps:$4 sm:$0xff]   ;;  %v13802_v1 = vld [vmem:[%s17979_s1 + $0x380] ss:$16 sps:$4 sm:$0xff]  }
  0x5e   :  { %2513 = vmatprep.subr.bf16.mxu0 %v13718_v2  ;;  %2759 = vmatprep.subr.bf16.mxu1 %v13720_v3  ;;  %v13805_v2 = vld [vmem:[%s17979_s1 + $0x388] ss:$16 sps:$4 sm:$0xff]   ;;  %v13810_v3 = vld [vmem:[%s17979_s1 + $0x3a4] ss:$16 sps:$4 sm:$0xff]  }
  0x61   :  { %2514 = vmatpush1.bf16.msra.mxu0 %v13722_v4  ;;  %2760 = vmatpush1.bf16.msra.mxu1 %v13723_v5  ;;  %v13813_v4 = vld [vmem:[%s17979_s1 + $0x3ac] ss:$16 sps:$4 sm:$0xff]   ;;  %v13808_v5 = vld [vmem:[%s17979_s1 + $0x3a0] ss:$16 sps:$4 sm:$0xff]  }
  0x62   :  { %2515 = vmatprep.subr.bf16.mxu0 %v13724_v6  ;;  %2761 = vmatprep.subr.bf16.mxu1 %v13726_v7  ;;  %v13811_v6 = vld [vmem:[%s17979_s1 + $0x3a8] ss:$16 sps:$4 sm:$0xff]   ;;  %v13816_v7 = vld [vmem:[%s17979_s1 + $0x3c4] ss:$16 sps:$4 sm:$0xff]  }
  0x65   :  { %2516 = vmatpush1.bf16.msra.mxu0 %v13728_v8  ;;  %2762 = vmatpush1.bf16.msra.mxu1 %v13729_v9  ;;  %v13819_v8 = vld [vmem:[%s17979_s1 + $0x3cc] ss:$16 sps:$4 sm:$0xff]   ;;  %v480_v9 = vcombine.high %v14891_v52, %v14891_v52 }
  0x66   :  { %2526 = vmatprep.subr.bf16.mxu0 %v13732_v10  ;;  %2772 = vmatprep.subr.bf16.mxu1 %v13735_v11  ;;  %v13814_v10 = vld [vmem:[%s17979_s1 + $0x3c0] ss:$16 sps:$4 sm:$0xff]   ;;  %v13817_v11 = vld [vmem:[%s17979_s1 + $0x3c8] ss:$16 sps:$4 sm:$0xff]   ;;  %v13825_v52 = vld [vmem:[%s17979_s1 + $0x3ec] ss:$16 sps:$4 sm:$0xff]  }
  0x68   :  { %2518 = vmatmul.mubr.bf16.vlgmr.msra.gmra.mrb[0].mxu0 %v14960_v13  ;;  %2764 = vmatmul.mubr.bf16.vlgmr.msra.gmra.mrb[0].mxu1 %v14960_v13 }
  0x69   :  { %2527 = vmatpush1.bf16.msra.mxu0 %v13730_v12  ;;  %2773 = vmatpush1.bf16.msra.mxu1 %v13733_v14  ;;  %v13822_v12 = vld [vmem:[%s17979_s1 + $0x3e4] ss:$16 sps:$4 sm:$0xff]   ;;  %v15144_v14 = vrot.slane %v480_v9, %v14880_v49  ;;  %v13901_v9 = vld [vmem:[%s17979_s1 + $0x588] ss:$16 sps:$4 sm:$0xff]  }
  0x6a   :  { %2528 = vmatprep.subr.bf16.mxu0 %v13738_v15  ;;  %2774 = vmatprep.subr.bf16.mxu1 %v13741_v16  ;;  %v13820_v15 = vld [vmem:[%s17979_s1 + $0x3e0] ss:$16 sps:$4 sm:$0xff]   ;;  %v13823_v16 = vld [vmem:[%s17979_s1 + $0x3e8] ss:$16 sps:$4 sm:$0xff]  }
  0x6b   :  { %2558 = vmatprep.mubr.bf16.mxu0 %v527_v17  ;;  %2804 = vmatprep.mubr.bf16.mxu1 %v527_v17  ;;  %v13828_v17 = vld [vmem:[%s17979_s1 + $0x404] ss:$16 sps:$4 sm:$0xff]  }
  0x6d   :  { %2529 = vmatpush1.bf16.msra.mxu0 %v13736_v18  ;;  %2775 = vmatpush1.bf16.msra.mxu1 %v13739_v19  ;;  %v13831_v18 = vld [vmem:[%s17979_s1 + $0x40c] ss:$16 sps:$4 sm:$0xff]   ;;  %v496_v19 = vcombine.high %v15144_v14, %v15144_v14 }
  0x6e   :  { %2530 = vmatprep.subr.bf16.mxu0 %v13744_v20  ;;  %2776 = vmatprep.subr.bf16.mxu1 %v13747_v21  ;;  %v13826_v20 = vld [vmem:[%s17979_s1 + $0x400] ss:$16 sps:$4 sm:$0xff]   ;;  %v525_v21 = vcombine.high %v14960_v13, %v14960_v13 }
  0x6f   :  { %v13832_v13 = vld [vmem:[%s17979_s1 + $0x420] ss:$16 sps:$4 sm:$0xff]  }
  0x71   :  { %2531 = vmatpush1.bf16.msra.mxu0 %v13742_v22  ;;  %2777 = vmatpush1.bf16.msra.mxu1 %v13745_v23  ;;  %v13829_v22 = vld [vmem:[%s17979_s1 + $0x408] ss:$16 sps:$4 sm:$0xff]   ;;  %v13834_v23 = vld [vmem:[%s17979_s1 + $0x424] ss:$16 sps:$4 sm:$0xff]  }
  0x72   :  { %2532 = vmatprep.subr.bf16.mxu0 %v13750_v24  ;;  %2778 = vmatprep.subr.bf16.mxu1 %v13753_v25  ;;  %v13837_v24 = vld [vmem:[%s17979_s1 + $0x42c] ss:$16 sps:$4 sm:$0xff]   ;;  %v15175_v25 = vrot.slane %v496_v19, %v14880_v49  ;;  %v13918_v19 = vld [vmem:[%s17979_s1 + $0x5e4] ss:$16 sps:$4 sm:$0xff]  }
  0x75   :  { %2533 = vmatpush1.bf16.msra.mxu0 %v13748_v26  ;;  %2779 = vmatpush1.bf16.msra.mxu1 %v13751_v27  ;;  %v13835_v26 = vld [vmem:[%s17979_s1 + $0x428] ss:$16 sps:$4 sm:$0xff]   ;;  %v13840_v27 = vld [vmem:[%s17979_s1 + $0x444] ss:$16 sps:$4 sm:$0xff]  }
  0x76   :  { %2534 = vmatprep.subr.bf16.mxu0 %v13756_v28  ;;  %2780 = vmatprep.subr.bf16.mxu1 %v13759_v29  ;;  %v13843_v28 = vld [vmem:[%s17979_s1 + $0x44c] ss:$16 sps:$4 sm:$0xff]   ;;  %v13838_v29 = vld [vmem:[%s17979_s1 + $0x440] ss:$16 sps:$4 sm:$0xff]  }
  0x79   :  { %2535 = vmatpush1.bf16.msra.mxu0 %v13754_v30  ;;  %2781 = vmatpush1.bf16.msra.mxu1 %v13757_v31  ;;  %v13841_v30 = vld [vmem:[%s17979_s1 + $0x448] ss:$16 sps:$4 sm:$0xff]   ;;  %v13846_v31 = vld [vmem:[%s17979_s1 + $0x464] ss:$16 sps:$4 sm:$0xff]  }
  0x7a   :  { %2536 = vmatprep.subr.bf16.mxu0 %v13762_v32  ;;  %2782 = vmatprep.subr.bf16.mxu1 %v13765_v33  ;;  %v13849_v32 = vld [vmem:[%s17979_s1 + $0x46c] ss:$16 sps:$4 sm:$0xff]   ;;  %v13844_v33 = vld [vmem:[%s17979_s1 + $0x460] ss:$16 sps:$4 sm:$0xff]  }
  0x7d   :  { %2537 = vmatpush1.bf16.msra.mxu0 %v13760_v34  ;;  %2783 = vmatpush1.bf16.msra.mxu1 %v13763_v35  ;;  %v13847_v34 = vld [vmem:[%s17979_s1 + $0x468] ss:$16 sps:$4 sm:$0xff]   ;;  %v13852_v35 = vld [vmem:[%s17979_s1 + $0x484] ss:$16 sps:$4 sm:$0xff]  }
  0x7e   :  { %2538 = vmatprep.subr.bf16.mxu0 %v13768_v36  ;;  %2784 = vmatprep.subr.bf16.mxu1 %v13771_v37  ;;  %v13855_v36 = vld [vmem:[%s17979_s1 + $0x48c] ss:$16 sps:$4 sm:$0xff]   ;;  %v13850_v37 = vld [vmem:[%s17979_s1 + $0x480] ss:$16 sps:$4 sm:$0xff]  }
  0x81   :  { %2539 = vmatpush1.bf16.msra.mxu0 %v13766_v38  ;;  %2785 = vmatpush1.bf16.msra.mxu1 %v13769_v39  ;;  %v13853_v38 = vld [vmem:[%s17979_s1 + $0x488] ss:$16 sps:$4 sm:$0xff]   ;;  %v13858_v39 = vld [vmem:[%s17979_s1 + $0x4a4] ss:$16 sps:$4 sm:$0xff]  }
  0x82   :  { %2540 = vmatprep.subr.bf16.mxu0 %v13774_v40  ;;  %2786 = vmatprep.subr.bf16.mxu1 %v13777_v41  ;;  %v13861_v40 = vld [vmem:[%s17979_s1 + $0x4ac] ss:$16 sps:$4 sm:$0xff]   ;;  %v13856_v41 = vld [vmem:[%s17979_s1 + $0x4a0] ss:$16 sps:$4 sm:$0xff]  }
  0x85   :  { %2541 = vmatpush1.bf16.msra.mxu0 %v13772_v43  ;;  %2787 = vmatpush1.bf16.msra.mxu1 %v13775_v44  ;;  %v13859_v43 = vld [vmem:[%s17979_s1 + $0x4a8] ss:$16 sps:$4 sm:$0xff]   ;;  %v13864_v44 = vld [vmem:[%s17979_s1 + $0x4c4] ss:$16 sps:$4 sm:$0xff]  }
  0x86   :  { %2542 = vmatprep.subr.bf16.mxu0 %v13780_v45  ;;  %2788 = vmatprep.subr.bf16.mxu1 %v13783_v46  ;;  %v13867_v45 = vld [vmem:[%s17979_s1 + $0x4cc] ss:$16 sps:$4 sm:$0xff]   ;;  %v13862_v46 = vld [vmem:[%s17979_s1 + $0x4c0] ss:$16 sps:$4 sm:$0xff]  }
  0x89   :  { %2543 = vmatpush1.bf16.msra.mxu0 %v13778_v47  ;;  %2789 = vmatpush1.bf16.msra.mxu1 %v13781_v48  ;;  %v13865_v47 = vld [vmem:[%s17979_s1 + $0x4c8] ss:$16 sps:$4 sm:$0xff]   ;;  %v13870_v48 = vld [vmem:[%s17979_s1 + $0x4e4] ss:$16 sps:$4 sm:$0xff]  }
  0x8a   :  { %2544 = vmatprep.subr.bf16.mxu0 %v13786_v50  ;;  %2790 = vmatprep.subr.bf16.mxu1 %v13789_v51  ;;  %v13873_v50 = vld [vmem:[%s17979_s1 + $0x4ec] ss:$16 sps:$4 sm:$0xff]   ;;  %v13868_v51 = vld [vmem:[%s17979_s1 + $0x4e0] ss:$16 sps:$4 sm:$0xff]  }
  0x8d   :  { %2545 = vmatpush1.bf16.msra.mxu0 %v13784_v53  ;;  %2791 = vmatpush1.bf16.msra.mxu1 %v13787_v54  ;;  %v13871_v53 = vld [vmem:[%s17979_s1 + $0x4e8] ss:$16 sps:$4 sm:$0xff]   ;;  %v13876_v54 = vld [vmem:[%s17979_s1 + $0x504] ss:$16 sps:$4 sm:$0xff]  }
  0x8e   :  { %2546 = vmatprep.subr.bf16.mxu0 %v13792_v55  ;;  %2792 = vmatprep.subr.bf16.mxu1 %v13795_v56  ;;  %v13879_v55 = vld [vmem:[%s17979_s1 + $0x50c] ss:$16 sps:$4 sm:$0xff]   ;;  %v13874_v56 = vld [vmem:[%s17979_s1 + $0x500] ss:$16 sps:$4 sm:$0xff]  }
  0x91   :  { %2547 = vmatpush1.bf16.msra.mxu0 %v13790_v57  ;;  %2793 = vmatpush1.bf16.msra.mxu1 %v13793_v58  ;;  %v13877_v57 = vld [vmem:[%s17979_s1 + $0x508] ss:$16 sps:$4 sm:$0xff]   ;;  %v13882_v58 = vld [vmem:[%s17979_s1 + $0x524] ss:$16 sps:$4 sm:$0xff]  }
  0x92   :  { %2548 = vmatprep.subr.bf16.mxu0 %v13798_v59  ;;  %2794 = vmatprep.subr.bf16.mxu1 %v13801_v60  ;;  %v13885_v59 = vld [vmem:[%s17979_s1 + $0x52c] ss:$16 sps:$4 sm:$0xff]   ;;  %v13880_v60 = vld [vmem:[%s17979_s1 + $0x520] ss:$16 sps:$4 sm:$0xff]  }
  0x95   :  { %2549 = vmatpush1.bf16.msra.mxu0 %v13796_v61  ;;  %2795 = vmatpush1.bf16.msra.mxu1 %v13799_v62  ;;  %v13883_v61 = vld [vmem:[%s17979_s1 + $0x528] ss:$16 sps:$4 sm:$0xff]   ;;  %v13888_v62 = vld [vmem:[%s17979_s1 + $0x544] ss:$16 sps:$4 sm:$0xff]  }
  0x96   :  { %2550 = vmatprep.subr.bf16.mxu0 %v13804_v63  ;;  %2796 = vmatprep.subr.bf16.mxu1 %v13807_v0  ;;  %v13891_v63 = vld [vmem:[%s17979_s1 + $0x54c] ss:$16 sps:$4 sm:$0xff]   ;;  %v13886_v0 = vld [vmem:[%s17979_s1 + $0x540] ss:$16 sps:$4 sm:$0xff]  }
  0x99   :  { %2551 = vmatpush1.bf16.msra.mxu0 %v13802_v1  ;;  %2797 = vmatpush1.bf16.msra.mxu1 %v13805_v2  ;;  %v13889_v1 = vld [vmem:[%s17979_s1 + $0x548] ss:$16 sps:$4 sm:$0xff]   ;;  %v13894_v2 = vld [vmem:[%s17979_s1 + $0x564] ss:$16 sps:$4 sm:$0xff]  }
  0x9a   :  { %2552 = vmatprep.subr.bf16.mxu0 %v13810_v3  ;;  %2798 = vmatprep.subr.bf16.mxu1 %v13813_v4  ;;  %v13897_v3 = vld [vmem:[%s17979_s1 + $0x56c] ss:$16 sps:$4 sm:$0xff]   ;;  %v13892_v4 = vld [vmem:[%s17979_s1 + $0x560] ss:$16 sps:$4 sm:$0xff]  }
  0x9d   :  { %2553 = vmatpush1.bf16.msra.mxu0 %v13808_v5  ;;  %2799 = vmatpush1.bf16.msra.mxu1 %v13811_v6  ;;  %v13895_v5 = vld [vmem:[%s17979_s1 + $0x568] ss:$16 sps:$4 sm:$0xff]   ;;  %v13900_v6 = vld [vmem:[%s17979_s1 + $0x584] ss:$16 sps:$4 sm:$0xff]  }
  0x9e   :  { %2554 = vmatprep.subr.bf16.mxu0 %v13816_v7  ;;  %2800 = vmatprep.subr.bf16.mxu1 %v13819_v8  ;;  %v13903_v7 = vld [vmem:[%s17979_s1 + $0x58c] ss:$16 sps:$4 sm:$0xff]   ;;  %v13898_v8 = vld [vmem:[%s17979_s1 + $0x580] ss:$16 sps:$4 sm:$0xff]  }
  0xa1   :  { %2555 = vmatpush1.bf16.msra.mxu0 %v13814_v10  ;;  %2801 = vmatpush1.bf16.msra.mxu1 %v13817_v11  ;;  %v13906_v10 = vld [vmem:[%s17979_s1 + $0x5a4] ss:$16 sps:$4 sm:$0xff]   ;;  %v13909_v11 = vld [vmem:[%s17979_s1 + $0x5ac] ss:$16 sps:$4 sm:$0xff]  }
  0xa2   :  { %2556 = vmatprep.subr.bf16.mxu0 %v13822_v12  ;;  %2802 = vmatprep.subr.bf16.mxu1 %v13825_v52  ;;  %v13904_v12 = vld [vmem:[%s17979_s1 + $0x5a0] ss:$16 sps:$4 sm:$0xff]   ;;  %v13907_v52 = vld [vmem:[%s17979_s1 + $0x5a8] ss:$16 sps:$4 sm:$0xff]  }
  0xa5   :  { %2557 = vmatpush1.bf16.msra.mxu0 %v13820_v15  ;;  %2803 = vmatpush1.bf16.msra.mxu1 %v13823_v16  ;;  %v13912_v15 = vld [vmem:[%s17979_s1 + $0x5c4] ss:$16 sps:$4 sm:$0xff]   ;;  %v13915_v16 = vld [vmem:[%s17979_s1 + $0x5cc] ss:$16 sps:$4 sm:$0xff]  }
  0xa6   :  { %2567 = vmatprep.subr.bf16.mxu0 %v13828_v17  ;;  %2813 = vmatprep.subr.bf16.mxu1 %v13831_v18  ;;  %v13910_v17 = vld [vmem:[%s17979_s1 + $0x5c0] ss:$16 sps:$4 sm:$0xff]   ;;  %v13913_v18 = vld [vmem:[%s17979_s1 + $0x5c8] ss:$16 sps:$4 sm:$0xff]  }
  0xa8   :  { %2559 = vmatmul.mubr.bf16.vlgmr.msra.gmra.mrb[0].mxu0 %v525_v21  ;;  %2805 = vmatmul.mubr.bf16.vlgmr.msra.gmra.mrb[0].mxu1 %v525_v21  ;;  %v13916_v21 = vld [vmem:[%s17979_s1 + $0x5e0] ss:$16 sps:$4 sm:$0xff]  }
  0xa9   :  { %2568 = vmatpush1.bf16.msra.mxu0 %v13826_v20  ;;  %2814 = vmatpush1.bf16.msra.mxu1 %v13829_v22  ;;  %v13921_v20 = vld [vmem:[%s17979_s1 + $0x5ec] ss:$16 sps:$4 sm:$0xff]   ;;  %v13919_v22 = vld [vmem:[%s17979_s1 + $0x5e8] ss:$16 sps:$4 sm:$0xff]  }
  0xaa   :  { %2569 = vmatprep.subr.bf16.mxu0 %v13834_v23  ;;  %2815 = vmatprep.subr.bf16.mxu1 %v13837_v24  ;;  %v13925_v23 = vld [vmem:[%s17979_s1 + $0x604] ss:$16 sps:$4 sm:$0xff]   ;;  %v13928_v24 = vld [vmem:[%s17979_s1 + $0x60c] ss:$16 sps:$4 sm:$0xff]  }
  0xab   :  { %2599 = vmatprep.mubr.bf16.mxu0 %v15175_v25  ;;  %2845 = vmatprep.mubr.bf16.mxu1 %v15175_v25 }
  0xad   :  { %2570 = vmatpush1.bf16.msra.mxu0 %v13832_v13  ;;  %2816 = vmatpush1.bf16.msra.mxu1 %v13835_v26  ;;  %v13923_v13 = vld [vmem:[%s17979_s1 + $0x600] ss:$16 sps:$4 sm:$0xff]   ;;  %v15364_v26 = vrot.slane %v15144_v14, %v14880_v49  ;;  %v528_v14 = vcombine.high %v15175_v25, %v15175_v25  ;;  %v13937_v25 = vld [vmem:[%s17979_s1 + $0x644] ss:$16 sps:$4 sm:$0xff]  }
  0xae   :  { %2571 = vmatprep.subr.bf16.mxu0 %v13840_v27  ;;  %2817 = vmatprep.subr.bf16.mxu1 %v13843_v28  ;;  %v13926_v27 = vld [vmem:[%s17979_s1 + $0x608] ss:$16 sps:$4 sm:$0xff]   ;;  %v13931_v28 = vld [vmem:[%s17979_s1 + $0x624] ss:$16 sps:$4 sm:$0xff]  }
  0xb1   :  { %2572 = vmatpush1.bf16.msra.mxu0 %v13838_v29  ;;  %2818 = vmatpush1.bf16.msra.mxu1 %v13841_v30  ;;  %v13934_v29 = vld [vmem:[%s17979_s1 + $0x62c] ss:$16 sps:$4 sm:$0xff]   ;;  %v13929_v30 = vld [vmem:[%s17979_s1 + $0x620] ss:$16 sps:$4 sm:$0xff]  }
  0xb2   :  { %2573 = vmatprep.subr.bf16.mxu0 %v13846_v31  ;;  %2819 = vmatprep.subr.bf16.mxu1 %v13849_v32  ;;  %v13932_v31 = vld [vmem:[%s17979_s1 + $0x628] ss:$16 sps:$4 sm:$0xff]   ;;  %v13940_v32 = vld [vmem:[%s17979_s1 + $0x64c] ss:$16 sps:$4 sm:$0xff]  }
  0xb5   :  { %2574 = vmatpush1.bf16.msra.mxu0 %v13844_v33  ;;  %2820 = vmatpush1.bf16.msra.mxu1 %v13847_v34  ;;  %v13935_v33 = vld [vmem:[%s17979_s1 + $0x640] ss:$16 sps:$4 sm:$0xff]   ;;  %v13938_v34 = vld [vmem:[%s17979_s1 + $0x648] ss:$16 sps:$4 sm:$0xff]  }
  0xb6   :  { %2575 = vmatprep.subr.bf16.mxu0 %v13852_v35  ;;  %2821 = vmatprep.subr.bf16.mxu1 %v13855_v36  ;;  %v13943_v35 = vld [vmem:[%s17979_s1 + $0x664] ss:$16 sps:$4 sm:$0xff]   ;;  %v13946_v36 = vld [vmem:[%s17979_s1 + $0x66c] ss:$16 sps:$4 sm:$0xff]  }
  0xb9   :  { %2576 = vmatpush1.bf16.msra.mxu0 %v13850_v37  ;;  %2822 = vmatpush1.bf16.msra.mxu1 %v13853_v38  ;;  %v13941_v37 = vld [vmem:[%s17979_s1 + $0x660] ss:$16 sps:$4 sm:$0xff]   ;;  %v13944_v38 = vld [vmem:[%s17979_s1 + $0x668] ss:$16 sps:$4 sm:$0xff]  }
  0xba   :  { %2577 = vmatprep.subr.bf16.mxu0 %v13858_v39  ;;  %2823 = vmatprep.subr.bf16.mxu1 %v13861_v40  ;;  %v13949_v39 = vld [vmem:[%s17979_s1 + $0x684] ss:$16 sps:$4 sm:$0xff]   ;;  %v13952_v40 = vld [vmem:[%s17979_s1 + $0x68c] ss:$16 sps:$4 sm:$0xff]  }
  0xbd   :  { %2578 = vmatpush1.bf16.msra.mxu0 %v13856_v41  ;;  %2824 = vmatpush1.bf16.msra.mxu1 %v13859_v43  ;;  %v13947_v41 = vld [vmem:[%s17979_s1 + $0x680] ss:$16 sps:$4 sm:$0xff]   ;;  %v13950_v43 = vld [vmem:[%s17979_s1 + $0x688] ss:$16 sps:$4 sm:$0xff]  }
  0xbe   :  { %2579 = vmatprep.subr.bf16.mxu0 %v13864_v44  ;;  %2825 = vmatprep.subr.bf16.mxu1 %v13867_v45  ;;  %v13955_v44 = vld [vmem:[%s17979_s1 + $0x6a4] ss:$16 sps:$4 sm:$0xff]   ;;  %v13958_v45 = vld [vmem:[%s17979_s1 + $0x6ac] ss:$16 sps:$4 sm:$0xff]  }
  0xc1   :  { %2580 = vmatpush1.bf16.msra.mxu0 %v13862_v46  ;;  %2826 = vmatpush1.bf16.msra.mxu1 %v13865_v47  ;;  %v13953_v46 = vld [vmem:[%s17979_s1 + $0x6a0] ss:$16 sps:$4 sm:$0xff]   ;;  %v13956_v47 = vld [vmem:[%s17979_s1 + $0x6a8] ss:$16 sps:$4 sm:$0xff]  }
  0xc2   :  { %2581 = vmatprep.subr.bf16.mxu0 %v13870_v48  ;;  %2827 = vmatprep.subr.bf16.mxu1 %v13873_v50  ;;  %v13961_v48 = vld [vmem:[%s17979_s1 + $0x6c4] ss:$16 sps:$4 sm:$0xff]   ;;  %v13964_v50 = vld [vmem:[%s17979_s1 + $0x6cc] ss:$16 sps:$4 sm:$0xff]  }
  0xc5   :  { %2582 = vmatpush1.bf16.msra.mxu0 %v13868_v51  ;;  %2828 = vmatpush1.bf16.msra.mxu1 %v13871_v53  ;;  %v13959_v51 = vld [vmem:[%s17979_s1 + $0x6c0] ss:$16 sps:$4 sm:$0xff]   ;;  %v13962_v53 = vld [vmem:[%s17979_s1 + $0x6c8] ss:$16 sps:$4 sm:$0xff]  }
  0xc6   :  { %2583 = vmatprep.subr.bf16.mxu0 %v13876_v54  ;;  %2829 = vmatprep.subr.bf16.mxu1 %v13879_v55  ;;  %v13967_v54 = vld [vmem:[%s17979_s1 + $0x6e4] ss:$16 sps:$4 sm:$0xff]   ;;  %v13970_v55 = vld [vmem:[%s17979_s1 + $0x6ec] ss:$16 sps:$4 sm:$0xff]  }
  0xc9   :  { %2584 = vmatpush1.bf16.msra.mxu0 %v13874_v56  ;;  %2830 = vmatpush1.bf16.msra.mxu1 %v13877_v57  ;;  %v13965_v56 = vld [vmem:[%s17979_s1 + $0x6e0] ss:$16 sps:$4 sm:$0xff]   ;;  %v13968_v57 = vld [vmem:[%s17979_s1 + $0x6e8] ss:$16 sps:$4 sm:$0xff]  }
  0xca   :  { %2585 = vmatprep.subr.bf16.mxu0 %v13882_v58  ;;  %2831 = vmatprep.subr.bf16.mxu1 %v13885_v59  ;;  %v13973_v58 = vld [vmem:[%s17979_s1 + $0x704] ss:$16 sps:$4 sm:$0xff]   ;;  %v13976_v59 = vld [vmem:[%s17979_s1 + $0x70c] ss:$16 sps:$4 sm:$0xff]  }
  0xcd   :  { %2586 = vmatpush1.bf16.msra.mxu0 %v13880_v60  ;;  %2832 = vmatpush1.bf16.msra.mxu1 %v13883_v61  ;;  %v13971_v60 = vld [vmem:[%s17979_s1 + $0x700] ss:$16 sps:$4 sm:$0xff]   ;;  %v13974_v61 = vld [vmem:[%s17979_s1 + $0x708] ss:$16 sps:$4 sm:$0xff]  }
  0xce   :  { %2587 = vmatprep.subr.bf16.mxu0 %v13888_v62  ;;  %2833 = vmatprep.subr.bf16.mxu1 %v13891_v63  ;;  %v13979_v62 = vld [vmem:[%s17979_s1 + $0x724] ss:$16 sps:$4 sm:$0xff]   ;;  %v13982_v63 = vld [vmem:[%s17979_s1 + $0x72c] ss:$16 sps:$4 sm:$0xff]  }
  0xd1   :  { %2588 = vmatpush1.bf16.msra.mxu0 %v13886_v0  ;;  %2834 = vmatpush1.bf16.msra.mxu1 %v13889_v1  ;;  %v13977_v0 = vld [vmem:[%s17979_s1 + $0x720] ss:$16 sps:$4 sm:$0xff]   ;;  %v13980_v1 = vld [vmem:[%s17979_s1 + $0x728] ss:$16 sps:$4 sm:$0xff]  }
  0xd2   :  { %2589 = vmatprep.subr.bf16.mxu0 %v13894_v2  ;;  %2835 = vmatprep.subr.bf16.mxu1 %v13897_v3  ;;  %v13985_v2 = vld [vmem:[%s17979_s1 + $0x744] ss:$16 sps:$4 sm:$0xff]   ;;  %v13988_v3 = vld [vmem:[%s17979_s1 + $0x74c] ss:$16 sps:$4 sm:$0xff]  }
  0xd5   :  { %2590 = vmatpush1.bf16.msra.mxu0 %v13892_v4  ;;  %2836 = vmatpush1.bf16.msra.mxu1 %v13895_v5  ;;  %v13983_v4 = vld [vmem:[%s17979_s1 + $0x740] ss:$16 sps:$4 sm:$0xff]   ;;  %v13986_v5 = vld [vmem:[%s17979_s1 + $0x748] ss:$16 sps:$4 sm:$0xff]  }
  0xd6   :  { %2591 = vmatprep.subr.bf16.mxu0 %v13900_v6  ;;  %2837 = vmatprep.subr.bf16.mxu1 %v13903_v7  ;;  %v13991_v6 = vld [vmem:[%s17979_s1 + $0x764] ss:$16 sps:$4 sm:$0xff]   ;;  %v13994_v7 = vld [vmem:[%s17979_s1 + $0x76c] ss:$16 sps:$4 sm:$0xff]  }
  0xd9   :  { %2592 = vmatpush1.bf16.msra.mxu0 %v13898_v8  ;;  %2838 = vmatpush1.bf16.msra.mxu1 %v13901_v9  ;;  %v13989_v8 = vld [vmem:[%s17979_s1 + $0x760] ss:$16 sps:$4 sm:$0xff]   ;;  %v13992_v9 = vld [vmem:[%s17979_s1 + $0x768] ss:$16 sps:$4 sm:$0xff]  }
  0xda   :  { %2593 = vmatprep.subr.bf16.mxu0 %v13906_v10  ;;  %2839 = vmatprep.subr.bf16.mxu1 %v13909_v11  ;;  %v13997_v10 = vld [vmem:[%s17979_s1 + $0x784] ss:$16 sps:$4 sm:$0xff]   ;;  %v14000_v11 = vld [vmem:[%s17979_s1 + $0x78c] ss:$16 sps:$4 sm:$0xff]  }
  0xdd   :  { %2594 = vmatpush1.bf16.msra.mxu0 %v13904_v12  ;;  %2840 = vmatpush1.bf16.msra.mxu1 %v13907_v52  ;;  %v13995_v12 = vld [vmem:[%s17979_s1 + $0x780] ss:$16 sps:$4 sm:$0xff]   ;;  %v13998_v52 = vld [vmem:[%s17979_s1 + $0x788] ss:$16 sps:$4 sm:$0xff]  }
  0xde   :  { %2595 = vmatprep.subr.bf16.mxu0 %v13912_v15  ;;  %2841 = vmatprep.subr.bf16.mxu1 %v13915_v16  ;;  %v14003_v15 = vld [vmem:[%s17979_s1 + $0x7a4] ss:$16 sps:$4 sm:$0xff]   ;;  %v14006_v16 = vld [vmem:[%s17979_s1 + $0x7ac] ss:$16 sps:$4 sm:$0xff]  }
  0xe1   :  { %2596 = vmatpush1.bf16.msra.mxu0 %v13910_v17  ;;  %2842 = vmatpush1.bf16.msra.mxu1 %v13913_v18  ;;  %v14001_v17 = vld [vmem:[%s17979_s1 + $0x7a0] ss:$16 sps:$4 sm:$0xff]   ;;  %v14004_v18 = vld [vmem:[%s17979_s1 + $0x7a8] ss:$16 sps:$4 sm:$0xff]  }
  0xe2   :  { %2597 = vmatprep.subr.bf16.mxu0 %v13918_v19  ;;  %2843 = vmatprep.subr.bf16.mxu1 %v13921_v20  ;;  %v14009_v19 = vld [vmem:[%s17979_s1 + $0x7c4] ss:$16 sps:$4 sm:$0xff]   ;;  %v14012_v20 = vld [vmem:[%s17979_s1 + $0x7cc] ss:$16 sps:$4 sm:$0xff]  }
  0xe5   :  { %2598 = vmatpush1.bf16.msra.mxu0 %v13916_v21  ;;  %2844 = vmatpush1.bf16.msra.mxu1 %v13919_v22  ;;  %v14007_v21 = vld [vmem:[%s17979_s1 + $0x7c0] ss:$16 sps:$4 sm:$0xff]   ;;  %v14010_v22 = vld [vmem:[%s17979_s1 + $0x7c8] ss:$16 sps:$4 sm:$0xff]  }
  0xe6   :  { %2608 = vmatprep.subr.bf16.mxu0 %v13925_v23  ;;  %2854 = vmatprep.subr.bf16.mxu1 %v13928_v24  ;;  %v14015_v23 = vld [vmem:[%s17979_s1 + $0x7e4] ss:$16 sps:$4 sm:$0xff]   ;;  %v14018_v24 = vld [vmem:[%s17979_s1 + $0x7ec] ss:$16 sps:$4 sm:$0xff]  }
  0xe8   :  { %2600 = vmatmul.mubr.bf16.vlgmr.msra.gmra.mrb[0].mxu0 %v15364_v26  ;;  %2846 = vmatmul.mubr.bf16.vlgmr.msra.gmra.mrb[0].mxu1 %v15364_v26 }
  0xe9   :  { %2609 = vmatpush1.bf16.msra.mxu0 %v13923_v13  ;;  %2855 = vmatpush1.bf16.msra.mxu1 %v13926_v27  ;;  %v15550_v13 = vld.sshfl [vmem:[%s17978_s0 + $0x8] sm:$0x33 pattern:$0x75316420]  ;;  %v14013_v27 = vld [vmem:[%s17979_s1 + $0x7e0] ss:$16 sps:$4 sm:$0xff]  }
  0xea   :  { %2610 = vmatprep.subr.bf16.mxu0 %v13931_v28  ;;  %2856 = vmatprep.subr.bf16.mxu1 %v13934_v29  ;;  %v14016_v28 = vld [vmem:[%s17979_s1 + $0x7e8] ss:$16 sps:$4 sm:$0xff]   ;;  %v14021_v29 = vld [vmem:[%s17979_s1 + $0x804] ss:$16 sps:$4 sm:$0xff]  }
  0xeb   :  { %2640 = vmatprep.mubr.bf16.mxu0 %v528_v14  ;;  %2886 = vmatprep.mubr.bf16.mxu1 %v528_v14  ;;  %v14024_v14 = vld [vmem:[%s17979_s1 + $0x80c] ss:$16 sps:$4 sm:$0xff]  }
  0xed   :  { %2611 = vmatpush1.bf16.msra.mxu0 %v13929_v30  ;;  %2857 = vmatpush1.bf16.msra.mxu1 %v13932_v31  ;;  %v14019_v30 = vld [vmem:[%s17979_s1 + $0x800] ss:$16 sps:$4 sm:$0xff]   ;;  %v536_v31 = vcombine.high %v15550_v13, %v15550_v13 }
  0xee   :  { %2612 = vmatprep.subr.bf16.mxu0 %v13937_v25  ;;  %2858 = vmatprep.subr.bf16.mxu1 %v13940_v32  ;;  %v14022_v25 = vld [vmem:[%s17979_s1 + $0x808] ss:$16 sps:$4 sm:$0xff]   ;;  %v526_v32 = vcombine.high %v15364_v26, %v15364_v26  ;;  %v14025_v26 = vld [vmem:[%s17979_s1 + $0x820] ss:$16 sps:$4 sm:$0xff]  }
  0xf1   :  { %2613 = vmatpush1.bf16.msra.mxu0 %v13935_v33  ;;  %2859 = vmatpush1.bf16.msra.mxu1 %v13938_v34  ;;  %v14027_v33 = vld [vmem:[%s17979_s1 + $0x824] ss:$16 sps:$4 sm:$0xff]   ;;  %v14030_v34 = vld [vmem:[%s17979_s1 + $0x82c] ss:$16 sps:$4 sm:$0xff]  }
  0xf2   :  { %2614 = vmatprep.subr.bf16.mxu0 %v13943_v35  ;;  %2860 = vmatprep.subr.bf16.mxu1 %v13946_v36  ;;  %v15581_v35 = vrot.slane %v536_v31, %v14880_v49  ;;  %v14028_v36 = vld [vmem:[%s17979_s1 + $0x828] ss:$16 sps:$4 sm:$0xff]   ;;  %v14114_v31 = vld [vmem:[%s17979_s1 + $0x9ec] ss:$16 sps:$4 sm:$0xff]  }
  0xf5   :  { %2615 = vmatpush1.bf16.msra.mxu0 %v13941_v37  ;;  %2861 = vmatpush1.bf16.msra.mxu1 %v13944_v38  ;;  %v14033_v37 = vld [vmem:[%s17979_s1 + $0x844] ss:$16 sps:$4 sm:$0xff]   ;;  %v14036_v38 = vld [vmem:[%s17979_s1 + $0x84c] ss:$16 sps:$4 sm:$0xff]  }
  0xf6   :  { %2616 = vmatprep.subr.bf16.mxu0 %v13949_v39  ;;  %2862 = vmatprep.subr.bf16.mxu1 %v13952_v40  ;;  %v14031_v39 = vld [vmem:[%s17979_s1 + $0x840] ss:$16 sps:$4 sm:$0xff]   ;;  %v14034_v40 = vld [vmem:[%s17979_s1 + $0x848] ss:$16 sps:$4 sm:$0xff]  }
  0xf9   :  { %2617 = vmatpush1.bf16.msra.mxu0 %v13947_v41  ;;  %2863 = vmatpush1.bf16.msra.mxu1 %v13950_v43  ;;  %v14039_v41 = vld [vmem:[%s17979_s1 + $0x864] ss:$16 sps:$4 sm:$0xff]   ;;  %v14042_v43 = vld [vmem:[%s17979_s1 + $0x86c] ss:$16 sps:$4 sm:$0xff]  }
  0xfa   :  { %2618 = vmatprep.subr.bf16.mxu0 %v13955_v44  ;;  %2864 = vmatprep.subr.bf16.mxu1 %v13958_v45  ;;  %v14037_v44 = vld [vmem:[%s17979_s1 + $0x860] ss:$16 sps:$4 sm:$0xff]   ;;  %v14040_v45 = vld [vmem:[%s17979_s1 + $0x868] ss:$16 sps:$4 sm:$0xff]  }
  0xfd   :  { %2619 = vmatpush1.bf16.msra.mxu0 %v13953_v46  ;;  %2865 = vmatpush1.bf16.msra.mxu1 %v13956_v47  ;;  %v14045_v46 = vld [vmem:[%s17979_s1 + $0x884] ss:$16 sps:$4 sm:$0xff]   ;;  %v14048_v47 = vld [vmem:[%s17979_s1 + $0x88c] ss:$16 sps:$4 sm:$0xff]  }
  0xfe   :  { %2620 = vmatprep.subr.bf16.mxu0 %v13961_v48  ;;  %2866 = vmatprep.subr.bf16.mxu1 %v13964_v50  ;;  %v14043_v48 = vld [vmem:[%s17979_s1 + $0x880] ss:$16 sps:$4 sm:$0xff]   ;;  %v14046_v50 = vld [vmem:[%s17979_s1 + $0x888] ss:$16 sps:$4 sm:$0xff]  }
 0x101   :  { %2621 = vmatpush1.bf16.msra.mxu0 %v13959_v51  ;;  %2867 = vmatpush1.bf16.msra.mxu1 %v13962_v53  ;;  %v14051_v51 = vld [vmem:[%s17979_s1 + $0x8a4] ss:$16 sps:$4 sm:$0xff]   ;;  %v14054_v53 = vld [vmem:[%s17979_s1 + $0x8ac] ss:$16 sps:$4 sm:$0xff]  }
 0x102   :  { %2622 = vmatprep.subr.bf16.mxu0 %v13967_v54  ;;  %2868 = vmatprep.subr.bf16.mxu1 %v13970_v55  ;;  %v14049_v54 = vld [vmem:[%s17979_s1 + $0x8a0] ss:$16 sps:$4 sm:$0xff]   ;;  %v14052_v55 = vld [vmem:[%s17979_s1 + $0x8a8] ss:$16 sps:$4 sm:$0xff]  }
 0x105   :  { %2623 = vmatpush1.bf16.msra.mxu0 %v13965_v56  ;;  %2869 = vmatpush1.bf16.msra.mxu1 %v13968_v57  ;;  %v14057_v56 = vld [vmem:[%s17979_s1 + $0x8c4] ss:$16 sps:$4 sm:$0xff]   ;;  %v14060_v57 = vld [vmem:[%s17979_s1 + $0x8cc] ss:$16 sps:$4 sm:$0xff]  }
 0x106   :  { %2624 = vmatprep.subr.bf16.mxu0 %v13973_v58  ;;  %2870 = vmatprep.subr.bf16.mxu1 %v13976_v59  ;;  %v14055_v58 = vld [vmem:[%s17979_s1 + $0x8c0] ss:$16 sps:$4 sm:$0xff]   ;;  %v14058_v59 = vld [vmem:[%s17979_s1 + $0x8c8] ss:$16 sps:$4 sm:$0xff]  }
 0x109   :  { %2625 = vmatpush1.bf16.msra.mxu0 %v13971_v60  ;;  %2871 = vmatpush1.bf16.msra.mxu1 %v13974_v61  ;;  %v14063_v60 = vld [vmem:[%s17979_s1 + $0x8e4] ss:$16 sps:$4 sm:$0xff]   ;;  %v14066_v61 = vld [vmem:[%s17979_s1 + $0x8ec] ss:$16 sps:$4 sm:$0xff]  }
 0x10a   :  { %2626 = vmatprep.subr.bf16.mxu0 %v13979_v62  ;;  %2872 = vmatprep.subr.bf16.mxu1 %v13982_v63  ;;  %v14061_v62 = vld [vmem:[%s17979_s1 + $0x8e0] ss:$16 sps:$4 sm:$0xff]   ;;  %v14064_v63 = vld [vmem:[%s17979_s1 + $0x8e8] ss:$16 sps:$4 sm:$0xff]  }
 0x10d   :  { %2627 = vmatpush1.bf16.msra.mxu0 %v13977_v0  ;;  %2873 = vmatpush1.bf16.msra.mxu1 %v13980_v1  ;;  %v14069_v0 = vld [vmem:[%s17979_s1 + $0x904] ss:$16 sps:$4 sm:$0xff]   ;;  %v14072_v1 = vld [vmem:[%s17979_s1 + $0x90c] ss:$16 sps:$4 sm:$0xff]  }
 0x10e   :  { %2628 = vmatprep.subr.bf16.mxu0 %v13985_v2  ;;  %2874 = vmatprep.subr.bf16.mxu1 %v13988_v3  ;;  %v14067_v2 = vld [vmem:[%s17979_s1 + $0x900] ss:$16 sps:$4 sm:$0xff]   ;;  %v14070_v3 = vld [vmem:[%s17979_s1 + $0x908] ss:$16 sps:$4 sm:$0xff]  }
 0x111   :  { %2629 = vmatpush1.bf16.msra.mxu0 %v13983_v4  ;;  %2875 = vmatpush1.bf16.msra.mxu1 %v13986_v5  ;;  %v14075_v4 = vld [vmem:[%s17979_s1 + $0x924] ss:$16 sps:$4 sm:$0xff]   ;;  %v14078_v5 = vld [vmem:[%s17979_s1 + $0x92c] ss:$16 sps:$4 sm:$0xff]  }
 0x112   :  { %2630 = vmatprep.subr.bf16.mxu0 %v13991_v6  ;;  %2876 = vmatprep.subr.bf16.mxu1 %v13994_v7  ;;  %v14073_v6 = vld [vmem:[%s17979_s1 + $0x920] ss:$16 sps:$4 sm:$0xff]   ;;  %v14076_v7 = vld [vmem:[%s17979_s1 + $0x928] ss:$16 sps:$4 sm:$0xff]  }
 0x115   :  { %2631 = vmatpush1.bf16.msra.mxu0 %v13989_v8  ;;  %2877 = vmatpush1.bf16.msra.mxu1 %v13992_v9  ;;  %v14081_v8 = vld [vmem:[%s17979_s1 + $0x944] ss:$16 sps:$4 sm:$0xff]   ;;  %v14084_v9 = vld [vmem:[%s17979_s1 + $0x94c] ss:$16 sps:$4 sm:$0xff]  }
 0x116   :  { %2632 = vmatprep.subr.bf16.mxu0 %v13997_v10  ;;  %2878 = vmatprep.subr.bf16.mxu1 %v14000_v11  ;;  %v14079_v10 = vld [vmem:[%s17979_s1 + $0x940] ss:$16 sps:$4 sm:$0xff]   ;;  %v14082_v11 = vld [vmem:[%s17979_s1 + $0x948] ss:$16 sps:$4 sm:$0xff]  }
 0x119   :  { %2633 = vmatpush1.bf16.msra.mxu0 %v13995_v12  ;;  %2879 = vmatpush1.bf16.msra.mxu1 %v13998_v52  ;;  %v14087_v12 = vld [vmem:[%s17979_s1 + $0x964] ss:$16 sps:$4 sm:$0xff]   ;;  %v14090_v52 = vld [vmem:[%s17979_s1 + $0x96c] ss:$16 sps:$4 sm:$0xff]  }
 0x11a   :  { %2634 = vmatprep.subr.bf16.mxu0 %v14003_v15  ;;  %2880 = vmatprep.subr.bf16.mxu1 %v14006_v16  ;;  %v14085_v15 = vld [vmem:[%s17979_s1 + $0x960] ss:$16 sps:$4 sm:$0xff]   ;;  %v14088_v16 = vld [vmem:[%s17979_s1 + $0x968] ss:$16 sps:$4 sm:$0xff]  }
 0x11d   :  { %2635 = vmatpush1.bf16.msra.mxu0 %v14001_v17  ;;  %2881 = vmatpush1.bf16.msra.mxu1 %v14004_v18  ;;  %v14093_v17 = vld [vmem:[%s17979_s1 + $0x984] ss:$16 sps:$4 sm:$0xff]   ;;  %v14096_v18 = vld [vmem:[%s17979_s1 + $0x98c] ss:$16 sps:$4 sm:$0xff]  }
 0x11e   :  { %2636 = vmatprep.subr.bf16.mxu0 %v14009_v19  ;;  %2882 = vmatprep.subr.bf16.mxu1 %v14012_v20  ;;  %v14091_v19 = vld [vmem:[%s17979_s1 + $0x980] ss:$16 sps:$4 sm:$0xff]   ;;  %v14094_v20 = vld [vmem:[%s17979_s1 + $0x988] ss:$16 sps:$4 sm:$0xff]  }
 0x121   :  { %2637 = vmatpush1.bf16.msra.mxu0 %v14007_v21  ;;  %2883 = vmatpush1.bf16.msra.mxu1 %v14010_v22  ;;  %v14099_v21 = vld [vmem:[%s17979_s1 + $0x9a4] ss:$16 sps:$4 sm:$0xff]   ;;  %v14102_v22 = vld [vmem:[%s17979_s1 + $0x9ac] ss:$16 sps:$4 sm:$0xff]  }
 0x122   :  { %2638 = vmatprep.subr.bf16.mxu0 %v14015_v23  ;;  %2884 = vmatprep.subr.bf16.mxu1 %v14018_v24  ;;  %v14097_v23 = vld [vmem:[%s17979_s1 + $0x9a0] ss:$16 sps:$4 sm:$0xff]   ;;  %v14100_v24 = vld [vmem:[%s17979_s1 + $0x9a8] ss:$16 sps:$4 sm:$0xff]  }
 0x125   :  { %2639 = vmatpush1.bf16.msra.mxu0 %v14013_v27  ;;  %2885 = vmatpush1.bf16.msra.mxu1 %v14016_v28  ;;  %v14105_v27 = vld [vmem:[%s17979_s1 + $0x9c4] ss:$16 sps:$4 sm:$0xff]   ;;  %v14108_v28 = vld [vmem:[%s17979_s1 + $0x9cc] ss:$16 sps:$4 sm:$0xff]  }
 0x126   :  { %2649 = vmatprep.subr.bf16.mxu0 %v14021_v29  ;;  %2895 = vmatprep.subr.bf16.mxu1 %v14024_v14  ;;  %v14103_v29 = vld [vmem:[%s17979_s1 + $0x9c0] ss:$16 sps:$4 sm:$0xff]   ;;  %v14106_v14 = vld [vmem:[%s17979_s1 + $0x9c8] ss:$16 sps:$4 sm:$0xff]  }
 0x128   :  { %2641 = vmatmul.mubr.bf16.vlgmr.msra.gmra.mrb[0].mxu0 %v526_v32  ;;  %2887 = vmatmul.mubr.bf16.vlgmr.msra.gmra.mrb[0].mxu1 %v526_v32  ;;  %v14112_v32 = vld [vmem:[%s17979_s1 + $0x9e8] ss:$16 sps:$4 sm:$0xff]  }
 0x129   :  { %2650 = vmatpush1.bf16.msra.mxu0 %v14019_v30  ;;  %2896 = vmatpush1.bf16.msra.mxu1 %v14022_v25  ;;  %v14111_v30 = vld [vmem:[%s17979_s1 + $0x9e4] ss:$16 sps:$4 sm:$0xff]   ;;  %v14109_v25 = vld [vmem:[%s17979_s1 + $0x9e0] ss:$16 sps:$4 sm:$0xff]  }
 0x12a   :  { %2651 = vmatprep.subr.bf16.mxu0 %v14027_v33  ;;  %2897 = vmatprep.subr.bf16.mxu1 %v14030_v34  ;;  %v14117_v33 = vld [vmem:[%s17979_s1 + $0xa04] ss:$16 sps:$4 sm:$0xff]   ;;  %v14120_v34 = vld [vmem:[%s17979_s1 + $0xa0c] ss:$16 sps:$4 sm:$0xff]  }
 0x12b   :  { %2681 = vmatprep.mubr.bf16.mxu0 %v15581_v35  ;;  %2927 = vmatprep.mubr.bf16.mxu1 %v15581_v35 }
 0x12d   :  { %2652 = vmatpush1.bf16.msra.mxu0 %v14025_v26  ;;  %2898 = vmatpush1.bf16.msra.mxu1 %v14028_v36  ;;  %v14115_v26 = vld [vmem:[%s17979_s1 + $0xa00] ss:$16 sps:$4 sm:$0xff]   ;;  %v14118_v36 = vld [vmem:[%s17979_s1 + $0xa08] ss:$16 sps:$4 sm:$0xff]  }
 0x12e   :  { %2653 = vmatprep.subr.bf16.mxu0 %v14033_v37  ;;  %2899 = vmatprep.subr.bf16.mxu1 %v14036_v38  ;;  %v15773_v37 = vrot.slane %v15550_v13, %v14880_v49  ;;  %v14123_v38 = vld [vmem:[%s17979_s1 + $0xa24] ss:$16 sps:$4 sm:$0xff]   ;;  %v14124_v49 = vld [vmem:[%s17979_s1 + $0xa28] ss:$16 sps:$4 sm:$0xff]   ;;  %v552_v13 = vcombine.high %v15581_v35, %v15581_v35  ;;  %v14127_v35 = vld [vmem:[%s17979_s1 + $0xa40] ss:$16 sps:$4 sm:$0xff]  }
 0x131   :  { %2654 = vmatpush1.bf16.msra.mxu0 %v14031_v39  ;;  %2900 = vmatpush1.bf16.msra.mxu1 %v14034_v40  ;;  %v14126_v39 = vld [vmem:[%s17979_s1 + $0xa2c] ss:$16 sps:$4 sm:$0xff]   ;;  %v14121_v40 = vld [vmem:[%s17979_s1 + $0xa20] ss:$16 sps:$4 sm:$0xff]  }
 0x132   :  { %2655 = vmatprep.subr.bf16.mxu0 %v14039_v41  ;;  %2901 = vmatprep.subr.bf16.mxu1 %v14042_v43  ;;  %v14129_v41 = vld [vmem:[%s17979_s1 + $0xa44] ss:$16 sps:$4 sm:$0xff]   ;;  %v14132_v43 = vld [vmem:[%s17979_s1 + $0xa4c] ss:$16 sps:$4 sm:$0xff]  }
 0x135   :  { %2656 = vmatpush1.bf16.msra.mxu0 %v14037_v44  ;;  %2902 = vmatpush1.bf16.msra.mxu1 %v14040_v45  ;;  %v14130_v44 = vld [vmem:[%s17979_s1 + $0xa48] ss:$16 sps:$4 sm:$0xff]   ;;  %v14135_v45 = vld [vmem:[%s17979_s1 + $0xa64] ss:$16 sps:$4 sm:$0xff]  }
 0x136   :  { %2657 = vmatprep.subr.bf16.mxu0 %v14045_v46  ;;  %2903 = vmatprep.subr.bf16.mxu1 %v14048_v47  ;;  %v14138_v46 = vld [vmem:[%s17979_s1 + $0xa6c] ss:$16 sps:$4 sm:$0xff]   ;;  %v14133_v47 = vld [vmem:[%s17979_s1 + $0xa60] ss:$16 sps:$4 sm:$0xff]  }
 0x139   :  { %2658 = vmatpush1.bf16.msra.mxu0 %v14043_v48  ;;  %2904 = vmatpush1.bf16.msra.mxu1 %v14046_v50  ;;  %v14136_v48 = vld [vmem:[%s17979_s1 + $0xa68] ss:$16 sps:$4 sm:$0xff]   ;;  %v14141_v50 = vld [vmem:[%s17979_s1 + $0xa84] ss:$16 sps:$4 sm:$0xff]  }
 0x13a   :  { %2659 = vmatprep.subr.bf16.mxu0 %v14051_v51  ;;  %2905 = vmatprep.subr.bf16.mxu1 %v14054_v53  ;;  %v14144_v51 = vld [vmem:[%s17979_s1 + $0xa8c] ss:$16 sps:$4 sm:$0xff]   ;;  %v14139_v53 = vld [vmem:[%s17979_s1 + $0xa80] ss:$16 sps:$4 sm:$0xff]  }
 0x13d   :  { %2660 = vmatpush1.bf16.msra.mxu0 %v14049_v54  ;;  %2906 = vmatpush1.bf16.msra.mxu1 %v14052_v55  ;;  %v14142_v54 = vld [vmem:[%s17979_s1 + $0xa88] ss:$16 sps:$4 sm:$0xff]   ;;  %v14147_v55 = vld [vmem:[%s17979_s1 + $0xaa4] ss:$16 sps:$4 sm:$0xff]  }
 0x13e   :  { %2661 = vmatprep.subr.bf16.mxu0 %v14057_v56  ;;  %2907 = vmatprep.subr.bf16.mxu1 %v14060_v57  ;;  %v14150_v56 = vld [vmem:[%s17979_s1 + $0xaac] ss:$16 sps:$4 sm:$0xff]   ;;  %v14145_v57 = vld [vmem:[%s17979_s1 + $0xaa0] ss:$16 sps:$4 sm:$0xff]  }
 0x141   :  { %2662 = vmatpush1.bf16.msra.mxu0 %v14055_v58  ;;  %2908 = vmatpush1.bf16.msra.mxu1 %v14058_v59  ;;  %v14148_v58 = vld [vmem:[%s17979_s1 + $0xaa8] ss:$16 sps:$4 sm:$0xff]   ;;  %v14153_v59 = vld [vmem:[%s17979_s1 + $0xac4] ss:$16 sps:$4 sm:$0xff]  }
 0x142   :  { %2663 = vmatprep.subr.bf16.mxu0 %v14063_v60  ;;  %2909 = vmatprep.subr.bf16.mxu1 %v14066_v61  ;;  %v14156_v60 = vld [vmem:[%s17979_s1 + $0xacc] ss:$16 sps:$4 sm:$0xff]   ;;  %v14151_v61 = vld [vmem:[%s17979_s1 + $0xac0] ss:$16 sps:$4 sm:$0xff]  }
 0x145   :  { %2664 = vmatpush1.bf16.msra.mxu0 %v14061_v62  ;;  %2910 = vmatpush1.bf16.msra.mxu1 %v14064_v63  ;;  %v14154_v62 = vld [vmem:[%s17979_s1 + $0xac8] ss:$16 sps:$4 sm:$0xff]   ;;  %v14159_v63 = vld [vmem:[%s17979_s1 + $0xae4] ss:$16 sps:$4 sm:$0xff]  }
 0x146   :  { %2665 = vmatprep.subr.bf16.mxu0 %v14069_v0  ;;  %2911 = vmatprep.subr.bf16.mxu1 %v14072_v1  ;;  %v14162_v0 = vld [vmem:[%s17979_s1 + $0xaec] ss:$16 sps:$4 sm:$0xff]   ;;  %v14157_v1 = vld [vmem:[%s17979_s1 + $0xae0] ss:$16 sps:$4 sm:$0xff]  }
 0x149   :  { %2666 = vmatpush1.bf16.msra.mxu0 %v14067_v2  ;;  %2912 = vmatpush1.bf16.msra.mxu1 %v14070_v3  ;;  %v14160_v2 = vld [vmem:[%s17979_s1 + $0xae8] ss:$16 sps:$4 sm:$0xff]   ;;  %v14165_v3 = vld [vmem:[%s17979_s1 + $0xb04] ss:$16 sps:$4 sm:$0xff]  }
 0x14a   :  { %2667 = vmatprep.subr.bf16.mxu0 %v14075_v4  ;;  %2913 = vmatprep.subr.bf16.mxu1 %v14078_v5  ;;  %v14168_v4 = vld [vmem:[%s17979_s1 + $0xb0c] ss:$16 sps:$4 sm:$0xff]   ;;  %v14163_v5 = vld [vmem:[%s17979_s1 + $0xb00] ss:$16 sps:$4 sm:$0xff]  }
 0x14d   :  { %2668 = vmatpush1.bf16.msra.mxu0 %v14073_v6  ;;  %2914 = vmatpush1.bf16.msra.mxu1 %v14076_v7  ;;  %v14166_v6 = vld [vmem:[%s17979_s1 + $0xb08] ss:$16 sps:$4 sm:$0xff]   ;;  %v14171_v7 = vld [vmem:[%s17979_s1 + $0xb24] ss:$16 sps:$4 sm:$0xff]  }
 0x14e   :  { %2669 = vmatprep.subr.bf16.mxu0 %v14081_v8  ;;  %2915 = vmatprep.subr.bf16.mxu1 %v14084_v9  ;;  %v14174_v8 = vld [vmem:[%s17979_s1 + $0xb2c] ss:$16 sps:$4 sm:$0xff]   ;;  %v14169_v9 = vld [vmem:[%s17979_s1 + $0xb20] ss:$16 sps:$4 sm:$0xff]  }
 0x151   :  { %2670 = vmatpush1.bf16.msra.mxu0 %v14079_v10  ;;  %2916 = vmatpush1.bf16.msra.mxu1 %v14082_v11  ;;  %v14172_v10 = vld [vmem:[%s17979_s1 + $0xb28] ss:$16 sps:$4 sm:$0xff]   ;;  %v14177_v11 = vld [vmem:[%s17979_s1 + $0xb44] ss:$16 sps:$4 sm:$0xff]  }
 0x152   :  { %2671 = vmatprep.subr.bf16.mxu0 %v14087_v12  ;;  %2917 = vmatprep.subr.bf16.mxu1 %v14090_v52  ;;  %v14180_v12 = vld [vmem:[%s17979_s1 + $0xb4c] ss:$16 sps:$4 sm:$0xff]   ;;  %v14175_v52 = vld [vmem:[%s17979_s1 + $0xb40] ss:$16 sps:$4 sm:$0xff]  }
 0x155   :  { %2672 = vmatpush1.bf16.msra.mxu0 %v14085_v15  ;;  %2918 = vmatpush1.bf16.msra.mxu1 %v14088_v16  ;;  %v14178_v15 = vld [vmem:[%s17979_s1 + $0xb48] ss:$16 sps:$4 sm:$0xff]   ;;  %v14183_v16 = vld [vmem:[%s17979_s1 + $0xb64] ss:$16 sps:$4 sm:$0xff]  }
 0x156   :  { %2673 = vmatprep.subr.bf16.mxu0 %v14093_v17  ;;  %2919 = vmatprep.subr.bf16.mxu1 %v14096_v18  ;;  %v14186_v17 = vld [vmem:[%s17979_s1 + $0xb6c] ss:$16 sps:$4 sm:$0xff]   ;;  %v14181_v18 = vld [vmem:[%s17979_s1 + $0xb60] ss:$16 sps:$4 sm:$0xff]  }
 0x159   :  { %2674 = vmatpush1.bf16.msra.mxu0 %v14091_v19  ;;  %2920 = vmatpush1.bf16.msra.mxu1 %v14094_v20  ;;  %v14184_v19 = vld [vmem:[%s17979_s1 + $0xb68] ss:$16 sps:$4 sm:$0xff]   ;;  %v14189_v20 = vld [vmem:[%s17979_s1 + $0xb84] ss:$16 sps:$4 sm:$0xff]  }
 0x15a   :  { %2675 = vmatprep.subr.bf16.mxu0 %v14099_v21  ;;  %2921 = vmatprep.subr.bf16.mxu1 %v14102_v22  ;;  %v14192_v21 = vld [vmem:[%s17979_s1 + $0xb8c] ss:$16 sps:$4 sm:$0xff]   ;;  %v14187_v22 = vld [vmem:[%s17979_s1 + $0xb80] ss:$16 sps:$4 sm:$0xff]  }
 0x15d   :  { %2676 = vmatpush1.bf16.msra.mxu0 %v14097_v23  ;;  %2922 = vmatpush1.bf16.msra.mxu1 %v14100_v24  ;;  %v14190_v23 = vld [vmem:[%s17979_s1 + $0xb88] ss:$16 sps:$4 sm:$0xff]   ;;  %v14195_v24 = vld [vmem:[%s17979_s1 + $0xba4] ss:$16 sps:$4 sm:$0xff]  }
 0x15e   :  { %2677 = vmatprep.subr.bf16.mxu0 %v14105_v27  ;;  %2923 = vmatprep.subr.bf16.mxu1 %v14108_v28  ;;  %v14198_v27 = vld [vmem:[%s17979_s1 + $0xbac] ss:$16 sps:$4 sm:$0xff]   ;;  %v14193_v28 = vld [vmem:[%s17979_s1 + $0xba0] ss:$16 sps:$4 sm:$0xff]  }
 0x161   :  { %2678 = vmatpush1.bf16.msra.mxu0 %v14103_v29  ;;  %2924 = vmatpush1.bf16.msra.mxu1 %v14106_v14  ;;  %v14196_v29 = vld [vmem:[%s17979_s1 + $0xba8] ss:$16 sps:$4 sm:$0xff]   ;;  %v14201_v14 = vld [vmem:[%s17979_s1 + $0xbc4] ss:$16 sps:$4 sm:$0xff]  }
 0x162   :  { %2679 = vmatprep.subr.bf16.mxu0 %v14111_v30  ;;  %2925 = vmatprep.subr.bf16.mxu1 %v14114_v31  ;;  %v14204_v30 = vld [vmem:[%s17979_s1 + $0xbcc] ss:$16 sps:$4 sm:$0xff]   ;;  %v14199_v31 = vld [vmem:[%s17979_s1 + $0xbc0] ss:$16 sps:$4 sm:$0xff]  }
 0x165   :  { %2680 = vmatpush1.bf16.msra.mxu0 %v14109_v25  ;;  %2926 = vmatpush1.bf16.msra.mxu1 %v14112_v32  ;;  %v14202_v25 = vld [vmem:[%s17979_s1 + $0xbc8] ss:$16 sps:$4 sm:$0xff]   ;;  %v14207_v32 = vld [vmem:[%s17979_s1 + $0xbe4] ss:$16 sps:$4 sm:$0xff]  }
 0x166   :  { %2690 = vmatprep.subr.bf16.mxu0 %v14117_v33  ;;  %2936 = vmatprep.subr.bf16.mxu1 %v14120_v34  ;;  %v14210_v33 = vld [vmem:[%s17979_s1 + $0xbec] ss:$16 sps:$4 sm:$0xff]   ;;  %v14205_v34 = vld [vmem:[%s17979_s1 + $0xbe0] ss:$16 sps:$4 sm:$0xff]  }
 0x168   :  { %2682 = vmatmul.mubr.bf16.vlgmr.msra.gmra.mrb[0].mxu0 %v15773_v37  ;;  %2928 = vmatmul.mubr.bf16.vlgmr.msra.gmra.mrb[0].mxu1 %v15773_v37 }
 0x169   :  { %2691 = vmatpush1.bf16.msra.mxu0 %v14115_v26  ;;  %2937 = vmatpush1.bf16.msra.mxu1 %v14118_v36  ;;  %v14208_v26 = vld [vmem:[%s17979_s1 + $0xbe8] ss:$16 sps:$4 sm:$0xff]   ;;  %v14213_v36 = vld [vmem:[#allocation2 + $0x4] ss:$24 sps:$4 sm:$0xff]  }
 0x16a   :  { %2692 = vmatprep.subr.bf16.mxu0 %v14123_v38  ;;  %2938 = vmatprep.subr.bf16.mxu1 %v14126_v39  ;;  %v14216_v38 = vld [vmem:[#allocation2 + $0xc] ss:$24 sps:$4 sm:$0xff]   ;;  %v551_v39 = vcombine.high %v15773_v37, %v15773_v37  ;;  %v14223_v37 = vld [vmem:[#allocation2 + $0x60] ss:$24 sps:$4 sm:$0xff]  }
 0x16b   :  { %2722 = vmatprep.mubr.bf16.mxu0 %v552_v13  ;;  %2968 = vmatprep.mubr.bf16.mxu1 %v552_v13  ;;  %v14219_v13 = vld [vmem:[#allocation2 + $0x34] ss:$24 sps:$4 sm:$0xff]  }
 0x16d   :  { %2693 = vmatpush1.bf16.msra.mxu0 %v14121_v40  ;;  %2939 = vmatpush1.bf16.msra.mxu1 %v14124_v49  ;;  %v14211_v40 = vld [vmem:[#allocation2] ss:$24 sps:$4 sm:$0xff]  }
 0x16e   :  { %2694 = vmatprep.subr.bf16.mxu0 %v14129_v41  ;;  %2940 = vmatprep.subr.bf16.mxu1 %v14132_v43  ;;  %v14214_v49 = vld [vmem:[#allocation2 + $0x8] ss:$24 sps:$4 sm:$0xff]   ;;  %v14222_v41 = vld [vmem:[#allocation2 + $0x3c] ss:$24 sps:$4 sm:$0xff]  }
 0x16f   :  { %v14217_v43 = vld [vmem:[#allocation2 + $0x30] ss:$24 sps:$4 sm:$0xff]  }
 0x171   :  { %2695 = vmatpush1.bf16.msra.mxu0 %v14127_v35  ;;  %2941 = vmatpush1.bf16.msra.mxu1 %v14130_v44  ;;  %v14220_v35 = vld [vmem:[#allocation2 + $0x38] ss:$24 sps:$4 sm:$0xff]   ;;  %v14225_v44 = vld [vmem:[#allocation2 + $0x64] ss:$24 sps:$4 sm:$0xff]  }
 0x172   :  { %2696 = vmatprep.subr.bf16.mxu0 %v14135_v45  ;;  %2942 = vmatprep.subr.bf16.mxu1 %v14138_v46  ;;  %v14228_v45 = vld [vmem:[#allocation2 + $0x6c] ss:$24 sps:$4 sm:$0xff]   ;;  %v14226_v46 = vld [vmem:[#allocation2 + $0x68] ss:$24 sps:$4 sm:$0xff]  }
 0x175   :  { %2697 = vmatpush1.bf16.msra.mxu0 %v14133_v47  ;;  %2943 = vmatpush1.bf16.msra.mxu1 %v14136_v48  ;;  %v14231_v47 = vld [vmem:[#allocation2 + $0x94] ss:$24 sps:$4 sm:$0xff]  }
 0x176   :  { %2698 = vmatprep.subr.bf16.mxu0 %v14141_v50  ;;  %2944 = vmatprep.subr.bf16.mxu1 %v14144_v51  ;;  %v14234_v48 = vld [vmem:[#allocation2 + $0x9c] ss:$24 sps:$4 sm:$0xff]   ;;  %v14229_v50 = vld [vmem:[#allocation2 + $0x90] ss:$24 sps:$4 sm:$0xff]  }
 0x177   :  { %v14232_v51 = vld [vmem:[#allocation2 + $0x98] ss:$24 sps:$4 sm:$0xff]  }
 0x179   :  { %2699 = vmatpush1.bf16.msra.mxu0 %v14139_v53  ;;  %2945 = vmatpush1.bf16.msra.mxu1 %v14142_v54  ;;  %v14237_v53 = vld [vmem:[#allocation2 + $0xc4] ss:$24 sps:$4 sm:$0xff]  }
 0x17a   :  { %2700 = vmatprep.subr.bf16.mxu0 %v14147_v55  ;;  %2946 = vmatprep.subr.bf16.mxu1 %v14150_v56  ;;  %v14240_v54 = vld [vmem:[#allocation2 + $0xcc] ss:$24 sps:$4 sm:$0xff]   ;;  %v14235_v55 = vld [vmem:[#allocation2 + $0xc0] ss:$24 sps:$4 sm:$0xff]  }
 0x17b   :  { %v14238_v56 = vld [vmem:[#allocation2 + $0xc8] ss:$24 sps:$4 sm:$0xff]  }
 0x17d   :  { %2701 = vmatpush1.bf16.msra.mxu0 %v14145_v57  ;;  %2947 = vmatpush1.bf16.msra.mxu1 %v14148_v58  ;;  %v14243_v57 = vld [vmem:[#allocation2 + $0xf4] ss:$24 sps:$4 sm:$0xff]  }
 0x17e   :  { %2702 = vmatprep.subr.bf16.mxu0 %v14153_v59  ;;  %2948 = vmatprep.subr.bf16.mxu1 %v14156_v60  ;;  %v14246_v58 = vld [vmem:[#allocation2 + $0xfc] ss:$24 sps:$4 sm:$0xff]   ;;  %v14241_v59 = vld [vmem:[#allocation2 + $0xf0] ss:$24 sps:$4 sm:$0xff]  }
 0x17f   :  { %v14244_v60 = vld [vmem:[#allocation2 + $0xf8] ss:$24 sps:$4 sm:$0xff]  }
 0x181   :  { %2703 = vmatpush1.bf16.msra.mxu0 %v14151_v61  ;;  %2949 = vmatpush1.bf16.msra.mxu1 %v14154_v62  ;;  %v14249_v61 = vld [vmem:[#allocation2 + $0x124] ss:$24 sps:$4 sm:$0xff]  }
 0x182   :  { %2704 = vmatprep.subr.bf16.mxu0 %v14159_v63  ;;  %2950 = vmatprep.subr.bf16.mxu1 %v14162_v0  ;;  %v14252_v62 = vld [vmem:[#allocation2 + $0x12c] ss:$24 sps:$4 sm:$0xff]   ;;  %v14247_v63 = vld [vmem:[#allocation2 + $0x120] ss:$24 sps:$4 sm:$0xff]  }
 0x183   :  { %v14250_v0 = vld [vmem:[#allocation2 + $0x128] ss:$24 sps:$4 sm:$0xff]  }
 0x185   :  { %2705 = vmatpush1.bf16.msra.mxu0 %v14157_v1  ;;  %2951 = vmatpush1.bf16.msra.mxu1 %v14160_v2  ;;  %v14255_v1 = vld [vmem:[#allocation2 + $0x154] ss:$24 sps:$4 sm:$0xff]  }
 0x186   :  { %2706 = vmatprep.subr.bf16.mxu0 %v14165_v3  ;;  %2952 = vmatprep.subr.bf16.mxu1 %v14168_v4  ;;  %v14258_v2 = vld [vmem:[#allocation2 + $0x15c] ss:$24 sps:$4 sm:$0xff]   ;;  %v14253_v3 = vld [vmem:[#allocation2 + $0x150] ss:$24 sps:$4 sm:$0xff]  }
 0x187   :  { %v14256_v4 = vld [vmem:[#allocation2 + $0x158] ss:$24 sps:$4 sm:$0xff]  }
 0x189   :  { %2707 = vmatpush1.bf16.msra.mxu0 %v14163_v5  ;;  %2953 = vmatpush1.bf16.msra.mxu1 %v14166_v6  ;;  %v14261_v5 = vld [vmem:[#allocation2 + $0x184] ss:$24 sps:$4 sm:$0xff]  }
 0x18a   :  { %2708 = vmatprep.subr.bf16.mxu0 %v14171_v7  ;;  %2954 = vmatprep.subr.bf16.mxu1 %v14174_v8  ;;  %v14264_v6 = vld [vmem:[#allocation2 + $0x18c] ss:$24 sps:$4 sm:$0xff]   ;;  %v14259_v7 = vld [vmem:[#allocation2 + $0x180] ss:$24 sps:$4 sm:$0xff]  }
 0x18b   :  { %v14262_v8 = vld [vmem:[#allocation2 + $0x188] ss:$24 sps:$4 sm:$0xff]  }
 0x18d   :  { %2709 = vmatpush1.bf16.msra.mxu0 %v14169_v9  ;;  %2955 = vmatpush1.bf16.msra.mxu1 %v14172_v10  ;;  %v14267_v9 = vld [vmem:[#allocation2 + $0x1b4] ss:$24 sps:$4 sm:$0xff]  }
 0x18e   :  { %2710 = vmatprep.subr.bf16.mxu0 %v14177_v11  ;;  %2956 = vmatprep.subr.bf16.mxu1 %v14180_v12  ;;  %v14270_v10 = vld [vmem:[#allocation2 + $0x1bc] ss:$24 sps:$4 sm:$0xff]   ;;  %v14265_v11 = vld [vmem:[#allocation2 + $0x1b0] ss:$24 sps:$4 sm:$0xff]  }
 0x18f   :  { %v14268_v12 = vld [vmem:[#allocation2 + $0x1b8] ss:$24 sps:$4 sm:$0xff]  }
 0x191   :  { %2711 = vmatpush1.bf16.msra.mxu0 %v14175_v52  ;;  %2957 = vmatpush1.bf16.msra.mxu1 %v14178_v15  ;;  %v14273_v52 = vld [vmem:[#allocation2 + $0x1e4] ss:$24 sps:$4 sm:$0xff]  }
 0x192   :  { %2712 = vmatprep.subr.bf16.mxu0 %v14183_v16  ;;  %2958 = vmatprep.subr.bf16.mxu1 %v14186_v17  ;;  %v14276_v15 = vld [vmem:[#allocation2 + $0x1ec] ss:$24 sps:$4 sm:$0xff]   ;;  %v14271_v16 = vld [vmem:[#allocation2 + $0x1e0] ss:$24 sps:$4 sm:$0xff]  }
 0x193   :  { %v14274_v17 = vld [vmem:[#allocation2 + $0x1e8] ss:$24 sps:$4 sm:$0xff]  }
 0x195   :  { %2713 = vmatpush1.bf16.msra.mxu0 %v14181_v18  ;;  %2959 = vmatpush1.bf16.msra.mxu1 %v14184_v19  ;;  %v14279_v18 = vld [vmem:[#allocation2 + $0x214] ss:$24 sps:$4 sm:$0xff]  }
 0x196   :  { %2714 = vmatprep.subr.bf16.mxu0 %v14189_v20  ;;  %2960 = vmatprep.subr.bf16.mxu1 %v14192_v21  ;;  %v14282_v19 = vld [vmem:[#allocation2 + $0x21c] ss:$24 sps:$4 sm:$0xff]   ;;  %v14277_v20 = vld [vmem:[#allocation2 + $0x210] ss:$24 sps:$4 sm:$0xff]  }
 0x197   :  { %v14280_v21 = vld [vmem:[#allocation2 + $0x218] ss:$24 sps:$4 sm:$0xff]  }
 0x199   :  { %2715 = vmatpush1.bf16.msra.mxu0 %v14187_v22  ;;  %2961 = vmatpush1.bf16.msra.mxu1 %v14190_v23  ;;  %v14285_v22 = vld [vmem:[#allocation2 + $0x244] ss:$24 sps:$4 sm:$0xff]  }
 0x19a   :  { %2716 = vmatprep.subr.bf16.mxu0 %v14195_v24  ;;  %2962 = vmatprep.subr.bf16.mxu1 %v14198_v27  ;;  %v14288_v23 = vld [vmem:[#allocation2 + $0x24c] ss:$24 sps:$4 sm:$0xff]   ;;  %v14283_v24 = vld [vmem:[#allocation2 + $0x240] ss:$24 sps:$4 sm:$0xff]  }
 0x19b   :  { %v14286_v27 = vld [vmem:[#allocation2 + $0x248] ss:$24 sps:$4 sm:$0xff]  }
 0x19d   :  { %2717 = vmatpush1.bf16.msra.mxu0 %v14193_v28  ;;  %2963 = vmatpush1.bf16.msra.mxu1 %v14196_v29  ;;  %v14291_v28 = vld [vmem:[#allocation2 + $0x274] ss:$24 sps:$4 sm:$0xff]  }
 0x19e   :  { %2718 = vmatprep.subr.bf16.mxu0 %v14201_v14  ;;  %2964 = vmatprep.subr.bf16.mxu1 %v14204_v30  ;;  %v14294_v29 = vld [vmem:[#allocation2 + $0x27c] ss:$24 sps:$4 sm:$0xff]   ;;  %v14289_v14 = vld [vmem:[#allocation2 + $0x270] ss:$24 sps:$4 sm:$0xff]  }
 0x19f   :  { %v14292_v30 = vld [vmem:[#allocation2 + $0x278] ss:$24 sps:$4 sm:$0xff]  }
 0x1a1   :  { %2719 = vmatpush1.bf16.msra.mxu0 %v14199_v31  ;;  %2965 = vmatpush1.bf16.msra.mxu1 %v14202_v25  ;;  %v14297_v31 = vld [vmem:[#allocation2 + $0x2a4] ss:$24 sps:$4 sm:$0xff]  }
 0x1a2   :  { %2720 = vmatprep.subr.bf16.mxu0 %v14207_v32  ;;  %2966 = vmatprep.subr.bf16.mxu1 %v14210_v33  ;;  %v14300_v25 = vld [vmem:[#allocation2 + $0x2ac] ss:$24 sps:$4 sm:$0xff]   ;;  %v14295_v32 = vld [vmem:[#allocation2 + $0x2a0] ss:$24 sps:$4 sm:$0xff]  }
 0x1a3   :  { %v14298_v33 = vld [vmem:[#allocation2 + $0x2a8] ss:$24 sps:$4 sm:$0xff]  }
 0x1a5   :  { %2721 = vmatpush1.bf16.msra.mxu0 %v14205_v34  ;;  %2967 = vmatpush1.bf16.msra.mxu1 %v14208_v26  ;;  %v14303_v34 = vld [vmem:[#allocation2 + $0x2d4] ss:$24 sps:$4 sm:$0xff]  }
 0x1a6   :  { %4189 = vmatprep.subr.bf16.mxu0 %v14213_v36  ;;  %4271 = vmatprep.subr.bf16.mxu1 %v14216_v38  ;;  %v14306_v26 = vld [vmem:[#allocation2 + $0x2dc] ss:$24 sps:$4 sm:$0xff]   ;;  %v14301_v36 = vld [vmem:[#allocation2 + $0x2d0] ss:$24 sps:$4 sm:$0xff]  }
 0x1a7   :  { %v14304_v38 = vld [vmem:[#allocation2 + $0x2d8] ss:$24 sps:$4 sm:$0xff]  }
 0x1a8   :  { %2723 = vmatmul.mubr.bf16.vlgmr.msra.gmra.mrb[0].mxu0 %v551_v39  ;;  %2969 = vmatmul.mubr.bf16.vlgmr.msra.gmra.mrb[0].mxu1 %v551_v39  ;;  %v14309_v39 = vld [vmem:[#allocation2 + $0x304] ss:$24 sps:$4 sm:$0xff]  }
 0x1a9   :  { %4190 = vmatpush1.bf16.msra.mxu0 %v14211_v40  ;;  %4272 = vmatpush1.bf16.msra.mxu1 %v14214_v49  ;;  %v14312_v40 = vld [vmem:[#allocation2 + $0x30c] ss:$24 sps:$4 sm:$0xff]   ;;  %v15962_v49 = vsub.s32 0, %v14862_v42 }
 0x1aa   :  { %4191 = vmatprep.subr.bf16.mxu0 %v14219_v13  ;;  %4273 = vmatprep.subr.bf16.mxu1 %v14222_v41  ;;  %v15967_v13 = vld [vmem:[%s17980_s2] sm:$0xf]  ;;  %v15970_v41 = vsub.s32 1, %v14862_v42 }
 0x1ad   :  { %4192 = vmatpush1.bf16.msra.mxu0 %v14217_v43  ;;  %4274 = vmatpush1.bf16.msra.mxu1 %v14220_v35  ;;  %v15973_v43 = vsub.s32 3, %v14862_v42  ;;  %v461_v35 = vrot.slane %v15967_v13, %v15962_v49 }
 0x1ae   :  { %4193 = vmatprep.subr.bf16.mxu0 %v14225_v44  ;;  %4275 = vmatprep.subr.bf16.mxu1 %v14228_v45  ;;  %v465_v44 = vrot.slane %v15967_v13, %v15970_v41 }
 0x1af   :  { %v473_v45 = vrot.slane %v15967_v13, %v15973_v43 }
 0x1b1   :  { %4194 = vmatpush1.bf16.msra.mxu0 %v14223_v37  ;;  %4276 = vmatpush1.bf16.msra.mxu1 %v14226_v46 }
 0x1b2   :  { %4195 = vmatprep.subr.bf16.mxu0 %v14231_v47  ;;  %4277 = vmatprep.subr.bf16.mxu1 %v14234_v48 }
 0x1b5   :  { %4196 = vmatpush1.bf16.msra.mxu0 %v14229_v50  ;;  %4278 = vmatpush1.bf16.msra.mxu1 %v14232_v51 }
 0x1b6   :  { %4197 = vmatprep.subr.bf16.mxu0 %v14237_v53  ;;  %4279 = vmatprep.subr.bf16.mxu1 %v14240_v54 }
 0x1b9   :  { %4198 = vmatpush1.bf16.msra.mxu0 %v14235_v55  ;;  %4280 = vmatpush1.bf16.msra.mxu1 %v14238_v56 }
 0x1ba   :  { %4199 = vmatprep.subr.bf16.mxu0 %v14243_v57  ;;  %4281 = vmatprep.subr.bf16.mxu1 %v14246_v58 }
 0x1bd   :  { %4200 = vmatpush1.bf16.msra.mxu0 %v14241_v59  ;;  %4282 = vmatpush1.bf16.msra.mxu1 %v14244_v60 }
 0x1be   :  { %4201 = vmatprep.subr.bf16.mxu0 %v14249_v61  ;;  %4283 = vmatprep.subr.bf16.mxu1 %v14252_v62 }
 0x1c1   :  { %4202 = vmatpush1.bf16.msra.mxu0 %v14247_v63  ;;  %4284 = vmatpush1.bf16.msra.mxu1 %v14250_v0 }
 0x1c2   :  { %4203 = vmatprep.subr.bf16.mxu0 %v14255_v1  ;;  %4285 = vmatprep.subr.bf16.mxu1 %v14258_v2 }
 0x1c5   :  { %4204 = vmatpush1.bf16.msra.mxu0 %v14253_v3  ;;  %4286 = vmatpush1.bf16.msra.mxu1 %v14256_v4 }
 0x1c6   :  { %4205 = vmatprep.subr.bf16.mxu0 %v14261_v5  ;;  %4287 = vmatprep.subr.bf16.mxu1 %v14264_v6 }
 0x1c9   :  { %4206 = vmatpush1.bf16.msra.mxu0 %v14259_v7  ;;  %4288 = vmatpush1.bf16.msra.mxu1 %v14262_v8 }
 0x1ca   :  { %4207 = vmatprep.subr.bf16.mxu0 %v14267_v9  ;;  %4289 = vmatprep.subr.bf16.mxu1 %v14270_v10  ;;  %v14307_v9 = vld [vmem:[#allocation2 + $0x300] ss:$24 sps:$4 sm:$0xff]  }
 0x1cb   :  { %v14310_v10 = vld [vmem:[#allocation2 + $0x308] ss:$24 sps:$4 sm:$0xff]  }
 0x1cd   :  { %4208 = vmatpush1.bf16.msra.mxu0 %v14265_v11  ;;  %4290 = vmatpush1.bf16.msra.mxu1 %v14268_v12 }
 0x1ce   :  { %4209 = vmatprep.subr.bf16.mxu0 %v14273_v52  ;;  %4291 = vmatprep.subr.bf16.mxu1 %v14276_v15  ;;  %v14315_v52 = vld [vmem:[#allocation2 + $0x334] ss:$24 sps:$4 sm:$0xff]  }
 0x1cf   :  { %v14318_v15 = vld [vmem:[#allocation2 + $0x33c] ss:$24 sps:$4 sm:$0xff]  }
 0x1d1   :  { %4210 = vmatpush1.bf16.msra.mxu0 %v14271_v16  ;;  %4292 = vmatpush1.bf16.msra.mxu1 %v14274_v17  ;;  %v14313_v17 = vld [vmem:[#allocation2 + $0x330] ss:$24 sps:$4 sm:$0xff]  }
 0x1d2   :  { %4211 = vmatprep.subr.bf16.mxu0 %v14279_v18  ;;  %4293 = vmatprep.subr.bf16.mxu1 %v14282_v19  ;;  %v14316_v18 = vld [vmem:[#allocation2 + $0x338] ss:$24 sps:$4 sm:$0xff]   ;;  %v14321_v19 = vld [vmem:[#allocation2 + $0x364] ss:$24 sps:$4 sm:$0xff]  }
 0x1d5   :  { %4212 = vmatpush1.bf16.msra.mxu0 %v14277_v20  ;;  %4294 = vmatpush1.bf16.msra.mxu1 %v14280_v21  ;;  %v14324_v20 = vld [vmem:[#allocation2 + $0x36c] ss:$24 sps:$4 sm:$0xff]   ;;  %v14319_v21 = vld [vmem:[#allocation2 + $0x360] ss:$24 sps:$4 sm:$0xff]  }
 0x1d6   :  { %4213 = vmatprep.subr.bf16.mxu0 %v14285_v22  ;;  %4295 = vmatprep.subr.bf16.mxu1 %v14288_v23  ;;  %v14322_v22 = vld [vmem:[#allocation2 + $0x368] ss:$24 sps:$4 sm:$0xff]   ;;  %v14327_v23 = vld [vmem:[#allocation2 + $0x394] ss:$24 sps:$4 sm:$0xff]  }
 0x1d9   :  { %4214 = vmatpush1.bf16.msra.mxu0 %v14283_v24  ;;  %4296 = vmatpush1.bf16.msra.mxu1 %v14286_v27  ;;  %v14330_v24 = vld [vmem:[#allocation2 + $0x39c] ss:$24 sps:$4 sm:$0xff]   ;;  %v14325_v27 = vld [vmem:[#allocation2 + $0x390] ss:$24 sps:$4 sm:$0xff]  }
 0x1da   :  { %4215 = vmatprep.subr.bf16.mxu0 %v14291_v28  ;;  %4297 = vmatprep.subr.bf16.mxu1 %v14294_v29  ;;  %v14328_v28 = vld [vmem:[#allocation2 + $0x398] ss:$24 sps:$4 sm:$0xff]   ;;  %v14333_v29 = vld [vmem:[#allocation2 + $0x3c4] ss:$24 sps:$4 sm:$0xff]  }
 0x1dd   :  { %4216 = vmatpush1.bf16.msra.mxu0 %v14289_v14  ;;  %4298 = vmatpush1.bf16.msra.mxu1 %v14292_v30  ;;  %v14336_v14 = vld [vmem:[#allocation2 + $0x3cc] ss:$24 sps:$4 sm:$0xff]   ;;  %v14331_v30 = vld [vmem:[#allocation2 + $0x3c0] ss:$24 sps:$4 sm:$0xff]  }
 0x1de   :  { %4217 = vmatprep.subr.bf16.mxu0 %v14297_v31  ;;  %4299 = vmatprep.subr.bf16.mxu1 %v14300_v25  ;;  %v14334_v31 = vld [vmem:[#allocation2 + $0x3c8] ss:$24 sps:$4 sm:$0xff]   ;;  %v14339_v25 = vld [vmem:[#allocation2 + $0x3f4] ss:$24 sps:$4 sm:$0xff]  }
 0x1e1   :  { %4218 = vmatpush1.bf16.msra.mxu0 %v14295_v32  ;;  %4300 = vmatpush1.bf16.msra.mxu1 %v14298_v33  ;;  %v14342_v32 = vld [vmem:[#allocation2 + $0x3fc] ss:$24 sps:$4 sm:$0xff]   ;;  %v14337_v33 = vld [vmem:[#allocation2 + $0x3f0] ss:$24 sps:$4 sm:$0xff]  }
 0x1e2   :  { %4219 = vmatprep.subr.bf16.mxu0 %v14303_v34  ;;  %4301 = vmatprep.subr.bf16.mxu1 %v14306_v26  ;;  %v14340_v34 = vld [vmem:[#allocation2 + $0x3f8] ss:$24 sps:$4 sm:$0xff]   ;;  %v14345_v26 = vld [vmem:[#allocation2 + $0x424] ss:$24 sps:$4 sm:$0xff]  }
 0x1e5   :  { %4220 = vmatpush1.bf16.msra.mxu0 %v14301_v36  ;;  %4302 = vmatpush1.bf16.msra.mxu1 %v14304_v38  ;;  %v14348_v36 = vld [vmem:[#allocation2 + $0x42c] ss:$24 sps:$4 sm:$0xff]   ;;  %v14343_v38 = vld [vmem:[#allocation2 + $0x420] ss:$24 sps:$4 sm:$0xff]  }
 0x1e6   :  { %4230 = vmatprep.subr.bf16.mxu0 %v14309_v39  ;;  %4312 = vmatprep.subr.bf16.mxu1 %v14312_v40  ;;  %v14346_v39 = vld [vmem:[#allocation2 + $0x428] ss:$24 sps:$4 sm:$0xff]   ;;  %v15996_v40 = vsub.s32 2, %v14862_v42 }
 0x27b   :  { %v2724_v37 = vpop.f32.mrb[0].mxu0  ;;  %v15981_v46 = vpop.f32.mrb[0].mxu1 }
 0x27c   :  { %v13465_v47 = vadd.f32 %v2724_v37, %v461_v35  ;;  %v2726_v48 = vpop.f32.mrb[1].mxu0  ;;  %v2972_v50 = vpop.f32.mrb[1].mxu1  ;;  %v14351_v35 = vld [vmem:[#allocation2 + $0x454] ss:$24 sps:$4 sm:$0xff]   ;;  %v14352_v37 = vld [vmem:[#allocation2 + $0x458] ss:$24 sps:$4 sm:$0xff]  }
 0x27d   :  { %v13466_v51 = vadd.f32 %v2726_v48, %v465_v44  ;;  %v13468_v53 = vadd.f32 %v2972_v50, %v473_v45  ;;  %v2728_v54 = vpop.f32.mrb[2].mxu0  ;;  %v2974_v55 = vpop.f32.mrb[2].mxu1  ;;  %v14354_v44 = vld [vmem:[#allocation2 + $0x45c] ss:$24 sps:$4 sm:$0xff]   ;;  %v14349_v45 = vld [vmem:[#allocation2 + $0x450] ss:$24 sps:$4 sm:$0xff]  }
 0x27e   :  { %v2981_v56 = vmin.f32 %v13465_v47, 0.0  ;;  %v2729_v57 = vpop.f32.mrb[3].mxu0  ;;  %v2975_v58 = vpop.f32.mrb[3].mxu1  ;;  %vm2977_vm0 = vcmp.gt.f32.partialorder %v13465_v47, 0.0  ;;  %v14357_v48 = vld [vmem:[#allocation2 + $0x484] ss:$24 sps:$4 sm:$0xff]  }
 0x27f   :  { %v2982_v59 = vmin.f32 %v13466_v51, 0.0  ;;  %v2984_v60 = vmin.f32 %v13468_v53, 0.0  ;;  %vm2978_vm1 = vcmp.gt.f32.partialorder %v13466_v51, 0.0  ;;  %vm2980_vm2 = vcmp.gt.f32.partialorder %v13468_v53, 0.0  ;;  %v14360_v50 = vld [vmem:[#allocation2 + $0x48c] ss:$24 sps:$4 sm:$0xff]  }
 0x280   :  { %v2985_v61 = vmul.f32 1.442695, %v2981_v56  ;;  %v14363_v55 = vld [vmem:[#allocation2 + $0x4b4] ss:$24 sps:$4 sm:$0xff]   ;;  %v14361_v57 = vld [vmem:[#allocation2 + $0x4b0] ss:$24 sps:$4 sm:$0xff]  }
 0x281   :  { %v2987_v62 = vmul.f32 1.442695, %v2982_v59  ;;  %v2991_v63 = vmul.f32 1.442695, %v2984_v60  ;;  %v14366_v56 = vld [vmem:[#allocation2 + $0x4bc] ss:$24 sps:$4 sm:$0xff]  }
 0x282   :  { %14563 = vpow2.f32 %v2985_v61  ;;  %v14364_v58 = vld [vmem:[#allocation2 + $0x4b8] ss:$24 sps:$4 sm:$0xff]   ;;  %v14369_v59 = vld [vmem:[#allocation2 + $0x4e4] ss:$24 sps:$4 sm:$0xff]  }
 0x283   :  { %14565 = vpow2.f32 %v2987_v62  ;;  %v14372_v60 = vld [vmem:[#allocation2 + $0x4ec] ss:$24 sps:$4 sm:$0xff]   ;;  %v14367_v61 = vld [vmem:[#allocation2 + $0x4e0] ss:$24 sps:$4 sm:$0xff]  }
 0x284   :  { %14567 = vpow2.f32 %v2991_v63  ;;  %v14370_v62 = vld [vmem:[#allocation2 + $0x4e8] ss:$24 sps:$4 sm:$0xff]   ;;  %v14375_v63 = vld [vmem:[#allocation2 + $0x514] ss:$24 sps:$4 sm:$0xff]  }
 0x28c   :  { %v14564_v0 = vpop.eup %14563 }
 0x28d   :  { %v12213_v1 = vadd.f32 -1.0, %v14564_v0  ;;  %v14566_v2 = vpop.eup %14565  ;;  %v14378_v0 = vld [vmem:[#allocation2 + $0x51c] ss:$24 sps:$4 sm:$0xff]  }
 0x28e   :  { %v14568_v3 = vpop.eup %14567  ;;  %v12214_v4 = vadd.f32 -1.0, %v14566_v2  ;;  %v14376_v2 = vld [vmem:[#allocation2 + $0x518] ss:$24 sps:$4 sm:$0xff]  }
 0x28f   :  { %v2997_v5 = vsel %vm2977_vm0, %v13465_v47, %v12213_v1  ;;  %v12216_v6 = vadd.f32 -1.0, %v14568_v3  ;;  %v469_v47 = vrot.slane %v15967_v13, %v15996_v40  ;;  %v14373_v1 = vld [vmem:[#allocation2 + $0x510] ss:$24 sps:$4 sm:$0xff]   ;;  %v14381_v3 = vld [vmem:[#allocation2 + $0x544] ss:$24 sps:$4 sm:$0xff]  }
 0x290   :  { %v2998_v7 = vsel %vm2978_vm1, %v13466_v51, %v12214_v4  ;;  %v15985_v12 = vpack.c.bf16 %v2997_v5, %v2997_v5  ;;  %v14355_v51 = vld [vmem:[#allocation2 + $0x480] ss:$24 sps:$4 sm:$0xff]   ;;  %v14384_v4 = vld [vmem:[#allocation2 + $0x54c] ss:$24 sps:$4 sm:$0xff]  }
 0x291   :  { %v15983_v8 = vpack.c.bf16 %v2998_v7, %v2998_v7  ;;  %v3000_v11 = vsel %vm2980_vm2, %v13468_v53, %v12216_v6  ;;  %v14358_v53 = vld [vmem:[#allocation2 + $0x488] ss:$24 sps:$4 sm:$0xff]   ;;  %v16001_v54 = vadd.f32 %v15981_v46, %v469_v47  ;;  %v14387_v7 = vld [vmem:[#allocation2 + $0x574] ss:$24 sps:$4 sm:$0xff]   ;;  %v14414_v47 = vld [vmem:[#allocation2 + $0xa4] ss:$24 sps:$4 sm:$0xff]  }
 0x292   :  { %v15991_v16 = vpack.c.bf16 %v3000_v11, %v3000_v11  ;;  %v14379_v5 = vld [vmem:[#allocation2 + $0x540] ss:$24 sps:$4 sm:$0xff]  }
 0x293   :  { %4221 = vmatprep.mubr.bf16.mxu0 %v15983_v8  ;;  %4303 = vmatprep.mubr.bf16.mxu1 %v15983_v8  ;;  %v2983_v13 = vmin.f32 %v16001_v54, 0.0  ;;  %v14382_v6 = vld [vmem:[#allocation2 + $0x548] ss:$24 sps:$4 sm:$0xff]   ;;  %v14388_v11 = vld [vmem:[#allocation2 + $0x578] ss:$24 sps:$4 sm:$0xff]   ;;  %vm2979_vm3 = vcmp.gt.f32.partialorder %v16001_v54, 0.0 }
 0x294   :  { %4222 = vmatmul.mubr.bf16.vlgmr.msra.gmra.mrb[4].mxu0 %v15985_v12  ;;  %4304 = vmatmul.mubr.bf16.vlgmr.msra.gmra.mrb[4].mxu1 %v15985_v12 }
 0x295   :  { %4231 = vmatpush1.bf16.msra.mxu0 %v14307_v9  ;;  %4313 = vmatpush1.bf16.msra.mxu1 %v14310_v10  ;;  %v2989_v46 = vmul.f32 1.442695, %v2983_v13  ;;  %v14390_v9 = vld [vmem:[#allocation2 + $0x57c] ss:$24 sps:$4 sm:$0xff]   ;;  %v14385_v10 = vld [vmem:[#allocation2 + $0x570] ss:$24 sps:$4 sm:$0xff]  }
 0x296   :  { %4262 = vmatprep.mubr.bf16.mxu0 %v15991_v16  ;;  %4344 = vmatprep.mubr.bf16.mxu1 %v15991_v16  ;;  %v4513_v13 = vld [vmem:[#allocation5 + $0x120] sm:$0xff] }
 0x297   :  { %4232 = vmatprep.subr.bf16.mxu0 %v14315_v52  ;;  %4314 = vmatprep.subr.bf16.mxu1 %v14318_v15  ;;  %14569 = vpow2.f32 %v2989_v46  ;;  %v14393_v52 = vld [vmem:[#allocation2 + $0x5a4] ss:$24 sps:$4 sm:$0xff]  }
 0x298   :  { %v14396_v15 = vld [vmem:[#allocation2 + $0x5ac] ss:$24 sps:$4 sm:$0xff]  }
 0x299   :  { %4233 = vmatpush1.bf16.msra.mxu0 %v14313_v17  ;;  %4315 = vmatpush1.bf16.msra.mxu1 %v14316_v18  ;;  %v14391_v18 = vld [vmem:[#allocation2 + $0x5a0] ss:$24 sps:$4 sm:$0xff]  }
 0x29a   :  { %4234 = vmatprep.subr.bf16.mxu0 %v14321_v19  ;;  %4316 = vmatprep.subr.bf16.mxu1 %v14324_v20  ;;  %v14394_v19 = vld [vmem:[#allocation2 + $0x5a8] ss:$24 sps:$4 sm:$0xff]   ;;  %v14399_v20 = vld [vmem:[#allocation2 + $0x5d4] ss:$24 sps:$4 sm:$0xff]  }
 0x29b   :  { %v4517_v46 = vld [vmem:[#allocation5 + $0x140] sm:$0xff] }
 0x29d   :  { %4235 = vmatpush1.bf16.msra.mxu0 %v14319_v21  ;;  %4317 = vmatpush1.bf16.msra.mxu1 %v14322_v22  ;;  %v14402_v21 = vld [vmem:[#allocation2 + $0x5dc] ss:$24 sps:$4 sm:$0xff]  }
 0x29e   :  { %4236 = vmatprep.subr.bf16.mxu0 %v14327_v23  ;;  %4318 = vmatprep.subr.bf16.mxu1 %v14330_v24  ;;  %v14397_v23 = vld [vmem:[#allocation2 + $0x5d0] ss:$24 sps:$4 sm:$0xff]  }
 0x29f   :  { %v14400_v24 = vld [vmem:[#allocation2 + $0x5d8] ss:$24 sps:$4 sm:$0xff]  }
 0x2a1   :  { %4237 = vmatpush1.bf16.msra.mxu0 %v14325_v27  ;;  %4319 = vmatpush1.bf16.msra.mxu1 %v14328_v28  ;;  %v14570_v17 = vpop.eup %14569  ;;  %v14405_v27 = vld [vmem:[#allocation2 + $0x14] ss:$24 sps:$4 sm:$0xff]  }
 0x2a2   :  { %4238 = vmatprep.subr.bf16.mxu0 %v14333_v29  ;;  %4320 = vmatprep.subr.bf16.mxu1 %v14336_v14  ;;  %v12215_v22 = vadd.f32 -1.0, %v14570_v17  ;;  %v14403_v29 = vld [vmem:[#allocation2 + $0x10] ss:$24 sps:$4 sm:$0xff]  }
 0x2a4   :  { %v2999_v28 = vsel %vm2979_vm3, %v16001_v54, %v12215_v22  ;;  %v14417_v54 = vld [vmem:[#allocation2 + $0xd4] ss:$24 sps:$4 sm:$0xff]   ;;  %v14432_v22 = vld [vmem:[#allocation2 + $0x1c4] ss:$24 sps:$4 sm:$0xff]  }
 0x2a5   :  { %4239 = vmatpush1.bf16.msra.mxu0 %v14331_v30  ;;  %4321 = vmatpush1.bf16.msra.mxu1 %v14334_v31  ;;  %v16006_v14 = vpack.c.bf16 %v2999_v28, %v2999_v28  ;;  %v14408_v30 = vld [vmem:[#allocation2 + $0x44] ss:$24 sps:$4 sm:$0xff]  }
 0x2a6   :  { %4240 = vmatprep.subr.bf16.mxu0 %v14339_v25  ;;  %4322 = vmatprep.subr.bf16.mxu1 %v14342_v32  ;;  %v4477_v31 = vld [vmem:[#allocation5] sm:$0xff] }
 0x2a7   :  { %v4481_v25 = vld [vmem:[#allocation5 + $0x20] sm:$0xff] }
 0x2a8   :  { %v14406_v32 = vld [vmem:[#allocation2 + $0x40] ss:$24 sps:$4 sm:$0xff]  }
 0x2a9   :  { %4241 = vmatpush1.bf16.msra.mxu0 %v14337_v33  ;;  %4323 = vmatpush1.bf16.msra.mxu1 %v14340_v34  ;;  %v12415_v33 = vcombine.low %v4477_v31, %v4481_v25  ;;  %v12416_v34 = vcombine.high %v4477_v31, %v4481_v25  ;;  %v4549_v28 = vld [vmem:[#allocation5 + $0x240] sm:$0xff] }
 0x2aa   :  { %4242 = vmatprep.subr.bf16.mxu0 %v14345_v26  ;;  %4324 = vmatprep.subr.bf16.mxu1 %v14348_v36  ;;  %v4485_v26 = vld [vmem:[#allocation5 + $0x40] sm:$0xff] }
 0x2ab   :  { %v4489_v36 = vld [vmem:[#allocation5 + $0x60] sm:$0xff] }
 0x2ad   :  { %4243 = vmatpush1.bf16.msra.mxu0 %v14343_v38  ;;  %4325 = vmatpush1.bf16.msra.mxu1 %v14346_v39  ;;  %v14411_v38 = vld [vmem:[#allocation2 + $0x74] ss:$24 sps:$4 sm:$0xff]   ;;  %v12424_v39 = vcombine.high %v4485_v26, %v4489_v36 }
 0x2ae   :  { %4244 = vmatprep.subr.bf16.mxu0 %v14351_v35  ;;  %4326 = vmatprep.subr.bf16.mxu1 %v14354_v44  ;;  %v12423_v35 = vcombine.low %v4485_v26, %v4489_v36  ;;  %v14409_v44 = vld [vmem:[#allocation2 + $0x70] ss:$24 sps:$4 sm:$0xff]   ;;  %v14441_v26 = vld [vmem:[#allocation2 + $0x254] ss:$24 sps:$4 sm:$0xff]  }
 0x2af   :  { %v14439_v36 = vld [vmem:[#allocation2 + $0x250] ss:$24 sps:$4 sm:$0xff]  }
 0x2b1   :  { %4245 = vmatpush1.bf16.msra.mxu0 %v14349_v45  ;;  %4327 = vmatpush1.bf16.msra.mxu1 %v14352_v37  ;;  %v4493_v45 = vld [vmem:[#allocation5 + $0x80] sm:$0xff] }
 0x2b2   :  { %4246 = vmatprep.subr.bf16.mxu0 %v14357_v48  ;;  %4328 = vmatprep.subr.bf16.mxu1 %v14360_v50  ;;  %v4497_v37 = vld [vmem:[#allocation5 + $0xa0] sm:$0xff] }
 0x2b3   :  { %v12432_v48 = vcombine.high %v4493_v45, %v4497_v37  ;;  %v14412_v50 = vld [vmem:[#allocation2 + $0xa0] ss:$24 sps:$4 sm:$0xff]  }
 0x2b5   :  { %4247 = vmatpush1.bf16.msra.mxu0 %v14355_v51  ;;  %4329 = vmatpush1.bf16.msra.mxu1 %v14358_v53  ;;  %v4501_v51 = vld [vmem:[#allocation5 + $0xc0] sm:$0xff] }
 0x2b6   :  { %4248 = vmatprep.subr.bf16.mxu0 %v14363_v55  ;;  %4330 = vmatprep.subr.bf16.mxu1 %v14366_v56  ;;  %v4505_v53 = vld [vmem:[#allocation5 + $0xe0] sm:$0xff] }
 0x2b7   :  { %v12440_v55 = vcombine.high %v4501_v51, %v4505_v53  ;;  %v12439_v56 = vcombine.low %v4501_v51, %v4505_v53  ;;  %v14459_v51 = vld [vmem:[#allocation2 + $0x374] ss:$24 sps:$4 sm:$0xff]   ;;  %v14457_v53 = vld [vmem:[#allocation2 + $0x370] ss:$24 sps:$4 sm:$0xff]  }
 0x2b9   :  { %4249 = vmatpush1.bf16.msra.mxu0 %v14361_v57  ;;  %4331 = vmatpush1.bf16.msra.mxu1 %v14364_v58  ;;  %v14415_v57 = vld [vmem:[#allocation2 + $0xd0] ss:$24 sps:$4 sm:$0xff]   ;;  %v4509_v58 = vld [vmem:[#allocation5 + $0x100] sm:$0xff] }
 0x2ba   :  { %4250 = vmatprep.subr.bf16.mxu0 %v14369_v59  ;;  %4332 = vmatprep.subr.bf16.mxu1 %v14372_v60  ;;  %v14420_v59 = vld [vmem:[#allocation2 + $0x104] ss:$24 sps:$4 sm:$0xff]   ;;  %v12448_v60 = vcombine.high %v4509_v58, %v4513_v13 }
 0x2bd   :  { %4251 = vmatpush1.bf16.msra.mxu0 %v14367_v61  ;;  %4333 = vmatpush1.bf16.msra.mxu1 %v14370_v62  ;;  %v12447_v61 = vcombine.low %v4509_v58, %v4513_v13  ;;  %v14418_v62 = vld [vmem:[#allocation2 + $0x100] ss:$24 sps:$4 sm:$0xff]   ;;  %v14468_v58 = vld [vmem:[#allocation2 + $0x404] ss:$24 sps:$4 sm:$0xff]  }
 0x2be   :  { %4252 = vmatprep.subr.bf16.mxu0 %v14375_v63  ;;  %4334 = vmatprep.subr.bf16.mxu1 %v14378_v0  ;;  %v4521_v63 = vld [vmem:[#allocation5 + $0x160] sm:$0xff]  ;;  %v14423_v0 = vld [vmem:[#allocation2 + $0x134] ss:$24 sps:$4 sm:$0xff]  }
 0x2bf   :  { %v4557_v13 = vld [vmem:[#allocation5 + $0x280] sm:$0xff] }
 0x2c1   :  { %4253 = vmatpush1.bf16.msra.mxu0 %v14373_v1  ;;  %4335 = vmatpush1.bf16.msra.mxu1 %v14376_v2  ;;  %v12456_v1 = vcombine.high %v4517_v46, %v4521_v63  ;;  %v12455_v2 = vcombine.low %v4517_v46, %v4521_v63  ;;  %v14474_v46 = vld [vmem:[#allocation2 + $0x464] ss:$24 sps:$4 sm:$0xff]  }
 0x2c2   :  { %4254 = vmatprep.subr.bf16.mxu0 %v14381_v3  ;;  %4336 = vmatprep.subr.bf16.mxu1 %v14384_v4  ;;  %v14421_v3 = vld [vmem:[#allocation2 + $0x130] ss:$24 sps:$4 sm:$0xff]   ;;  %v4525_v4 = vld [vmem:[#allocation5 + $0x180] sm:$0xff] }
 0x2c3   :  { %v4565_v63 = vld [vmem:[#allocation5 + $0x2c0] sm:$0xff] }
 0x2c5   :  { %4255 = vmatpush1.bf16.msra.mxu0 %v14379_v5  ;;  %4337 = vmatpush1.bf16.msra.mxu1 %v14382_v6  ;;  %v4529_v5 = vld [vmem:[#allocation5 + $0x1a0] sm:$0xff] }
 0x2c6   :  { %4256 = vmatprep.subr.bf16.mxu0 %v14387_v7  ;;  %4338 = vmatprep.subr.bf16.mxu1 %v14390_v9  ;;  %v14426_v6 = vld [vmem:[#allocation2 + $0x164] ss:$24 sps:$4 sm:$0xff]   ;;  %v12464_v7 = vcombine.high %v4525_v4, %v4529_v5  ;;  %v12463_v9 = vcombine.low %v4525_v4, %v4529_v5  ;;  %v14477_v4 = vld [vmem:[#allocation2 + $0x494] ss:$24 sps:$4 sm:$0xff]  }
 0x2c7   :  { %v4573_v5 = vld [vmem:[#allocation5 + $0x300] sm:$0xff] }
 0x2c9   :  { %4257 = vmatpush1.bf16.msra.mxu0 %v14385_v10  ;;  %4339 = vmatpush1.bf16.msra.mxu1 %v14388_v11  ;;  %v14424_v10 = vld [vmem:[#allocation2 + $0x160] ss:$24 sps:$4 sm:$0xff]  }
 0x2ca   :  { %4258 = vmatprep.subr.bf16.mxu0 %v14393_v52  ;;  %4340 = vmatprep.subr.bf16.mxu1 %v14396_v15  ;;  %v4533_v11 = vld [vmem:[#allocation5 + $0x1c0] sm:$0xff]  ;;  %v14429_v15 = vld [vmem:[#allocation2 + $0x194] ss:$24 sps:$4 sm:$0xff]  }
 0x2cb   :  { %v4537_v52 = vld [vmem:[#allocation5 + $0x1e0] sm:$0xff] }
 0x2cc   :  { %v12472_v17 = vcombine.high %v4533_v11, %v4537_v52 }
 0x2cd   :  { %4259 = vmatpush1.bf16.msra.mxu0 %v14391_v18  ;;  %4341 = vmatpush1.bf16.msra.mxu1 %v14394_v19  ;;  %v12471_v18 = vcombine.low %v4533_v11, %v4537_v52  ;;  %v14427_v19 = vld [vmem:[#allocation2 + $0x190] ss:$24 sps:$4 sm:$0xff]   ;;  %v14480_v11 = vld [vmem:[#allocation2 + $0x4c4] ss:$24 sps:$4 sm:$0xff]  }
 0x2ce   :  { %4260 = vmatprep.subr.bf16.mxu0 %v14399_v20  ;;  %4342 = vmatprep.subr.bf16.mxu1 %v14402_v21  ;;  %v4541_v20 = vld [vmem:[#allocation5 + $0x200] sm:$0xff] }
 0x2cf   :  { %v4545_v21 = vld [vmem:[#allocation5 + $0x220] sm:$0xff] }
 0x2d0   :  { %v4581_v52 = vld [vmem:[#allocation5 + $0x340] sm:$0xff] }
 0x2d1   :  { %4261 = vmatpush1.bf16.msra.mxu0 %v14397_v23  ;;  %4343 = vmatpush1.bf16.msra.mxu1 %v14400_v24  ;;  %v12480_v23 = vcombine.high %v4541_v20, %v4545_v21  ;;  %v12479_v24 = vcombine.low %v4541_v20, %v4545_v21  ;;  %v14483_v20 = vld [vmem:[#allocation2 + $0x4f4] ss:$24 sps:$4 sm:$0xff]   ;;  %v4589_v21 = vld [vmem:[#allocation5 + $0x380] sm:$0xff] }
 0x2d2   :  { %4353 = vmatprep.subr.bf16.mxu0 %v14405_v27  ;;  %6823 = vmatprep.subr.bf16.mxu1 %v12416_v34  ;;  %v14430_v27 = vld [vmem:[#allocation2 + $0x1c0] ss:$24 sps:$4 sm:$0xff]  }
 0x2d3   :  { %v14436_v34 = vld [vmem:[#allocation2 + $0x220] ss:$24 sps:$4 sm:$0xff]  }
 0x2d4   :  { %4263 = vmatmul.mubr.bf16.vlgmr.msra.gmra.mrb[4].mxu0 %v16006_v14  ;;  %4345 = vmatmul.mubr.bf16.vlgmr.msra.gmra.mrb[4].mxu1 %v16006_v14 }
 0x2d5   :  { %4354 = vmatpush1.bf16.msra.mxu0 %v14403_v29  ;;  %4385 = vmatprep.mubr.bf16.mxu0 %v15983_v8  ;;  %v12431_v8 = vcombine.low %v4493_v45, %v4497_v37  ;;  %v4553_v29 = vld [vmem:[#allocation5 + $0x260] sm:$0xff] }
 0x2d6   :  { %4355 = vmatprep.subr.bf16.mxu0 %v14408_v30  ;;  %6824 = vmatpush1.bf16.msra.mxu1 %v12415_v33  ;;  %v14435_v30 = vld [vmem:[#allocation2 + $0x1f4] ss:$24 sps:$4 sm:$0xff]   ;;  %v12488_v31 = vcombine.high %v4549_v28, %v4553_v29  ;;  %v12487_v25 = vcombine.low %v4549_v28, %v4553_v29  ;;  %v14438_v33 = vld [vmem:[#allocation2 + $0x224] ss:$24 sps:$4 sm:$0xff]   ;;  %v14448_v37 = vld [vmem:[#allocation2 + $0x2e0] ss:$24 sps:$4 sm:$0xff]  }
 0x2d7   :  { %6825 = vmatprep.subr.bf16.mxu1 %v12424_v39  ;;  %v14442_v39 = vld [vmem:[#allocation2 + $0x280] ss:$24 sps:$4 sm:$0xff]   ;;  %v14450_v45 = vld [vmem:[#allocation2 + $0x2e4] ss:$24 sps:$4 sm:$0xff]  }
 0x2d8   :  { %v14486_v28 = vld [vmem:[#allocation2 + $0x524] ss:$24 sps:$4 sm:$0xff]  }
 0x2d9   :  { %4356 = vmatpush1.bf16.msra.mxu0 %v14406_v32  ;;  %v14433_v32 = vld [vmem:[#allocation2 + $0x1f0] ss:$24 sps:$4 sm:$0xff]   ;;  %v4597_v29 = vld [vmem:[#allocation5 + $0x3c0] sm:$0xff] }
 0x2da   :  { %4357 = vmatprep.subr.bf16.mxu0 %v14411_v38  ;;  %6826 = vmatpush1.bf16.msra.mxu1 %v12423_v35  ;;  %v14444_v38 = vld [vmem:[#allocation2 + $0x284] ss:$24 sps:$4 sm:$0xff]   ;;  %v14447_v35 = vld [vmem:[#allocation2 + $0x2b4] ss:$24 sps:$4 sm:$0xff]  }
 0x2db   :  { %6827 = vmatprep.subr.bf16.mxu1 %v12432_v48  ;;  %v14451_v48 = vld [vmem:[#allocation2 + $0x310] ss:$24 sps:$4 sm:$0xff]  }
 0x2dd   :  { %4358 = vmatpush1.bf16.msra.mxu0 %v14409_v44  ;;  %v14445_v44 = vld [vmem:[#allocation2 + $0x2b0] ss:$24 sps:$4 sm:$0xff]  }
 0x2de   :  { %4359 = vmatprep.subr.bf16.mxu0 %v14414_v47  ;;  %6828 = vmatpush1.bf16.msra.mxu1 %v12431_v8  ;;  %v14453_v47 = vld [vmem:[#allocation2 + $0x314] ss:$24 sps:$4 sm:$0xff]   ;;  %v14456_v8 = vld [vmem:[#allocation2 + $0x344] ss:$24 sps:$4 sm:$0xff]  }
 0x2df   :  { %6829 = vmatprep.subr.bf16.mxu1 %v12440_v55  ;;  %v14460_v55 = vld [vmem:[#allocation2 + $0x3a0] ss:$24 sps:$4 sm:$0xff]  }
 0x2e1   :  { %4360 = vmatpush1.bf16.msra.mxu0 %v14412_v50  ;;  %v14454_v50 = vld [vmem:[#allocation2 + $0x340] ss:$24 sps:$4 sm:$0xff]  }
 0x2e2   :  { %4361 = vmatprep.subr.bf16.mxu0 %v14417_v54  ;;  %6830 = vmatpush1.bf16.msra.mxu1 %v12439_v56  ;;  %v14462_v54 = vld [vmem:[#allocation2 + $0x3a4] ss:$24 sps:$4 sm:$0xff]   ;;  %v14465_v56 = vld [vmem:[#allocation2 + $0x3d4] ss:$24 sps:$4 sm:$0xff]  }
 0x2e3   :  { %6831 = vmatprep.subr.bf16.mxu1 %v12448_v60 }
 0x2e5   :  { %4362 = vmatpush1.bf16.msra.mxu0 %v14415_v57  ;;  %v14463_v57 = vld [vmem:[#allocation2 + $0x3d0] ss:$24 sps:$4 sm:$0xff]  }
 0x2e6   :  { %4363 = vmatprep.subr.bf16.mxu0 %v14420_v59  ;;  %6832 = vmatpush1.bf16.msra.mxu1 %v12447_v61  ;;  %v4561_v59 = vld [vmem:[#allocation5 + $0x2a0] sm:$0xff] }
 0x2e7   :  { %6833 = vmatprep.subr.bf16.mxu1 %v12456_v1  ;;  %v12496_v60 = vcombine.high %v4557_v13, %v4561_v59  ;;  %v12495_v61 = vcombine.low %v4557_v13, %v4561_v59  ;;  %v4502_v59 = vld [vmem:[#allocation5 + $0xc8] sm:$0xff] }
 0x2e9   :  { %4364 = vmatpush1.bf16.msra.mxu0 %v14418_v62  ;;  %v14469_v62 = vld [vmem:[#allocation2 + $0x430] ss:$24 sps:$4 sm:$0xff]  }
 0x2ea   :  { %4365 = vmatprep.subr.bf16.mxu0 %v14423_v0  ;;  %6834 = vmatpush1.bf16.msra.mxu1 %v12455_v2  ;;  %v4569_v0 = vld [vmem:[#allocation5 + $0x2e0] sm:$0xff] }
 0x2eb   :  { %6835 = vmatprep.subr.bf16.mxu1 %v12464_v7  ;;  %v12504_v1 = vcombine.high %v4565_v63, %v4569_v0  ;;  %v12503_v2 = vcombine.low %v4565_v63, %v4569_v0 }
 0x2ed   :  { %4366 = vmatpush1.bf16.msra.mxu0 %v14421_v3  ;;  %v14472_v3 = vld [vmem:[#allocation2 + $0x460] ss:$24 sps:$4 sm:$0xff]  }
 0x2ee   :  { %4367 = vmatprep.subr.bf16.mxu0 %v14426_v6  ;;  %6836 = vmatpush1.bf16.msra.mxu1 %v12463_v9  ;;  %v4577_v6 = vld [vmem:[#allocation5 + $0x320] sm:$0xff] }
 0x2ef   :  { %6837 = vmatprep.subr.bf16.mxu1 %v12472_v17  ;;  %v12512_v7 = vcombine.high %v4573_v5, %v4577_v6  ;;  %v12511_v9 = vcombine.low %v4573_v5, %v4577_v6  ;;  %v4530_v5 = vld [vmem:[#allocation5 + $0x1a8] sm:$0xff] }
 0x2f1   :  { %4368 = vmatpush1.bf16.msra.mxu0 %v14424_v10  ;;  %v14475_v10 = vld [vmem:[#allocation2 + $0x490] ss:$24 sps:$4 sm:$0xff]  }
 0x2f2   :  { %4369 = vmatprep.subr.bf16.mxu0 %v14429_v15  ;;  %6838 = vmatpush1.bf16.msra.mxu1 %v12471_v18  ;;  %v4585_v15 = vld [vmem:[#allocation5 + $0x360] sm:$0xff] }
 0x2f3   :  { %6839 = vmatprep.subr.bf16.mxu1 %v12480_v23  ;;  %v12520_v17 = vcombine.high %v4581_v52, %v4585_v15  ;;  %v12519_v18 = vcombine.low %v4581_v52, %v4585_v15  ;;  %v4542_v15 = vld [vmem:[#allocation5 + $0x208] sm:$0xff] }
 0x2f5   :  { %4370 = vmatpush1.bf16.msra.mxu0 %v14427_v19  ;;  %v14478_v19 = vld [vmem:[#allocation2 + $0x4c0] ss:$24 sps:$4 sm:$0xff]  }
 0x2f6   :  { %4371 = vmatprep.subr.bf16.mxu0 %v14432_v22  ;;  %6840 = vmatpush1.bf16.msra.mxu1 %v12479_v24  ;;  %v4593_v22 = vld [vmem:[#allocation5 + $0x3a0] sm:$0xff] }
 0x2f7   :  { %6841 = vmatprep.subr.bf16.mxu1 %v12488_v31  ;;  %v12528_v23 = vcombine.high %v4589_v21, %v4593_v22  ;;  %v12527_v24 = vcombine.low %v4589_v21, %v4593_v22  ;;  %v4554_v21 = vld [vmem:[#allocation5 + $0x268] sm:$0xff] }
 0x2f9   :  { %4372 = vmatpush1.bf16.msra.mxu0 %v14430_v27  ;;  %v14481_v27 = vld [vmem:[#allocation2 + $0x4f0] ss:$24 sps:$4 sm:$0xff]  }
 0x2fa   :  { %4373 = vmatprep.subr.bf16.mxu0 %v14435_v30  ;;  %6842 = vmatpush1.bf16.msra.mxu1 %v12487_v25  ;;  %v4601_v30 = vld [vmem:[#allocation5 + $0x3e0] sm:$0xff] }
 0x2fb   :  { %6843 = vmatprep.subr.bf16.mxu1 %v12496_v60  ;;  %v12536_v31 = vcombine.high %v4597_v29, %v4601_v30  ;;  %v12535_v25 = vcombine.low %v4597_v29, %v4601_v30  ;;  %v4566_v30 = vld [vmem:[#allocation5 + $0x2c8] sm:$0xff] }
 0x2fd   :  { %4374 = vmatpush1.bf16.msra.mxu0 %v14433_v32  ;;  %v14484_v32 = vld [vmem:[#allocation2 + $0x520] ss:$24 sps:$4 sm:$0xff]  }
 0x2fe   :  { %4375 = vmatprep.subr.bf16.mxu0 %v14438_v33  ;;  %6844 = vmatpush1.bf16.msra.mxu1 %v12495_v61  ;;  %v14489_v33 = vld [vmem:[#allocation2 + $0x554] ss:$24 sps:$4 sm:$0xff]  }
 0x2ff   :  { %6845 = vmatprep.subr.bf16.mxu1 %v12504_v1  ;;  %v4518_v1 = vld [vmem:[#allocation5 + $0x148] sm:$0xff] }
 0x301   :  { %4376 = vmatpush1.bf16.msra.mxu0 %v14436_v34  ;;  %v16013_v34 = vld [vmem:[#allocation5 + $0x400] sm:$0xff] }
 0x302   :  { %4377 = vmatprep.subr.bf16.mxu0 %v14441_v26  ;;  %6846 = vmatpush1.bf16.msra.mxu1 %v12503_v2  ;;  %v16015_v26 = vld [vmem:[#allocation5 + $0x420] sm:$0xff]  ;;  %v4522_v2 = vld [vmem:[#allocation5 + $0x168] sm:$0xff] }
 0x303   :  { %6847 = vmatprep.subr.bf16.mxu1 %v12512_v7  ;;  %v12457_v6 = vcombine.low %v4518_v1, %v4522_v2 }
 0x305   :  { %4378 = vmatpush1.bf16.msra.mxu0 %v14439_v36  ;;  %v12544_v36 = vcombine.high %v16013_v34, %v16015_v26 }
 0x306   :  { %4379 = vmatprep.subr.bf16.mxu0 %v14444_v38  ;;  %6848 = vmatpush1.bf16.msra.mxu1 %v12511_v9  ;;  %v12543_v38 = vcombine.low %v16013_v34, %v16015_v26  ;;  %v4534_v9 = vld [vmem:[#allocation5 + $0x1c8] sm:$0xff] }
 0x307   :  { %6849 = vmatprep.subr.bf16.mxu1 %v12520_v17  ;;  %v4546_v17 = vld [vmem:[#allocation5 + $0x228] sm:$0xff] }
 0x308   :  { %v12481_v22 = vcombine.low %v4542_v15, %v4546_v17 }
 0x309   :  { %4380 = vmatpush1.bf16.msra.mxu0 %v14442_v39  ;;  %v14487_v39 = vld [vmem:[#allocation2 + $0x550] ss:$24 sps:$4 sm:$0xff]  }
 0x30a   :  { %4381 = vmatprep.subr.bf16.mxu0 %v14447_v35  ;;  %6850 = vmatpush1.bf16.msra.mxu1 %v12519_v18  ;;  %v14492_v35 = vld [vmem:[#allocation2 + $0x584] ss:$24 sps:$4 sm:$0xff]  }
 0x30b   :  { %6851 = vmatprep.subr.bf16.mxu1 %v12528_v23 }
 0x30d   :  { %4382 = vmatpush1.bf16.msra.mxu0 %v14445_v44  ;;  %v14490_v44 = vld [vmem:[#allocation2 + $0x580] ss:$24 sps:$4 sm:$0xff]  }
 0x30e   :  { %4383 = vmatprep.subr.bf16.mxu0 %v14450_v45  ;;  %6852 = vmatpush1.bf16.msra.mxu1 %v12527_v24  ;;  %v14495_v45 = vld [vmem:[#allocation2 + $0x5b4] ss:$24 sps:$4 sm:$0xff]  }
 0x30f   :  { %6853 = vmatprep.subr.bf16.mxu1 %v12536_v31  ;;  %v4558_v24 = vld [vmem:[#allocation5 + $0x288] sm:$0xff] }
 0x310   :  { %v4570_v31 = vld [vmem:[#allocation5 + $0x2e8] sm:$0xff] }
 0x311   :  { %4384 = vmatpush1.bf16.msra.mxu0 %v14448_v37  ;;  %v14493_v37 = vld [vmem:[#allocation2 + $0x5b0] ss:$24 sps:$4 sm:$0xff]  }
 0x312   :  { %4394 = vmatprep.subr.bf16.mxu0 %v14453_v47  ;;  %6854 = vmatpush1.bf16.msra.mxu1 %v12535_v25  ;;  %v14498_v47 = vld [vmem:[#allocation2 + $0x5e4] ss:$24 sps:$4 sm:$0xff]  }
 0x313   :  { %6864 = vmatprep.subr.bf16.mxu1 %v12544_v36  ;;  %v4578_v36 = vld [vmem:[#allocation5 + $0x328] sm:$0xff] }
 0x314   :  { %4386 = vmatmul.mubr.bf16.vlgmr.msra.gmra.mrb[8].mxu0 %v15985_v12  ;;  %v14466_v12 = vld [vmem:[#allocation2 + $0x400] ss:$24 sps:$4 sm:$0xff]  }
 0x315   :  { %4395 = vmatpush1.bf16.msra.mxu0 %v14451_v48  ;;  %4426 = vmatprep.mubr.bf16.mxu0 %v15991_v16  ;;  %v14471_v16 = vld [vmem:[#allocation2 + $0x434] ss:$24 sps:$4 sm:$0xff]  }
 0x316   :  { %4396 = vmatprep.subr.bf16.mxu0 %v14456_v8  ;;  %v4478_v48 = vld [vmem:[#allocation5 + $0x8] sm:$0xff] }
 0x317   :  { %v4482_v8 = vld [vmem:[#allocation5 + $0x28] sm:$0xff] }
 0x319   :  { %4397 = vmatpush1.bf16.msra.mxu0 %v14454_v50  ;;  %v14496_v50 = vld [vmem:[#allocation2 + $0x5e0] ss:$24 sps:$4 sm:$0xff]  }
 0x31a   :  { %4398 = vmatprep.subr.bf16.mxu0 %v14459_v51  ;;  %v12418_v51 = vcombine.high %v4478_v48, %v4482_v8 }
 0x31d   :  { %4399 = vmatpush1.bf16.msra.mxu0 %v14457_v53  ;;  %v4486_v53 = vld [vmem:[#allocation5 + $0x48] sm:$0xff] }
 0x31e   :  { %4400 = vmatprep.subr.bf16.mxu0 %v14462_v54  ;;  %v4490_v54 = vld [vmem:[#allocation5 + $0x68] sm:$0xff] }
 0x321   :  { %4401 = vmatpush1.bf16.msra.mxu0 %v14460_v55  ;;  %v12417_v55 = vcombine.low %v4478_v48, %v4482_v8  ;;  %v4590_v48 = vld [vmem:[#allocation5 + $0x388] sm:$0xff] }
 0x322   :  { %4402 = vmatprep.subr.bf16.mxu0 %v14465_v56  ;;  %v12426_v56 = vcombine.high %v4486_v53, %v4490_v54  ;;  %v4594_v8 = vld [vmem:[#allocation5 + $0x3a8] sm:$0xff] }
 0x325   :  { %4403 = vmatpush1.bf16.msra.mxu0 %v14463_v57  ;;  %v4494_v57 = vld [vmem:[#allocation5 + $0x88] sm:$0xff] }
 0x326   :  { %4404 = vmatprep.subr.bf16.mxu0 %v14468_v58  ;;  %v4498_v58 = vld [vmem:[#allocation5 + $0xa8] sm:$0xff] }
 0x327   :  { %v12434_v13 = vcombine.high %v4494_v57, %v4498_v58  ;;  %v12433_v60 = vcombine.low %v4494_v57, %v4498_v58  ;;  %v16022_v57 = vld [vmem:[#allocation5 + $0x408] sm:$0xff] }
 0x328   :  { %v4610_v58 = vld [vmem:[#allocation5 + $0x428] sm:$0xff] }
 0x329   :  { %4405 = vmatpush1.bf16.msra.mxu0 %v14466_v12  ;;  %v12425_v12 = vcombine.low %v4486_v53, %v4490_v54  ;;  %v4598_v53 = vld [vmem:[#allocation5 + $0x3c8] sm:$0xff] }
 0x32a   :  { %4406 = vmatprep.subr.bf16.mxu0 %v14471_v16  ;;  %v4506_v16 = vld [vmem:[#allocation5 + $0xe8] sm:$0xff] }
 0x32b   :  { %v12442_v61 = vcombine.high %v4502_v59, %v4506_v16  ;;  %v12441_v63 = vcombine.low %v4502_v59, %v4506_v16  ;;  %v4602_v54 = vld [vmem:[#allocation5 + $0x3e8] sm:$0xff]  ;;  %v16028_v59 = vld [vmem:[%s17982_s4] sm:$0x3f] }
 0x32c   :  { %v3202_v16 = vrot.slane %v16028_v59, %v15962_v49 }
 0x32d   :  { %4407 = vmatpush1.bf16.msra.mxu0 %v14469_v62  ;;  %v4510_v62 = vld [vmem:[#allocation5 + $0x108] sm:$0xff] }
 0x32e   :  { %4408 = vmatprep.subr.bf16.mxu0 %v14474_v46  ;;  %v4514_v46 = vld [vmem:[#allocation5 + $0x128] sm:$0xff] }
 0x32f   :  { %v12450_v0 = vcombine.high %v4510_v62, %v4514_v46 }
 0x331   :  { %4409 = vmatpush1.bf16.msra.mxu0 %v14472_v3  ;;  %v12458_v3 = vcombine.high %v4518_v1, %v4522_v2 }
 0x332   :  { %4410 = vmatprep.subr.bf16.mxu0 %v14477_v4  ;;  %v4526_v4 = vld [vmem:[#allocation5 + $0x188] sm:$0xff] }
 0x333   :  { %v12466_v7 = vcombine.high %v4526_v4, %v4530_v5 }
 0x335   :  { %4411 = vmatpush1.bf16.msra.mxu0 %v14475_v10  ;;  %v4538_v10 = vld [vmem:[#allocation5 + $0x1e8] sm:$0xff] }
 0x336   :  { %4412 = vmatprep.subr.bf16.mxu0 %v14480_v11  ;;  %v12465_v11 = vcombine.low %v4526_v4, %v4530_v5  ;;  %v12474_v52 = vcombine.high %v4534_v9, %v4538_v10  ;;  %v12473_v18 = vcombine.low %v4534_v9, %v4538_v10 }
 0x339   :  { %4413 = vmatpush1.bf16.msra.mxu0 %v14478_v19  ;;  %v12482_v19 = vcombine.high %v4542_v15, %v4546_v17 }
 0x33a   :  { %4414 = vmatprep.subr.bf16.mxu0 %v14483_v20  ;;  %v4550_v20 = vld [vmem:[#allocation5 + $0x248] sm:$0xff] }
 0x33b   :  { %v12490_v23 = vcombine.high %v4550_v20, %v4554_v21 }
 0x33d   :  { %4415 = vmatpush1.bf16.msra.mxu0 %v14481_v27  ;;  %v4562_v27 = vld [vmem:[#allocation5 + $0x2a8] sm:$0xff] }
 0x33e   :  { %4416 = vmatprep.subr.bf16.mxu0 %v14486_v28  ;;  %v12489_v28 = vcombine.low %v4550_v20, %v4554_v21  ;;  %v12498_v29 = vcombine.high %v4558_v24, %v4562_v27  ;;  %v12497_v25 = vcombine.low %v4558_v24, %v4562_v27  ;;  %v4613_v24 = vld [vmem:[#allocation5 + $0x440] sm:$0xff] }
 0x341   :  { %4417 = vmatpush1.bf16.msra.mxu0 %v14484_v32  ;;  %v12506_v32 = vcombine.high %v4566_v30, %v4570_v31 }
 0x342   :  { %4418 = vmatprep.subr.bf16.mxu0 %v14489_v33  ;;  %v4574_v33 = vld [vmem:[#allocation5 + $0x308] sm:$0xff] }
 0x345   :  { %4419 = vmatpush1.bf16.msra.mxu0 %v14487_v39  ;;  %v12505_v39 = vcombine.low %v4566_v30, %v4570_v31  ;;  %v4618_v30 = vld [vmem:[#allocation5 + $0x468] sm:$0xff] }
 0x346   :  { %4420 = vmatprep.subr.bf16.mxu0 %v14492_v35  ;;  %v12514_v35 = vcombine.high %v4574_v33, %v4578_v36 }
 0x349   :  { %4421 = vmatpush1.bf16.msra.mxu0 %v14490_v44  ;;  %v4582_v44 = vld [vmem:[#allocation5 + $0x348] sm:$0xff] }
 0x34a   :  { %4422 = vmatprep.subr.bf16.mxu0 %v14495_v45  ;;  %v4586_v45 = vld [vmem:[#allocation5 + $0x368] sm:$0xff] }
 0x34d   :  { %4423 = vmatpush1.bf16.msra.mxu0 %v14493_v37  ;;  %v12513_v37 = vcombine.low %v4574_v33, %v4578_v36  ;;  %v4621_v36 = vld [vmem:[#allocation5 + $0x480] sm:$0xff] }
 0x34e   :  { %4424 = vmatprep.subr.bf16.mxu0 %v14498_v47  ;;  %v12522_v47 = vcombine.high %v4582_v44, %v4586_v45 }
 0x351   :  { %4425 = vmatpush1.bf16.msra.mxu0 %v14496_v50  ;;  %v12521_v50 = vcombine.low %v4582_v44, %v4586_v45  ;;  %v4625_v44 = vld [vmem:[#allocation5 + $0x4a0] sm:$0xff]  ;;  %v4622_v45 = vld [vmem:[#allocation5 + $0x488] sm:$0xff] }
 0x352   :  { %6946 = vmatprep.subr.bf16.mxu0 %v12418_v51  ;;  %v12530_v51 = vcombine.high %v4590_v48, %v4594_v8 }
 0x354   :  { %4427 = vmatmul.mubr.bf16.vlgmr.msra.gmra.mrb[8].mxu0 %v16006_v14  ;;  %v12449_v14 = vcombine.low %v4510_v62, %v4514_v46 }
 0x355   :  { %6947 = vmatpush1.bf16.msra.mxu0 %v12417_v55  ;;  %v12529_v55 = vcombine.low %v4590_v48, %v4594_v8 }
 0x356   :  { %6948 = vmatprep.subr.bf16.mxu0 %v12426_v56  ;;  %v12538_v56 = vcombine.high %v4598_v53, %v4602_v54 }
 0x359   :  { %6949 = vmatpush1.bf16.msra.mxu0 %v12425_v12  ;;  %v12537_v12 = vcombine.low %v4598_v53, %v4602_v54  ;;  %v4629_v53 = vld [vmem:[#allocation5 + $0x4c0] sm:$0xff] }
 0x35a   :  { %6950 = vmatprep.subr.bf16.mxu0 %v12434_v13  ;;  %v12546_v13 = vcombine.high %v16022_v57, %v4610_v58  ;;  %v4633_v54 = vld [vmem:[#allocation5 + $0x4e0] sm:$0xff] }
 0x35b   :  { %v12568_v26 = vcombine.high %v4629_v53, %v4633_v54 }
 0x35d   :  { %6951 = vmatpush1.bf16.msra.mxu0 %v12433_v60  ;;  %v3206_v60 = vrot.slane %v16028_v59, %v15970_v41 }
 0x35e   :  { %6952 = vmatprep.subr.bf16.mxu0 %v12442_v61  ;;  %v3214_v61 = vrot.slane %v16028_v59, %v15973_v43 }
 0x361   :  { %6953 = vmatpush1.bf16.msra.mxu0 %v12441_v63 }
 0x362   :  { %6954 = vmatprep.subr.bf16.mxu0 %v12450_v0 }
 0x365   :  { %6955 = vmatpush1.bf16.msra.mxu0 %v12449_v14 }
 0x366   :  { %6956 = vmatprep.subr.bf16.mxu0 %v12458_v3 }
 0x369   :  { %6957 = vmatpush1.bf16.msra.mxu0 %v12457_v6 }
 0x36a   :  { %6958 = vmatprep.subr.bf16.mxu0 %v12466_v7 }
 0x36d   :  { %6959 = vmatpush1.bf16.msra.mxu0 %v12465_v11 }
 0x36e   :  { %6960 = vmatprep.subr.bf16.mxu0 %v12474_v52 }
 0x371   :  { %6961 = vmatpush1.bf16.msra.mxu0 %v12473_v18 }
 0x372   :  { %6962 = vmatprep.subr.bf16.mxu0 %v12482_v19 }
 0x375   :  { %6963 = vmatpush1.bf16.msra.mxu0 %v12481_v22 }
 0x376   :  { %6964 = vmatprep.subr.bf16.mxu0 %v12490_v23 }
 0x379   :  { %6965 = vmatpush1.bf16.msra.mxu0 %v12489_v28  ;;  %v4617_v28 = vld [vmem:[#allocation5 + $0x460] sm:$0xff] }
 0x37a   :  { %6966 = vmatprep.subr.bf16.mxu0 %v12498_v29  ;;  %v4614_v29 = vld [vmem:[#allocation5 + $0x448] sm:$0xff]  ;;  %v12551_v48 = vcombine.low %v4613_v24, %v4617_v28 }
 0x37b   :  { %v12553_v8 = vcombine.low %v4614_v29, %v4618_v30 }
 0x37d   :  { %6967 = vmatpush1.bf16.msra.mxu0 %v12497_v25 }
 0x37e   :  { %6968 = vmatprep.subr.bf16.mxu0 %v12506_v32  ;;  %v12545_v32 = vcombine.low %v16022_v57, %v4610_v58  ;;  %v12559_v57 = vcombine.low %v4621_v36, %v4625_v44  ;;  %v4637_v58 = vld [vmem:[#allocation5 + $0x500] sm:$0xff] }
 0x381   :  { %6969 = vmatpush1.bf16.msra.mxu0 %v12505_v39  ;;  %v12552_v39 = vcombine.high %v4613_v24, %v4617_v28 }
 0x382   :  { %6970 = vmatprep.subr.bf16.mxu0 %v12514_v35  ;;  %v12554_v35 = vcombine.high %v4614_v29, %v4618_v30  ;;  %v4669_v29 = vld [vmem:[#allocation5 + $0x600] sm:$0xff] }
 0x383   :  { %v4673_v30 = vld [vmem:[#allocation5 + $0x620] sm:$0xff] }
 0x385   :  { %6971 = vmatpush1.bf16.msra.mxu0 %v12513_v37  ;;  %v4626_v37 = vld [vmem:[#allocation5 + $0x4a8] sm:$0xff] }
 0x386   :  { %6972 = vmatprep.subr.bf16.mxu0 %v12522_v47  ;;  %v12561_v34 = vcombine.low %v4622_v45, %v4626_v37 }
 0x389   :  { %6973 = vmatpush1.bf16.msra.mxu0 %v12521_v50  ;;  %v12560_v50 = vcombine.high %v4621_v36, %v4625_v44  ;;  %v12608_v44 = vcombine.high %v4669_v29, %v4673_v30 }
 0x38a   :  { %6974 = vmatprep.subr.bf16.mxu0 %v12530_v51  ;;  %v12562_v51 = vcombine.high %v4622_v45, %v4626_v37  ;;  %v4677_v37 = vld [vmem:[#allocation5 + $0x640] sm:$0xff] }
 0x38d   :  { %6975 = vmatpush1.bf16.msra.mxu0 %v12529_v55  ;;  %v4630_v55 = vld [vmem:[#allocation5 + $0x4c8] sm:$0xff] }
 0x38e   :  { %6976 = vmatprep.subr.bf16.mxu0 %v12538_v56  ;;  %v4634_v56 = vld [vmem:[#allocation5 + $0x4e8] sm:$0xff] }
 0x391   :  { %6977 = vmatpush1.bf16.msra.mxu0 %v12537_v12  ;;  %v4641_v12 = vld [vmem:[#allocation5 + $0x520] sm:$0xff] }
 0x392   :  { %6987 = vmatprep.subr.bf16.mxu0 %v12546_v13  ;;  %v4638_v13 = vld [vmem:[#allocation5 + $0x508] sm:$0xff] }
 0x3a7   :  { %v4264_v62 = vpop.f32.mrb[4].mxu0  ;;  %v16036_v46 = vpop.f32.mrb[4].mxu1 }
 0x3a8   :  { %v13469_v63 = vadd.f32 %v4264_v62, %v3202_v16  ;;  %v4266_v0 = vpop.f32.mrb[5].mxu0  ;;  %v4348_v1 = vpop.f32.mrb[5].mxu1  ;;  %v4642_v16 = vld [vmem:[#allocation5 + $0x528] sm:$0xff]  ;;  %v12576_v62 = vcombine.high %v4637_v58, %v4641_v12 }
 0x3a9   :  { %v13470_v2 = vadd.f32 %v4266_v0, %v3206_v60  ;;  %v13472_v14 = vadd.f32 %v4348_v1, %v3214_v61  ;;  %v4268_v3 = vpop.f32.mrb[6].mxu0  ;;  %v4350_v4 = vpop.f32.mrb[6].mxu1  ;;  %v12567_v60 = vcombine.low %v4629_v53, %v4633_v54  ;;  %v12569_v61 = vcombine.low %v4630_v55, %v4634_v56  ;;  %v4645_v0 = vld [vmem:[#allocation5 + $0x540] sm:$0xff] }
 0x3aa   :  { %v4441_v5 = vmin.f32 %v13469_v63, 0.0  ;;  %v4269_v6 = vpop.f32.mrb[7].mxu0  ;;  %v4351_v7 = vpop.f32.mrb[7].mxu1  ;;  %vm4435_vm4 = vcmp.gt.f32.partialorder %v13469_v63, 0.0  ;;  %v4649_v1 = vld [vmem:[#allocation5 + $0x560] sm:$0xff]  ;;  %v12575_v3 = vcombine.low %v4637_v58, %v4641_v12  ;;  %v12577_v4 = vcombine.low %v4638_v13, %v4642_v16 }
 0x3ab   :  { %v4442_v9 = vmin.f32 %v13470_v2, 0.0  ;;  %v4444_v10 = vmin.f32 %v13472_v14, 0.0  ;;  %vm4436_vm5 = vcmp.gt.f32.partialorder %v13470_v2, 0.0  ;;  %vm4438_vm6 = vcmp.gt.f32.partialorder %v13472_v14, 0.0  ;;  %v4653_v7 = vld [vmem:[#allocation5 + $0x580] sm:$0xff] }
 0x3ac   :  { %v4447_v11 = vmul.f32 1.442695, %v4441_v5  ;;  %v12584_v5 = vcombine.high %v4645_v0, %v4649_v1 }
 0x3ad   :  { %v4449_v52 = vmul.f32 1.442695, %v4442_v9  ;;  %v4453_v15 = vmul.f32 1.442695, %v4444_v10  ;;  %v4657_v9 = vld [vmem:[#allocation5 + $0x5a0] sm:$0xff]  ;;  %v4654_v10 = vld [vmem:[#allocation5 + $0x588] sm:$0xff] }
 0x3ae   :  { %14571 = vpow2.f32 %v4447_v11  ;;  %v4658_v11 = vld [vmem:[#allocation5 + $0x5a8] sm:$0xff] }
 0x3af   :  { %14573 = vpow2.f32 %v4449_v52  ;;  %v12583_v52 = vcombine.low %v4645_v0, %v4649_v1  ;;  %v12593_v24 = vcombine.low %v4654_v10, %v4658_v11 }
 0x3b0   :  { %14575 = vpow2.f32 %v4453_v15 }
 0x3b8   :  { %v14572_v17 = vpop.eup %14571 }
 0x3b9   :  { %v12409_v18 = vadd.f32 -1.0, %v14572_v17  ;;  %v14574_v19 = vpop.eup %14573  ;;  %v12592_v17 = vcombine.high %v4653_v7, %v4657_v9 }
 0x3ba   :  { %v14576_v20 = vpop.eup %14575  ;;  %v12410_v21 = vadd.f32 -1.0, %v14574_v19  ;;  %v4661_v19 = vld [vmem:[#allocation5 + $0x5c0] sm:$0xff] }
 0x3bb   :  { %v4465_v22 = vsel %vm4435_vm4, %v13469_v63, %v12409_v18  ;;  %v12412_v23 = vadd.f32 -1.0, %v14576_v20  ;;  %v12578_v63 = vcombine.high %v4638_v13, %v4642_v16  ;;  %v12594_v18 = vcombine.high %v4654_v10, %v4658_v11  ;;  %v4665_v20 = vld [vmem:[#allocation5 + $0x5e0] sm:$0xff] }
 0x3bc   :  { %v4466_v27 = vsel %vm4436_vm5, %v13470_v2, %v12410_v21  ;;  %v16041_v33 = vpack.c.bf16 %v4465_v22, %v4465_v22  ;;  %v4646_v2 = vld [vmem:[#allocation5 + $0x548] sm:$0xff]  ;;  %v12599_v36 = vcombine.low %v4661_v19, %v4665_v20 }
 0x3bd   :  { %v16038_v31 = vpack.c.bf16 %v4466_v27, %v4466_v27  ;;  %v4468_v25 = vsel %vm4438_vm6, %v13472_v14, %v12412_v23  ;;  %v4650_v14 = vld [vmem:[#allocation5 + $0x568] sm:$0xff]  ;;  %v12591_v23 = vcombine.low %v4653_v7, %v4657_v9  ;;  %v12600_v27 = vcombine.high %v4661_v19, %v4665_v20 }
 0x3be   :  { %v16045_v47 = vpack.c.bf16 %v4468_v25, %v4468_v25  ;;  %v12586_v6 = vcombine.high %v4646_v2, %v4650_v14  ;;  %v12585_v15 = vcombine.low %v4646_v2, %v4650_v14  ;;  %v4662_v21 = vld [vmem:[#allocation5 + $0x5c8] sm:$0xff] }
 0x3bf   :  { %6855 = vmatprep.mubr.bf16.mxu1 %v16038_v31  ;;  %6978 = vmatprep.mubr.bf16.mxu0 %v16038_v31  ;;  %v4666_v22 = vld [vmem:[#allocation5 + $0x5e8] sm:$0xff] }
 0x3c0   :  { %6856 = vmatmul.mubr.bf16.vlgmr.msra.gmra.mrb[8].mxu1 %v16041_v33  ;;  %6979 = vmatmul.mubr.bf16.vlgmr.msra.gmra.mrb[12].mxu0 %v16041_v33  ;;  %v12602_v28 = vcombine.high %v4662_v21, %v4666_v22  ;;  %v4670_v25 = vld [vmem:[#allocation5 + $0x608] sm:$0xff] }
 0x3c1   :  { %6865 = vmatpush1.bf16.msra.mxu1 %v12543_v38  ;;  %6988 = vmatpush1.bf16.msra.mxu0 %v12545_v32  ;;  %v12570_v38 = vcombine.high %v4630_v55, %v4634_v56  ;;  %v4674_v32 = vld [vmem:[#allocation5 + $0x628] sm:$0xff] }
 0x3c2   :  { %6896 = vmatprep.mubr.bf16.mxu1 %v16045_v47  ;;  %7019 = vmatprep.mubr.bf16.mxu0 %v16045_v47  ;;  %v12610_v45 = vcombine.high %v4670_v25, %v4674_v32  ;;  %v12609_v53 = vcombine.low %v4670_v25, %v4674_v32  ;;  %v4706_v7 = vld [vmem:[#allocation5 + $0x728] sm:$0xff] }
 0x3c3   :  { %6866 = vmatprep.subr.bf16.mxu1 %v12552_v39  ;;  %6989 = vmatprep.subr.bf16.mxu0 %v12554_v35  ;;  %v12601_v39 = vcombine.low %v4662_v21, %v4666_v22  ;;  %v3210_v35 = vrot.slane %v16028_v59, %v15996_v40  ;;  %v4714_v19 = vld [vmem:[#allocation5 + $0x768] sm:$0xff] }
 0x3c5   :  { %6867 = vmatpush1.bf16.msra.mxu1 %v12551_v48  ;;  %6990 = vmatpush1.bf16.msra.mxu0 %v12553_v8  ;;  %v4681_v48 = vld [vmem:[#allocation5 + $0x660] sm:$0xff]  ;;  %v4678_v8 = vld [vmem:[#allocation5 + $0x648] sm:$0xff]  ;;  %v16057_v54 = vadd.f32 %v16036_v46, %v3210_v35 }
 0x3c6   :  { %6868 = vmatprep.subr.bf16.mxu1 %v12560_v50  ;;  %6991 = vmatprep.subr.bf16.mxu0 %v12562_v51  ;;  %v4682_v50 = vld [vmem:[#allocation5 + $0x668] sm:$0xff]  ;;  %v12607_v51 = vcombine.low %v4669_v29, %v4673_v30  ;;  %v12616_v55 = vcombine.high %v4677_v37, %v4681_v48  ;;  %v12615_v58 = vcombine.low %v4677_v37, %v4681_v48  ;;  %v4693_v46 = vld [vmem:[#allocation5 + $0x6c0] sm:$0xff] }
 0x3c7   :  { %v12618_v56 = vcombine.high %v4678_v8, %v4682_v50  ;;  %v12617_v12 = vcombine.low %v4678_v8, %v4682_v50  ;;  %v4443_v13 = vmin.f32 %v16057_v54, 0.0  ;;  %v4722_v29 = vld [vmem:[#allocation5 + $0x7a8] sm:$0xff]  ;;  %v4729_v35 = vld [vmem:[#allocation5 + $0x7e0] sm:$0xff]  ;;  %vm4437_vm7 = vcmp.gt.f32.partialorder %v16057_v54, 0.0 }
 0x3c9   :  { %6869 = vmatpush1.bf16.msra.mxu1 %v12559_v57  ;;  %6992 = vmatpush1.bf16.msra.mxu0 %v12561_v34  ;;  %v4685_v57 = vld [vmem:[#allocation5 + $0x680] sm:$0xff]  ;;  %v4451_v2 = vmul.f32 1.442695, %v4443_v13 }
 0x3ca   :  { %6870 = vmatprep.subr.bf16.mxu1 %v12568_v26  ;;  %6993 = vmatprep.subr.bf16.mxu0 %v12570_v38  ;;  %v4689_v34 = vld [vmem:[#allocation5 + $0x6a0] sm:$0xff]  ;;  %v4686_v26 = vld [vmem:[#allocation5 + $0x688] sm:$0xff] }
 0x3cb   :  { %v4690_v38 = vld [vmem:[#allocation5 + $0x6a8] sm:$0xff]  ;;  %v12624_v16 = vcombine.high %v4685_v57, %v4689_v34  ;;  %v12623_v0 = vcombine.low %v4685_v57, %v4689_v34  ;;  %14577 = vpow2.f32 %v4451_v2  ;;  %v4741_v13 = vld [vmem:[#allocation5 + $0x840] sm:$0xff] }
 0x3cc   :  { %v12625_v1 = vcombine.low %v4686_v26, %v4690_v38  ;;  %v4734_v57 = vld [vmem:[#allocation5 + $0x808] sm:$0xff] }
 0x3cd   :  { %6871 = vmatpush1.bf16.msra.mxu1 %v12567_v60  ;;  %6994 = vmatpush1.bf16.msra.mxu0 %v12569_v61  ;;  %v12626_v60 = vcombine.high %v4686_v26, %v4690_v38  ;;  %v4697_v61 = vld [vmem:[#allocation5 + $0x6e0] sm:$0xff]  ;;  %v4738_v34 = vld [vmem:[#allocation5 + $0x828] sm:$0xff] }
 0x3ce   :  { %6872 = vmatprep.subr.bf16.mxu1 %v12576_v62  ;;  %6995 = vmatprep.subr.bf16.mxu0 %v12578_v63  ;;  %v4694_v62 = vld [vmem:[#allocation5 + $0x6c8] sm:$0xff]  ;;  %v12632_v14 = vcombine.high %v4693_v46, %v4697_v61  ;;  %v12631_v9 = vcombine.low %v4693_v46, %v4697_v61 }
 0x3cf   :  { %v4698_v63 = vld [vmem:[#allocation5 + $0x6e8] sm:$0xff] }
 0x3d0   :  { %v12633_v10 = vcombine.low %v4694_v62, %v4698_v63  ;;  %v4742_v46 = vld [vmem:[#allocation5 + $0x848] sm:$0xff] }
 0x3d1   :  { %6873 = vmatpush1.bf16.msra.mxu1 %v12575_v3  ;;  %6996 = vmatpush1.bf16.msra.mxu0 %v12577_v4  ;;  %v12634_v3 = vcombine.high %v4694_v62, %v4698_v63  ;;  %v4701_v4 = vld [vmem:[#allocation5 + $0x700] sm:$0xff]  ;;  %v4746_v61 = vld [vmem:[#allocation5 + $0x868] sm:$0xff]  ;;  %v12673_v63 = vcombine.low %v4734_v57, %v4738_v34 }
 0x3d2   :  { %6874 = vmatprep.subr.bf16.mxu1 %v12584_v5  ;;  %6997 = vmatprep.subr.bf16.mxu0 %v12586_v6  ;;  %v4705_v5 = vld [vmem:[#allocation5 + $0x720] sm:$0xff]  ;;  %v4702_v6 = vld [vmem:[#allocation5 + $0x708] sm:$0xff]  ;;  %v12682_v2 = vcombine.high %v4742_v46, %v4746_v61 }
 0x3d3   :  { %v12640_v11 = vcombine.high %v4701_v4, %v4705_v5  ;;  %v12639_v20 = vcombine.low %v4701_v4, %v4705_v5  ;;  %v12641_v21 = vcombine.low %v4702_v6, %v4706_v7  ;;  %v4750_v4 = vld [vmem:[#allocation5 + $0x888] sm:$0xff] }
 0x3d4   :  { %v4754_v5 = vld [vmem:[#allocation5 + $0x8a8] sm:$0xff] }
 0x3d5   :  { %6875 = vmatpush1.bf16.msra.mxu1 %v12583_v52  ;;  %6998 = vmatpush1.bf16.msra.mxu0 %v12585_v15  ;;  %v12642_v52 = vcombine.high %v4702_v6, %v4706_v7  ;;  %v4709_v15 = vld [vmem:[#allocation5 + $0x740] sm:$0xff]  ;;  %v14578_v37 = vpop.eup %14577  ;;  %v12681_v6 = vcombine.low %v4742_v46, %v4746_v61 }
 0x3d6   :  { %6876 = vmatprep.subr.bf16.mxu1 %v12592_v17  ;;  %6999 = vmatprep.subr.bf16.mxu0 %v12594_v18  ;;  %v4713_v17 = vld [vmem:[#allocation5 + $0x760] sm:$0xff]  ;;  %v4710_v18 = vld [vmem:[#allocation5 + $0x748] sm:$0xff] }
 0x3d7   :  { %v12648_v22 = vcombine.high %v4709_v15, %v4713_v17  ;;  %v12647_v30 = vcombine.low %v4709_v15, %v4713_v17  ;;  %v12649_v25 = vcombine.low %v4710_v18, %v4714_v19  ;;  %v4762_v15 = vld [vmem:[#allocation5 + $0x8e8] sm:$0xff]  ;;  %v4797_v46 = vld [vmem:[#allocation5 + $0xa00] sm:$0xff] }
 0x3d8   :  { %v4801_v61 = vld [vmem:[#allocation5 + $0xa20] sm:$0xff] }
 0x3d9   :  { %6877 = vmatpush1.bf16.msra.mxu1 %v12591_v23  ;;  %7000 = vmatpush1.bf16.msra.mxu0 %v12593_v24  ;;  %v12650_v23 = vcombine.high %v4710_v18, %v4714_v19  ;;  %v4717_v24 = vld [vmem:[#allocation5 + $0x780] sm:$0xff]  ;;  %v12689_v18 = vcombine.low %v4750_v4, %v4754_v5 }
 0x3da   :  { %6878 = vmatprep.subr.bf16.mxu1 %v12600_v27  ;;  %7001 = vmatprep.subr.bf16.mxu0 %v12602_v28  ;;  %v4721_v27 = vld [vmem:[#allocation5 + $0x7a0] sm:$0xff]  ;;  %v4718_v28 = vld [vmem:[#allocation5 + $0x788] sm:$0xff] }
 0x3db   :  { %v12656_v32 = vcombine.high %v4717_v24, %v4721_v27  ;;  %v12655_v48 = vcombine.low %v4717_v24, %v4721_v27  ;;  %v12657_v8 = vcombine.low %v4718_v28, %v4722_v29  ;;  %v4770_v24 = vld [vmem:[#allocation5 + $0x928] sm:$0xff] }
 0x3dd   :  { %6879 = vmatpush1.bf16.msra.mxu1 %v12599_v36  ;;  %7002 = vmatpush1.bf16.msra.mxu0 %v12601_v39  ;;  %v12658_v36 = vcombine.high %v4718_v28, %v4722_v29  ;;  %v4725_v39 = vld [vmem:[#allocation5 + $0x7c0] sm:$0xff] }
 0x3de   :  { %6880 = vmatprep.subr.bf16.mxu1 %v12608_v44  ;;  %7003 = vmatprep.subr.bf16.mxu0 %v12610_v45  ;;  %v4726_v44 = vld [vmem:[#allocation5 + $0x7c8] sm:$0xff]  ;;  %v12664_v50 = vcombine.high %v4725_v39, %v4729_v35  ;;  %v12663_v26 = vcombine.low %v4725_v39, %v4729_v35 }
 0x3df   :  { %v4730_v45 = vld [vmem:[#allocation5 + $0x7e8] sm:$0xff] }
 0x3e0   :  { %v12665_v38 = vcombine.low %v4726_v44, %v4730_v45  ;;  %v4778_v39 = vld [vmem:[#allocation5 + $0x968] sm:$0xff] }
 0x3e1   :  { %6881 = vmatpush1.bf16.msra.mxu1 %v12607_v51  ;;  %7004 = vmatpush1.bf16.msra.mxu0 %v12609_v53  ;;  %v12666_v51 = vcombine.high %v4726_v44, %v4730_v45  ;;  %v4733_v53 = vld [vmem:[#allocation5 + $0x800] sm:$0xff] }
 0x3e2   :  { %6882 = vmatprep.subr.bf16.mxu1 %v12616_v55  ;;  %7005 = vmatprep.subr.bf16.mxu0 %v12618_v56  ;;  %v12411_v55 = vadd.f32 -1.0, %v14578_v37  ;;  %v4737_v56 = vld [vmem:[#allocation5 + $0x820] sm:$0xff] }
 0x3e3   :  { %v12671_v62 = vcombine.low %v4733_v53, %v4737_v56 }
 0x3e5   :  { %6883 = vmatpush1.bf16.msra.mxu1 %v12615_v58  ;;  %7006 = vmatpush1.bf16.msra.mxu0 %v12617_v12  ;;  %v12672_v58 = vcombine.high %v4733_v53, %v4737_v56  ;;  %v12674_v12 = vcombine.high %v4734_v57, %v4738_v34  ;;  %v4789_v34 = vld [vmem:[#allocation5 + $0x9c0] sm:$0xff] }
 0x3e6   :  { %6884 = vmatprep.subr.bf16.mxu1 %v12624_v16  ;;  %7007 = vmatprep.subr.bf16.mxu0 %v12626_v60  ;;  %v4467_v16 = vsel %vm4437_vm7, %v16057_v54, %v12411_v55  ;;  %v4745_v60 = vld [vmem:[#allocation5 + $0x860] sm:$0xff] }
 0x3e7   :  { %v12679_v54 = vcombine.low %v4741_v13, %v4745_v60 }
 0x3e9   :  { %6885 = vmatpush1.bf16.msra.mxu1 %v12623_v0  ;;  %7008 = vmatpush1.bf16.msra.mxu0 %v12625_v1  ;;  %v16062_v0 = vpack.c.bf16 %v4467_v16, %v4467_v16  ;;  %v12680_v1 = vcombine.high %v4741_v13, %v4745_v60 }
 0x3ea   :  { %6886 = vmatprep.subr.bf16.mxu1 %v12632_v14  ;;  %7009 = vmatprep.subr.bf16.mxu0 %v12634_v3  ;;  %v4749_v14 = vld [vmem:[#allocation5 + $0x880] sm:$0xff] }
 0x3eb   :  { %v4753_v3 = vld [vmem:[#allocation5 + $0x8a0] sm:$0xff] }
 0x3ec   :  { %v12688_v7 = vcombine.high %v4749_v14, %v4753_v3  ;;  %v12687_v17 = vcombine.low %v4749_v14, %v4753_v3  ;;  %v12736_v14 = vcombine.high %v4797_v46, %v4801_v61 }
 0x3ed   :  { %6887 = vmatpush1.bf16.msra.mxu1 %v12631_v9  ;;  %7010 = vmatpush1.bf16.msra.mxu0 %v12633_v10  ;;  %v12690_v9 = vcombine.high %v4750_v4, %v4754_v5  ;;  %v4757_v10 = vld [vmem:[#allocation5 + $0x8c0] sm:$0xff] }
 0x3ee   :  { %6888 = vmatprep.subr.bf16.mxu1 %v12640_v11  ;;  %7011 = vmatprep.subr.bf16.mxu0 %v12642_v52  ;;  %v4761_v11 = vld [vmem:[#allocation5 + $0x8e0] sm:$0xff]  ;;  %v4758_v52 = vld [vmem:[#allocation5 + $0x8c8] sm:$0xff] }
 0x3ef   :  { %v12696_v19 = vcombine.high %v4757_v10, %v4761_v11  ;;  %v12695_v27 = vcombine.low %v4757_v10, %v4761_v11  ;;  %v12697_v28 = vcombine.low %v4758_v52, %v4762_v15  ;;  %v4805_v4 = vld [vmem:[#allocation5 + $0xa40] sm:$0xff] }
 0x3f0   :  { %v4809_v5 = vld [vmem:[#allocation5 + $0xa60] sm:$0xff] }
 0x3f1   :  { %6889 = vmatpush1.bf16.msra.mxu1 %v12639_v20  ;;  %7012 = vmatpush1.bf16.msra.mxu0 %v12641_v21  ;;  %v12698_v20 = vcombine.high %v4758_v52, %v4762_v15  ;;  %v4765_v21 = vld [vmem:[#allocation5 + $0x900] sm:$0xff]  ;;  %v12744_v10 = vcombine.high %v4805_v4, %v4809_v5  ;;  %v16067_v15 = vsub.s32 4, %v14862_v42 }
 0x3f2   :  { %6890 = vmatprep.subr.bf16.mxu1 %v12648_v22  ;;  %7013 = vmatprep.subr.bf16.mxu0 %v12650_v23  ;;  %v4769_v22 = vld [vmem:[#allocation5 + $0x920] sm:$0xff]  ;;  %v4766_v23 = vld [vmem:[#allocation5 + $0x908] sm:$0xff] }
 0x3f3   :  { %v12704_v29 = vcombine.high %v4765_v21, %v4769_v22  ;;  %v12703_v35 = vcombine.low %v4765_v21, %v4769_v22  ;;  %v12705_v44 = vcombine.low %v4766_v23, %v4770_v24  ;;  %v4813_v52 = vld [vmem:[#allocation5 + $0xa80] sm:$0xff]  ;;  %v12743_v21 = vcombine.low %v4805_v4, %v4809_v5  ;;  %v4846_v5 = vld [vmem:[#allocation5 + $0xb88] sm:$0xff] }
 0x3f4   :  { %v4849_v4 = vld [vmem:[#allocation5 + $0xba0] sm:$0xff] }
 0x3f5   :  { %6891 = vmatpush1.bf16.msra.mxu1 %v12647_v30  ;;  %7014 = vmatpush1.bf16.msra.mxu0 %v12649_v25  ;;  %v12706_v30 = vcombine.high %v4766_v23, %v4770_v24  ;;  %v4773_v25 = vld [vmem:[#allocation5 + $0x940] sm:$0xff] }
 0x3f6   :  { %6892 = vmatprep.subr.bf16.mxu1 %v12656_v32  ;;  %7015 = vmatprep.subr.bf16.mxu0 %v12658_v36  ;;  %v4777_v32 = vld [vmem:[#allocation5 + $0x960] sm:$0xff]  ;;  %v4774_v36 = vld [vmem:[#allocation5 + $0x948] sm:$0xff] }
 0x3f7   :  { %v12712_v45 = vcombine.high %v4773_v25, %v4777_v32  ;;  %v12714_v37 = vcombine.high %v4774_v36, %v4778_v39  ;;  %v12711_v53 = vcombine.low %v4773_v25, %v4777_v32  ;;  %v12713_v55 = vcombine.low %v4774_v36, %v4778_v39  ;;  %v4826_v25 = vld [vmem:[#allocation5 + $0xae8] sm:$0xff] }
 0x3f9   :  { %6893 = vmatpush1.bf16.msra.mxu1 %v12655_v48  ;;  %7016 = vmatpush1.bf16.msra.mxu0 %v12657_v8  ;;  %v4781_v48 = vld [vmem:[#allocation5 + $0x980] sm:$0xff] }
 0x3fa   :  { %6894 = vmatprep.subr.bf16.mxu1 %v12664_v50  ;;  %7017 = vmatprep.subr.bf16.mxu0 %v12666_v51  ;;  %v4785_v8 = vld [vmem:[#allocation5 + $0x9a0] sm:$0xff]  ;;  %v4782_v50 = vld [vmem:[#allocation5 + $0x988] sm:$0xff] }
 0x3fb   :  { %v4786_v51 = vld [vmem:[#allocation5 + $0x9a8] sm:$0xff]  ;;  %v12720_v56 = vcombine.high %v4781_v48, %v4785_v8 }
 0x3fc   :  { %v12722_v57 = vcombine.high %v4782_v50, %v4786_v51  ;;  %v12721_v13 = vcombine.low %v4782_v50, %v4786_v51  ;;  %v4833_v50 = vld [vmem:[#allocation5 + $0xb20] sm:$0xff]  ;;  %v4830_v51 = vld [vmem:[#allocation5 + $0xb08] sm:$0xff] }
 0x3fd   :  { %6895 = vmatpush1.bf16.msra.mxu1 %v12663_v26  ;;  %7018 = vmatpush1.bf16.msra.mxu0 %v12665_v38  ;;  %v4793_v26 = vld [vmem:[#allocation5 + $0x9e0] sm:$0xff]  ;;  %v4790_v38 = vld [vmem:[#allocation5 + $0x9c8] sm:$0xff] }
 0x3fe   :  { %6905 = vmatprep.subr.bf16.mxu1 %v12672_v58  ;;  %7028 = vmatprep.subr.bf16.mxu0 %v12674_v12  ;;  %v4794_v58 = vld [vmem:[#allocation5 + $0x9e8] sm:$0xff]  ;;  %v12719_v12 = vcombine.low %v4781_v48, %v4785_v8  ;;  %v12728_v16 = vcombine.high %v4789_v34, %v4793_v26 }
 0x3ff   :  { %v12730_v60 = vcombine.high %v4790_v38, %v4794_v58 }
 0x400   :  { %6897 = vmatmul.mubr.bf16.vlgmr.msra.gmra.mrb[8].mxu1 %v16062_v0  ;;  %7020 = vmatmul.mubr.bf16.vlgmr.msra.gmra.mrb[12].mxu0 %v16062_v0 }
 0x401   :  { %6906 = vmatpush1.bf16.msra.mxu1 %v12671_v62  ;;  %7029 = vmatpush1.bf16.msra.mxu0 %v12673_v63  ;;  %v4798_v62 = vld [vmem:[#allocation5 + $0xa08] sm:$0xff] }
 0x402   :  { %6907 = vmatprep.subr.bf16.mxu1 %v12680_v1  ;;  %7030 = vmatprep.subr.bf16.mxu0 %v12682_v2  ;;  %v4802_v63 = vld [vmem:[#allocation5 + $0xa28] sm:$0xff]  ;;  %v12727_v1 = vcombine.low %v4789_v34, %v4793_v26  ;;  %v12729_v2 = vcombine.low %v4790_v38, %v4794_v58 }
 0x403   :  { %v12738_v3 = vcombine.high %v4798_v62, %v4802_v63 }
 0x405   :  { %6908 = vmatpush1.bf16.msra.mxu1 %v12679_v54  ;;  %7031 = vmatpush1.bf16.msra.mxu0 %v12681_v6  ;;  %v4806_v54 = vld [vmem:[#allocation5 + $0xa48] sm:$0xff] }
 0x406   :  { %6909 = vmatprep.subr.bf16.mxu1 %v12688_v7  ;;  %7032 = vmatprep.subr.bf16.mxu0 %v12690_v9  ;;  %v4810_v6 = vld [vmem:[#allocation5 + $0xa68] sm:$0xff]  ;;  %v12735_v7 = vcombine.low %v4797_v46, %v4801_v61  ;;  %v12737_v9 = vcombine.low %v4798_v62, %v4802_v63 }
 0x407   :  { %v12746_v11 = vcombine.high %v4806_v54, %v4810_v6  ;;  %v12745_v22 = vcombine.low %v4806_v54, %v4810_v6  ;;  %v4838_v46 = vld [vmem:[#allocation5 + $0xb48] sm:$0xff] }
 0x408   :  { %v4842_v61 = vld [vmem:[#allocation5 + $0xb68] sm:$0xff] }
 0x409   :  { %6910 = vmatpush1.bf16.msra.mxu1 %v12687_v17  ;;  %7033 = vmatpush1.bf16.msra.mxu0 %v12689_v18  ;;  %v4817_v17 = vld [vmem:[#allocation5 + $0xaa0] sm:$0xff]  ;;  %v4814_v18 = vld [vmem:[#allocation5 + $0xa88] sm:$0xff] }
 0x40a   :  { %6911 = vmatprep.subr.bf16.mxu1 %v12696_v19  ;;  %7034 = vmatprep.subr.bf16.mxu0 %v12698_v20  ;;  %v4818_v19 = vld [vmem:[#allocation5 + $0xaa8] sm:$0xff]  ;;  %v16070_v20 = vsub.s32 5, %v14862_v42  ;;  %v12752_v23 = vcombine.high %v4813_v52, %v4817_v17  ;;  %v12751_v36 = vcombine.low %v4813_v52, %v4817_v17  ;;  %v4857_v52 = vld [vmem:[#allocation5 + $0xbe0] sm:$0xff] }
 0x40b   :  { %v12754_v24 = vcombine.high %v4814_v18, %v4818_v19  ;;  %v12753_v39 = vcombine.low %v4814_v18, %v4818_v19  ;;  %v4850_v54 = vld [vmem:[#allocation5 + $0xba8] sm:$0xff] }
 0x40c   :  { %v3222_v32 = vrot.slane %v16028_v59, %v16070_v20  ;;  %v4854_v17 = vld [vmem:[#allocation5 + $0xbc8] sm:$0xff] }
 0x40d   :  { %6912 = vmatpush1.bf16.msra.mxu1 %v12695_v27  ;;  %7035 = vmatpush1.bf16.msra.mxu0 %v12697_v28  ;;  %v4821_v27 = vld [vmem:[#allocation5 + $0xac0] sm:$0xff]  ;;  %v3218_v28 = vrot.slane %v16028_v59, %v16067_v15  ;;  %v4858_v18 = vld [vmem:[#allocation5 + $0xbe8] sm:$0xff] }
 0x40e   :  { %6913 = vmatprep.subr.bf16.mxu1 %v12704_v29  ;;  %7036 = vmatprep.subr.bf16.mxu0 %v12706_v30  ;;  %v4825_v29 = vld [vmem:[#allocation5 + $0xae0] sm:$0xff]  ;;  %v4822_v30 = vld [vmem:[#allocation5 + $0xac8] sm:$0xff] }
 0x40f   :  { %v12759_v34 = vcombine.low %v4821_v27, %v4825_v29  ;;  %v12761_v26 = vcombine.low %v4822_v30, %v4826_v25 }
 0x411   :  { %6914 = vmatpush1.bf16.msra.mxu1 %v12703_v35  ;;  %7037 = vmatpush1.bf16.msra.mxu0 %v12705_v44  ;;  %v12760_v44 = vcombine.high %v4821_v27, %v4825_v29  ;;  %v4479_v27 = vld [vmem:[#allocation5 + $0x10] sm:$0xff] }
 0x412   :  { %6915 = vmatprep.subr.bf16.mxu1 %v12712_v45  ;;  %7038 = vmatprep.subr.bf16.mxu0 %v12714_v37  ;;  %v12762_v45 = vcombine.high %v4822_v30, %v4826_v25  ;;  %v4829_v37 = vld [vmem:[#allocation5 + $0xb00] sm:$0xff]  ;;  %v4483_v30 = vld [vmem:[#allocation5 + $0x30] sm:$0xff]  ;;  %v4480_v25 = vld [vmem:[#allocation5 + $0x18] sm:$0xff] }
 0x413   :  { %v12768_v58 = vcombine.high %v4829_v37, %v4833_v50  ;;  %v12767_v63 = vcombine.low %v4829_v37, %v4833_v50  ;;  %v12420_v37 = vcombine.high %v4479_v27, %v4483_v30  ;;  %v4487_v50 = vld [vmem:[#allocation5 + $0x50] sm:$0xff] }
 0x415   :  { %6916 = vmatpush1.bf16.msra.mxu1 %v12711_v53  ;;  %7039 = vmatpush1.bf16.msra.mxu0 %v12713_v55  ;;  %v4834_v53 = vld [vmem:[#allocation5 + $0xb28] sm:$0xff] }
 0x416   :  { %6917 = vmatprep.subr.bf16.mxu1 %v12720_v56  ;;  %7040 = vmatprep.subr.bf16.mxu0 %v12722_v57 }
 0x419   :  { %6918 = vmatpush1.bf16.msra.mxu1 %v12719_v12  ;;  %7041 = vmatpush1.bf16.msra.mxu0 %v12721_v13  ;;  %v12770_v12 = vcombine.high %v4830_v51, %v4834_v53  ;;  %v4837_v13 = vld [vmem:[#allocation5 + $0xb40] sm:$0xff] }
 0x41a   :  { %6919 = vmatprep.subr.bf16.mxu1 %v12728_v16  ;;  %7042 = vmatprep.subr.bf16.mxu0 %v12730_v60  ;;  %v4841_v60 = vld [vmem:[#allocation5 + $0xb60] sm:$0xff] }
 0x41b   :  { %v12775_v6 = vcombine.low %v4837_v13, %v4841_v60 }
 0x41d   :  { %6920 = vmatpush1.bf16.msra.mxu1 %v12727_v1  ;;  %7043 = vmatpush1.bf16.msra.mxu0 %v12729_v2  ;;  %v12769_v1 = vcombine.low %v4830_v51, %v4834_v53  ;;  %v12776_v2 = vcombine.high %v4837_v13, %v4841_v60  ;;  %v4491_v53 = vld [vmem:[#allocation5 + $0x70] sm:$0xff]  ;;  %v4500_v13 = vld [vmem:[#allocation5 + $0xb8] sm:$0xff] }
 0x41e   :  { %6921 = vmatprep.subr.bf16.mxu1 %v12736_v14  ;;  %7044 = vmatprep.subr.bf16.mxu0 %v12738_v3  ;;  %v12778_v14 = vcombine.high %v4838_v46, %v4842_v61  ;;  %v4845_v3 = vld [vmem:[#allocation5 + $0xb80] sm:$0xff] }
 0x41f   :  { %v12783_v19 = vcombine.low %v4845_v3, %v4849_v4 }
 0x421   :  { %6922 = vmatpush1.bf16.msra.mxu1 %v12735_v7  ;;  %7045 = vmatpush1.bf16.msra.mxu0 %v12737_v9  ;;  %v12777_v7 = vcombine.low %v4838_v46, %v4842_v61  ;;  %v12784_v9 = vcombine.high %v4845_v3, %v4849_v4 }
 0x422   :  { %6923 = vmatprep.subr.bf16.mxu1 %v12744_v10  ;;  %7046 = vmatprep.subr.bf16.mxu0 %v12746_v11  ;;  %v12786_v10 = vcombine.high %v4846_v5, %v4850_v54  ;;  %v4853_v11 = vld [vmem:[#allocation5 + $0xbc0] sm:$0xff] }
 0x425   :  { %6924 = vmatpush1.bf16.msra.mxu1 %v12743_v21  ;;  %7047 = vmatpush1.bf16.msra.mxu0 %v12745_v22  ;;  %v12785_v21 = vcombine.low %v4846_v5, %v4850_v54  ;;  %v12792_v22 = vcombine.high %v4853_v11, %v4857_v52  ;;  %v4511_v54 = vld [vmem:[#allocation5 + $0x110] sm:$0xff] }
 0x426   :  { %6925 = vmatprep.subr.bf16.mxu1 %v12752_v23  ;;  %7048 = vmatprep.subr.bf16.mxu0 %v12754_v24  ;;  %v12794_v23 = vcombine.high %v4854_v17, %v4858_v18 }
 0x427   :  { %v4428_v35 = vpop.f32.mrb[8].mxu0 }
 0x428   :  { %v16076_v48 = vadd.f32 %v4428_v35, %v3218_v28  ;;  %v4430_v8 = vpop.f32.mrb[9].mxu0  ;;  %v12793_v35 = vcombine.low %v4854_v17, %v4858_v18  ;;  %v4519_v17 = vld [vmem:[#allocation5 + $0x150] sm:$0xff] }
 0x429   :  { %v16078_v55 = vadd.f32 %v4430_v8, %v3222_v32  ;;  %v4432_v56 = vpop.f32.mrb[10].mxu0  ;;  %6926 = vmatpush1.bf16.msra.mxu1 %v12751_v36  ;;  %7049 = vmatpush1.bf16.msra.mxu0 %v12753_v39  ;;  %v4484_v32 = vld [vmem:[#allocation5 + $0x38] sm:$0xff]  ;;  %v12791_v39 = vcombine.low %v4853_v11, %v4857_v52  ;;  %v4523_v18 = vld [vmem:[#allocation5 + $0x170] sm:$0xff] }
 0x42a   :  { %v4445_v59 = vmin.f32 %v16076_v48, 0.0  ;;  %v4433_v57 = vpop.f32.mrb[11].mxu0  ;;  %6927 = vmatprep.subr.bf16.mxu1 %v12760_v44  ;;  %7050 = vmatprep.subr.bf16.mxu0 %v12762_v45  ;;  %vm4439_vm8 = vcmp.gt.f32.partialorder %v16076_v48, 0.0  ;;  %v12422_v8 = vcombine.high %v4480_v25, %v4484_v32  ;;  %v4488_v56 = vld [vmem:[#allocation5 + $0x58] sm:$0xff] }
 0x42b   :  { %v4446_v38 = vmin.f32 %v16078_v55, 0.0  ;;  %vm4440_vm9 = vcmp.gt.f32.partialorder %v16078_v55, 0.0  ;;  %v12419_v57 = vcombine.low %v4479_v27, %v4483_v30  ;;  %v4528_v30 = vld [vmem:[#allocation5 + $0x198] sm:$0xff] }
 0x42c   :  { %v4455_v16 = vmul.f32 1.442695, %v4445_v59  ;;  %v4492_v59 = vld [vmem:[#allocation5 + $0x78] sm:$0xff] }
 0x42d   :  { %v4457_v62 = vmul.f32 1.442695, %v4446_v38  ;;  %6928 = vmatpush1.bf16.msra.mxu1 %v12759_v34  ;;  %7051 = vmatpush1.bf16.msra.mxu0 %v12761_v26  ;;  %v12421_v34 = vcombine.low %v4480_v25, %v4484_v32  ;;  %v12430_v38 = vcombine.high %v4488_v56, %v4492_v59  ;;  %v12429_v60 = vcombine.low %v4488_v56, %v4492_v59  ;;  %v4532_v25 = vld [vmem:[#allocation5 + $0x1b8] sm:$0xff] }
 0x42e   :  { %14579 = vpow2.f32 %v4455_v16  ;;  %6929 = vmatprep.subr.bf16.mxu1 %v12768_v58  ;;  %7052 = vmatprep.subr.bf16.mxu0 %v12770_v12  ;;  %v4499_v58 = vld [vmem:[#allocation5 + $0xb0] sm:$0xff]  ;;  %v4496_v12 = vld [vmem:[#allocation5 + $0x98] sm:$0xff]  ;;  %v12427_v16 = vcombine.low %v4487_v50, %v4491_v53  ;;  %v12459_v32 = vcombine.low %v4519_v17, %v4523_v18 }
 0x42f   :  { %14581 = vpow2.f32 %v4457_v62  ;;  %v12438_v61 = vcombine.high %v4496_v12, %v4500_v13  ;;  %v4503_v62 = vld [vmem:[#allocation5 + $0xd0] sm:$0xff]  ;;  %v12437_v3 = vcombine.low %v4496_v12, %v4500_v13 }
 0x431   :  { %6930 = vmatpush1.bf16.msra.mxu1 %v12767_v63  ;;  %7053 = vmatpush1.bf16.msra.mxu0 %v12769_v1  ;;  %v4507_v63 = vld [vmem:[#allocation5 + $0xf0] sm:$0xff]  ;;  %v4504_v1 = vld [vmem:[#allocation5 + $0xd8] sm:$0xff] }
 0x432   :  { %6931 = vmatprep.subr.bf16.mxu1 %v12776_v2  ;;  %7054 = vmatprep.subr.bf16.mxu0 %v12778_v14  ;;  %v4508_v2 = vld [vmem:[#allocation5 + $0xf8] sm:$0xff]  ;;  %v12444_v4 = vcombine.high %v4503_v62, %v4507_v63 }
 0x433   :  { %v12446_v5 = vcombine.high %v4504_v1, %v4508_v2 }
 0x435   :  { %6932 = vmatpush1.bf16.msra.mxu1 %v12775_v6  ;;  %7055 = vmatpush1.bf16.msra.mxu0 %v12777_v7  ;;  %v4515_v6 = vld [vmem:[#allocation5 + $0x130] sm:$0xff]  ;;  %v4512_v7 = vld [vmem:[#allocation5 + $0x118] sm:$0xff] }
 0x436   :  { %6933 = vmatprep.subr.bf16.mxu1 %v12784_v9  ;;  %7056 = vmatprep.subr.bf16.mxu0 %v12786_v10  ;;  %v12443_v9 = vcombine.low %v4503_v62, %v4507_v63  ;;  %v12445_v10 = vcombine.low %v4504_v1, %v4508_v2  ;;  %v12452_v11 = vcombine.high %v4511_v54, %v4515_v6 }
 0x438   :  { %v14580_v24 = vpop.eup %14579 }
 0x439   :  { %v14582_v28 = vpop.eup %14581  ;;  %v12413_v29 = vadd.f32 -1.0, %v14580_v24  ;;  %6934 = vmatpush1.bf16.msra.mxu1 %v12783_v19  ;;  %7057 = vmatpush1.bf16.msra.mxu0 %v12785_v21  ;;  %v4520_v19 = vld [vmem:[#allocation5 + $0x158] sm:$0xff]  ;;  %v12460_v24 = vcombine.high %v4519_v17, %v4523_v18 }
 0x43a   :  { %v12414_v36 = vadd.f32 -1.0, %v14582_v28  ;;  %6935 = vmatprep.subr.bf16.mxu1 %v12792_v22  ;;  %7058 = vmatprep.subr.bf16.mxu0 %v12794_v23  ;;  %v4524_v21 = vld [vmem:[#allocation5 + $0x178] sm:$0xff]  ;;  %v12451_v22 = vcombine.low %v4511_v54, %v4515_v6  ;;  %v4527_v28 = vld [vmem:[#allocation5 + $0x190] sm:$0xff] }
 0x43b   :  { %v4469_v44 = vsel %vm4439_vm8, %v16076_v48, %v12413_v29  ;;  %v4495_v48 = vld [vmem:[#allocation5 + $0x90] sm:$0xff]  ;;  %v12462_v27 = vcombine.high %v4520_v19, %v4524_v21 }
 0x43c   :  { %v4470_v45 = vsel %vm4440_vm9, %v16078_v55, %v12414_v36  ;;  %v16088_v26 = vpack.c.bf16 %v4469_v44, %v4469_v44  ;;  %v12428_v55 = vcombine.high %v4487_v50, %v4491_v53  ;;  %v12436_v46 = vcombine.high %v4495_v48, %v4499_v58  ;;  %v4531_v29 = vld [vmem:[#allocation5 + $0x1b0] sm:$0xff] }
 0x43d   :  { %v16086_v51 = vpack.c.bf16 %v4470_v45, %v4470_v45  ;;  %6936 = vmatpush1.bf16.msra.mxu1 %v12791_v39  ;;  %7059 = vmatpush1.bf16.msra.mxu0 %v12793_v35  ;;  %v12435_v14 = vcombine.low %v4495_v48, %v4499_v58  ;;  %v12461_v36 = vcombine.low %v4520_v19, %v4524_v21  ;;  %v4535_v44 = vld [vmem:[#allocation5 + $0x1d0] sm:$0xff]  ;;  %v4544_v48 = vld [vmem:[#allocation5 + $0x218] sm:$0xff] }
 0x43e   :  { %7069 = vmatprep.subr.bf16.mxu1 %v12420_v37  ;;  %7192 = vmatprep.subr.bf16.mxu0 %v12422_v8  ;;  %v12468_v39 = vcombine.high %v4527_v28, %v4531_v29  ;;  %v12470_v35 = vcombine.high %v4528_v30, %v4532_v25  ;;  %v4539_v45 = vld [vmem:[#allocation5 + $0x1f0] sm:$0xff]  ;;  %v4536_v37 = vld [vmem:[#allocation5 + $0x1d8] sm:$0xff]  ;;  %v12467_v50 = vcombine.low %v4527_v28, %v4531_v29 }
 0x43f   :  { %6937 = vmatprep.mubr.bf16.mxu1 %v16086_v51  ;;  %7060 = vmatprep.mubr.bf16.mxu0 %v16086_v51  ;;  %v4540_v8 = vld [vmem:[#allocation5 + $0x1f8] sm:$0xff]  ;;  %v12469_v53 = vcombine.low %v4528_v30, %v4532_v25  ;;  %v12476_v56 = vcombine.high %v4535_v44, %v4539_v45 }
 0x440   :  { %6938 = vmatmul.mubr.bf16.vlgmr.msra.gmra.mrb[8].mxu1 %v16088_v26  ;;  %7061 = vmatmul.mubr.bf16.vlgmr.msra.gmra.mrb[12].mxu0 %v16088_v26  ;;  %v12478_v59 = vcombine.high %v4536_v37, %v4540_v8  ;;  %v12477_v58 = vcombine.low %v4536_v37, %v4540_v8 }
 0x441   :  { %7070 = vmatpush1.bf16.msra.mxu1 %v12419_v57  ;;  %7193 = vmatpush1.bf16.msra.mxu0 %v12421_v34  ;;  %v4543_v57 = vld [vmem:[#allocation5 + $0x210] sm:$0xff] }
 0x442   :  { %7101 = vmatprep.mubr.bf16.mxu1 %v16038_v31  ;;  %7224 = vmatprep.mubr.bf16.mxu0 %v16038_v31  ;;  %v4516_v31 = vld [vmem:[#allocation5 + $0x138] sm:$0xff]  ;;  %v4547_v34 = vld [vmem:[#allocation5 + $0x230] sm:$0xff] }
 0x443   :  { %7071 = vmatprep.subr.bf16.mxu1 %v12428_v55  ;;  %7194 = vmatprep.subr.bf16.mxu0 %v12430_v38  ;;  %v12454_v52 = vcombine.high %v4512_v7, %v4516_v31  ;;  %v12453_v23 = vcombine.low %v4512_v7, %v4516_v31  ;;  %v4548_v55 = vld [vmem:[#allocation5 + $0x238] sm:$0xff]  ;;  %v12475_v38 = vcombine.low %v4535_v44, %v4539_v45 }
 0x444   :  { %v12484_v12 = vcombine.high %v4543_v57, %v4547_v34  ;;  %v12486_v13 = vcombine.high %v4544_v48, %v4548_v55  ;;  %v12483_v62 = vcombine.low %v4543_v57, %v4547_v34  ;;  %v12485_v63 = vcombine.low %v4544_v48, %v4548_v55 }
 0x445   :  { %7072 = vmatpush1.bf16.msra.mxu1 %v12427_v16  ;;  %7195 = vmatpush1.bf16.msra.mxu0 %v12429_v60  ;;  %v4551_v16 = vld [vmem:[#allocation5 + $0x250] sm:$0xff] }
 0x446   :  { %7073 = vmatprep.subr.bf16.mxu1 %v12436_v46  ;;  %7196 = vmatprep.subr.bf16.mxu0 %v12438_v61  ;;  %v4555_v60 = vld [vmem:[#allocation5 + $0x270] sm:$0xff]  ;;  %v4552_v46 = vld [vmem:[#allocation5 + $0x258] sm:$0xff] }
 0x447   :  { %v4556_v61 = vld [vmem:[#allocation5 + $0x278] sm:$0xff]  ;;  %v12492_v1 = vcombine.high %v4551_v16, %v4555_v60  ;;  %v12491_v54 = vcombine.low %v4551_v16, %v4555_v60 }
 0x448   :  { %v12494_v2 = vcombine.high %v4552_v46, %v4556_v61  ;;  %v12493_v6 = vcombine.low %v4552_v46, %v4556_v61 }
 0x449   :  { %7074 = vmatpush1.bf16.msra.mxu1 %v12435_v14  ;;  %7197 = vmatpush1.bf16.msra.mxu0 %v12437_v3  ;;  %v4559_v14 = vld [vmem:[#allocation5 + $0x290] sm:$0xff] }
 0x44a   :  { %7075 = vmatprep.subr.bf16.mxu1 %v12444_v4  ;;  %7198 = vmatprep.subr.bf16.mxu0 %v12446_v5  ;;  %v4563_v3 = vld [vmem:[#allocation5 + $0x2b0] sm:$0xff]  ;;  %v4560_v4 = vld [vmem:[#allocation5 + $0x298] sm:$0xff] }
 0x44b   :  { %v4564_v5 = vld [vmem:[#allocation5 + $0x2b8] sm:$0xff]  ;;  %v12500_v7 = vcombine.high %v4559_v14, %v4563_v3  ;;  %v12499_v17 = vcombine.low %v4559_v14, %v4563_v3 }
 0x44c   :  { %v12502_v31 = vcombine.high %v4560_v4, %v4564_v5  ;;  %v12501_v18 = vcombine.low %v4560_v4, %v4564_v5 }
 0x44d   :  { %7076 = vmatpush1.bf16.msra.mxu1 %v12443_v9  ;;  %7199 = vmatpush1.bf16.msra.mxu0 %v12445_v10  ;;  %v4567_v9 = vld [vmem:[#allocation5 + $0x2d0] sm:$0xff] }
 0x44e   :  { %7077 = vmatprep.subr.bf16.mxu1 %v12452_v11  ;;  %7200 = vmatprep.subr.bf16.mxu0 %v12454_v52  ;;  %v4571_v10 = vld [vmem:[#allocation5 + $0x2f0] sm:$0xff]  ;;  %v4568_v11 = vld [vmem:[#allocation5 + $0x2d8] sm:$0xff] }
 0x44f   :  { %v4572_v52 = vld [vmem:[#allocation5 + $0x2f8] sm:$0xff]  ;;  %v12508_v19 = vcombine.high %v4567_v9, %v4571_v10  ;;  %v12507_v28 = vcombine.low %v4567_v9, %v4571_v10 }
 0x450   :  { %v12510_v21 = vcombine.high %v4568_v11, %v4572_v52  ;;  %v12509_v29 = vcombine.low %v4568_v11, %v4572_v52 }
 0x451   :  { %7078 = vmatpush1.bf16.msra.mxu1 %v12451_v22  ;;  %7201 = vmatpush1.bf16.msra.mxu0 %v12453_v23  ;;  %v4575_v22 = vld [vmem:[#allocation5 + $0x310] sm:$0xff] }
 0x452   :  { %7079 = vmatprep.subr.bf16.mxu1 %v12460_v24  ;;  %7202 = vmatprep.subr.bf16.mxu0 %v12462_v27  ;;  %v4579_v23 = vld [vmem:[#allocation5 + $0x330] sm:$0xff]  ;;  %v4576_v24 = vld [vmem:[#allocation5 + $0x318] sm:$0xff] }
 0x453   :  { %v4580_v27 = vld [vmem:[#allocation5 + $0x338] sm:$0xff]  ;;  %v12516_v30 = vcombine.high %v4575_v22, %v4579_v23  ;;  %v12515_v44 = vcombine.low %v4575_v22, %v4579_v23 }
 0x454   :  { %v12518_v25 = vcombine.high %v4576_v24, %v4580_v27  ;;  %v12517_v45 = vcombine.low %v4576_v24, %v4580_v27 }
 0x455   :  { %7080 = vmatpush1.bf16.msra.mxu1 %v12459_v32  ;;  %7203 = vmatpush1.bf16.msra.mxu0 %v12461_v36  ;;  %v4583_v32 = vld [vmem:[#allocation5 + $0x350] sm:$0xff] }
 0x456   :  { %7081 = vmatprep.subr.bf16.mxu1 %v12468_v39  ;;  %7204 = vmatprep.subr.bf16.mxu0 %v12470_v35  ;;  %v4587_v36 = vld [vmem:[#allocation5 + $0x370] sm:$0xff]  ;;  %v4584_v39 = vld [vmem:[#allocation5 + $0x358] sm:$0xff] }
 0x457   :  { %v4588_v35 = vld [vmem:[#allocation5 + $0x378] sm:$0xff]  ;;  %v12524_v37 = vcombine.high %v4583_v32, %v4587_v36  ;;  %v12523_v57 = vcombine.low %v4583_v32, %v4587_v36 }
 0x458   :  { %v12526_v8 = vcombine.high %v4584_v39, %v4588_v35  ;;  %v12525_v34 = vcombine.low %v4584_v39, %v4588_v35  ;;  %v4639_v35 = vld [vmem:[#allocation5 + $0x510] sm:$0xff] }
 0x459   :  { %7082 = vmatpush1.bf16.msra.mxu1 %v12467_v50  ;;  %7205 = vmatpush1.bf16.msra.mxu0 %v12469_v53  ;;  %v4591_v50 = vld [vmem:[#allocation5 + $0x390] sm:$0xff] }
 0x45a   :  { %7083 = vmatprep.subr.bf16.mxu1 %v12476_v56  ;;  %7206 = vmatprep.subr.bf16.mxu0 %v12478_v59  ;;  %v4595_v53 = vld [vmem:[#allocation5 + $0x3b0] sm:$0xff]  ;;  %v4592_v56 = vld [vmem:[#allocation5 + $0x398] sm:$0xff] }
 0x45b   :  { %v4596_v59 = vld [vmem:[#allocation5 + $0x3b8] sm:$0xff]  ;;  %v12532_v48 = vcombine.high %v4591_v50, %v4595_v53  ;;  %v12531_v16 = vcombine.low %v4591_v50, %v4595_v53 }
 0x45c   :  { %v12534_v55 = vcombine.high %v4592_v56, %v4596_v59  ;;  %v12533_v60 = vcombine.low %v4592_v56, %v4596_v59  ;;  %v4647_v56 = vld [vmem:[#allocation5 + $0x550] sm:$0xff] }
 0x45d   :  { %7084 = vmatpush1.bf16.msra.mxu1 %v12475_v38  ;;  %7207 = vmatpush1.bf16.msra.mxu0 %v12477_v58  ;;  %v4599_v38 = vld [vmem:[#allocation5 + $0x3d0] sm:$0xff] }
 0x45e   :  { %7085 = vmatprep.subr.bf16.mxu1 %v12484_v12  ;;  %7208 = vmatprep.subr.bf16.mxu0 %v12486_v13  ;;  %v4603_v58 = vld [vmem:[#allocation5 + $0x3f0] sm:$0xff]  ;;  %v4600_v12 = vld [vmem:[#allocation5 + $0x3d8] sm:$0xff] }
 0x45f   :  { %v4604_v13 = vld [vmem:[#allocation5 + $0x3f8] sm:$0xff]  ;;  %v12540_v46 = vcombine.high %v4599_v38, %v4603_v58  ;;  %v12539_v14 = vcombine.low %v4599_v38, %v4603_v58  ;;  %v4651_v59 = vld [vmem:[#allocation5 + $0x570] sm:$0xff] }
 0x460   :  { %v12542_v61 = vcombine.high %v4600_v12, %v4604_v13  ;;  %v12541_v3 = vcombine.low %v4600_v12, %v4604_v13  ;;  %v12588_v38 = vcombine.high %v4647_v56, %v4651_v59  ;;  %v4655_v12 = vld [vmem:[#allocation5 + $0x590] sm:$0xff] }
 0x461   :  { %7086 = vmatpush1.bf16.msra.mxu1 %v12483_v62  ;;  %7209 = vmatpush1.bf16.msra.mxu0 %v12485_v63  ;;  %v4607_v62 = vld [vmem:[#allocation5 + $0x410] sm:$0xff] }
 0x462   :  { %7087 = vmatprep.subr.bf16.mxu1 %v12492_v1  ;;  %7210 = vmatprep.subr.bf16.mxu0 %v12494_v2  ;;  %v4611_v63 = vld [vmem:[#allocation5 + $0x430] sm:$0xff]  ;;  %v4608_v1 = vld [vmem:[#allocation5 + $0x418] sm:$0xff] }
 0x463   :  { %v4612_v2 = vld [vmem:[#allocation5 + $0x438] sm:$0xff]  ;;  %v12548_v4 = vcombine.high %v4607_v62, %v4611_v63  ;;  %v12547_v9 = vcombine.low %v4607_v62, %v4611_v63  ;;  %v4659_v13 = vld [vmem:[#allocation5 + $0x5b0] sm:$0xff] }
 0x464   :  { %v12550_v5 = vcombine.high %v4608_v1, %v4612_v2  ;;  %v12549_v10 = vcombine.low %v4608_v1, %v4612_v2  ;;  %v12596_v62 = vcombine.high %v4655_v12, %v4659_v13  ;;  %v4663_v1 = vld [vmem:[#allocation5 + $0x5d0] sm:$0xff] }
 0x465   :  { %7088 = vmatpush1.bf16.msra.mxu1 %v12491_v54  ;;  %7211 = vmatpush1.bf16.msra.mxu0 %v12493_v6  ;;  %v4615_v54 = vld [vmem:[#allocation5 + $0x450] sm:$0xff] }
 0x466   :  { %7089 = vmatprep.subr.bf16.mxu1 %v12500_v7  ;;  %7212 = vmatprep.subr.bf16.mxu0 %v12502_v31  ;;  %v4619_v6 = vld [vmem:[#allocation5 + $0x470] sm:$0xff]  ;;  %v4616_v7 = vld [vmem:[#allocation5 + $0x458] sm:$0xff] }
 0x467   :  { %v4620_v31 = vld [vmem:[#allocation5 + $0x478] sm:$0xff]  ;;  %v12556_v11 = vcombine.high %v4615_v54, %v4619_v6  ;;  %v12555_v22 = vcombine.low %v4615_v54, %v4619_v6  ;;  %v4667_v2 = vld [vmem:[#allocation5 + $0x5f0] sm:$0xff] }
 0x468   :  { %v12558_v52 = vcombine.high %v4616_v7, %v4620_v31  ;;  %v12557_v23 = vcombine.low %v4616_v7, %v4620_v31  ;;  %v12604_v54 = vcombine.high %v4663_v1, %v4667_v2  ;;  %v4671_v7 = vld [vmem:[#allocation5 + $0x610] sm:$0xff] }
 0x469   :  { %7090 = vmatpush1.bf16.msra.mxu1 %v12499_v17  ;;  %7213 = vmatpush1.bf16.msra.mxu0 %v12501_v18  ;;  %v4623_v17 = vld [vmem:[#allocation5 + $0x490] sm:$0xff] }
 0x46a   :  { %7091 = vmatprep.subr.bf16.mxu1 %v12508_v19  ;;  %7214 = vmatprep.subr.bf16.mxu0 %v12510_v21  ;;  %v4627_v18 = vld [vmem:[#allocation5 + $0x4b0] sm:$0xff]  ;;  %v4624_v19 = vld [vmem:[#allocation5 + $0x498] sm:$0xff] }
 0x46b   :  { %v4628_v21 = vld [vmem:[#allocation5 + $0x4b8] sm:$0xff]  ;;  %v12564_v24 = vcombine.high %v4623_v17, %v4627_v18  ;;  %v4675_v31 = vld [vmem:[#allocation5 + $0x630] sm:$0xff] }
 0x46c   :  { %v12566_v27 = vcombine.high %v4624_v19, %v4628_v21  ;;  %v12565_v32 = vcombine.low %v4624_v19, %v4628_v21  ;;  %v4679_v19 = vld [vmem:[#allocation5 + $0x650] sm:$0xff] }
 0x46d   :  { %7092 = vmatpush1.bf16.msra.mxu1 %v12507_v28  ;;  %7215 = vmatpush1.bf16.msra.mxu0 %v12509_v29  ;;  %v4631_v28 = vld [vmem:[#allocation5 + $0x4d0] sm:$0xff] }
 0x46e   :  { %7093 = vmatprep.subr.bf16.mxu1 %v12516_v30  ;;  %7216 = vmatprep.subr.bf16.mxu0 %v12518_v25  ;;  %v4635_v29 = vld [vmem:[#allocation5 + $0x4f0] sm:$0xff]  ;;  %v4632_v30 = vld [vmem:[#allocation5 + $0x4d8] sm:$0xff] }
 0x46f   :  { %v4636_v25 = vld [vmem:[#allocation5 + $0x4f8] sm:$0xff]  ;;  %v12572_v36 = vcombine.high %v4631_v28, %v4635_v29  ;;  %v4683_v21 = vld [vmem:[#allocation5 + $0x670] sm:$0xff] }
 0x470   :  { %v12574_v39 = vcombine.high %v4632_v30, %v4636_v25 }
 0x471   :  { %7094 = vmatpush1.bf16.msra.mxu1 %v12515_v44  ;;  %7217 = vmatpush1.bf16.msra.mxu0 %v12517_v45  ;;  %v4643_v44 = vld [vmem:[#allocation5 + $0x530] sm:$0xff]  ;;  %v4644_v45 = vld [vmem:[#allocation5 + $0x538] sm:$0xff] }
 0x472   :  { %7095 = vmatprep.subr.bf16.mxu1 %v12524_v37  ;;  %7218 = vmatprep.subr.bf16.mxu0 %v12526_v8  ;;  %v12571_v37 = vcombine.low %v4631_v28, %v4635_v29  ;;  %v12573_v8 = vcombine.low %v4632_v30, %v4636_v25  ;;  %v12580_v50 = vcombine.high %v4639_v35, %v4643_v44  ;;  %v4687_v30 = vld [vmem:[#allocation5 + $0x690] sm:$0xff] }
 0x473   :  { %v12620_v28 = vcombine.high %v4679_v19, %v4683_v21  ;;  %v4691_v25 = vld [vmem:[#allocation5 + $0x6b0] sm:$0xff] }
 0x475   :  { %7096 = vmatpush1.bf16.msra.mxu1 %v12523_v57  ;;  %7219 = vmatpush1.bf16.msra.mxu0 %v12525_v34  ;;  %v4648_v57 = vld [vmem:[#allocation5 + $0x558] sm:$0xff] }
 0x476   :  { %7097 = vmatprep.subr.bf16.mxu1 %v12532_v48  ;;  %7220 = vmatprep.subr.bf16.mxu0 %v12534_v55  ;;  %v4652_v34 = vld [vmem:[#allocation5 + $0x578] sm:$0xff]  ;;  %v12579_v48 = vcombine.low %v4639_v35, %v4643_v44  ;;  %v12628_v35 = vcombine.high %v4687_v30, %v4691_v25 }
 0x477   :  { %v12590_v58 = vcombine.high %v4648_v57, %v4652_v34 }
 0x479   :  { %7098 = vmatpush1.bf16.msra.mxu1 %v12531_v16  ;;  %7221 = vmatpush1.bf16.msra.mxu0 %v12533_v60  ;;  %v4656_v16 = vld [vmem:[#allocation5 + $0x598] sm:$0xff] }
 0x47a   :  { %7099 = vmatprep.subr.bf16.mxu1 %v12540_v46  ;;  %7222 = vmatprep.subr.bf16.mxu0 %v12542_v61  ;;  %v4660_v60 = vld [vmem:[#allocation5 + $0x5b8] sm:$0xff]  ;;  %v12587_v46 = vcombine.low %v4647_v56, %v4651_v59  ;;  %v12589_v61 = vcombine.low %v4648_v57, %v4652_v34  ;;  %v4703_v57 = vld [vmem:[#allocation5 + $0x710] sm:$0xff] }
 0x47b   :  { %v12598_v63 = vcombine.high %v4656_v16, %v4660_v60  ;;  %v4707_v34 = vld [vmem:[#allocation5 + $0x730] sm:$0xff] }
 0x47d   :  { %7100 = vmatpush1.bf16.msra.mxu1 %v12539_v14  ;;  %7223 = vmatpush1.bf16.msra.mxu0 %v12541_v3  ;;  %v4664_v14 = vld [vmem:[#allocation5 + $0x5d8] sm:$0xff] }
 0x47e   :  { %7110 = vmatprep.subr.bf16.mxu1 %v12548_v4  ;;  %7233 = vmatprep.subr.bf16.mxu0 %v12550_v5  ;;  %v4668_v3 = vld [vmem:[#allocation5 + $0x5f8] sm:$0xff]  ;;  %v12595_v4 = vcombine.low %v4655_v12, %v4659_v13  ;;  %v12597_v5 = vcombine.low %v4656_v16, %v4660_v60  ;;  %v12644_v12 = vcombine.high %v4703_v57, %v4707_v34  ;;  %v4711_v16 = vld [vmem:[#allocation5 + $0x750] sm:$0xff] }
 0x47f   :  { %v12606_v6 = vcombine.high %v4664_v14, %v4668_v3  ;;  %v4715_v60 = vld [vmem:[#allocation5 + $0x770] sm:$0xff] }
 0x480   :  { %7102 = vmatmul.mubr.bf16.vlgmr.msra.gmra.mrb[12].mxu1 %v16041_v33  ;;  %7225 = vmatmul.mubr.bf16.vlgmr.msra.gmra.mrb[16].mxu0 %v16041_v33  ;;  %v12563_v33 = vcombine.low %v4623_v17, %v4627_v18  ;;  %v12612_v17 = vcombine.high %v4671_v7, %v4675_v31 }
 0x481   :  { %7111 = vmatpush1.bf16.msra.mxu1 %v12547_v9  ;;  %7142 = vmatprep.mubr.bf16.mxu1 %v16045_v47  ;;  %v4672_v9 = vld [vmem:[#allocation5 + $0x618] sm:$0xff] }
 0x482   :  { %7234 = vmatpush1.bf16.msra.mxu0 %v12549_v10  ;;  %7265 = vmatprep.mubr.bf16.mxu0 %v16045_v47  ;;  %v4640_v47 = vld [vmem:[#allocation5 + $0x518] sm:$0xff] }
 0x483   :  { %7112 = vmatprep.subr.bf16.mxu1 %v12556_v11  ;;  %7235 = vmatprep.subr.bf16.mxu0 %v12558_v52  ;;  %v12582_v53 = vcombine.high %v4640_v47, %v4644_v45  ;;  %v12581_v55 = vcombine.low %v4640_v47, %v4644_v45  ;;  %v4676_v10 = vld [vmem:[#allocation5 + $0x638] sm:$0xff]  ;;  %v12603_v11 = vcombine.low %v4663_v1, %v4667_v2  ;;  %v4695_v47 = vld [vmem:[#allocation5 + $0x6d0] sm:$0xff] }
 0x484   :  { %v12605_v52 = vcombine.low %v4664_v14, %v4668_v3  ;;  %v12614_v18 = vcombine.high %v4672_v9, %v4676_v10  ;;  %v4699_v45 = vld [vmem:[#allocation5 + $0x6f0] sm:$0xff]  ;;  %v12652_v1 = vcombine.high %v4711_v16, %v4715_v60 }
 0x485   :  { %7113 = vmatpush1.bf16.msra.mxu1 %v12555_v22  ;;  %v4680_v22 = vld [vmem:[#allocation5 + $0x658] sm:$0xff]  ;;  %v12636_v56 = vcombine.high %v4695_v47, %v4699_v45  ;;  %v4719_v14 = vld [vmem:[#allocation5 + $0x790] sm:$0xff] }
 0x486   :  { %7236 = vmatpush1.bf16.msra.mxu0 %v12557_v23  ;;  %7114 = vmatprep.subr.bf16.mxu1 %v12564_v24  ;;  %v4684_v23 = vld [vmem:[#allocation5 + $0x678] sm:$0xff]  ;;  %v12611_v24 = vcombine.low %v4671_v7, %v4675_v31  ;;  %v4723_v3 = vld [vmem:[#allocation5 + $0x7b0] sm:$0xff] }
 0x487   :  { %7237 = vmatprep.subr.bf16.mxu0 %v12566_v27  ;;  %v12613_v27 = vcombine.low %v4672_v9, %v4676_v10  ;;  %v12622_v29 = vcombine.high %v4680_v22, %v4684_v23  ;;  %v12660_v7 = vcombine.high %v4719_v14, %v4723_v3  ;;  %v4727_v9 = vld [vmem:[#allocation5 + $0x7d0] sm:$0xff] }
 0x488   :  { %v4731_v10 = vld [vmem:[#allocation5 + $0x7f0] sm:$0xff] }
 0x489   :  { %7115 = vmatpush1.bf16.msra.mxu1 %v12563_v33  ;;  %v4688_v33 = vld [vmem:[#allocation5 + $0x698] sm:$0xff] }
 0x48a   :  { %7238 = vmatpush1.bf16.msra.mxu0 %v12565_v32  ;;  %7116 = vmatprep.subr.bf16.mxu1 %v12572_v36  ;;  %v4692_v32 = vld [vmem:[#allocation5 + $0x6b8] sm:$0xff]  ;;  %v12619_v36 = vcombine.low %v4679_v19, %v4683_v21  ;;  %v12668_v19 = vcombine.high %v4727_v9, %v4731_v10 }
 0x48b   :  { %7239 = vmatprep.subr.bf16.mxu0 %v12574_v39  ;;  %v12621_v39 = vcombine.low %v4680_v22, %v4684_v23  ;;  %v12630_v44 = vcombine.high %v4688_v33, %v4692_v32  ;;  %v4735_v22 = vld [vmem:[#allocation5 + $0x810] sm:$0xff] }
 0x48c   :  { %v4739_v23 = vld [vmem:[#allocation5 + $0x830] sm:$0xff] }
 0x48d   :  { %7117 = vmatpush1.bf16.msra.mxu1 %v12571_v37  ;;  %v4696_v37 = vld [vmem:[#allocation5 + $0x6d8] sm:$0xff] }
 0x48e   :  { %7240 = vmatpush1.bf16.msra.mxu0 %v12573_v8  ;;  %7118 = vmatprep.subr.bf16.mxu1 %v12580_v50  ;;  %v4700_v8 = vld [vmem:[#allocation5 + $0x6f8] sm:$0xff]  ;;  %v12627_v50 = vcombine.low %v4687_v30, %v4691_v25  ;;  %v12676_v30 = vcombine.high %v4735_v22, %v4739_v23 }
 0x48f   :  { %7241 = vmatprep.subr.bf16.mxu0 %v12582_v53  ;;  %v12629_v53 = vcombine.low %v4688_v33, %v4692_v32  ;;  %v12638_v59 = vcombine.high %v4696_v37, %v4700_v8  ;;  %v4743_v33 = vld [vmem:[#allocation5 + $0x850] sm:$0xff] }
 0x490   :  { %v4747_v32 = vld [vmem:[#allocation5 + $0x870] sm:$0xff] }
 0x491   :  { %7119 = vmatpush1.bf16.msra.mxu1 %v12579_v48  ;;  %v4704_v48 = vld [vmem:[#allocation5 + $0x718] sm:$0xff] }
 0x492   :  { %7242 = vmatpush1.bf16.msra.mxu0 %v12581_v55  ;;  %7120 = vmatprep.subr.bf16.mxu1 %v12588_v38  ;;  %v4708_v55 = vld [vmem:[#allocation5 + $0x738] sm:$0xff]  ;;  %v12635_v38 = vcombine.low %v4695_v47, %v4699_v45  ;;  %v12684_v47 = vcombine.high %v4743_v33, %v4747_v32  ;;  %v4751_v45 = vld [vmem:[#allocation5 + $0x890] sm:$0xff] }
 0x493   :  { %7243 = vmatprep.subr.bf16.mxu0 %v12590_v58  ;;  %v12637_v58 = vcombine.low %v4696_v37, %v4700_v8  ;;  %v12646_v13 = vcombine.high %v4704_v48, %v4708_v55  ;;  %v4755_v37 = vld [vmem:[#allocation5 + $0x8b0] sm:$0xff] }
 0x495   :  { %7121 = vmatpush1.bf16.msra.mxu1 %v12587_v46  ;;  %v4712_v46 = vld [vmem:[#allocation5 + $0x758] sm:$0xff] }
 0x496   :  { %7244 = vmatpush1.bf16.msra.mxu0 %v12589_v61  ;;  %7122 = vmatprep.subr.bf16.mxu1 %v12596_v62  ;;  %v4716_v61 = vld [vmem:[#allocation5 + $0x778] sm:$0xff]  ;;  %v12643_v62 = vcombine.low %v4703_v57, %v4707_v34  ;;  %v12692_v57 = vcombine.high %v4751_v45, %v4755_v37 }
 0x497   :  { %7245 = vmatprep.subr.bf16.mxu0 %v12598_v63  ;;  %v12645_v63 = vcombine.low %v4704_v48, %v4708_v55  ;;  %v12654_v2 = vcombine.high %v4712_v46, %v4716_v61  ;;  %v4759_v48 = vld [vmem:[#allocation5 + $0x8d0] sm:$0xff] }
 0x498   :  { %v4763_v55 = vld [vmem:[#allocation5 + $0x8f0] sm:$0xff] }
 0x499   :  { %7123 = vmatpush1.bf16.msra.mxu1 %v12595_v4  ;;  %v4720_v4 = vld [vmem:[#allocation5 + $0x798] sm:$0xff] }
 0x49a   :  { %7246 = vmatpush1.bf16.msra.mxu0 %v12597_v5  ;;  %7124 = vmatprep.subr.bf16.mxu1 %v12604_v54  ;;  %v4724_v5 = vld [vmem:[#allocation5 + $0x7b8] sm:$0xff]  ;;  %v12651_v54 = vcombine.low %v4711_v16, %v4715_v60  ;;  %v4767_v60 = vld [vmem:[#allocation5 + $0x910] sm:$0xff] }
 0x49b   :  { %7247 = vmatprep.subr.bf16.mxu0 %v12606_v6  ;;  %v12653_v6 = vcombine.low %v4712_v46, %v4716_v61  ;;  %v12662_v31 = vcombine.high %v4720_v4, %v4724_v5  ;;  %v4771_v46 = vld [vmem:[#allocation5 + $0x930] sm:$0xff]  ;;  %v4768_v61 = vld [vmem:[#allocation5 + $0x918] sm:$0xff] }
 0x49d   :  { %7125 = vmatpush1.bf16.msra.mxu1 %v12603_v11  ;;  %v4728_v11 = vld [vmem:[#allocation5 + $0x7d8] sm:$0xff] }
 0x49e   :  { %7248 = vmatpush1.bf16.msra.mxu0 %v12605_v52  ;;  %7126 = vmatprep.subr.bf16.mxu1 %v12612_v17  ;;  %v4732_v52 = vld [vmem:[#allocation5 + $0x7f8] sm:$0xff]  ;;  %v12659_v17 = vcombine.low %v4719_v14, %v4723_v3  ;;  %v4775_v14 = vld [vmem:[#allocation5 + $0x950] sm:$0xff] }
 0x49f   :  { %7249 = vmatprep.subr.bf16.mxu0 %v12614_v18  ;;  %v12661_v18 = vcombine.low %v4720_v4, %v4724_v5  ;;  %v12670_v21 = vcombine.high %v4728_v11, %v4732_v52  ;;  %v4779_v3 = vld [vmem:[#allocation5 + $0x970] sm:$0xff]  ;;  %v4776_v4 = vld [vmem:[#allocation5 + $0x958] sm:$0xff] }
 0x4a0   :  { %v4780_v5 = vld [vmem:[#allocation5 + $0x978] sm:$0xff] }
 0x4a1   :  { %7127 = vmatpush1.bf16.msra.mxu1 %v12611_v24  ;;  %v4736_v24 = vld [vmem:[#allocation5 + $0x818] sm:$0xff] }
 0x4a2   :  { %7250 = vmatpush1.bf16.msra.mxu0 %v12613_v27  ;;  %7128 = vmatprep.subr.bf16.mxu1 %v12620_v28  ;;  %v4740_v27 = vld [vmem:[#allocation5 + $0x838] sm:$0xff]  ;;  %v12667_v28 = vcombine.low %v4727_v9, %v4731_v10  ;;  %v4783_v9 = vld [vmem:[#allocation5 + $0x990] sm:$0xff] }
 0x4a3   :  { %7251 = vmatprep.subr.bf16.mxu0 %v12622_v29  ;;  %v12669_v29 = vcombine.low %v4728_v11, %v4732_v52  ;;  %v12678_v25 = vcombine.high %v4736_v24, %v4740_v27  ;;  %v4787_v10 = vld [vmem:[#allocation5 + $0x9b0] sm:$0xff]  ;;  %v4784_v11 = vld [vmem:[#allocation5 + $0x998] sm:$0xff] }
 0x4a4   :  { %v4788_v52 = vld [vmem:[#allocation5 + $0x9b8] sm:$0xff] }
 0x4a5   :  { %7129 = vmatpush1.bf16.msra.mxu1 %v12619_v36  ;;  %v12675_v36 = vcombine.low %v4735_v22, %v4739_v23  ;;  %v4791_v22 = vld [vmem:[#allocation5 + $0x9d0] sm:$0xff] }
 0x4a6   :  { %7252 = vmatpush1.bf16.msra.mxu0 %v12621_v39  ;;  %7130 = vmatprep.subr.bf16.mxu1 %v12628_v35  ;;  %v4744_v39 = vld [vmem:[#allocation5 + $0x858] sm:$0xff]  ;;  %v4795_v23 = vld [vmem:[#allocation5 + $0x9f0] sm:$0xff] }
 0x4a7   :  { %7253 = vmatprep.subr.bf16.mxu0 %v12630_v44  ;;  %v4748_v35 = vld [vmem:[#allocation5 + $0x878] sm:$0xff]  ;;  %v12677_v44 = vcombine.low %v4736_v24, %v4740_v27 }
 0x4a8   :  { %v12686_v8 = vcombine.high %v4744_v39, %v4748_v35  ;;  %v4792_v24 = vld [vmem:[#allocation5 + $0x9d8] sm:$0xff] }
 0x4a9   :  { %7131 = vmatpush1.bf16.msra.mxu1 %v12627_v50  ;;  %v4752_v50 = vld [vmem:[#allocation5 + $0x898] sm:$0xff] }
 0x4aa   :  { %7254 = vmatpush1.bf16.msra.mxu0 %v12629_v53  ;;  %7132 = vmatprep.subr.bf16.mxu1 %v12636_v56  ;;  %v4756_v53 = vld [vmem:[#allocation5 + $0x8b8] sm:$0xff]  ;;  %v12683_v56 = vcombine.low %v4743_v33, %v4747_v32  ;;  %v4799_v33 = vld [vmem:[#allocation5 + $0xa10] sm:$0xff] }
 0x4ab   :  { %7255 = vmatprep.subr.bf16.mxu0 %v12638_v59  ;;  %v12685_v59 = vcombine.low %v4744_v39, %v4748_v35  ;;  %v12694_v34 = vcombine.high %v4752_v50, %v4756_v53  ;;  %v4796_v27 = vld [vmem:[#allocation5 + $0x9f8] sm:$0xff]  ;;  %v4803_v32 = vld [vmem:[#allocation5 + $0xa30] sm:$0xff]  ;;  %v12731_v35 = vcombine.low %v4791_v22, %v4795_v23 }
 0x4ac   :  { %v4804_v39 = vld [vmem:[#allocation5 + $0xa38] sm:$0xff] }
 0x4ad   :  { %7133 = vmatpush1.bf16.msra.mxu1 %v12635_v38  ;;  %v4760_v38 = vld [vmem:[#allocation5 + $0x8d8] sm:$0xff] }
 0x4ae   :  { %7256 = vmatpush1.bf16.msra.mxu0 %v12637_v58  ;;  %7134 = vmatprep.subr.bf16.mxu1 %v12644_v12  ;;  %v4764_v58 = vld [vmem:[#allocation5 + $0x8f8] sm:$0xff]  ;;  %v12691_v12 = vcombine.low %v4751_v45, %v4755_v37  ;;  %v4807_v37 = vld [vmem:[#allocation5 + $0xa50] sm:$0xff] }
 0x4af   :  { %7257 = vmatprep.subr.bf16.mxu0 %v12646_v13  ;;  %v12700_v13 = vcombine.high %v4759_v48, %v4763_v55  ;;  %v12702_v16 = vcombine.high %v4760_v38, %v4764_v58 }
 0x4b1   :  { %7135 = vmatpush1.bf16.msra.mxu1 %v12643_v62  ;;  %v4772_v62 = vld [vmem:[#allocation5 + $0x938] sm:$0xff] }
 0x4b2   :  { %7258 = vmatpush1.bf16.msra.mxu0 %v12645_v63  ;;  %7136 = vmatprep.subr.bf16.mxu1 %v12652_v1  ;;  %v12701_v63 = vcombine.low %v4760_v38, %v4764_v58  ;;  %v12708_v1 = vcombine.high %v4767_v60, %v4771_v46  ;;  %v4816_v38 = vld [vmem:[#allocation5 + $0xa98] sm:$0xff] }
 0x4b3   :  { %7259 = vmatprep.subr.bf16.mxu0 %v12654_v2  ;;  %v12710_v2 = vcombine.high %v4768_v61, %v4772_v62  ;;  %v4820_v58 = vld [vmem:[#allocation5 + $0xab8] sm:$0xff] }
 0x4b5   :  { %7137 = vmatpush1.bf16.msra.mxu1 %v12651_v54  ;;  %v12707_v54 = vcombine.low %v4767_v60, %v4771_v46  ;;  %v4823_v60 = vld [vmem:[#allocation5 + $0xad0] sm:$0xff] }
 0x4b6   :  { %7260 = vmatpush1.bf16.msra.mxu0 %v12653_v6  ;;  %7138 = vmatprep.subr.bf16.mxu1 %v12660_v7  ;;  %v12709_v6 = vcombine.low %v4768_v61, %v4772_v62  ;;  %v12716_v7 = vcombine.high %v4775_v14, %v4779_v3  ;;  %v4827_v46 = vld [vmem:[#allocation5 + $0xaf0] sm:$0xff]  ;;  %v4824_v61 = vld [vmem:[#allocation5 + $0xad8] sm:$0xff] }
 0x4b7   :  { %7261 = vmatprep.subr.bf16.mxu0 %v12662_v31  ;;  %v12718_v31 = vcombine.high %v4776_v4, %v4780_v5  ;;  %v4828_v62 = vld [vmem:[#allocation5 + $0xaf8] sm:$0xff] }
 0x4b9   :  { %7139 = vmatpush1.bf16.msra.mxu1 %v12659_v17  ;;  %v12715_v17 = vcombine.low %v4775_v14, %v4779_v3  ;;  %v4831_v14 = vld [vmem:[#allocation5 + $0xb10] sm:$0xff] }
 0x4ba   :  { %7262 = vmatpush1.bf16.msra.mxu0 %v12661_v18  ;;  %7140 = vmatprep.subr.bf16.mxu1 %v12668_v19  ;;  %v12717_v18 = vcombine.low %v4776_v4, %v4780_v5  ;;  %v12724_v19 = vcombine.high %v4783_v9, %v4787_v10  ;;  %v4835_v3 = vld [vmem:[#allocation5 + $0xb30] sm:$0xff]  ;;  %v4832_v4 = vld [vmem:[#allocation5 + $0xb18] sm:$0xff] }
 0x4bb   :  { %7263 = vmatprep.subr.bf16.mxu0 %v12670_v21  ;;  %v12726_v21 = vcombine.high %v4784_v11, %v4788_v52  ;;  %v4836_v5 = vld [vmem:[#allocation5 + $0xb38] sm:$0xff] }
 0x4bd   :  { %7141 = vmatpush1.bf16.msra.mxu1 %v12667_v28  ;;  %v12723_v28 = vcombine.low %v4783_v9, %v4787_v10  ;;  %v4839_v9 = vld [vmem:[#allocation5 + $0xb50] sm:$0xff] }
 0x4be   :  { %7264 = vmatpush1.bf16.msra.mxu0 %v12669_v29  ;;  %7151 = vmatprep.subr.bf16.mxu1 %v12676_v30  ;;  %v12725_v29 = vcombine.low %v4784_v11, %v4788_v52  ;;  %v12732_v30 = vcombine.high %v4791_v22, %v4795_v23  ;;  %v4843_v10 = vld [vmem:[#allocation5 + $0xb70] sm:$0xff]  ;;  %v4840_v11 = vld [vmem:[#allocation5 + $0xb58] sm:$0xff] }
 0x4bf   :  { %7274 = vmatprep.subr.bf16.mxu0 %v12678_v25  ;;  %v12734_v25 = vcombine.high %v4792_v24, %v4796_v27  ;;  %v4844_v52 = vld [vmem:[#allocation5 + $0xb78] sm:$0xff]  ;;  %v4847_v22 = vld [vmem:[#allocation5 + $0xb90] sm:$0xff] }
 0x4c0   :  { %7143 = vmatmul.mubr.bf16.vlgmr.msra.gmra.mrb[12].mxu1 %v16062_v0  ;;  %v4851_v23 = vld [vmem:[#allocation5 + $0xbb0] sm:$0xff] }
 0x4c1   :  { %7266 = vmatmul.mubr.bf16.vlgmr.msra.gmra.mrb[16].mxu0 %v16062_v0  ;;  %7152 = vmatpush1.bf16.msra.mxu1 %v12675_v36  ;;  %v12693_v0 = vcombine.low %v4752_v50, %v4756_v53  ;;  %v4800_v36 = vld [vmem:[#allocation5 + $0xa18] sm:$0xff] }
 0x4c2   :  { %7183 = vmatprep.mubr.bf16.mxu1 %v16086_v51  ;;  %7275 = vmatpush1.bf16.msra.mxu0 %v12677_v44  ;;  %v12733_v44 = vcombine.low %v4792_v24, %v4796_v27  ;;  %v12742_v45 = vcombine.high %v4800_v36, %v4804_v39  ;;  %v4808_v50 = vld [vmem:[#allocation5 + $0xa58] sm:$0xff] }
 0x4c3   :  { %7306 = vmatprep.mubr.bf16.mxu0 %v16086_v51  ;;  %7153 = vmatprep.subr.bf16.mxu1 %v12684_v47  ;;  %v12699_v51 = vcombine.low %v4759_v48, %v4763_v55  ;;  %v12740_v47 = vcombine.high %v4799_v33, %v4803_v32  ;;  %v4812_v53 = vld [vmem:[#allocation5 + $0xa78] sm:$0xff]  ;;  %v4815_v48 = vld [vmem:[#allocation5 + $0xa90] sm:$0xff] }
 0x4c4   :  { %7276 = vmatprep.subr.bf16.mxu0 %v12686_v8  ;;  %v4811_v8 = vld [vmem:[#allocation5 + $0xa70] sm:$0xff]  ;;  %v4848_v24 = vld [vmem:[#allocation5 + $0xb98] sm:$0xff] }
 0x4c5   :  { %7154 = vmatpush1.bf16.msra.mxu1 %v12683_v56  ;;  %v12739_v56 = vcombine.low %v4799_v33, %v4803_v32  ;;  %v4819_v55 = vld [vmem:[#allocation5 + $0xab0] sm:$0xff]  ;;  %v4852_v27 = vld [vmem:[#allocation5 + $0xbb8] sm:$0xff] }
 0x4c6   :  { %7277 = vmatpush1.bf16.msra.mxu0 %v12685_v59  ;;  %7155 = vmatprep.subr.bf16.mxu1 %v12692_v57  ;;  %v12741_v59 = vcombine.low %v4800_v36, %v4804_v39  ;;  %v12748_v57 = vcombine.high %v4807_v37, %v4811_v8  ;;  %v4855_v33 = vld [vmem:[#allocation5 + $0xbd0] sm:$0xff]  ;;  %v4856_v36 = vld [vmem:[#allocation5 + $0xbd8] sm:$0xff] }
 0x4c7   :  { %7278 = vmatprep.subr.bf16.mxu0 %v12694_v34  ;;  %v12750_v34 = vcombine.high %v4808_v50, %v4812_v53  ;;  %v4859_v32 = vld [vmem:[#allocation5 + $0xbf0] sm:$0xff]  ;;  %v4860_v39 = vld [vmem:[#allocation5 + $0xbf8] sm:$0xff] }
 0x4c9   :  { %7156 = vmatpush1.bf16.msra.mxu1 %v12691_v12  ;;  %v12747_v12 = vcombine.low %v4807_v37, %v4811_v8  ;;  %v7323_v37 = vld [vmem:[%s17985_s7] sm:$0xff] }
 0x4ca   :  { %7279 = vmatpush1.bf16.msra.mxu0 %v12693_v0  ;;  %7157 = vmatprep.subr.bf16.mxu1 %v12700_v13  ;;  %v12749_v0 = vcombine.low %v4808_v50, %v4812_v53  ;;  %v12756_v13 = vcombine.high %v4815_v48, %v4819_v55  ;;  %v7327_v8 = vld [vmem:[%s17985_s7 + $0x20] sm:$0xff]  ;;  %v7324_v50 = vld [vmem:[%s17985_s7 + $0x8] sm:$0xff] }
 0x4cb   :  { %7280 = vmatprep.subr.bf16.mxu0 %v12702_v16  ;;  %v12758_v16 = vcombine.high %v4816_v38, %v4820_v58  ;;  %v7328_v53 = vld [vmem:[%s17985_s7 + $0x28] sm:$0xff] }
 0x4cd   :  { %7158 = vmatpush1.bf16.msra.mxu1 %v12699_v51  ;;  %v12755_v51 = vcombine.low %v4815_v48, %v4819_v55  ;;  %v7331_v48 = vld [vmem:[%s17985_s7 + $0x40] sm:$0xff] }
 0x4ce   :  { %7281 = vmatpush1.bf16.msra.mxu0 %v12701_v63  ;;  %7159 = vmatprep.subr.bf16.mxu1 %v12708_v1  ;;  %v12757_v63 = vcombine.low %v4816_v38, %v4820_v58  ;;  %v12764_v1 = vcombine.high %v4823_v60, %v4827_v46  ;;  %v7335_v55 = vld [vmem:[%s17985_s7 + $0x60] sm:$0xff]  ;;  %v7332_v38 = vld [vmem:[%s17985_s7 + $0x48] sm:$0xff] }
 0x4cf   :  { %7282 = vmatprep.subr.bf16.mxu0 %v12710_v2  ;;  %v12766_v2 = vcombine.high %v4824_v61, %v4828_v62  ;;  %v7336_v58 = vld [vmem:[%s17985_s7 + $0x68] sm:$0xff] }
 0x4d1   :  { %7160 = vmatpush1.bf16.msra.mxu1 %v12707_v54  ;;  %v12763_v54 = vcombine.low %v4823_v60, %v4827_v46  ;;  %v7339_v60 = vld [vmem:[%s17985_s7 + $0x80] sm:$0xff] }
 0x4d2   :  { %7283 = vmatpush1.bf16.msra.mxu0 %v12709_v6  ;;  %7161 = vmatprep.subr.bf16.mxu1 %v12716_v7  ;;  %v12765_v6 = vcombine.low %v4824_v61, %v4828_v62  ;;  %v12772_v7 = vcombine.high %v4831_v14, %v4835_v3  ;;  %v7343_v46 = vld [vmem:[%s17985_s7 + $0xa0] sm:$0xff]  ;;  %v7340_v61 = vld [vmem:[%s17985_s7 + $0x88] sm:$0xff] }
 0x4d3   :  { %7284 = vmatprep.subr.bf16.mxu0 %v12718_v31  ;;  %v12774_v31 = vcombine.high %v4832_v4, %v4836_v5  ;;  %v7344_v62 = vld [vmem:[%s17985_s7 + $0xa8] sm:$0xff] }
 0x4d5   :  { %7162 = vmatpush1.bf16.msra.mxu1 %v12715_v17  ;;  %v12771_v17 = vcombine.low %v4831_v14, %v4835_v3  ;;  %v7347_v14 = vld [vmem:[%s17985_s7 + $0xc0] sm:$0xff] }
 0x4d6   :  { %7285 = vmatpush1.bf16.msra.mxu0 %v12717_v18  ;;  %7163 = vmatprep.subr.bf16.mxu1 %v12724_v19  ;;  %v12773_v18 = vcombine.low %v4832_v4, %v4836_v5  ;;  %v12780_v19 = vcombine.high %v4839_v9, %v4843_v10  ;;  %v7351_v3 = vld [vmem:[%s17985_s7 + $0xe0] sm:$0xff]  ;;  %v7352_v4 = vld [vmem:[%s17985_s7 + $0xe8] sm:$0xff]  ;;  %v12815_v5 = vcombine.low %v7339_v60, %v7343_v46 }
 0x4d7   :  { %7286 = vmatprep.subr.bf16.mxu0 %v12726_v21  ;;  %v12782_v21 = vcombine.high %v4840_v11, %v4844_v52 }
 0x4d9   :  { %7164 = vmatpush1.bf16.msra.mxu1 %v12723_v28  ;;  %v12779_v28 = vcombine.low %v4839_v9, %v4843_v10  ;;  %v7359_v9 = vld [vmem:[%s17985_s7 + $0x120] sm:$0xff]  ;;  %v7356_v10 = vld [vmem:[%s17985_s7 + $0x108] sm:$0xff] }
 0x4da   :  { %7287 = vmatpush1.bf16.msra.mxu0 %v12725_v29  ;;  %7165 = vmatprep.subr.bf16.mxu1 %v12732_v30  ;;  %v12781_v29 = vcombine.low %v4840_v11, %v4844_v52  ;;  %v12788_v30 = vcombine.high %v4847_v22, %v4851_v23  ;;  %v7360_v11 = vld [vmem:[%s17985_s7 + $0x128] sm:$0xff]  ;;  %v12823_v52 = vcombine.low %v7347_v14, %v7351_v3 }
 0x4db   :  { %7288 = vmatprep.subr.bf16.mxu0 %v12734_v25  ;;  %v12790_v25 = vcombine.high %v4848_v24, %v4852_v27 }
 0x4dd   :  { %7166 = vmatpush1.bf16.msra.mxu1 %v12731_v35  ;;  %v12787_v35 = vcombine.low %v4847_v22, %v4851_v23  ;;  %v7367_v22 = vld [vmem:[%s17985_s7 + $0x160] sm:$0xff]  ;;  %v7364_v23 = vld [vmem:[%s17985_s7 + $0x148] sm:$0xff] }
 0x4de   :  { %7289 = vmatpush1.bf16.msra.mxu0 %v12733_v44  ;;  %7167 = vmatprep.subr.bf16.mxu1 %v12740_v47  ;;  %v12789_v44 = vcombine.low %v4848_v24, %v4852_v27  ;;  %v12796_v47 = vcombine.high %v4855_v33, %v4859_v32  ;;  %v7368_v24 = vld [vmem:[%s17985_s7 + $0x168] sm:$0xff] }
 0x4df   :  { %7290 = vmatprep.subr.bf16.mxu0 %v12742_v45  ;;  %v12798_v45 = vcombine.high %v4856_v36, %v4860_v39 }
 0x4e1   :  { %7168 = vmatpush1.bf16.msra.mxu1 %v12739_v56  ;;  %v12795_v56 = vcombine.low %v4855_v33, %v4859_v32  ;;  %v7371_v33 = vld [vmem:[%s17985_s7 + $0x180] sm:$0xff] }
 0x4e2   :  { %7291 = vmatpush1.bf16.msra.mxu0 %v12741_v59  ;;  %7169 = vmatprep.subr.bf16.mxu1 %v12748_v57  ;;  %v12797_v59 = vcombine.low %v4856_v36, %v4860_v39  ;;  %v12800_v57 = vcombine.high %v7323_v37, %v7327_v8  ;;  %v7375_v32 = vld [vmem:[%s17985_s7 + $0x1a0] sm:$0xff]  ;;  %v7372_v36 = vld [vmem:[%s17985_s7 + $0x188] sm:$0xff] }
 0x4e3   :  { %7292 = vmatprep.subr.bf16.mxu0 %v12750_v34  ;;  %v12802_v34 = vcombine.high %v7324_v50, %v7328_v53  ;;  %v7376_v39 = vld [vmem:[%s17985_s7 + $0x1a8] sm:$0xff] }
 0x4e5   :  { %7170 = vmatpush1.bf16.msra.mxu1 %v12747_v12  ;;  %v12799_v12 = vcombine.low %v7323_v37, %v7327_v8 }
 0x4e6   :  { %7293 = vmatpush1.bf16.msra.mxu0 %v12749_v0  ;;  %7171 = vmatprep.subr.bf16.mxu1 %v12756_v13  ;;  %v12801_v0 = vcombine.low %v7324_v50, %v7328_v53  ;;  %v12808_v13 = vcombine.high %v7331_v48, %v7335_v55  ;;  %v12850_v50 = vcombine.high %v7372_v36, %v7376_v39  ;;  %v7379_v53 = vld [vmem:[%s17985_s7 + $0x1c0] sm:$0xff] }
 0x4e7   :  { %7294 = vmatprep.subr.bf16.mxu0 %v12758_v16  ;;  %v12810_v16 = vcombine.high %v7332_v38, %v7336_v58 }
 0x4e9   :  { %7172 = vmatpush1.bf16.msra.mxu1 %v12755_v51  ;;  %v12807_v51 = vcombine.low %v7331_v48, %v7335_v55  ;;  %v7384_v48 = vld [vmem:[%s17985_s7 + $0x1e8] sm:$0xff] }
 0x4ea   :  { %7295 = vmatpush1.bf16.msra.mxu0 %v12757_v63  ;;  %7173 = vmatprep.subr.bf16.mxu1 %v12764_v1  ;;  %v12809_v63 = vcombine.low %v7332_v38, %v7336_v58  ;;  %v12816_v1 = vcombine.high %v7339_v60, %v7343_v46 }
 0x4eb   :  { %7296 = vmatprep.subr.bf16.mxu0 %v12766_v2  ;;  %v12818_v2 = vcombine.high %v7340_v61, %v7344_v62 }
 0x4ed   :  { %7174 = vmatpush1.bf16.msra.mxu1 %v12763_v54  ;;  %v12817_v54 = vcombine.low %v7340_v61, %v7344_v62  ;;  %v7387_v62 = vld [vmem:[%s17985_s7 + $0x200] sm:$0xff] }
 0x4ee   :  { %7297 = vmatpush1.bf16.msra.mxu0 %v12765_v6  ;;  %7175 = vmatprep.subr.bf16.mxu1 %v12772_v7  ;;  %v12824_v6 = vcombine.high %v7347_v14, %v7351_v3 }
 0x4ef   :  { %7298 = vmatprep.subr.bf16.mxu0 %v12774_v31  ;;  %v7355_v31 = vld [vmem:[%s17985_s7 + $0x100] sm:$0xff] }
 0x4f0   :  { %v12831_v27 = vcombine.low %v7355_v31, %v7359_v9 }
 0x4f1   :  { %7176 = vmatpush1.bf16.msra.mxu1 %v12771_v17 }
 0x4f2   :  { %7299 = vmatpush1.bf16.msra.mxu0 %v12773_v18  ;;  %7177 = vmatprep.subr.bf16.mxu1 %v12780_v19  ;;  %v12832_v18 = vcombine.high %v7355_v31, %v7359_v9  ;;  %v12834_v19 = vcombine.high %v7356_v10, %v7360_v11 }
 0x4f3   :  { %7300 = vmatprep.subr.bf16.mxu0 %v12782_v21  ;;  %v7363_v21 = vld [vmem:[%s17985_s7 + $0x140] sm:$0xff] }
 0x4f5   :  { %7178 = vmatpush1.bf16.msra.mxu1 %v12779_v28  ;;  %v12833_v28 = vcombine.low %v7356_v10, %v7360_v11  ;;  %v7403_v11 = vld [vmem:[%s17985_s7 + $0x280] sm:$0xff] }
 0x4f6   :  { %7301 = vmatpush1.bf16.msra.mxu0 %v12781_v29  ;;  %7179 = vmatprep.subr.bf16.mxu1 %v12788_v30  ;;  %v16181_v29 = vld [vmem:[%s17984_s6] sm:$0xff]  ;;  %v12840_v30 = vcombine.high %v7363_v21, %v7367_v22 }
 0x4f7   :  { %7302 = vmatprep.subr.bf16.mxu0 %v12790_v25  ;;  %v12842_v25 = vcombine.high %v7364_v23, %v7368_v24 }
 0x4f9   :  { %7180 = vmatpush1.bf16.msra.mxu1 %v12787_v35  ;;  %v12839_v35 = vcombine.low %v7363_v21, %v7367_v22 }
 0x4fa   :  { %7303 = vmatpush1.bf16.msra.mxu0 %v12789_v44  ;;  %7181 = vmatprep.subr.bf16.mxu1 %v12796_v47  ;;  %v4870_v44 = vrot.slane %v16181_v29, %v15970_v41  ;;  %v12841_v47 = vcombine.low %v7364_v23, %v7368_v24  ;;  %v7411_v24 = vld [vmem:[%s17985_s7 + $0x2c0] sm:$0xff] }
 0x4fb   :  { %7304 = vmatprep.subr.bf16.mxu0 %v12798_v45  ;;  %v12848_v45 = vcombine.high %v7371_v33, %v7375_v32 }
 0x4fd   :  { %7182 = vmatpush1.bf16.msra.mxu1 %v12795_v56 }
 0x4fe   :  { %7305 = vmatpush1.bf16.msra.mxu0 %v12797_v59  ;;  %10437 = vmatprep.subr.bf16.mxu1 %v12800_v57  ;;  %v7383_v57 = vld [vmem:[%s17985_s7 + $0x1e0] sm:$0xff] }
 0x4ff   :  { %10601 = vmatprep.subr.bf16.mxu0 %v12802_v34  ;;  %v7380_v34 = vld [vmem:[%s17985_s7 + $0x1c8] sm:$0xff]  ;;  %v12856_v46 = vcombine.high %v7379_v53, %v7383_v57 }
 0x500   :  { %7184 = vmatmul.mubr.bf16.vlgmr.msra.gmra.mrb[12].mxu1 %v16088_v26  ;;  %v12858_v61 = vcombine.high %v7380_v34, %v7384_v48  ;;  %v12857_v14 = vcombine.low %v7380_v34, %v7384_v48  ;;  %v7431_v34 = vld [vmem:[%s17985_s7 + $0x360] sm:$0xff]  ;;  %v7428_v48 = vld [vmem:[%s17985_s7 + $0x348] sm:$0xff] }
 0x501   :  { %7307 = vmatmul.mubr.bf16.vlgmr.msra.gmra.mrb[16].mxu0 %v16088_v26  ;;  %10438 = vmatpush1.bf16.msra.mxu1 %v12799_v12  ;;  %v7348_v26 = vld [vmem:[%s17985_s7 + $0xc8] sm:$0xff]  ;;  %v12847_v12 = vcombine.low %v7371_v33, %v7375_v32 }
 0x502   :  { %10602 = vmatpush1.bf16.msra.mxu0 %v12801_v0  ;;  %10439 = vmatprep.subr.bf16.mxu1 %v12808_v13  ;;  %v12826_v7 = vcombine.high %v7348_v26, %v7352_v4  ;;  %v12825_v17 = vcombine.low %v7348_v26, %v7352_v4  ;;  %v7395_v4 = vld [vmem:[%s17985_s7 + $0x240] sm:$0xff] }
 0x503   :  { %10603 = vmatprep.subr.bf16.mxu0 %v12810_v16  ;;  %v12849_v16 = vcombine.low %v7372_v36, %v7376_v39  ;;  %v7419_v39 = vld [vmem:[%s17985_s7 + $0x300] sm:$0xff] }
 0x505   :  { %10440 = vmatpush1.bf16.msra.mxu1 %v12807_v51  ;;  %v7391_v51 = vld [vmem:[%s17985_s7 + $0x220] sm:$0xff] }
 0x506   :  { %10604 = vmatpush1.bf16.msra.mxu0 %v12809_v63  ;;  %10441 = vmatprep.subr.bf16.mxu1 %v12816_v1  ;;  %v7388_v63 = vld [vmem:[%s17985_s7 + $0x208] sm:$0xff]  ;;  %v12864_v3 = vcombine.high %v7387_v62, %v7391_v51 }
 0x507   :  { %10605 = vmatprep.subr.bf16.mxu0 %v12818_v2  ;;  %v7392_v1 = vld [vmem:[%s17985_s7 + $0x228] sm:$0xff]  ;;  %v12855_v2 = vcombine.low %v7379_v53, %v7383_v57  ;;  %v7427_v57 = vld [vmem:[%s17985_s7 + $0x340] sm:$0xff] }
 0x508   :  { %v12866_v26 = vcombine.high %v7388_v63, %v7392_v1  ;;  %v12865_v31 = vcombine.low %v7388_v63, %v7392_v1 }
 0x509   :  { %10442 = vmatpush1.bf16.msra.mxu1 %v12815_v5  ;;  %v7399_v5 = vld [vmem:[%s17985_s7 + $0x260] sm:$0xff] }
 0x50a   :  { %10606 = vmatpush1.bf16.msra.mxu0 %v12817_v54  ;;  %10443 = vmatprep.subr.bf16.mxu1 %v12824_v6  ;;  %v7396_v54 = vld [vmem:[%s17985_s7 + $0x248] sm:$0xff]  ;;  %v12872_v9 = vcombine.high %v7395_v4, %v7399_v5 }
 0x50b   :  { %10607 = vmatprep.subr.bf16.mxu0 %v12826_v7  ;;  %v7400_v6 = vld [vmem:[%s17985_s7 + $0x268] sm:$0xff]  ;;  %v12863_v7 = vcombine.low %v7387_v62, %v7391_v51  ;;  %v12903_v62 = vcombine.low %v7427_v57, %v7431_v34 }
 0x50c   :  { %v12874_v10 = vcombine.high %v7396_v54, %v7400_v6  ;;  %v12873_v21 = vcombine.low %v7396_v54, %v7400_v6 }
 0x50d   :  { %10444 = vmatpush1.bf16.msra.mxu1 %v12823_v52  ;;  %v7407_v52 = vld [vmem:[%s17985_s7 + $0x2a0] sm:$0xff] }
 0x50e   :  { %10608 = vmatpush1.bf16.msra.mxu0 %v12825_v17  ;;  %10445 = vmatprep.subr.bf16.mxu1 %v12832_v18  ;;  %v7404_v17 = vld [vmem:[%s17985_s7 + $0x288] sm:$0xff]  ;;  %v12880_v22 = vcombine.high %v7403_v11, %v7407_v52 }
 0x50f   :  { %10609 = vmatprep.subr.bf16.mxu0 %v12834_v19  ;;  %v7408_v18 = vld [vmem:[%s17985_s7 + $0x2a8] sm:$0xff]  ;;  %v12871_v19 = vcombine.low %v7395_v4, %v7399_v5  ;;  %v4866_v5 = vrot.slane %v16181_v29, %v15962_v49 }
 0x510   :  { %v12882_v23 = vcombine.high %v7404_v17, %v7408_v18  ;;  %v12881_v33 = vcombine.low %v7404_v17, %v7408_v18 }
 0x511   :  { %10446 = vmatpush1.bf16.msra.mxu1 %v12831_v27  ;;  %v7415_v27 = vld [vmem:[%s17985_s7 + $0x2e0] sm:$0xff] }
 0x512   :  { %10610 = vmatpush1.bf16.msra.mxu0 %v12833_v28  ;;  %10447 = vmatprep.subr.bf16.mxu1 %v12840_v30  ;;  %v7412_v28 = vld [vmem:[%s17985_s7 + $0x2c8] sm:$0xff]  ;;  %v12888_v32 = vcombine.high %v7411_v24, %v7415_v27 }
 0x513   :  { %v16197_v37 = vpop.f32.mrb[8].mxu1  ;;  %v16199_v8 = vpop.f32.mrb[12].mxu0  ;;  %10611 = vmatprep.subr.bf16.mxu0 %v12842_v25  ;;  %v7416_v30 = vld [vmem:[%s17985_s7 + $0x2e8] sm:$0xff]  ;;  %v12879_v25 = vcombine.low %v7403_v11, %v7407_v52 }
 0x514   :  { %v6941_v56 = vpop.f32.mrb[9].mxu1  ;;  %v16204_v59 = vpop.f32.mrb[13].mxu0  ;;  %v12890_v36 = vcombine.high %v7412_v28, %v7416_v30  ;;  %v7452_v11 = vld [vmem:[%s17985_s7 + $0x408] sm:$0xff]  ;;  %v13475_v18 = vadd.f32 %v16197_v37, %v4866_v5 }
 0x515   :  { %v13476_v55 = vadd.f32 %v6941_v56, %v4870_v44  ;;  %10448 = vmatpush1.bf16.msra.mxu1 %v12839_v35  ;;  %v6943_v38 = vpop.f32.mrb[10].mxu1  ;;  %v7066_v58 = vpop.f32.mrb[14].mxu0  ;;  %v7423_v35 = vld [vmem:[%s17985_s7 + $0x320] sm:$0xff]  ;;  %v7420_v44 = vld [vmem:[%s17985_s7 + $0x308] sm:$0xff] }
 0x516   :  { %10612 = vmatpush1.bf16.msra.mxu0 %v12841_v47  ;;  %v6944_v0 = vpop.f32.mrb[11].mxu1  ;;  %v7067_v13 = vpop.f32.mrb[15].mxu0  ;;  %10449 = vmatprep.subr.bf16.mxu1 %v12848_v45  ;;  %v7424_v47 = vld [vmem:[%s17985_s7 + $0x328] sm:$0xff]  ;;  %v12887_v45 = vcombine.low %v7411_v24, %v7415_v27  ;;  %v12896_v53 = vcombine.high %v7419_v39, %v7423_v35  ;;  %v12895_v38 = vcombine.low %v7419_v39, %v7423_v35  ;;  %v7459_v24 = vld [vmem:[%s17985_s7 + $0x440] sm:$0xff] }
 0x517   :  { %v16215_v60 = vpack.c.bf16 %v13476_v55, %v13476_v55  ;;  %10613 = vmatprep.subr.bf16.mxu0 %v12850_v50  ;;  %v12889_v50 = vcombine.low %v7412_v28, %v7416_v30  ;;  %v12898_v56 = vcombine.high %v7420_v44, %v7424_v47  ;;  %v7432_v55 = vld [vmem:[%s17985_s7 + $0x368] sm:$0xff]  ;;  %v12897_v58 = vcombine.low %v7420_v44, %v7424_v47  ;;  %v7435_v13 = vld [vmem:[%s17985_s7 + $0x380] sm:$0xff] }
 0x518   :  { %v12906_v0 = vcombine.high %v7428_v48, %v7432_v55  ;;  %v12905_v51 = vcombine.low %v7428_v48, %v7432_v55  ;;  %v7456_v52 = vld [vmem:[%s17985_s7 + $0x428] sm:$0xff]  ;;  %v7463_v27 = vld [vmem:[%s17985_s7 + $0x460] sm:$0xff] }
 0x519   :  { %10450 = vmatpush1.bf16.msra.mxu1 %v12847_v12  ;;  %10469 = vmatprep.mubr.bf16.mxu1 %v16215_v60  ;;  %v12904_v12 = vcombine.high %v7427_v57, %v7431_v34  ;;  %v7460_v37 = vld [vmem:[%s17985_s7 + $0x448] sm:$0xff]  ;;  %v7475_v57 = vld [vmem:[%s17985_s7 + $0x4c0] sm:$0xff] }
 0x51a   :  { %10614 = vmatpush1.bf16.msra.mxu0 %v12849_v16  ;;  %10633 = vmatprep.mubr.bf16.mxu0 %v16215_v60  ;;  %v7439_v16 = vld [vmem:[%s17985_s7 + $0x3a0] sm:$0xff]  ;;  %v7464_v30 = vld [vmem:[%s17985_s7 + $0x468] sm:$0xff] }
 0x51b   :  { %10451 = vmatprep.subr.bf16.mxu1 %v12856_v46  ;;  %10615 = vmatprep.subr.bf16.mxu0 %v12858_v61  ;;  %v7436_v46 = vld [vmem:[%s17985_s7 + $0x388] sm:$0xff]  ;;  %v12912_v63 = vcombine.high %v7435_v13, %v7439_v16  ;;  %v12911_v4 = vcombine.low %v7435_v13, %v7439_v16  ;;  %v12938_v35 = vcombine.high %v7460_v37, %v7464_v30  ;;  %v7479_v34 = vld [vmem:[%s17985_s7 + $0x4e0] sm:$0xff] }
 0x51c   :  { %v7440_v61 = vld [vmem:[%s17985_s7 + $0x3a8] sm:$0xff]  ;;  %v7483_v13 = vld [vmem:[%s17985_s7 + $0x500] sm:$0xff] }
 0x51d   :  { %10452 = vmatpush1.bf16.msra.mxu1 %v12855_v2  ;;  %v12914_v1 = vcombine.high %v7436_v46, %v7440_v61  ;;  %v7443_v2 = vld [vmem:[%s17985_s7 + $0x3c0] sm:$0xff]  ;;  %v12913_v54 = vcombine.low %v7436_v46, %v7440_v61  ;;  %v7468_v44 = vld [vmem:[%s17985_s7 + $0x488] sm:$0xff] }
 0x51e   :  { %10616 = vmatpush1.bf16.msra.mxu0 %v12857_v14  ;;  %10453 = vmatprep.subr.bf16.mxu1 %v12864_v3  ;;  %v7447_v14 = vld [vmem:[%s17985_s7 + $0x3e0] sm:$0xff]  ;;  %v7444_v3 = vld [vmem:[%s17985_s7 + $0x3c8] sm:$0xff] }
 0x51f   :  { %10617 = vmatprep.subr.bf16.mxu0 %v12866_v26  ;;  %v7448_v26 = vld [vmem:[%s17985_s7 + $0x3e8] sm:$0xff]  ;;  %v12920_v6 = vcombine.high %v7443_v2, %v7447_v14  ;;  %v12919_v17 = vcombine.low %v7443_v2, %v7447_v14  ;;  %v7487_v16 = vld [vmem:[%s17985_s7 + $0x520] sm:$0xff] }
 0x520   :  { %v7472_v47 = vld [vmem:[%s17985_s7 + $0x4a8] sm:$0xff]  ;;  %v7491_v2 = vld [vmem:[%s17985_s7 + $0x540] sm:$0xff] }
 0x521   :  { %10454 = vmatpush1.bf16.msra.mxu1 %v12863_v7  ;;  %v12922_v7 = vcombine.high %v7444_v3, %v7448_v26  ;;  %v7476_v48 = vld [vmem:[%s17985_s7 + $0x4c8] sm:$0xff]  ;;  %v7495_v14 = vld [vmem:[%s17985_s7 + $0x560] sm:$0xff] }
 0x522   :  { %10618 = vmatpush1.bf16.msra.mxu0 %v12865_v31  ;;  %10455 = vmatprep.subr.bf16.mxu1 %v12872_v9  ;;  %v7451_v31 = vld [vmem:[%s17985_s7 + $0x400] sm:$0xff]  ;;  %v7480_v55 = vld [vmem:[%s17985_s7 + $0x4e8] sm:$0xff] }
 0x523   :  { %10619 = vmatprep.subr.bf16.mxu0 %v12874_v10  ;;  %v7455_v9 = vld [vmem:[%s17985_s7 + $0x420] sm:$0xff]  ;;  %v4878_v10 = vrot.slane %v16181_v29, %v15973_v43  ;;  %v7484_v46 = vld [vmem:[%s17985_s7 + $0x508] sm:$0xff] }
 0x524   :  { %v12927_v28 = vcombine.low %v7451_v31, %v7455_v9  ;;  %v7488_v61 = vld [vmem:[%s17985_s7 + $0x528] sm:$0xff] }
 0x525   :  { %10456 = vmatpush1.bf16.msra.mxu1 %v12871_v19  ;;  %v12921_v19 = vcombine.low %v7444_v3, %v7448_v26  ;;  %v7492_v3 = vld [vmem:[%s17985_s7 + $0x548] sm:$0xff]  ;;  %v12961_v5 = vcombine.low %v7484_v46, %v7488_v61 }
 0x526   :  { %10620 = vmatpush1.bf16.msra.mxu0 %v12873_v21  ;;  %10457 = vmatprep.subr.bf16.mxu1 %v12880_v22  ;;  %v12928_v21 = vcombine.high %v7451_v31, %v7455_v9  ;;  %v12930_v22 = vcombine.high %v7452_v11, %v7456_v52  ;;  %v7496_v26 = vld [vmem:[%s17985_s7 + $0x568] sm:$0xff]  ;;  %v7503_v31 = vld [vmem:[%s17985_s7 + $0x5a0] sm:$0xff] }
 0x527   :  { %10621 = vmatprep.subr.bf16.mxu0 %v12882_v23  ;;  %v13478_v23 = vadd.f32 %v16204_v59, %v4878_v10  ;;  %v12929_v59 = vcombine.low %v7452_v11, %v7456_v52  ;;  %v7500_v9 = vld [vmem:[%s17985_s7 + $0x588] sm:$0xff]  ;;  %v12967_v11 = vcombine.low %v7491_v2, %v7495_v14  ;;  %v12969_v52 = vcombine.low %v7492_v3, %v7496_v26 }
 0x528   :  { %v7504_v10 = vld [vmem:[%s17985_s7 + $0x5a8] sm:$0xff] }
 0x529   :  { %10458 = vmatpush1.bf16.msra.mxu1 %v12879_v25  ;;  %v16345_v25 = vpack.c.bf16 %v13475_v18, %v13475_v18  ;;  %v16353_v39 = vpack.c.bf16 %v13478_v23, %v13478_v23  ;;  %v12978_v18 = vcombine.high %v7500_v9, %v7504_v10  ;;  %v7512_v23 = vld [vmem:[%s17985_s7 + $0x5e8] sm:$0xff] }
 0x52a   :  { %10622 = vmatpush1.bf16.msra.mxu0 %v12881_v33  ;;  %10459 = vmatprep.subr.bf16.mxu1 %v12888_v32  ;;  %v12936_v33 = vcombine.high %v7459_v24, %v7463_v27  ;;  %v7467_v32 = vld [vmem:[%s17985_s7 + $0x480] sm:$0xff] }
 0x52b   :  { %10623 = vmatprep.subr.bf16.mxu0 %v12890_v36  ;;  %v7471_v36 = vld [vmem:[%s17985_s7 + $0x4a0] sm:$0xff] }
 0x52d   :  { %10460 = vmatpush1.bf16.msra.mxu1 %v12887_v45  ;;  %v12935_v45 = vcombine.low %v7459_v24, %v7463_v27  ;;  %v12977_v27 = vcombine.low %v7500_v9, %v7504_v10 }
 0x52e   :  { %10624 = vmatpush1.bf16.msra.mxu0 %v12889_v50  ;;  %10461 = vmatprep.subr.bf16.mxu1 %v12896_v53  ;;  %v12937_v50 = vcombine.low %v7460_v37, %v7464_v30  ;;  %v12944_v53 = vcombine.high %v7467_v32, %v7471_v36  ;;  %v7515_v30 = vld [vmem:[%s17985_s7 + $0x600] sm:$0xff] }
 0x52f   :  { %10625 = vmatprep.subr.bf16.mxu0 %v12898_v56  ;;  %v12946_v56 = vcombine.high %v7468_v44, %v7472_v47 }
 0x531   :  { %10462 = vmatpush1.bf16.msra.mxu1 %v12895_v38  ;;  %v12943_v38 = vcombine.low %v7467_v32, %v7471_v36  ;;  %v7520_v32 = vld [vmem:[%s17985_s7 + $0x628] sm:$0xff] }
 0x532   :  { %10626 = vmatpush1.bf16.msra.mxu0 %v12897_v58  ;;  %10463 = vmatprep.subr.bf16.mxu1 %v12904_v12  ;;  %v12945_v58 = vcombine.low %v7468_v44, %v7472_v47  ;;  %v12952_v12 = vcombine.high %v7475_v57, %v7479_v34 }
 0x533   :  { %10627 = vmatprep.subr.bf16.mxu0 %v12906_v0  ;;  %v12954_v0 = vcombine.high %v7476_v48, %v7480_v55 }
 0x535   :  { %10464 = vmatpush1.bf16.msra.mxu1 %v12903_v62  ;;  %v12951_v62 = vcombine.low %v7475_v57, %v7479_v34 }
 0x536   :  { %10628 = vmatpush1.bf16.msra.mxu0 %v12905_v51  ;;  %10465 = vmatprep.subr.bf16.mxu1 %v12912_v63  ;;  %v12953_v51 = vcombine.low %v7476_v48, %v7480_v55  ;;  %v12960_v63 = vcombine.high %v7483_v13, %v7487_v16 }
 0x537   :  { %10629 = vmatprep.subr.bf16.mxu0 %v12914_v1  ;;  %v12962_v1 = vcombine.high %v7484_v46, %v7488_v61 }
 0x539   :  { %10466 = vmatpush1.bf16.msra.mxu1 %v12911_v4  ;;  %v12959_v4 = vcombine.low %v7483_v13, %v7487_v16 }
 0x53a   :  { %10630 = vmatpush1.bf16.msra.mxu0 %v12913_v54  ;;  %10467 = vmatprep.subr.bf16.mxu1 %v12920_v6  ;;  %v12968_v54 = vcombine.high %v7491_v2, %v7495_v14  ;;  %v12970_v6 = vcombine.high %v7492_v3, %v7496_v26 }
 0x53b   :  { %10631 = vmatprep.subr.bf16.mxu0 %v12922_v7  ;;  %v7499_v7 = vld [vmem:[%s17985_s7 + $0x580] sm:$0xff] }
 0x53c   :  { %v12975_v24 = vcombine.low %v7499_v7, %v7503_v31 }
 0x53d   :  { %10468 = vmatpush1.bf16.msra.mxu1 %v12919_v17  ;;  %v12976_v17 = vcombine.high %v7499_v7, %v7503_v31 }
 0x53e   :  { %10632 = vmatpush1.bf16.msra.mxu0 %v12921_v19  ;;  %10478 = vmatprep.subr.bf16.mxu1 %v12928_v21  ;;  %v7507_v19 = vld [vmem:[%s17985_s7 + $0x5c0] sm:$0xff] }
 0x53f   :  { %10642 = vmatprep.subr.bf16.mxu0 %v12930_v22  ;;  %v7511_v21 = vld [vmem:[%s17985_s7 + $0x5e0] sm:$0xff]  ;;  %v7508_v22 = vld [vmem:[%s17985_s7 + $0x5c8] sm:$0xff] }
 0x540   :  { %10470 = vmatmul.mubr.bf16.vlgmr.msra.gmra.mrb[16].mxu1 %v16345_v25  ;;  %v12986_v37 = vcombine.high %v7508_v22, %v7512_v23  ;;  %v12983_v36 = vcombine.low %v7507_v19, %v7511_v21 }
 0x541   :  { %10634 = vmatmul.mubr.bf16.vlgmr.msra.gmra.mrb[20].mxu0 %v16345_v25  ;;  %10479 = vmatpush1.bf16.msra.mxu1 %v12927_v28  ;;  %v12984_v28 = vcombine.high %v7507_v19, %v7511_v21 }
 0x542   :  { %10510 = vmatprep.mubr.bf16.mxu1 %v16353_v39  ;;  %10643 = vmatpush1.bf16.msra.mxu0 %v12929_v59  ;;  %v7519_v59 = vld [vmem:[%s17985_s7 + $0x620] sm:$0xff] }
 0x543   :  { %10674 = vmatprep.mubr.bf16.mxu0 %v16353_v39  ;;  %10480 = vmatprep.subr.bf16.mxu1 %v12936_v33  ;;  %v7516_v33 = vld [vmem:[%s17985_s7 + $0x608] sm:$0xff]  ;;  %v12992_v44 = vcombine.high %v7515_v30, %v7519_v59  ;;  %v12991_v57 = vcombine.low %v7515_v30, %v7519_v59 }
 0x544   :  { %10644 = vmatprep.subr.bf16.mxu0 %v12938_v35  ;;  %v12985_v35 = vcombine.low %v7508_v22, %v7512_v23  ;;  %v12994_v47 = vcombine.high %v7516_v33, %v7520_v32  ;;  %v12993_v34 = vcombine.low %v7516_v33, %v7520_v32 }
 0x545   :  { %10481 = vmatpush1.bf16.msra.mxu1 %v12935_v45  ;;  %v7523_v45 = vld [vmem:[%s17985_s7 + $0x640] sm:$0xff] }
 0x546   :  { %10645 = vmatpush1.bf16.msra.mxu0 %v12937_v50  ;;  %10482 = vmatprep.subr.bf16.mxu1 %v12944_v53  ;;  %v7527_v50 = vld [vmem:[%s17985_s7 + $0x660] sm:$0xff]  ;;  %v7524_v53 = vld [vmem:[%s17985_s7 + $0x648] sm:$0xff] }
 0x547   :  { %10646 = vmatprep.subr.bf16.mxu0 %v12946_v56  ;;  %v7528_v56 = vld [vmem:[%s17985_s7 + $0x668] sm:$0xff]  ;;  %v13000_v48 = vcombine.high %v7523_v45, %v7527_v50  ;;  %v12999_v13 = vcombine.low %v7523_v45, %v7527_v50  ;;  %v4874_v50 = vrot.slane %v16181_v29, %v15996_v40 }
 0x548   :  { %v13002_v55 = vcombine.high %v7524_v53, %v7528_v56  ;;  %v13001_v16 = vcombine.low %v7524_v53, %v7528_v56  ;;  %v7584_v29 = vld [vmem:[%s17985_s7 + $0x828] sm:$0xff] }
 0x549   :  { %10483 = vmatpush1.bf16.msra.mxu1 %v12943_v38  ;;  %v7531_v38 = vld [vmem:[%s17985_s7 + $0x680] sm:$0xff] }
 0x54a   :  { %10647 = vmatpush1.bf16.msra.mxu0 %v12945_v58  ;;  %10484 = vmatprep.subr.bf16.mxu1 %v12952_v12  ;;  %v7535_v58 = vld [vmem:[%s17985_s7 + $0x6a0] sm:$0xff]  ;;  %v7532_v12 = vld [vmem:[%s17985_s7 + $0x688] sm:$0xff] }
 0x54b   :  { %10648 = vmatprep.subr.bf16.mxu0 %v12954_v0  ;;  %v7536_v0 = vld [vmem:[%s17985_s7 + $0x6a8] sm:$0xff]  ;;  %v13008_v46 = vcombine.high %v7531_v38, %v7535_v58  ;;  %v13007_v2 = vcombine.low %v7531_v38, %v7535_v58  ;;  %v13477_v58 = vadd.f32 %v16199_v8, %v4874_v50  ;;  %v7627_v50 = vld [vmem:[%s17985_s7 + $0x980] sm:$0xff] }
 0x54c   :  { %v13010_v61 = vcombine.high %v7532_v12, %v7536_v0  ;;  %v13009_v14 = vcombine.low %v7532_v12, %v7536_v0  ;;  %v7592_v8 = vld [vmem:[%s17985_s7 + $0x868] sm:$0xff] }
 0x54d   :  { %10485 = vmatpush1.bf16.msra.mxu1 %v12951_v62  ;;  %v7539_v62 = vld [vmem:[%s17985_s7 + $0x6c0] sm:$0xff] }
 0x54e   :  { %10649 = vmatpush1.bf16.msra.mxu0 %v12953_v51  ;;  %10486 = vmatprep.subr.bf16.mxu1 %v12960_v63  ;;  %v7543_v51 = vld [vmem:[%s17985_s7 + $0x6e0] sm:$0xff]  ;;  %v7540_v63 = vld [vmem:[%s17985_s7 + $0x6c8] sm:$0xff] }
 0x54f   :  { %10650 = vmatprep.subr.bf16.mxu0 %v12962_v1  ;;  %v7544_v1 = vld [vmem:[%s17985_s7 + $0x6e8] sm:$0xff]  ;;  %v13016_v3 = vcombine.high %v7539_v62, %v7543_v51  ;;  %v13015_v7 = vcombine.low %v7539_v62, %v7543_v51  ;;  %v16548_v51 = vpack.c.bf16 %v13477_v58, %v13477_v58  ;;  %v7639_v58 = vld [vmem:[%s17985_s7 + $0x9e0] sm:$0xff] }
 0x550   :  { %v13018_v26 = vcombine.high %v7540_v63, %v7544_v1  ;;  %v13017_v31 = vcombine.low %v7540_v63, %v7544_v1 }
 0x551   :  { %10487 = vmatpush1.bf16.msra.mxu1 %v12959_v4  ;;  %v7547_v4 = vld [vmem:[%s17985_s7 + $0x700] sm:$0xff] }
 0x552   :  { %10651 = vmatpush1.bf16.msra.mxu0 %v12961_v5  ;;  %10488 = vmatprep.subr.bf16.mxu1 %v12968_v54  ;;  %v7551_v5 = vld [vmem:[%s17985_s7 + $0x720] sm:$0xff]  ;;  %v7548_v54 = vld [vmem:[%s17985_s7 + $0x708] sm:$0xff] }
 0x553   :  { %10652 = vmatprep.subr.bf16.mxu0 %v12970_v6  ;;  %v7552_v6 = vld [vmem:[%s17985_s7 + $0x728] sm:$0xff]  ;;  %v13024_v9 = vcombine.high %v7547_v4, %v7551_v5  ;;  %v13023_v19 = vcombine.low %v7547_v4, %v7551_v5 }
 0x554   :  { %v13026_v10 = vcombine.high %v7548_v54, %v7552_v6  ;;  %v13025_v21 = vcombine.low %v7548_v54, %v7552_v6  ;;  %v7600_v4 = vld [vmem:[%s17985_s7 + $0x8a8] sm:$0xff] }
 0x555   :  { %10489 = vmatpush1.bf16.msra.mxu1 %v12967_v11  ;;  %v7555_v11 = vld [vmem:[%s17985_s7 + $0x740] sm:$0xff] }
 0x556   :  { %10653 = vmatpush1.bf16.msra.mxu0 %v12969_v52  ;;  %10490 = vmatprep.subr.bf16.mxu1 %v12976_v17  ;;  %v7559_v52 = vld [vmem:[%s17985_s7 + $0x760] sm:$0xff]  ;;  %v7556_v17 = vld [vmem:[%s17985_s7 + $0x748] sm:$0xff] }
 0x557   :  { %10654 = vmatprep.subr.bf16.mxu0 %v12978_v18  ;;  %v7560_v18 = vld [vmem:[%s17985_s7 + $0x768] sm:$0xff]  ;;  %v13032_v22 = vcombine.high %v7555_v11, %v7559_v52  ;;  %v13031_v30 = vcombine.low %v7555_v11, %v7559_v52 }
 0x558   :  { %v13034_v23 = vcombine.high %v7556_v17, %v7560_v18  ;;  %v13033_v59 = vcombine.low %v7556_v17, %v7560_v18  ;;  %v7608_v11 = vld [vmem:[%s17985_s7 + $0x8e8] sm:$0xff] }
 0x559   :  { %10491 = vmatpush1.bf16.msra.mxu1 %v12975_v24  ;;  %v7563_v24 = vld [vmem:[%s17985_s7 + $0x780] sm:$0xff] }
 0x55a   :  { %10655 = vmatpush1.bf16.msra.mxu0 %v12977_v27  ;;  %10492 = vmatprep.subr.bf16.mxu1 %v12984_v28  ;;  %v7567_v27 = vld [vmem:[%s17985_s7 + $0x7a0] sm:$0xff]  ;;  %v7564_v28 = vld [vmem:[%s17985_s7 + $0x788] sm:$0xff] }
 0x55b   :  { %10656 = vmatprep.subr.bf16.mxu0 %v12986_v37  ;;  %v7568_v37 = vld [vmem:[%s17985_s7 + $0x7a8] sm:$0xff]  ;;  %v13040_v33 = vcombine.high %v7563_v24, %v7567_v27  ;;  %v13039_v45 = vcombine.low %v7563_v24, %v7567_v27 }
 0x55c   :  { %v13042_v32 = vcombine.high %v7564_v28, %v7568_v37  ;;  %v13041_v53 = vcombine.low %v7564_v28, %v7568_v37  ;;  %v7616_v24 = vld [vmem:[%s17985_s7 + $0x928] sm:$0xff] }
 0x55d   :  { %10493 = vmatpush1.bf16.msra.mxu1 %v12983_v36  ;;  %v7571_v36 = vld [vmem:[%s17985_s7 + $0x7c0] sm:$0xff] }
 0x55e   :  { %10657 = vmatpush1.bf16.msra.mxu0 %v12985_v35  ;;  %10494 = vmatprep.subr.bf16.mxu1 %v12992_v44  ;;  %v7575_v35 = vld [vmem:[%s17985_s7 + $0x7e0] sm:$0xff]  ;;  %v7572_v44 = vld [vmem:[%s17985_s7 + $0x7c8] sm:$0xff] }
 0x55f   :  { %10658 = vmatprep.subr.bf16.mxu0 %v12994_v47  ;;  %v7576_v47 = vld [vmem:[%s17985_s7 + $0x7e8] sm:$0xff]  ;;  %v13048_v56 = vcombine.high %v7571_v36, %v7575_v35  ;;  %v13047_v38 = vcombine.low %v7571_v36, %v7575_v35 }
 0x560   :  { %v13049_v12 = vcombine.low %v7572_v44, %v7576_v47  ;;  %v7624_v36 = vld [vmem:[%s17985_s7 + $0x968] sm:$0xff] }
 0x561   :  { %10495 = vmatpush1.bf16.msra.mxu1 %v12991_v57  ;;  %v13050_v57 = vcombine.high %v7572_v44, %v7576_v47 }
 0x562   :  { %10659 = vmatpush1.bf16.msra.mxu0 %v12993_v34  ;;  %10496 = vmatprep.subr.bf16.mxu1 %v13000_v48  ;;  %v7579_v34 = vld [vmem:[%s17985_s7 + $0x800] sm:$0xff] }
 0x563   :  { %10660 = vmatprep.subr.bf16.mxu0 %v13002_v55  ;;  %v7583_v48 = vld [vmem:[%s17985_s7 + $0x820] sm:$0xff]  ;;  %v7580_v55 = vld [vmem:[%s17985_s7 + $0x808] sm:$0xff] }
 0x564   :  { %v13056_v0 = vcombine.high %v7579_v34, %v7583_v48  ;;  %v13055_v62 = vcombine.low %v7579_v34, %v7583_v48  ;;  %v13057_v63 = vcombine.low %v7580_v55, %v7584_v29 }
 0x565   :  { %10497 = vmatpush1.bf16.msra.mxu1 %v12999_v13  ;;  %v13058_v13 = vcombine.high %v7580_v55, %v7584_v29 }
 0x566   :  { %10661 = vmatpush1.bf16.msra.mxu0 %v13001_v16  ;;  %10498 = vmatprep.subr.bf16.mxu1 %v13008_v46  ;;  %v7587_v16 = vld [vmem:[%s17985_s7 + $0x840] sm:$0xff] }
 0x567   :  { %10662 = vmatprep.subr.bf16.mxu0 %v13010_v61  ;;  %v7591_v46 = vld [vmem:[%s17985_s7 + $0x860] sm:$0xff]  ;;  %v7588_v61 = vld [vmem:[%s17985_s7 + $0x848] sm:$0xff] }
 0x568   :  { %v13064_v1 = vcombine.high %v7587_v16, %v7591_v46  ;;  %v13063_v5 = vcombine.low %v7587_v16, %v7591_v46  ;;  %v13065_v54 = vcombine.low %v7588_v61, %v7592_v8 }
 0x569   :  { %10499 = vmatpush1.bf16.msra.mxu1 %v13007_v2  ;;  %v13066_v2 = vcombine.high %v7588_v61, %v7592_v8  ;;  %v7643_v8 = vld [vmem:[%s17985_s7 + $0xa00] sm:$0xff] }
 0x56a   :  { %10663 = vmatpush1.bf16.msra.mxu0 %v13009_v14  ;;  %10500 = vmatprep.subr.bf16.mxu1 %v13016_v3  ;;  %v7595_v14 = vld [vmem:[%s17985_s7 + $0x880] sm:$0xff] }
 0x56b   :  { %10664 = vmatprep.subr.bf16.mxu0 %v13018_v26  ;;  %v7599_v3 = vld [vmem:[%s17985_s7 + $0x8a0] sm:$0xff]  ;;  %v7596_v26 = vld [vmem:[%s17985_s7 + $0x888] sm:$0xff] }
 0x56c   :  { %v13072_v6 = vcombine.high %v7595_v14, %v7599_v3  ;;  %v13071_v52 = vcombine.low %v7595_v14, %v7599_v3  ;;  %v13073_v17 = vcombine.low %v7596_v26, %v7600_v4 }
 0x56d   :  { %10501 = vmatpush1.bf16.msra.mxu1 %v13015_v7  ;;  %v13074_v7 = vcombine.high %v7596_v26, %v7600_v4  ;;  %v7651_v4 = vld [vmem:[%s17985_s7 + $0xa40] sm:$0xff] }
 0x56e   :  { %10665 = vmatpush1.bf16.msra.mxu0 %v13017_v31  ;;  %10502 = vmatprep.subr.bf16.mxu1 %v13024_v9  ;;  %v7603_v31 = vld [vmem:[%s17985_s7 + $0x8c0] sm:$0xff] }
 0x56f   :  { %10666 = vmatprep.subr.bf16.mxu0 %v13026_v10  ;;  %v7607_v9 = vld [vmem:[%s17985_s7 + $0x8e0] sm:$0xff]  ;;  %v7604_v10 = vld [vmem:[%s17985_s7 + $0x8c8] sm:$0xff] }
 0x570   :  { %v13080_v18 = vcombine.high %v7603_v31, %v7607_v9  ;;  %v13079_v27 = vcombine.low %v7603_v31, %v7607_v9  ;;  %v13081_v28 = vcombine.low %v7604_v10, %v7608_v11 }
 0x571   :  { %10503 = vmatpush1.bf16.msra.mxu1 %v13023_v19  ;;  %v13082_v19 = vcombine.high %v7604_v10, %v7608_v11  ;;  %v7659_v11 = vld [vmem:[%s17985_s7 + $0xa80] sm:$0xff] }
 0x572   :  { %10667 = vmatpush1.bf16.msra.mxu0 %v13025_v21  ;;  %10504 = vmatprep.subr.bf16.mxu1 %v13032_v22  ;;  %v7611_v21 = vld [vmem:[%s17985_s7 + $0x900] sm:$0xff] }
 0x573   :  { %10668 = vmatprep.subr.bf16.mxu0 %v13034_v23  ;;  %v7615_v22 = vld [vmem:[%s17985_s7 + $0x920] sm:$0xff]  ;;  %v7612_v23 = vld [vmem:[%s17985_s7 + $0x908] sm:$0xff] }
 0x574   :  { %v13088_v37 = vcombine.high %v7611_v21, %v7615_v22  ;;  %v13087_v35 = vcombine.low %v7611_v21, %v7615_v22  ;;  %v13089_v44 = vcombine.low %v7612_v23, %v7616_v24 }
 0x575   :  { %10505 = vmatpush1.bf16.msra.mxu1 %v13031_v30  ;;  %v13090_v30 = vcombine.high %v7612_v23, %v7616_v24  ;;  %v7667_v24 = vld [vmem:[%s17985_s7 + $0xac0] sm:$0xff] }
 0x576   :  { %10669 = vmatpush1.bf16.msra.mxu0 %v13033_v59  ;;  %10506 = vmatprep.subr.bf16.mxu1 %v13040_v33  ;;  %v7619_v59 = vld [vmem:[%s17985_s7 + $0x940] sm:$0xff] }
 0x577   :  { %10670 = vmatprep.subr.bf16.mxu0 %v13042_v32  ;;  %v7623_v33 = vld [vmem:[%s17985_s7 + $0x960] sm:$0xff]  ;;  %v7620_v32 = vld [vmem:[%s17985_s7 + $0x948] sm:$0xff] }
 0x578   :  { %v13096_v47 = vcombine.high %v7619_v59, %v7623_v33  ;;  %v13095_v34 = vcombine.low %v7619_v59, %v7623_v33  ;;  %v13097_v48 = vcombine.low %v7620_v32, %v7624_v36 }
 0x579   :  { %10507 = vmatpush1.bf16.msra.mxu1 %v13039_v45  ;;  %v13098_v45 = vcombine.high %v7620_v32, %v7624_v36  ;;  %v7675_v36 = vld [vmem:[%s17985_s7 + $0xb00] sm:$0xff] }
 0x57a   :  { %10671 = vmatpush1.bf16.msra.mxu0 %v13041_v53  ;;  %10508 = vmatprep.subr.bf16.mxu1 %v13048_v56  ;;  %v7631_v53 = vld [vmem:[%s17985_s7 + $0x9a0] sm:$0xff]  ;;  %v7628_v56 = vld [vmem:[%s17985_s7 + $0x988] sm:$0xff] }
 0x57b   :  { %10672 = vmatprep.subr.bf16.mxu0 %v13050_v57  ;;  %v7632_v57 = vld [vmem:[%s17985_s7 + $0x9a8] sm:$0xff]  ;;  %v13104_v55 = vcombine.high %v7627_v50, %v7631_v53 }
 0x57c   :  { %v13106_v29 = vcombine.high %v7628_v56, %v7632_v57  ;;  %v13105_v16 = vcombine.low %v7628_v56, %v7632_v57  ;;  %v7683_v57 = vld [vmem:[%s17985_s7 + $0xb40] sm:$0xff] }
 0x57d   :  { %10509 = vmatpush1.bf16.msra.mxu1 %v13047_v38  ;;  %v7635_v38 = vld [vmem:[%s17985_s7 + $0x9c0] sm:$0xff] }
 0x57e   :  { %10673 = vmatpush1.bf16.msra.mxu0 %v13049_v12  ;;  %10519 = vmatprep.subr.bf16.mxu1 %v13056_v0  ;;  %v7636_v12 = vld [vmem:[%s17985_s7 + $0x9c8] sm:$0xff]  ;;  %v13112_v46 = vcombine.high %v7635_v38, %v7639_v58 }
 0x57f   :  { %10683 = vmatprep.subr.bf16.mxu0 %v13058_v13  ;;  %v7640_v0 = vld [vmem:[%s17985_s7 + $0x9e8] sm:$0xff]  ;;  %v13103_v13 = vcombine.low %v7627_v50, %v7631_v53 }
 0x580   :  { %10511 = vmatmul.mubr.bf16.vlgmr.msra.gmra.mrb[16].mxu1 %v16548_v51  ;;  %v13114_v61 = vcombine.high %v7636_v12, %v7640_v0  ;;  %v13113_v14 = vcombine.low %v7636_v12, %v7640_v0  ;;  %v7691_v0 = vld [vmem:[%s17985_s7 + $0xb80] sm:$0xff] }
 0x581   :  { %10675 = vmatmul.mubr.bf16.vlgmr.msra.gmra.mrb[20].mxu0 %v16548_v51  ;;  %10520 = vmatpush1.bf16.msra.mxu1 %v13055_v62  ;;  %v7647_v62 = vld [vmem:[%s17985_s7 + $0xa20] sm:$0xff] }
 0x582   :  { %10684 = vmatpush1.bf16.msra.mxu0 %v13057_v63  ;;  %10521 = vmatprep.subr.bf16.mxu1 %v13064_v1  ;;  %v7644_v63 = vld [vmem:[%s17985_s7 + $0xa08] sm:$0xff]  ;;  %v13120_v3 = vcombine.high %v7643_v8, %v7647_v62 }
 0x583   :  { %10685 = vmatprep.subr.bf16.mxu0 %v13066_v2  ;;  %v7648_v1 = vld [vmem:[%s17985_s7 + $0xa28] sm:$0xff]  ;;  %v13111_v2 = vcombine.low %v7635_v38, %v7639_v58 }
 0x584   :  { %v13122_v26 = vcombine.high %v7644_v63, %v7648_v1  ;;  %v13121_v31 = vcombine.low %v7644_v63, %v7648_v1  ;;  %v7699_v1 = vld [vmem:[%s17985_s7 + $0xbc0] sm:$0xff] }
 0x585   :  { %10522 = vmatpush1.bf16.msra.mxu1 %v13063_v5  ;;  %v7655_v5 = vld [vmem:[%s17985_s7 + $0xa60] sm:$0xff] }
 0x586   :  { %10686 = vmatpush1.bf16.msra.mxu0 %v13065_v54  ;;  %10523 = vmatprep.subr.bf16.mxu1 %v13072_v6  ;;  %v7652_v54 = vld [vmem:[%s17985_s7 + $0xa48] sm:$0xff]  ;;  %v13128_v9 = vcombine.high %v7651_v4, %v7655_v5 }
 0x587   :  { %10687 = vmatprep.subr.bf16.mxu0 %v13074_v7  ;;  %v7656_v6 = vld [vmem:[%s17985_s7 + $0xa68] sm:$0xff]  ;;  %v13119_v7 = vcombine.low %v7643_v8, %v7647_v62 }
 0x588   :  { %v13130_v10 = vcombine.high %v7652_v54, %v7656_v6  ;;  %v13129_v21 = vcombine.low %v7652_v54, %v7656_v6  ;;  %v7707_v6 = vld [vmem:[%s17985_s7 + $0xc00] sm:$0xff] }
 0x589   :  { %10524 = vmatpush1.bf16.msra.mxu1 %v13071_v52  ;;  %v7663_v52 = vld [vmem:[%s17985_s7 + $0xaa0] sm:$0xff] }
 0x58a   :  { %10688 = vmatpush1.bf16.msra.mxu0 %v13073_v17  ;;  %10525 = vmatprep.subr.bf16.mxu1 %v13080_v18  ;;  %v7660_v17 = vld [vmem:[%s17985_s7 + $0xa88] sm:$0xff]  ;;  %v13136_v22 = vcombine.high %v7659_v11, %v7663_v52 }
 0x58b   :  { %10689 = vmatprep.subr.bf16.mxu0 %v13082_v19  ;;  %v7664_v18 = vld [vmem:[%s17985_s7 + $0xaa8] sm:$0xff]  ;;  %v13127_v19 = vcombine.low %v7651_v4, %v7655_v5 }
 0x58c   :  { %v13138_v23 = vcombine.high %v7660_v17, %v7664_v18  ;;  %v13137_v59 = vcombine.low %v7660_v17, %v7664_v18  ;;  %v4893_v18 = vsub.s32 7, %v14862_v42 }
 0x58d   :  { %10526 = vmatpush1.bf16.msra.mxu1 %v13079_v27  ;;  %v7671_v27 = vld [vmem:[%s17985_s7 + $0xae0] sm:$0xff] }
 0x58e   :  { %10690 = vmatpush1.bf16.msra.mxu0 %v13081_v28  ;;  %10527 = vmatprep.subr.bf16.mxu1 %v13088_v37  ;;  %v7668_v28 = vld [vmem:[%s17985_s7 + $0xac8] sm:$0xff]  ;;  %v13144_v33 = vcombine.high %v7667_v24, %v7671_v27 }
 0x58f   :  { %10691 = vmatprep.subr.bf16.mxu0 %v13090_v30  ;;  %v7672_v37 = vld [vmem:[%s17985_s7 + $0xae8] sm:$0xff]  ;;  %v13135_v30 = vcombine.low %v7659_v11, %v7663_v52 }
 0x590   :  { %v13146_v32 = vcombine.high %v7668_v28, %v7672_v37  ;;  %v13145_v50 = vcombine.low %v7668_v28, %v7672_v37 }
 0x591   :  { %10528 = vmatpush1.bf16.msra.mxu1 %v13087_v35  ;;  %v7679_v35 = vld [vmem:[%s17985_s7 + $0xb20] sm:$0xff] }
 0x592   :  { %10692 = vmatpush1.bf16.msra.mxu0 %v13089_v44  ;;  %10529 = vmatprep.subr.bf16.mxu1 %v13096_v47  ;;  %v7676_v44 = vld [vmem:[%s17985_s7 + $0xb08] sm:$0xff]  ;;  %v13152_v53 = vcombine.high %v7675_v36, %v7679_v35 }
 0x593   :  { %10693 = vmatprep.subr.bf16.mxu0 %v13098_v45  ;;  %v7680_v47 = vld [vmem:[%s17985_s7 + $0xb28] sm:$0xff]  ;;  %v13143_v45 = vcombine.low %v7667_v24, %v7671_v27 }
 0x594   :  { %v13154_v56 = vcombine.high %v7676_v44, %v7680_v47  ;;  %v13153_v38 = vcombine.low %v7676_v44, %v7680_v47  ;;  %v7719_v47 = vld [vmem:[%s17985_s7 + $0xc60] sm:$0xff] }
 0x595   :  { %10530 = vmatpush1.bf16.msra.mxu1 %v13095_v34  ;;  %v7687_v34 = vld [vmem:[%s17985_s7 + $0xb60] sm:$0xff] }
 0x596   :  { %10694 = vmatpush1.bf16.msra.mxu0 %v13097_v48  ;;  %10531 = vmatprep.subr.bf16.mxu1 %v13104_v55  ;;  %v7684_v48 = vld [vmem:[%s17985_s7 + $0xb48] sm:$0xff]  ;;  %v13160_v58 = vcombine.high %v7683_v57, %v7687_v34 }
 0x597   :  { %10695 = vmatprep.subr.bf16.mxu0 %v13106_v29  ;;  %v7688_v55 = vld [vmem:[%s17985_s7 + $0xb68] sm:$0xff]  ;;  %v13151_v29 = vcombine.low %v7675_v36, %v7679_v35 }
 0x598   :  { %v13162_v12 = vcombine.high %v7684_v48, %v7688_v55  ;;  %v13161_v8 = vcombine.low %v7684_v48, %v7688_v55  ;;  %v7723_v55 = vld [vmem:[%s17985_s7 + $0xc80] sm:$0xff] }
 0x599   :  { %10532 = vmatpush1.bf16.msra.mxu1 %v13103_v13  ;;  %v7695_v13 = vld [vmem:[%s17985_s7 + $0xba0] sm:$0xff] }
 0x59a   :  { %10696 = vmatpush1.bf16.msra.mxu0 %v13105_v16  ;;  %10533 = vmatprep.subr.bf16.mxu1 %v13112_v46  ;;  %v7692_v16 = vld [vmem:[%s17985_s7 + $0xb88] sm:$0xff]  ;;  %v13168_v62 = vcombine.high %v7691_v0, %v7695_v13 }
 0x59b   :  { %10697 = vmatprep.subr.bf16.mxu0 %v13114_v61  ;;  %v7696_v46 = vld [vmem:[%s17985_s7 + $0xba8] sm:$0xff]  ;;  %v13159_v61 = vcombine.low %v7683_v57, %v7687_v34 }
 0x59c   :  { %v13170_v63 = vcombine.high %v7692_v16, %v7696_v46  ;;  %v13169_v4 = vcombine.low %v7692_v16, %v7696_v46 }
 0x59d   :  { %10534 = vmatpush1.bf16.msra.mxu1 %v13111_v2  ;;  %v7703_v2 = vld [vmem:[%s17985_s7 + $0xbe0] sm:$0xff] }
 0x59e   :  { %10698 = vmatpush1.bf16.msra.mxu0 %v13113_v14  ;;  %10535 = vmatprep.subr.bf16.mxu1 %v13120_v3  ;;  %v7700_v14 = vld [vmem:[%s17985_s7 + $0xbc8] sm:$0xff]  ;;  %v13176_v5 = vcombine.high %v7699_v1, %v7703_v2 }
 0x59f   :  { %10699 = vmatprep.subr.bf16.mxu0 %v13122_v26  ;;  %v7704_v3 = vld [vmem:[%s17985_s7 + $0xbe8] sm:$0xff]  ;;  %v13167_v26 = vcombine.low %v7691_v0, %v7695_v13 }
 0x5a0   :  { %v13178_v54 = vcombine.high %v7700_v14, %v7704_v3  ;;  %v13177_v11 = vcombine.low %v7700_v14, %v7704_v3  ;;  %v7728_v0 = vld [vmem:[%s17985_s7 + $0xca8] sm:$0xff] }
 0x5a1   :  { %10536 = vmatpush1.bf16.msra.mxu1 %v13119_v7  ;;  %v7711_v7 = vld [vmem:[%s17985_s7 + $0xc20] sm:$0xff] }
 0x5a2   :  { %10700 = vmatpush1.bf16.msra.mxu0 %v13121_v31  ;;  %10537 = vmatprep.subr.bf16.mxu1 %v13128_v9  ;;  %v7708_v31 = vld [vmem:[%s17985_s7 + $0xc08] sm:$0xff]  ;;  %v13184_v52 = vcombine.high %v7707_v6, %v7711_v7  ;;  %v13183_v57 = vcombine.low %v7707_v6, %v7711_v7 }
 0x5a3   :  { %10701 = vmatprep.subr.bf16.mxu0 %v13130_v10  ;;  %v7712_v9 = vld [vmem:[%s17985_s7 + $0xc28] sm:$0xff]  ;;  %v13175_v10 = vcombine.low %v7699_v1, %v7703_v2 }
 0x5a4   :  { %v13186_v17 = vcombine.high %v7708_v31, %v7712_v9  ;;  %v13185_v34 = vcombine.low %v7708_v31, %v7712_v9  ;;  %v7732_v1 = vld [vmem:[%s17985_s7 + $0xcc8] sm:$0xff] }
 0x5a5   :  { %10538 = vmatpush1.bf16.msra.mxu1 %v13127_v19  ;;  %v16736_v19 = vld [vmem:[%s17984_s6] sm:$0xff]  ;;  %v7736_v2 = vld [vmem:[%s17985_s7 + $0xce8] sm:$0xff] }
 0x5a6   :  { %10702 = vmatpush1.bf16.msra.mxu0 %v13129_v21  ;;  %10539 = vmatprep.subr.bf16.mxu1 %v13136_v22  ;;  %v4882_v21 = vrot.slane %v16736_v19, %v16067_v15  ;;  %v4886_v22 = vrot.slane %v16736_v19, %v16070_v20  ;;  %v7740_v6 = vld [vmem:[%s17985_s7 + $0xd08] sm:$0xff]  ;;  %v13209_v9 = vcombine.low %v7732_v1, %v7736_v2 }
 0x5a7   :  { %10703 = vmatprep.subr.bf16.mxu0 %v13138_v23  ;;  %v4894_v23 = vrot.slane %v16736_v19, %v4893_v18  ;;  %v7744_v7 = vld [vmem:[%s17985_s7 + $0xd28] sm:$0xff] }
 0x5a9   :  { %10540 = vmatpush1.bf16.msra.mxu1 %v13135_v30 }
 0x5aa   :  { %10704 = vmatpush1.bf16.msra.mxu0 %v13137_v59  ;;  %10541 = vmatprep.subr.bf16.mxu1 %v13144_v33 }
 0x5ab   :  { %10705 = vmatprep.subr.bf16.mxu0 %v13146_v32  ;;  %v7715_v32 = vld [vmem:[%s17985_s7 + $0xc40] sm:$0xff] }
 0x5ac   :  { %v13191_v16 = vcombine.low %v7715_v32, %v7719_v47 }
 0x5ad   :  { %10542 = vmatpush1.bf16.msra.mxu1 %v13143_v45  ;;  %v7716_v45 = vld [vmem:[%s17985_s7 + $0xc48] sm:$0xff] }
 0x5ae   :  { %10706 = vmatpush1.bf16.msra.mxu0 %v13145_v50  ;;  %10543 = vmatprep.subr.bf16.mxu1 %v13152_v53  ;;  %v7720_v50 = vld [vmem:[%s17985_s7 + $0xc68] sm:$0xff] }
 0x5af   :  { %10707 = vmatprep.subr.bf16.mxu0 %v13154_v56  ;;  %v13193_v46 = vcombine.low %v7716_v45, %v7720_v50 }
 0x5b1   :  { %10544 = vmatpush1.bf16.msra.mxu1 %v13151_v29  ;;  %v13192_v29 = vcombine.high %v7715_v32, %v7719_v47  ;;  %v7760_v32 = vld [vmem:[%s17985_s7 + $0xda8] sm:$0xff] }
 0x5b2   :  { %10708 = vmatpush1.bf16.msra.mxu0 %v13153_v38  ;;  %10545 = vmatprep.subr.bf16.mxu1 %v13160_v58  ;;  %v13194_v38 = vcombine.high %v7716_v45, %v7720_v50  ;;  %v7727_v58 = vld [vmem:[%s17985_s7 + $0xca0] sm:$0xff] }
 0x5b3   :  { %10709 = vmatprep.subr.bf16.mxu0 %v13162_v12  ;;  %v7724_v12 = vld [vmem:[%s17985_s7 + $0xc88] sm:$0xff]  ;;  %v13199_v14 = vcombine.low %v7723_v55, %v7727_v58  ;;  %v7763_v45 = vld [vmem:[%s17985_s7 + $0xdc0] sm:$0xff] }
 0x5b4   :  { %v13201_v3 = vcombine.low %v7724_v12, %v7728_v0  ;;  %v7767_v50 = vld [vmem:[%s17985_s7 + $0xde0] sm:$0xff] }
 0x5b5   :  { %10546 = vmatpush1.bf16.msra.mxu1 %v13159_v61  ;;  %v13200_v61 = vcombine.high %v7723_v55, %v7727_v58  ;;  %v7771_v58 = vld [vmem:[%s17985_s7 + $0xe00] sm:$0xff] }
 0x5b6   :  { %10710 = vmatpush1.bf16.msra.mxu0 %v13161_v8  ;;  %10547 = vmatprep.subr.bf16.mxu1 %v13168_v62  ;;  %v13202_v8 = vcombine.high %v7724_v12, %v7728_v0  ;;  %v7731_v62 = vld [vmem:[%s17985_s7 + $0xcc0] sm:$0xff]  ;;  %v7772_v0 = vld [vmem:[%s17985_s7 + $0xe08] sm:$0xff] }
 0x5b7   :  { %10711 = vmatprep.subr.bf16.mxu0 %v13170_v63  ;;  %v7735_v63 = vld [vmem:[%s17985_s7 + $0xce0] sm:$0xff] }
 0x5b8   :  { %v13207_v31 = vcombine.low %v7731_v62, %v7735_v63  ;;  %v7775_v12 = vld [vmem:[%s17985_s7 + $0xe20] sm:$0xff] }
 0x5b9   :  { %10548 = vmatpush1.bf16.msra.mxu1 %v13167_v26  ;;  %v13208_v26 = vcombine.high %v7731_v62, %v7735_v63  ;;  %v7779_v63 = vld [vmem:[%s17985_s7 + $0xe40] sm:$0xff] }
 0x5ba   :  { %10712 = vmatpush1.bf16.msra.mxu0 %v13169_v4  ;;  %10549 = vmatprep.subr.bf16.mxu1 %v13176_v5  ;;  %v13210_v4 = vcombine.high %v7732_v1, %v7736_v2  ;;  %v7739_v5 = vld [vmem:[%s17985_s7 + $0xd00] sm:$0xff]  ;;  %v7780_v2 = vld [vmem:[%s17985_s7 + $0xe48] sm:$0xff] }
 0x5bb   :  { %10713 = vmatprep.subr.bf16.mxu0 %v13178_v54  ;;  %v7743_v54 = vld [vmem:[%s17985_s7 + $0xd20] sm:$0xff] }
 0x5bc   :  { %v7783_v1 = vld [vmem:[%s17985_s7 + $0xe60] sm:$0xff] }
 0x5bd   :  { %10550 = vmatpush1.bf16.msra.mxu1 %v13175_v10  ;;  %v13216_v10 = vcombine.high %v7739_v5, %v7743_v54 }
 0x5be   :  { %10714 = vmatpush1.bf16.msra.mxu0 %v13177_v11  ;;  %10560 = vmatprep.subr.bf16.mxu1 %v13184_v52  ;;  %v13218_v11 = vcombine.high %v7740_v6, %v7744_v7  ;;  %v7747_v52 = vld [vmem:[%s17985_s7 + $0xd40] sm:$0xff] }
 0x5bf   :  { %10724 = vmatprep.subr.bf16.mxu0 %v13186_v17  ;;  %v7751_v17 = vld [vmem:[%s17985_s7 + $0xd60] sm:$0xff] }
 0x5d3   :  { %v7185_v24 = vpop.f32.mrb[12].mxu1 }
 0x5d4   :  { %v13479_v27 = vadd.f32 %v7185_v24, %v4882_v21  ;;  %v16745_v28 = vpop.f32.mrb[16].mxu0  ;;  %v7187_v37 = vpop.f32.mrb[13].mxu1  ;;  %v7748_v21 = vld [vmem:[%s17985_s7 + $0xd48] sm:$0xff]  ;;  %v13217_v24 = vcombine.low %v7740_v6, %v7744_v7  ;;  %v7791_v6 = vld [vmem:[%s17985_s7 + $0xea0] sm:$0xff] }
 0x5d5   :  { %v13480_v30 = vadd.f32 %v7187_v37, %v4886_v22  ;;  %v7310_v59 = vpop.f32.mrb[17].mxu0  ;;  %v7189_v33 = vpop.f32.mrb[14].mxu1  ;;  %v7752_v22 = vld [vmem:[%s17985_s7 + $0xd68] sm:$0xff] }
 0x5d6   :  { %v13482_v36 = vadd.f32 %v7310_v59, %v4894_v23  ;;  %v7312_v35 = vpop.f32.mrb[18].mxu0  ;;  %v7190_v44 = vpop.f32.mrb[15].mxu1  ;;  %v16761_v48 = vpack.c.bf16 %v13479_v27, %v13479_v27  ;;  %v13215_v23 = vcombine.low %v7739_v5, %v7743_v54  ;;  %v13224_v27 = vcombine.high %v7747_v52, %v7751_v17  ;;  %v7759_v59 = vld [vmem:[%s17985_s7 + $0xda0] sm:$0xff]  ;;  %v7756_v33 = vld [vmem:[%s17985_s7 + $0xd88] sm:$0xff] }
 0x5d7   :  { %v16759_v53 = vpack.c.bf16 %v13480_v30, %v13480_v30  ;;  %v7313_v56 = vpop.f32.mrb[19].mxu0  ;;  %v13226_v37 = vcombine.high %v7748_v21, %v7752_v22  ;;  %v7755_v30 = vld [vmem:[%s17985_s7 + $0xd80] sm:$0xff]  ;;  %v13225_v35 = vcombine.low %v7748_v21, %v7752_v22  ;;  %v13234_v47 = vcombine.high %v7756_v33, %v7760_v32  ;;  %v7788_v7 = vld [vmem:[%s17985_s7 + $0xe88] sm:$0xff] }
 0x5d8   :  { %v16777_v13 = vpack.c.bf16 %v13482_v36, %v13482_v36  ;;  %v13223_v36 = vcombine.low %v7747_v52, %v7751_v17  ;;  %v13232_v44 = vcombine.high %v7755_v30, %v7759_v59  ;;  %v7764_v56 = vld [vmem:[%s17985_s7 + $0xdc8] sm:$0xff]  ;;  %v13233_v55 = vcombine.low %v7756_v33, %v7760_v32  ;;  %v7787_v54 = vld [vmem:[%s17985_s7 + $0xe80] sm:$0xff] }
 0x5d9   :  { %10551 = vmatprep.mubr.bf16.mxu1 %v16759_v53  ;;  %10715 = vmatprep.mubr.bf16.mxu0 %v16759_v53  ;;  %v7795_v17 = vld [vmem:[%s17985_s7 + $0xec0] sm:$0xff]  ;;  %v7796_v22 = vld [vmem:[%s17985_s7 + $0xec8] sm:$0xff] }
 0x5da   :  { %10552 = vmatmul.mubr.bf16.vlgmr.msra.gmra.mrb[16].mxu1 %v16761_v48  ;;  %10716 = vmatmul.mubr.bf16.vlgmr.msra.gmra.mrb[20].mxu0 %v16761_v48  ;;  %v7799_v21 = vld [vmem:[%s17985_s7 + $0xee0] sm:$0xff]  ;;  %v7804_v32 = vld [vmem:[%s17985_s7 + $0xf08] sm:$0xff] }
 0x5db   :  { %10561 = vmatpush1.bf16.msra.mxu1 %v13183_v57  ;;  %10725 = vmatpush1.bf16.msra.mxu0 %v13185_v34  ;;  %v7768_v57 = vld [vmem:[%s17985_s7 + $0xde8] sm:$0xff]  ;;  %v13231_v34 = vcombine.low %v7755_v30, %v7759_v59  ;;  %v7803_v59 = vld [vmem:[%s17985_s7 + $0xf00] sm:$0xff] }
 0x5dc   :  { %10592 = vmatprep.mubr.bf16.mxu1 %v16777_v13  ;;  %10756 = vmatprep.mubr.bf16.mxu0 %v16777_v13  ;;  %v7807_v33 = vld [vmem:[%s17985_s7 + $0xf20] sm:$0xff] }
 0x5dd   :  { %10562 = vmatprep.subr.bf16.mxu1 %v13192_v29  ;;  %10726 = vmatprep.subr.bf16.mxu0 %v13194_v38  ;;  %v13240_v29 = vcombine.high %v7763_v45, %v7767_v50  ;;  %v13242_v38 = vcombine.high %v7764_v56, %v7768_v57 }
 0x5df   :  { %10563 = vmatpush1.bf16.msra.mxu1 %v13191_v16  ;;  %10727 = vmatpush1.bf16.msra.mxu0 %v13193_v46  ;;  %v7776_v16 = vld [vmem:[%s17985_s7 + $0xe28] sm:$0xff]  ;;  %v13239_v46 = vcombine.low %v7763_v45, %v7767_v50  ;;  %v7811_v50 = vld [vmem:[%s17985_s7 + $0xf40] sm:$0xff] }
 0x5e0   :  { %10564 = vmatprep.subr.bf16.mxu1 %v13200_v61  ;;  %10728 = vmatprep.subr.bf16.mxu0 %v13202_v8  ;;  %v13241_v61 = vcombine.low %v7764_v56, %v7768_v57  ;;  %v13248_v8 = vcombine.high %v7771_v58, %v7775_v12  ;;  %v13250_v62 = vcombine.high %v7772_v0, %v7776_v16  ;;  %v7815_v56 = vld [vmem:[%s17985_s7 + $0xf60] sm:$0xff]  ;;  %v7812_v57 = vld [vmem:[%s17985_s7 + $0xf48] sm:$0xff] }
 0x5e3   :  { %10565 = vmatpush1.bf16.msra.mxu1 %v13199_v14  ;;  %10729 = vmatpush1.bf16.msra.mxu0 %v13201_v3  ;;  %v7784_v14 = vld [vmem:[%s17985_s7 + $0xe68] sm:$0xff]  ;;  %v13247_v3 = vcombine.low %v7771_v58, %v7775_v12  ;;  %v7819_v12 = vld [vmem:[%s17985_s7 + $0xf80] sm:$0xff] }
 0x5e4   :  { %10566 = vmatprep.subr.bf16.mxu1 %v13208_v26  ;;  %10730 = vmatprep.subr.bf16.mxu0 %v13210_v4  ;;  %v13249_v26 = vcombine.low %v7772_v0, %v7776_v16  ;;  %v13256_v4 = vcombine.high %v7779_v63, %v7783_v1  ;;  %v13258_v5 = vcombine.high %v7780_v2, %v7784_v14  ;;  %v7823_v0 = vld [vmem:[%s17985_s7 + $0xfa0] sm:$0xff]  ;;  %v7820_v16 = vld [vmem:[%s17985_s7 + $0xf88] sm:$0xff] }
 0x5e7   :  { %10567 = vmatpush1.bf16.msra.mxu1 %v13207_v31  ;;  %10731 = vmatpush1.bf16.msra.mxu0 %v13209_v9  ;;  %v7792_v31 = vld [vmem:[%s17985_s7 + $0xea8] sm:$0xff]  ;;  %v13255_v9 = vcombine.low %v7779_v63, %v7783_v1  ;;  %v13296_v63 = vcombine.high %v7819_v12, %v7823_v0 }
 0x5e8   :  { %10568 = vmatprep.subr.bf16.mxu1 %v13216_v10  ;;  %10732 = vmatprep.subr.bf16.mxu0 %v13218_v11  ;;  %v13257_v10 = vcombine.low %v7780_v2, %v7784_v14  ;;  %v13264_v11 = vcombine.high %v7787_v54, %v7791_v6  ;;  %v13266_v52 = vcombine.high %v7788_v7, %v7792_v31  ;;  %v7827_v2 = vld [vmem:[%s17985_s7 + $0xfc0] sm:$0xff] }
 0x5e9   :  { %v7831_v14 = vld [vmem:[%s17985_s7 + $0xfe0] sm:$0xff] }
 0x5eb   :  { %10569 = vmatpush1.bf16.msra.mxu1 %v13215_v23  ;;  %10733 = vmatpush1.bf16.msra.mxu0 %v13217_v24  ;;  %v7800_v23 = vld [vmem:[%s17985_s7 + $0xee8] sm:$0xff]  ;;  %v13263_v24 = vcombine.low %v7787_v54, %v7791_v6  ;;  %v13304_v6 = vcombine.high %v7827_v2, %v7831_v14 }
 0x5ec   :  { %10570 = vmatprep.subr.bf16.mxu1 %v13224_v27  ;;  %10734 = vmatprep.subr.bf16.mxu0 %v13226_v37  ;;  %v13265_v27 = vcombine.low %v7788_v7, %v7792_v31  ;;  %v13272_v37 = vcombine.high %v7795_v17, %v7799_v21  ;;  %v13274_v30 = vcombine.high %v7796_v22, %v7800_v23  ;;  %v7325_v31 = vld [vmem:[%s17985_s7 + $0x10] sm:$0xff] }
 0x5ef   :  { %10571 = vmatpush1.bf16.msra.mxu1 %v13223_v36  ;;  %10735 = vmatpush1.bf16.msra.mxu0 %v13225_v35  ;;  %v7808_v36 = vld [vmem:[%s17985_s7 + $0xf28] sm:$0xff]  ;;  %v13271_v35 = vcombine.low %v7795_v17, %v7799_v21 }
 0x5f0   :  { %10572 = vmatprep.subr.bf16.mxu1 %v13232_v44  ;;  %10736 = vmatprep.subr.bf16.mxu0 %v13234_v47  ;;  %v13273_v44 = vcombine.low %v7796_v22, %v7800_v23  ;;  %v13280_v47 = vcombine.high %v7803_v59, %v7807_v33  ;;  %v13282_v45 = vcombine.high %v7804_v32, %v7808_v36  ;;  %v7333_v23 = vld [vmem:[%s17985_s7 + $0x50] sm:$0xff] }
 0x5f3   :  { %10573 = vmatpush1.bf16.msra.mxu1 %v13231_v34  ;;  %10737 = vmatpush1.bf16.msra.mxu0 %v13233_v55  ;;  %v7816_v34 = vld [vmem:[%s17985_s7 + $0xf68] sm:$0xff]  ;;  %v13279_v55 = vcombine.low %v7803_v59, %v7807_v33 }
 0x5f4   :  { %10574 = vmatprep.subr.bf16.mxu1 %v13240_v29  ;;  %10738 = vmatprep.subr.bf16.mxu0 %v13242_v38  ;;  %v13281_v29 = vcombine.low %v7804_v32, %v7808_v36  ;;  %v13288_v38 = vcombine.high %v7811_v50, %v7815_v56  ;;  %v13290_v58 = vcombine.high %v7812_v57, %v7816_v34  ;;  %v7341_v36 = vld [vmem:[%s17985_s7 + $0x90] sm:$0xff] }
 0x5f7   :  { %10575 = vmatpush1.bf16.msra.mxu1 %v13239_v46  ;;  %10739 = vmatpush1.bf16.msra.mxu0 %v13241_v61  ;;  %v7824_v46 = vld [vmem:[%s17985_s7 + $0xfa8] sm:$0xff]  ;;  %v13287_v61 = vcombine.low %v7811_v50, %v7815_v56 }
 0x5f8   :  { %10576 = vmatprep.subr.bf16.mxu1 %v13248_v8  ;;  %10740 = vmatprep.subr.bf16.mxu0 %v13250_v62  ;;  %v13289_v8 = vcombine.low %v7812_v57, %v7816_v34  ;;  %v4889_v62 = vsub.s32 6, %v14862_v42  ;;  %v13298_v1 = vcombine.high %v7820_v16, %v7824_v46  ;;  %v7349_v34 = vld [vmem:[%s17985_s7 + $0xd0] sm:$0xff] }
 0x5fa   :  { %v4890_v54 = vrot.slane %v16736_v19, %v4889_v62  ;;  %v7330_v19 = vld [vmem:[%s17985_s7 + $0x38] sm:$0xff] }
 0x5fb   :  { %10577 = vmatpush1.bf16.msra.mxu1 %v13247_v3  ;;  %10741 = vmatpush1.bf16.msra.mxu0 %v13249_v26  ;;  %v7828_v3 = vld [vmem:[%s17985_s7 + $0xfc8] sm:$0xff] }
 0x5fc   :  { %10578 = vmatprep.subr.bf16.mxu1 %v13256_v4  ;;  %10742 = vmatprep.subr.bf16.mxu0 %v13258_v5  ;;  %v7832_v26 = vld [vmem:[%s17985_s7 + $0xfe8] sm:$0xff]  ;;  %v13295_v4 = vcombine.low %v7819_v12, %v7823_v0  ;;  %v13297_v5 = vcombine.low %v7820_v16, %v7824_v46  ;;  %v13481_v17 = vadd.f32 %v16745_v28, %v4890_v54  ;;  %v7338_v28 = vld [vmem:[%s17985_s7 + $0x78] sm:$0xff]  ;;  %v7357_v16 = vld [vmem:[%s17985_s7 + $0x110] sm:$0xff] }
 0x5fd   :  { %v13306_v7 = vcombine.high %v7828_v3, %v7832_v26  ;;  %v7361_v46 = vld [vmem:[%s17985_s7 + $0x130] sm:$0xff] }
 0x5fe   :  { %v12835_v54 = vcombine.low %v7357_v16, %v7361_v46 }
 0x5ff   :  { %10579 = vmatpush1.bf16.msra.mxu1 %v13255_v9  ;;  %10743 = vmatpush1.bf16.msra.mxu0 %v13257_v10  ;;  %v7329_v9 = vld [vmem:[%s17985_s7 + $0x30] sm:$0xff]  ;;  %v7326_v10 = vld [vmem:[%s17985_s7 + $0x18] sm:$0xff] }
 0x600   :  { %10580 = vmatprep.subr.bf16.mxu1 %v13264_v11  ;;  %10744 = vmatprep.subr.bf16.mxu0 %v13266_v52  ;;  %v13303_v11 = vcombine.low %v7827_v2, %v7831_v14  ;;  %v13305_v52 = vcombine.low %v7828_v3, %v7832_v26  ;;  %v12804_v21 = vcombine.high %v7325_v31, %v7329_v9  ;;  %v7365_v3 = vld [vmem:[%s17985_s7 + $0x150] sm:$0xff] }
 0x601   :  { %v12806_v22 = vcombine.high %v7326_v10, %v7330_v19  ;;  %v12805_v59 = vcombine.low %v7326_v10, %v7330_v19  ;;  %v12836_v2 = vcombine.high %v7357_v16, %v7361_v46  ;;  %v7369_v26 = vld [vmem:[%s17985_s7 + $0x170] sm:$0xff]  ;;  %v7374_v19 = vld [vmem:[%s17985_s7 + $0x198] sm:$0xff] }
 0x602   :  { %v7377_v10 = vld [vmem:[%s17985_s7 + $0x1b0] sm:$0xff] }
 0x603   :  { %10581 = vmatpush1.bf16.msra.mxu1 %v13263_v24  ;;  %10745 = vmatpush1.bf16.msra.mxu0 %v13265_v27  ;;  %v7337_v24 = vld [vmem:[%s17985_s7 + $0x70] sm:$0xff]  ;;  %v7334_v27 = vld [vmem:[%s17985_s7 + $0x58] sm:$0xff] }
 0x604   :  { %10582 = vmatprep.subr.bf16.mxu1 %v13272_v37  ;;  %10746 = vmatprep.subr.bf16.mxu0 %v13274_v30  ;;  %v12803_v37 = vcombine.low %v7325_v31, %v7329_v9  ;;  %v16968_v30 = vpack.c.bf16 %v13481_v17, %v13481_v17  ;;  %v12812_v33 = vcombine.high %v7333_v23, %v7337_v24  ;;  %v7373_v9 = vld [vmem:[%s17985_s7 + $0x190] sm:$0xff] }
 0x605   :  { %v12814_v32 = vcombine.high %v7334_v27, %v7338_v28  ;;  %v12813_v50 = vcombine.low %v7334_v27, %v7338_v28  ;;  %v7382_v27 = vld [vmem:[%s17985_s7 + $0x1d8] sm:$0xff]  ;;  %v7405_v16 = vld [vmem:[%s17985_s7 + $0x290] sm:$0xff] }
 0x606   :  { %v7386_v28 = vld [vmem:[%s17985_s7 + $0x1f8] sm:$0xff]  ;;  %v7409_v46 = vld [vmem:[%s17985_s7 + $0x2b0] sm:$0xff] }
 0x607   :  { %10583 = vmatpush1.bf16.msra.mxu1 %v13271_v35  ;;  %10747 = vmatpush1.bf16.msra.mxu0 %v13273_v44  ;;  %v7345_v35 = vld [vmem:[%s17985_s7 + $0xb0] sm:$0xff]  ;;  %v7342_v44 = vld [vmem:[%s17985_s7 + $0x98] sm:$0xff] }
 0x608   :  { %10584 = vmatprep.subr.bf16.mxu1 %v13280_v47  ;;  %10748 = vmatprep.subr.bf16.mxu0 %v13282_v45  ;;  %v7346_v47 = vld [vmem:[%s17985_s7 + $0xb8] sm:$0xff]  ;;  %v12811_v45 = vcombine.low %v7333_v23, %v7337_v24  ;;  %v12820_v56 = vcombine.high %v7341_v36, %v7345_v35  ;;  %v7381_v23 = vld [vmem:[%s17985_s7 + $0x1d0] sm:$0xff] }
 0x609   :  { %v12822_v57 = vcombine.high %v7342_v44, %v7346_v47  ;;  %v7385_v24 = vld [vmem:[%s17985_s7 + $0x1f0] sm:$0xff] }
 0x60b   :  { %10585 = vmatpush1.bf16.msra.mxu1 %v13279_v55  ;;  %10749 = vmatpush1.bf16.msra.mxu0 %v13281_v29  ;;  %v7353_v55 = vld [vmem:[%s17985_s7 + $0xf0] sm:$0xff]  ;;  %v7350_v29 = vld [vmem:[%s17985_s7 + $0xd8] sm:$0xff] }
 0x60c   :  { %10586 = vmatprep.subr.bf16.mxu1 %v13288_v38  ;;  %10750 = vmatprep.subr.bf16.mxu0 %v13290_v58  ;;  %v12819_v38 = vcombine.low %v7341_v36, %v7345_v35  ;;  %v12821_v58 = vcombine.low %v7342_v44, %v7346_v47  ;;  %v12828_v12 = vcombine.high %v7349_v34, %v7353_v55  ;;  %v7389_v36 = vld [vmem:[%s17985_s7 + $0x210] sm:$0xff]  ;;  %v7390_v44 = vld [vmem:[%s17985_s7 + $0x218] sm:$0xff] }
 0x60d   :  { %v7393_v35 = vld [vmem:[%s17985_s7 + $0x230] sm:$0xff]  ;;  %v7394_v47 = vld [vmem:[%s17985_s7 + $0x238] sm:$0xff] }
 0x60f   :  { %10587 = vmatpush1.bf16.msra.mxu1 %v13287_v61  ;;  %10751 = vmatpush1.bf16.msra.mxu0 %v13289_v8  ;;  %v7358_v61 = vld [vmem:[%s17985_s7 + $0x118] sm:$0xff] }
 0x610   :  { %10588 = vmatprep.subr.bf16.mxu1 %v13296_v63  ;;  %10752 = vmatprep.subr.bf16.mxu0 %v13298_v1  ;;  %v7362_v8 = vld [vmem:[%s17985_s7 + $0x138] sm:$0xff]  ;;  %v12827_v63 = vcombine.low %v7349_v34, %v7353_v55  ;;  %v7397_v34 = vld [vmem:[%s17985_s7 + $0x250] sm:$0xff] }
 0x611   :  { %v12838_v14 = vcombine.high %v7358_v61, %v7362_v8  ;;  %v7401_v55 = vld [vmem:[%s17985_s7 + $0x270] sm:$0xff] }
 0x613   :  { %10589 = vmatpush1.bf16.msra.mxu1 %v13295_v4  ;;  %10753 = vmatpush1.bf16.msra.mxu0 %v13297_v5  ;;  %v7366_v4 = vld [vmem:[%s17985_s7 + $0x158] sm:$0xff] }
 0x614   :  { %10590 = vmatprep.subr.bf16.mxu1 %v13304_v6  ;;  %10754 = vmatprep.subr.bf16.mxu0 %v13306_v7  ;;  %v7370_v5 = vld [vmem:[%s17985_s7 + $0x178] sm:$0xff]  ;;  %v12837_v6 = vcombine.low %v7358_v61, %v7362_v8  ;;  %v12844_v7 = vcombine.high %v7365_v3, %v7369_v26 }
 0x615   :  { %v12846_v31 = vcombine.high %v7366_v4, %v7370_v5  ;;  %v12845_v17 = vcombine.low %v7366_v4, %v7370_v5  ;;  %v7406_v61 = vld [vmem:[%s17985_s7 + $0x298] sm:$0xff] }
 0x616   :  { %v7410_v8 = vld [vmem:[%s17985_s7 + $0x2b8] sm:$0xff] }
 0x617   :  { %10591 = vmatpush1.bf16.msra.mxu1 %v13303_v11  ;;  %10755 = vmatpush1.bf16.msra.mxu0 %v13305_v52  ;;  %v7378_v11 = vld [vmem:[%s17985_s7 + $0x1b8] sm:$0xff]  ;;  %v12843_v52 = vcombine.low %v7365_v3, %v7369_v26  ;;  %v7413_v3 = vld [vmem:[%s17985_s7 + $0x2d0] sm:$0xff] }
 0x618   :  { %10765 = vmatprep.subr.bf16.mxu1 %v12804_v21  ;;  %10929 = vmatprep.subr.bf16.mxu0 %v12806_v22  ;;  %v12852_v21 = vcombine.high %v7373_v9, %v7377_v10  ;;  %v12854_v22 = vcombine.high %v7374_v19, %v7378_v11  ;;  %v7417_v26 = vld [vmem:[%s17985_s7 + $0x2f0] sm:$0xff]  ;;  %v7414_v4 = vld [vmem:[%s17985_s7 + $0x2d8] sm:$0xff] }
 0x619   :  { %v7418_v5 = vld [vmem:[%s17985_s7 + $0x2f8] sm:$0xff] }
 0x61a   :  { %10593 = vmatmul.mubr.bf16.vlgmr.msra.gmra.mrb[16].mxu1 %v16968_v30  ;;  %10757 = vmatmul.mubr.bf16.vlgmr.msra.gmra.mrb[20].mxu0 %v16968_v30 }
 0x61b   :  { %10766 = vmatpush1.bf16.msra.mxu1 %v12803_v37  ;;  %10797 = vmatprep.mubr.bf16.mxu1 %v16215_v60  ;;  %v12851_v37 = vcombine.low %v7373_v9, %v7377_v10  ;;  %v7421_v9 = vld [vmem:[%s17985_s7 + $0x310] sm:$0xff] }
 0x61c   :  { %10930 = vmatpush1.bf16.msra.mxu0 %v12805_v59  ;;  %10961 = vmatprep.mubr.bf16.mxu0 %v16215_v60  ;;  %v7354_v60 = vld [vmem:[%s17985_s7 + $0xf8] sm:$0xff]  ;;  %v12853_v59 = vcombine.low %v7374_v19, %v7378_v11  ;;  %v7425_v10 = vld [vmem:[%s17985_s7 + $0x330] sm:$0xff] }
 0x61d   :  { %10767 = vmatprep.subr.bf16.mxu1 %v12812_v33  ;;  %10931 = vmatprep.subr.bf16.mxu0 %v12814_v32  ;;  %v12830_v0 = vcombine.high %v7350_v29, %v7354_v60  ;;  %v12829_v1 = vcombine.low %v7350_v29, %v7354_v60  ;;  %v12860_v33 = vcombine.high %v7381_v23, %v7385_v24  ;;  %v7398_v29 = vld [vmem:[%s17985_s7 + $0x258] sm:$0xff] }
 0x61e   :  { %v12862_v32 = vcombine.high %v7382_v27, %v7386_v28  ;;  %v7402_v60 = vld [vmem:[%s17985_s7 + $0x278] sm:$0xff] }
 0x61f   :  { %10768 = vmatpush1.bf16.msra.mxu1 %v12811_v45  ;;  %v12859_v45 = vcombine.low %v7381_v23, %v7385_v24  ;;  %v7422_v19 = vld [vmem:[%s17985_s7 + $0x318] sm:$0xff]  ;;  %v7429_v23 = vld [vmem:[%s17985_s7 + $0x350] sm:$0xff] }
 0x620   :  { %10932 = vmatpush1.bf16.msra.mxu0 %v12813_v50  ;;  %10769 = vmatprep.subr.bf16.mxu1 %v12820_v56  ;;  %v12861_v50 = vcombine.low %v7382_v27, %v7386_v28  ;;  %v12868_v56 = vcombine.high %v7389_v36, %v7393_v35  ;;  %v7426_v11 = vld [vmem:[%s17985_s7 + $0x338] sm:$0xff]  ;;  %v7433_v24 = vld [vmem:[%s17985_s7 + $0x370] sm:$0xff] }
 0x621   :  { %10933 = vmatprep.subr.bf16.mxu0 %v12822_v57  ;;  %v12870_v57 = vcombine.high %v7390_v44, %v7394_v47  ;;  %v7430_v27 = vld [vmem:[%s17985_s7 + $0x358] sm:$0xff] }
 0x622   :  { %v7434_v28 = vld [vmem:[%s17985_s7 + $0x378] sm:$0xff] }
 0x623   :  { %10770 = vmatpush1.bf16.msra.mxu1 %v12819_v38  ;;  %v12867_v38 = vcombine.low %v7389_v36, %v7393_v35  ;;  %v7437_v36 = vld [vmem:[%s17985_s7 + $0x390] sm:$0xff] }
 0x624   :  { %10934 = vmatpush1.bf16.msra.mxu0 %v12821_v58  ;;  %10771 = vmatprep.subr.bf16.mxu1 %v12828_v12  ;;  %v12869_v58 = vcombine.low %v7390_v44, %v7394_v47  ;;  %v12876_v12 = vcombine.high %v7397_v34, %v7401_v55  ;;  %v7441_v35 = vld [vmem:[%s17985_s7 + $0x3b0] sm:$0xff]  ;;  %v7438_v44 = vld [vmem:[%s17985_s7 + $0x398] sm:$0xff] }
 0x625   :  { %10935 = vmatprep.subr.bf16.mxu0 %v12830_v0  ;;  %v12878_v0 = vcombine.high %v7398_v29, %v7402_v60  ;;  %v7442_v47 = vld [vmem:[%s17985_s7 + $0x3b8] sm:$0xff] }
 0x627   :  { %10772 = vmatpush1.bf16.msra.mxu1 %v12827_v63  ;;  %v12875_v63 = vcombine.low %v7397_v34, %v7401_v55  ;;  %v7445_v34 = vld [vmem:[%s17985_s7 + $0x3d0] sm:$0xff] }
 0x628   :  { %10936 = vmatpush1.bf16.msra.mxu0 %v12829_v1  ;;  %10773 = vmatprep.subr.bf16.mxu1 %v12836_v2  ;;  %v12877_v1 = vcombine.low %v7398_v29, %v7402_v60  ;;  %v12884_v2 = vcombine.high %v7405_v16, %v7409_v46  ;;  %v7449_v55 = vld [vmem:[%s17985_s7 + $0x3f0] sm:$0xff]  ;;  %v7446_v29 = vld [vmem:[%s17985_s7 + $0x3d8] sm:$0xff] }
 0x629   :  { %10937 = vmatprep.subr.bf16.mxu0 %v12838_v14  ;;  %v12886_v14 = vcombine.high %v7406_v61, %v7410_v8  ;;  %v7450_v60 = vld [vmem:[%s17985_s7 + $0x3f8] sm:$0xff] }
 0x62b   :  { %10774 = vmatpush1.bf16.msra.mxu1 %v12835_v54  ;;  %v12883_v54 = vcombine.low %v7405_v16, %v7409_v46  ;;  %v7453_v16 = vld [vmem:[%s17985_s7 + $0x410] sm:$0xff] }
 0x62c   :  { %10938 = vmatpush1.bf16.msra.mxu0 %v12837_v6  ;;  %10775 = vmatprep.subr.bf16.mxu1 %v12844_v7  ;;  %v12885_v6 = vcombine.low %v7406_v61, %v7410_v8  ;;  %v12892_v7 = vcombine.high %v7413_v3, %v7417_v26  ;;  %v7457_v46 = vld [vmem:[%s17985_s7 + $0x430] sm:$0xff]  ;;  %v7454_v61 = vld [vmem:[%s17985_s7 + $0x418] sm:$0xff] }
 0x62d   :  { %10939 = vmatprep.subr.bf16.mxu0 %v12846_v31  ;;  %v12894_v31 = vcombine.high %v7414_v4, %v7418_v5  ;;  %v7458_v8 = vld [vmem:[%s17985_s7 + $0x438] sm:$0xff] }
 0x62f   :  { %10776 = vmatpush1.bf16.msra.mxu1 %v12843_v52  ;;  %v12891_v52 = vcombine.low %v7413_v3, %v7417_v26  ;;  %v7461_v3 = vld [vmem:[%s17985_s7 + $0x450] sm:$0xff] }
 0x630   :  { %10940 = vmatpush1.bf16.msra.mxu0 %v12845_v17  ;;  %10777 = vmatprep.subr.bf16.mxu1 %v12852_v21  ;;  %v12893_v17 = vcombine.low %v7414_v4, %v7418_v5  ;;  %v12900_v21 = vcombine.high %v7421_v9, %v7425_v10  ;;  %v7465_v26 = vld [vmem:[%s17985_s7 + $0x470] sm:$0xff]  ;;  %v12931_v4 = vcombine.low %v7453_v16, %v7457_v46  ;;  %v7462_v5 = vld [vmem:[%s17985_s7 + $0x458] sm:$0xff] }
 0x631   :  { %10941 = vmatprep.subr.bf16.mxu0 %v12854_v22  ;;  %v12902_v22 = vcombine.high %v7422_v19, %v7426_v11 }
 0x633   :  { %10778 = vmatpush1.bf16.msra.mxu1 %v12851_v37  ;;  %v12899_v37 = vcombine.low %v7421_v9, %v7425_v10  ;;  %v7473_v9 = vld [vmem:[%s17985_s7 + $0x4b0] sm:$0xff] }
 0x634   :  { %10942 = vmatpush1.bf16.msra.mxu0 %v12853_v59  ;;  %10779 = vmatprep.subr.bf16.mxu1 %v12860_v33  ;;  %v12901_v59 = vcombine.low %v7422_v19, %v7426_v11  ;;  %v12908_v33 = vcombine.high %v7429_v23, %v7433_v24  ;;  %v7470_v19 = vld [vmem:[%s17985_s7 + $0x498] sm:$0xff] }
 0x635   :  { %10943 = vmatprep.subr.bf16.mxu0 %v12862_v32  ;;  %v12910_v32 = vcombine.high %v7430_v27, %v7434_v28  ;;  %v7474_v11 = vld [vmem:[%s17985_s7 + $0x4b8] sm:$0xff] }
 0x637   :  { %10780 = vmatpush1.bf16.msra.mxu1 %v12859_v45  ;;  %v12907_v45 = vcombine.low %v7429_v23, %v7433_v24  ;;  %v7477_v23 = vld [vmem:[%s17985_s7 + $0x4d0] sm:$0xff] }
 0x638   :  { %10944 = vmatpush1.bf16.msra.mxu0 %v12861_v50  ;;  %10781 = vmatprep.subr.bf16.mxu1 %v12868_v56  ;;  %v12909_v50 = vcombine.low %v7430_v27, %v7434_v28  ;;  %v12916_v56 = vcombine.high %v7437_v36, %v7441_v35  ;;  %v7481_v24 = vld [vmem:[%s17985_s7 + $0x4f0] sm:$0xff]  ;;  %v7482_v27 = vld [vmem:[%s17985_s7 + $0x4f8] sm:$0xff]  ;;  %v12949_v28 = vcombine.low %v7470_v19, %v7474_v11 }
 0x639   :  { %10945 = vmatprep.subr.bf16.mxu0 %v12870_v57  ;;  %v12918_v57 = vcombine.high %v7438_v44, %v7442_v47 }
 0x63b   :  { %10782 = vmatpush1.bf16.msra.mxu1 %v12867_v38  ;;  %v12915_v38 = vcombine.low %v7437_v36, %v7441_v35  ;;  %v7486_v36 = vld [vmem:[%s17985_s7 + $0x518] sm:$0xff] }
 0x63c   :  { %10946 = vmatpush1.bf16.msra.mxu0 %v12869_v58  ;;  %10783 = vmatprep.subr.bf16.mxu1 %v12876_v12  ;;  %v12917_v58 = vcombine.low %v7438_v44, %v7442_v47  ;;  %v12924_v12 = vcombine.high %v7445_v34, %v7449_v55  ;;  %v7490_v35 = vld [vmem:[%s17985_s7 + $0x538] sm:$0xff]  ;;  %v12955_v44 = vcombine.low %v7477_v23, %v7481_v24 }
 0x63d   :  { %10947 = vmatprep.subr.bf16.mxu0 %v12878_v0  ;;  %v12926_v0 = vcombine.high %v7446_v29, %v7450_v60 }
 0x63f   :  { %10784 = vmatpush1.bf16.msra.mxu1 %v12875_v63  ;;  %v12923_v63 = vcombine.low %v7445_v34, %v7449_v55  ;;  %v7494_v34 = vld [vmem:[%s17985_s7 + $0x558] sm:$0xff] }
 0x640   :  { %10948 = vmatpush1.bf16.msra.mxu0 %v12877_v1  ;;  %10785 = vmatprep.subr.bf16.mxu1 %v12884_v2  ;;  %v12925_v1 = vcombine.low %v7446_v29, %v7450_v60  ;;  %v12932_v2 = vcombine.high %v7453_v16, %v7457_v46  ;;  %v7498_v55 = vld [vmem:[%s17985_s7 + $0x578] sm:$0xff]  ;;  %v12965_v60 = vcombine.low %v7486_v36, %v7490_v35 }
 0x641   :  { %10949 = vmatprep.subr.bf16.mxu0 %v12886_v14  ;;  %v12934_v14 = vcombine.high %v7454_v61, %v7458_v8  ;;  %v7502_v16 = vld [vmem:[%s17985_s7 + $0x598] sm:$0xff] }
 0x642   :  { %v7506_v46 = vld [vmem:[%s17985_s7 + $0x5b8] sm:$0xff] }
 0x643   :  { %10786 = vmatpush1.bf16.msra.mxu1 %v12883_v54  ;;  %v7466_v54 = vld [vmem:[%s17985_s7 + $0x478] sm:$0xff] }
 0x644   :  { %10950 = vmatpush1.bf16.msra.mxu0 %v12885_v6  ;;  %10787 = vmatprep.subr.bf16.mxu1 %v12892_v7  ;;  %v12933_v6 = vcombine.low %v7454_v61, %v7458_v8  ;;  %v12940_v7 = vcombine.high %v7461_v3, %v7465_v26  ;;  %v12942_v10 = vcombine.high %v7462_v5, %v7466_v54 }
 0x645   :  { %10951 = vmatprep.subr.bf16.mxu0 %v12894_v31  ;;  %v7469_v31 = vld [vmem:[%s17985_s7 + $0x490] sm:$0xff]  ;;  %v12973_v8 = vcombine.low %v7494_v34, %v7498_v55 }
 0x647   :  { %10788 = vmatpush1.bf16.msra.mxu1 %v12891_v52  ;;  %v12939_v52 = vcombine.low %v7461_v3, %v7465_v26  ;;  %v7510_v3 = vld [vmem:[%s17985_s7 + $0x5d8] sm:$0xff] }
 0x648   :  { %10952 = vmatpush1.bf16.msra.mxu0 %v12893_v17  ;;  %10789 = vmatprep.subr.bf16.mxu1 %v12900_v21  ;;  %v12941_v17 = vcombine.low %v7462_v5, %v7466_v54  ;;  %v12948_v21 = vcombine.high %v7469_v31, %v7473_v9  ;;  %v7514_v26 = vld [vmem:[%s17985_s7 + $0x5f8] sm:$0xff]  ;;  %v12981_v5 = vcombine.low %v7502_v16, %v7506_v46 }
 0x649   :  { %10953 = vmatprep.subr.bf16.mxu0 %v12902_v22  ;;  %v12950_v22 = vcombine.high %v7470_v19, %v7474_v11  ;;  %v12989_v11 = vcombine.low %v7510_v3, %v7514_v26 }
 0x64b   :  { %10790 = vmatpush1.bf16.msra.mxu1 %v12899_v37  ;;  %v12956_v37 = vcombine.high %v7477_v23, %v7481_v24  ;;  %v7526_v23 = vld [vmem:[%s17985_s7 + $0x658] sm:$0xff] }
 0x64c   :  { %10954 = vmatpush1.bf16.msra.mxu0 %v12901_v59  ;;  %10791 = vmatprep.subr.bf16.mxu1 %v12908_v33  ;;  %v7485_v33 = vld [vmem:[%s17985_s7 + $0x510] sm:$0xff]  ;;  %v7530_v24 = vld [vmem:[%s17985_s7 + $0x678] sm:$0xff] }
 0x64d   :  { %10955 = vmatprep.subr.bf16.mxu0 %v12910_v32  ;;  %v7489_v32 = vld [vmem:[%s17985_s7 + $0x530] sm:$0xff] }
 0x64e   :  { %v12963_v29 = vcombine.low %v7485_v33, %v7489_v32 }
 0x64f   :  { %10792 = vmatpush1.bf16.msra.mxu1 %v12907_v45  ;;  %v12964_v45 = vcombine.high %v7485_v33, %v7489_v32  ;;  %v7534_v33 = vld [vmem:[%s17985_s7 + $0x698] sm:$0xff] }
 0x650   :  { %10956 = vmatpush1.bf16.msra.mxu0 %v12909_v50  ;;  %10793 = vmatprep.subr.bf16.mxu1 %v12916_v56  ;;  %v12966_v50 = vcombine.high %v7486_v36, %v7490_v35  ;;  %v7493_v56 = vld [vmem:[%s17985_s7 + $0x550] sm:$0xff]  ;;  %v7538_v32 = vld [vmem:[%s17985_s7 + $0x6b8] sm:$0xff]  ;;  %v13005_v35 = vcombine.low %v7526_v23, %v7530_v24 }
 0x651   :  { %10957 = vmatprep.subr.bf16.mxu0 %v12918_v57  ;;  %v7497_v57 = vld [vmem:[%s17985_s7 + $0x570] sm:$0xff] }
 0x652   :  { %v12971_v61 = vcombine.low %v7493_v56, %v7497_v57 }
 0x653   :  { %10794 = vmatpush1.bf16.msra.mxu1 %v12915_v38  ;;  %v12972_v38 = vcombine.high %v7493_v56, %v7497_v57  ;;  %v7542_v56 = vld [vmem:[%s17985_s7 + $0x6d8] sm:$0xff] }
 0x654   :  { %10958 = vmatpush1.bf16.msra.mxu0 %v12917_v58  ;;  %10795 = vmatprep.subr.bf16.mxu1 %v12924_v12  ;;  %v12974_v58 = vcombine.high %v7494_v34, %v7498_v55  ;;  %v7501_v12 = vld [vmem:[%s17985_s7 + $0x590] sm:$0xff]  ;;  %v7546_v57 = vld [vmem:[%s17985_s7 + $0x6f8] sm:$0xff]  ;;  %v13013_v55 = vcombine.low %v7534_v33, %v7538_v32 }
 0x655   :  { %10959 = vmatprep.subr.bf16.mxu0 %v12926_v0  ;;  %v7505_v0 = vld [vmem:[%s17985_s7 + $0x5b0] sm:$0xff] }
 0x657   :  { %10796 = vmatpush1.bf16.msra.mxu1 %v12923_v63  ;;  %v12980_v63 = vcombine.high %v7501_v12, %v7505_v0 }
 0x658   :  { %10960 = vmatpush1.bf16.msra.mxu0 %v12925_v1  ;;  %10806 = vmatprep.subr.bf16.mxu1 %v12932_v2  ;;  %v12982_v1 = vcombine.high %v7502_v16, %v7506_v46  ;;  %v7509_v2 = vld [vmem:[%s17985_s7 + $0x5d0] sm:$0xff]  ;;  %v13021_v46 = vcombine.low %v7542_v56, %v7546_v57 }
 0x659   :  { %10970 = vmatprep.subr.bf16.mxu0 %v12934_v14  ;;  %v7513_v14 = vld [vmem:[%s17985_s7 + $0x5f0] sm:$0xff] }
 0x65a   :  { %10798 = vmatmul.mubr.bf16.vlgmr.msra.gmra.mrb[20].mxu1 %v16345_v25  ;;  %v12988_v54 = vcombine.high %v7509_v2, %v7513_v14  ;;  %v12987_v19 = vcombine.low %v7509_v2, %v7513_v14  ;;  %v7558_v2 = vld [vmem:[%s17985_s7 + $0x758] sm:$0xff] }
 0x65b   :  { %10962 = vmatmul.mubr.bf16.vlgmr.msra.gmra.mrb[24].mxu0 %v16345_v25  ;;  %10807 = vmatpush1.bf16.msra.mxu1 %v12931_v4  ;;  %v7478_v25 = vld [vmem:[%s17985_s7 + $0x4d8] sm:$0xff]  ;;  %v12979_v4 = vcombine.low %v7501_v12, %v7505_v0 }
 0x65c   :  { %10838 = vmatprep.mubr.bf16.mxu1 %v16353_v39  ;;  %10971 = vmatpush1.bf16.msra.mxu0 %v12933_v6  ;;  %v12958_v59 = vcombine.high %v7478_v25, %v7482_v27  ;;  %v12957_v47 = vcombine.low %v7478_v25, %v7482_v27  ;;  %v12990_v6 = vcombine.high %v7510_v3, %v7514_v26  ;;  %v7550_v12 = vld [vmem:[%s17985_s7 + $0x718] sm:$0xff] }
 0x65d   :  { %11002 = vmatprep.mubr.bf16.mxu0 %v16353_v39  ;;  %10808 = vmatprep.subr.bf16.mxu1 %v12940_v7  ;;  %v12947_v39 = vcombine.low %v7469_v31, %v7473_v9  ;;  %v7517_v7 = vld [vmem:[%s17985_s7 + $0x610] sm:$0xff]  ;;  %v7518_v9 = vld [vmem:[%s17985_s7 + $0x618] sm:$0xff] }
 0x65e   :  { %10972 = vmatprep.subr.bf16.mxu0 %v12942_v10  ;;  %v7521_v31 = vld [vmem:[%s17985_s7 + $0x630] sm:$0xff]  ;;  %v7522_v10 = vld [vmem:[%s17985_s7 + $0x638] sm:$0xff] }
 0x65f   :  { %10809 = vmatpush1.bf16.msra.mxu1 %v12939_v52  ;;  %v12996_v52 = vcombine.high %v7517_v7, %v7521_v31  ;;  %v12995_v25 = vcombine.low %v7517_v7, %v7521_v31  ;;  %v12997_v27 = vcombine.low %v7518_v9, %v7522_v10  ;;  %v7554_v0 = vld [vmem:[%s17985_s7 + $0x738] sm:$0xff] }
 0x660   :  { %10973 = vmatpush1.bf16.msra.mxu0 %v12941_v17  ;;  %10810 = vmatprep.subr.bf16.mxu1 %v12948_v21  ;;  %v12998_v17 = vcombine.high %v7518_v9, %v7522_v10  ;;  %v7525_v21 = vld [vmem:[%s17985_s7 + $0x650] sm:$0xff]  ;;  %v7562_v14 = vld [vmem:[%s17985_s7 + $0x778] sm:$0xff]  ;;  %v13029_v26 = vcombine.low %v7550_v12, %v7554_v0 }
 0x661   :  { %10974 = vmatprep.subr.bf16.mxu0 %v12950_v22  ;;  %v7529_v22 = vld [vmem:[%s17985_s7 + $0x670] sm:$0xff]  ;;  %v7566_v7 = vld [vmem:[%s17985_s7 + $0x798] sm:$0xff]  ;;  %v13037_v10 = vcombine.low %v7558_v2, %v7562_v14 }
 0x662   :  { %v13003_v36 = vcombine.low %v7525_v21, %v7529_v22  ;;  %v7570_v31 = vld [vmem:[%s17985_s7 + $0x7b8] sm:$0xff] }
 0x663   :  { %10811 = vmatpush1.bf16.msra.mxu1 %v12947_v39  ;;  %v13004_v39 = vcombine.high %v7525_v21, %v7529_v22  ;;  %v7574_v21 = vld [vmem:[%s17985_s7 + $0x7d8] sm:$0xff] }
 0x664   :  { %10975 = vmatpush1.bf16.msra.mxu0 %v12949_v28  ;;  %10812 = vmatprep.subr.bf16.mxu1 %v12956_v37  ;;  %v13006_v28 = vcombine.high %v7526_v23, %v7530_v24  ;;  %v7533_v37 = vld [vmem:[%s17985_s7 + $0x690] sm:$0xff]  ;;  %v7578_v22 = vld [vmem:[%s17985_s7 + $0x7f8] sm:$0xff]  ;;  %v13045_v24 = vcombine.low %v7566_v7, %v7570_v31 }
 0x665   :  { %10976 = vmatprep.subr.bf16.mxu0 %v12958_v59  ;;  %v7537_v59 = vld [vmem:[%s17985_s7 + $0x6b0] sm:$0xff] }
 0x666   :  { %v13011_v34 = vcombine.low %v7533_v37, %v7537_v59 }
 0x667   :  { %10813 = vmatpush1.bf16.msra.mxu1 %v12955_v44  ;;  %v13012_v44 = vcombine.high %v7533_v37, %v7537_v59  ;;  %v7582_v37 = vld [vmem:[%s17985_s7 + $0x818] sm:$0xff] }
 0x668   :  { %10977 = vmatpush1.bf16.msra.mxu0 %v12957_v47  ;;  %10814 = vmatprep.subr.bf16.mxu1 %v12964_v45  ;;  %v13014_v47 = vcombine.high %v7534_v33, %v7538_v32  ;;  %v7541_v45 = vld [vmem:[%s17985_s7 + $0x6d0] sm:$0xff]  ;;  %v7586_v59 = vld [vmem:[%s17985_s7 + $0x838] sm:$0xff]  ;;  %v13053_v32 = vcombine.low %v7574_v21, %v7578_v22 }
 0x669   :  { %10978 = vmatprep.subr.bf16.mxu0 %v12966_v50  ;;  %v7545_v50 = vld [vmem:[%s17985_s7 + $0x6f0] sm:$0xff] }
 0x66a   :  { %v13019_v16 = vcombine.low %v7541_v45, %v7545_v50 }
 0x66b   :  { %10815 = vmatpush1.bf16.msra.mxu1 %v12963_v29  ;;  %v13020_v29 = vcombine.high %v7541_v45, %v7545_v50  ;;  %v7590_v50 = vld [vmem:[%s17985_s7 + $0x858] sm:$0xff] }
 0x66c   :  { %10979 = vmatpush1.bf16.msra.mxu0 %v12965_v60  ;;  %10816 = vmatprep.subr.bf16.mxu1 %v12972_v38  ;;  %v13022_v60 = vcombine.high %v7542_v56, %v7546_v57  ;;  %v7549_v38 = vld [vmem:[%s17985_s7 + $0x710] sm:$0xff]  ;;  %v7594_v56 = vld [vmem:[%s17985_s7 + $0x878] sm:$0xff]  ;;  %v13061_v57 = vcombine.low %v7582_v37, %v7586_v59 }
 0x66d   :  { %10980 = vmatprep.subr.bf16.mxu0 %v12974_v58  ;;  %v7553_v58 = vld [vmem:[%s17985_s7 + $0x730] sm:$0xff] }
 0x66e   :  { %v13027_v3 = vcombine.low %v7549_v38, %v7553_v58 }
 0x66f   :  { %10817 = vmatpush1.bf16.msra.mxu1 %v12971_v61  ;;  %v13028_v61 = vcombine.high %v7549_v38, %v7553_v58  ;;  %v7598_v38 = vld [vmem:[%s17985_s7 + $0x898] sm:$0xff] }
 0x670   :  { %10981 = vmatpush1.bf16.msra.mxu0 %v12973_v8  ;;  %10818 = vmatprep.subr.bf16.mxu1 %v12980_v63  ;;  %v13030_v8 = vcombine.high %v7550_v12, %v7554_v0  ;;  %v7557_v63 = vld [vmem:[%s17985_s7 + $0x750] sm:$0xff]  ;;  %v7602_v58 = vld [vmem:[%s17985_s7 + $0x8b8] sm:$0xff]  ;;  %v13069_v0 = vcombine.low %v7590_v50, %v7594_v56 }
 0x671   :  { %10982 = vmatprep.subr.bf16.mxu0 %v12982_v1  ;;  %v7561_v1 = vld [vmem:[%s17985_s7 + $0x770] sm:$0xff] }
 0x672   :  { %v13035_v9 = vcombine.low %v7557_v63, %v7561_v1 }
 0x673   :  { %10819 = vmatpush1.bf16.msra.mxu1 %v12979_v4  ;;  %v13036_v4 = vcombine.high %v7557_v63, %v7561_v1  ;;  %v7610_v63 = vld [vmem:[%s17985_s7 + $0x8f8] sm:$0xff]  ;;  %v13077_v1 = vcombine.low %v7598_v38, %v7602_v58 }
 0x674   :  { %10983 = vmatpush1.bf16.msra.mxu0 %v12981_v5  ;;  %10820 = vmatprep.subr.bf16.mxu1 %v12988_v54  ;;  %v13038_v5 = vcombine.high %v7558_v2, %v7562_v14  ;;  %v7565_v54 = vld [vmem:[%s17985_s7 + $0x790] sm:$0xff] }
 0x675   :  { %10984 = vmatprep.subr.bf16.mxu0 %v12990_v6  ;;  %v7569_v6 = vld [vmem:[%s17985_s7 + $0x7b0] sm:$0xff] }
 0x676   :  { %v13043_v23 = vcombine.low %v7565_v54, %v7569_v6 }
 0x677   :  { %10821 = vmatpush1.bf16.msra.mxu1 %v12987_v19  ;;  %v13044_v19 = vcombine.high %v7565_v54, %v7569_v6 }
 0x678   :  { %10985 = vmatpush1.bf16.msra.mxu0 %v12989_v11  ;;  %10822 = vmatprep.subr.bf16.mxu1 %v12996_v52  ;;  %v13046_v11 = vcombine.high %v7566_v7, %v7570_v31  ;;  %v7573_v52 = vld [vmem:[%s17985_s7 + $0x7d0] sm:$0xff] }
 0x679   :  { %10986 = vmatprep.subr.bf16.mxu0 %v12998_v17  ;;  %v7577_v17 = vld [vmem:[%s17985_s7 + $0x7f0] sm:$0xff] }
 0x67a   :  { %v13051_v33 = vcombine.low %v7573_v52, %v7577_v17 }
 0x67b   :  { %10823 = vmatpush1.bf16.msra.mxu1 %v12995_v25  ;;  %v13052_v25 = vcombine.high %v7573_v52, %v7577_v17 }
 0x67c   :  { %10987 = vmatpush1.bf16.msra.mxu0 %v12997_v27  ;;  %10824 = vmatprep.subr.bf16.mxu1 %v13004_v39  ;;  %v13054_v27 = vcombine.high %v7574_v21, %v7578_v22  ;;  %v7581_v39 = vld [vmem:[%s17985_s7 + $0x810] sm:$0xff] }
 0x67d   :  { %10988 = vmatprep.subr.bf16.mxu0 %v13006_v28  ;;  %v7585_v28 = vld [vmem:[%s17985_s7 + $0x830] sm:$0xff] }
 0x67e   :  { %v13059_v45 = vcombine.low %v7581_v39, %v7585_v28 }
 0x67f   :  { %10825 = vmatpush1.bf16.msra.mxu1 %v13003_v36  ;;  %v13060_v36 = vcombine.high %v7581_v39, %v7585_v28 }
 0x680   :  { %10989 = vmatpush1.bf16.msra.mxu0 %v13005_v35  ;;  %10826 = vmatprep.subr.bf16.mxu1 %v13012_v44  ;;  %v13062_v35 = vcombine.high %v7582_v37, %v7586_v59  ;;  %v7589_v44 = vld [vmem:[%s17985_s7 + $0x850] sm:$0xff] }
 0x681   :  { %10990 = vmatprep.subr.bf16.mxu0 %v13014_v47  ;;  %v7593_v47 = vld [vmem:[%s17985_s7 + $0x870] sm:$0xff] }
 0x682   :  { %v13067_v12 = vcombine.low %v7589_v44, %v7593_v47 }
 0x683   :  { %10827 = vmatpush1.bf16.msra.mxu1 %v13011_v34  ;;  %v13068_v34 = vcombine.high %v7589_v44, %v7593_v47 }
 0x684   :  { %10991 = vmatpush1.bf16.msra.mxu0 %v13013_v55  ;;  %10828 = vmatprep.subr.bf16.mxu1 %v13020_v29  ;;  %v7597_v55 = vld [vmem:[%s17985_s7 + $0x890] sm:$0xff] }
 0x685   :  { %10992 = vmatprep.subr.bf16.mxu0 %v13022_v60  ;;  %v7601_v29 = vld [vmem:[%s17985_s7 + $0x8b0] sm:$0xff]  ;;  %v13070_v60 = vcombine.high %v7590_v50, %v7594_v56 }
 0x686   :  { %v7645_v56 = vld [vmem:[%s17985_s7 + $0xa10] sm:$0xff] }
 0x687   :  { %10829 = vmatpush1.bf16.msra.mxu1 %v13019_v16  ;;  %v13076_v16 = vcombine.high %v7597_v55, %v7601_v29 }
 0x688   :  { %10993 = vmatpush1.bf16.msra.mxu0 %v13021_v46  ;;  %10830 = vmatprep.subr.bf16.mxu1 %v13028_v61  ;;  %v13078_v46 = vcombine.high %v7598_v38, %v7602_v58  ;;  %v7605_v61 = vld [vmem:[%s17985_s7 + $0x8d0] sm:$0xff] }
 0x689   :  { %10994 = vmatprep.subr.bf16.mxu0 %v13030_v8  ;;  %v7609_v8 = vld [vmem:[%s17985_s7 + $0x8f0] sm:$0xff] }
 0x68a   :  { %v13084_v2 = vcombine.high %v7605_v61, %v7609_v8  ;;  %v13083_v54 = vcombine.low %v7605_v61, %v7609_v8 }
 0x68b   :  { %10831 = vmatpush1.bf16.msra.mxu1 %v13027_v3  ;;  %v7613_v3 = vld [vmem:[%s17985_s7 + $0x910] sm:$0xff] }
 0x68c   :  { %10995 = vmatpush1.bf16.msra.mxu0 %v13029_v26  ;;  %10832 = vmatprep.subr.bf16.mxu1 %v13036_v4  ;;  %v7617_v26 = vld [vmem:[%s17985_s7 + $0x930] sm:$0xff]  ;;  %v7614_v4 = vld [vmem:[%s17985_s7 + $0x918] sm:$0xff] }
 0x68d   :  { %10996 = vmatprep.subr.bf16.mxu0 %v13038_v5  ;;  %v7618_v5 = vld [vmem:[%s17985_s7 + $0x938] sm:$0xff]  ;;  %v13092_v7 = vcombine.high %v7613_v3, %v7617_v26  ;;  %v13091_v52 = vcombine.low %v7613_v3, %v7617_v26 }
 0x68e   :  { %v13094_v31 = vcombine.high %v7614_v4, %v7618_v5  ;;  %v13093_v17 = vcombine.low %v7614_v4, %v7618_v5 }
 0x68f   :  { %10833 = vmatpush1.bf16.msra.mxu1 %v13035_v9  ;;  %v7621_v9 = vld [vmem:[%s17985_s7 + $0x950] sm:$0xff] }
 0x690   :  { %10997 = vmatpush1.bf16.msra.mxu0 %v13037_v10  ;;  %10834 = vmatprep.subr.bf16.mxu1 %v13044_v19  ;;  %v7625_v10 = vld [vmem:[%s17985_s7 + $0x970] sm:$0xff]  ;;  %v7622_v19 = vld [vmem:[%s17985_s7 + $0x958] sm:$0xff] }
 0x691   :  { %10998 = vmatprep.subr.bf16.mxu0 %v13046_v11  ;;  %v7626_v11 = vld [vmem:[%s17985_s7 + $0x978] sm:$0xff]  ;;  %v13100_v21 = vcombine.high %v7621_v9, %v7625_v10  ;;  %v13099_v39 = vcombine.low %v7621_v9, %v7625_v10 }
 0x692   :  { %v13102_v22 = vcombine.high %v7622_v19, %v7626_v11  ;;  %v13101_v28 = vcombine.low %v7622_v19, %v7626_v11 }
 0x693   :  { %10835 = vmatpush1.bf16.msra.mxu1 %v13043_v23  ;;  %v7629_v23 = vld [vmem:[%s17985_s7 + $0x990] sm:$0xff] }
 0x694   :  { %10999 = vmatpush1.bf16.msra.mxu0 %v13045_v24  ;;  %10836 = vmatprep.subr.bf16.mxu1 %v13052_v25  ;;  %v7633_v24 = vld [vmem:[%s17985_s7 + $0x9b0] sm:$0xff]  ;;  %v7630_v25 = vld [vmem:[%s17985_s7 + $0x998] sm:$0xff] }
 0x695   :  { %11000 = vmatprep.subr.bf16.mxu0 %v13054_v27  ;;  %v7634_v27 = vld [vmem:[%s17985_s7 + $0x9b8] sm:$0xff]  ;;  %v13108_v37 = vcombine.high %v7629_v23, %v7633_v24  ;;  %v13107_v44 = vcombine.low %v7629_v23, %v7633_v24 }
 0x696   :  { %v13110_v59 = vcombine.high %v7630_v25, %v7634_v27  ;;  %v13109_v47 = vcombine.low %v7630_v25, %v7634_v27 }
 0x697   :  { %10837 = vmatpush1.bf16.msra.mxu1 %v13051_v33  ;;  %v7637_v33 = vld [vmem:[%s17985_s7 + $0x9d0] sm:$0xff] }
 0x698   :  { %11001 = vmatpush1.bf16.msra.mxu0 %v13053_v32  ;;  %10847 = vmatprep.subr.bf16.mxu1 %v13060_v36  ;;  %v7641_v32 = vld [vmem:[%s17985_s7 + $0x9f0] sm:$0xff]  ;;  %v7638_v36 = vld [vmem:[%s17985_s7 + $0x9d8] sm:$0xff] }
 0x699   :  { %11011 = vmatprep.subr.bf16.mxu0 %v13062_v35  ;;  %v7642_v35 = vld [vmem:[%s17985_s7 + $0x9f8] sm:$0xff] }
 0x69a   :  { %10839 = vmatmul.mubr.bf16.vlgmr.msra.gmra.mrb[20].mxu1 %v16548_v51  ;;  %v13118_v50 = vcombine.high %v7638_v36, %v7642_v35 }
 0x69b   :  { %11003 = vmatmul.mubr.bf16.vlgmr.msra.gmra.mrb[24].mxu0 %v16548_v51  ;;  %10848 = vmatpush1.bf16.msra.mxu1 %v13059_v45  ;;  %v7606_v51 = vld [vmem:[%s17985_s7 + $0x8d8] sm:$0xff]  ;;  %v13116_v45 = vcombine.high %v7637_v33, %v7641_v32 }
 0x69c   :  { %10879 = vmatprep.mubr.bf16.mxu1 %v16759_v53  ;;  %11012 = vmatpush1.bf16.msra.mxu0 %v13061_v57  ;;  %v13086_v14 = vcombine.high %v7606_v51, %v7610_v63  ;;  %v13085_v6 = vcombine.low %v7606_v51, %v7610_v63  ;;  %v7649_v57 = vld [vmem:[%s17985_s7 + $0xa30] sm:$0xff] }
 0x69d   :  { %11043 = vmatprep.mubr.bf16.mxu0 %v16759_v53  ;;  %10849 = vmatprep.subr.bf16.mxu1 %v13068_v34  ;;  %v13075_v53 = vcombine.low %v7597_v55, %v7601_v29  ;;  %v7646_v34 = vld [vmem:[%s17985_s7 + $0xa18] sm:$0xff]  ;;  %v13115_v29 = vcombine.low %v7637_v33, %v7641_v32  ;;  %v13124_v38 = vcombine.high %v7645_v56, %v7649_v57 }
 0x69e   :  { %11013 = vmatprep.subr.bf16.mxu0 %v13070_v60  ;;  %v7650_v55 = vld [vmem:[%s17985_s7 + $0xa38] sm:$0xff]  ;;  %v13117_v60 = vcombine.low %v7638_v36, %v7642_v35  ;;  %v13123_v61 = vcombine.low %v7645_v56, %v7649_v57 }
 0x69f   :  { %10850 = vmatpush1.bf16.msra.mxu1 %v13067_v12  ;;  %v13126_v58 = vcombine.high %v7646_v34, %v7650_v55  ;;  %v7653_v12 = vld [vmem:[%s17985_s7 + $0xa50] sm:$0xff]  ;;  %v13125_v8 = vcombine.low %v7646_v34, %v7650_v55 }
 0x6a0   :  { %11014 = vmatpush1.bf16.msra.mxu0 %v13069_v0  ;;  %10851 = vmatprep.subr.bf16.mxu1 %v13076_v16  ;;  %v7657_v0 = vld [vmem:[%s17985_s7 + $0xa70] sm:$0xff]  ;;  %v7654_v16 = vld [vmem:[%s17985_s7 + $0xa58] sm:$0xff] }
 0x6a1   :  { %11015 = vmatprep.subr.bf16.mxu0 %v13078_v46  ;;  %v7658_v46 = vld [vmem:[%s17985_s7 + $0xa78] sm:$0xff]  ;;  %v13132_v51 = vcombine.high %v7653_v12, %v7657_v0  ;;  %v13131_v3 = vcombine.low %v7653_v12, %v7657_v0 }
 0x6a2   :  { %v13134_v63 = vcombine.high %v7654_v16, %v7658_v46  ;;  %v13133_v26 = vcombine.low %v7654_v16, %v7658_v46 }
 0x6a3   :  { %10852 = vmatpush1.bf16.msra.mxu1 %v13075_v53  ;;  %v7661_v53 = vld [vmem:[%s17985_s7 + $0xa90] sm:$0xff] }
 0x6a4   :  { %11016 = vmatpush1.bf16.msra.mxu0 %v13077_v1  ;;  %10853 = vmatprep.subr.bf16.mxu1 %v13084_v2  ;;  %v7665_v1 = vld [vmem:[%s17985_s7 + $0xab0] sm:$0xff]  ;;  %v7662_v2 = vld [vmem:[%s17985_s7 + $0xa98] sm:$0xff] }
 0x6a5   :  { %11017 = vmatprep.subr.bf16.mxu0 %v13086_v14  ;;  %v7666_v14 = vld [vmem:[%s17985_s7 + $0xab8] sm:$0xff]  ;;  %v13140_v4 = vcombine.high %v7661_v53, %v7665_v1  ;;  %v13139_v9 = vcombine.low %v7661_v53, %v7665_v1 }
 0x6a6   :  { %v13142_v5 = vcombine.high %v7662_v2, %v7666_v14  ;;  %v13141_v10 = vcombine.low %v7662_v2, %v7666_v14 }
 0x6a7   :  { %10854 = vmatpush1.bf16.msra.mxu1 %v13083_v54  ;;  %v7669_v54 = vld [vmem:[%s17985_s7 + $0xad0] sm:$0xff] }
 0x6a8   :  { %11018 = vmatpush1.bf16.msra.mxu0 %v13085_v6  ;;  %10855 = vmatprep.subr.bf16.mxu1 %v13092_v7  ;;  %v7673_v6 = vld [vmem:[%s17985_s7 + $0xaf0] sm:$0xff]  ;;  %v7670_v7 = vld [vmem:[%s17985_s7 + $0xad8] sm:$0xff] }
 0x6a9   :  { %11019 = vmatprep.subr.bf16.mxu0 %v13094_v31  ;;  %v7674_v31 = vld [vmem:[%s17985_s7 + $0xaf8] sm:$0xff]  ;;  %v13148_v19 = vcombine.high %v7669_v54, %v7673_v6  ;;  %v13147_v23 = vcombine.low %v7669_v54, %v7673_v6 }
 0x6aa   :  { %v13150_v11 = vcombine.high %v7670_v7, %v7674_v31  ;;  %v13149_v24 = vcombine.low %v7670_v7, %v7674_v31  ;;  %v7722_v54 = vld [vmem:[%s17985_s7 + $0xc78] sm:$0xff]  ;;  %v7725_v31 = vld [vmem:[%s17985_s7 + $0xc90] sm:$0xff] }
 0x6ab   :  { %10856 = vmatpush1.bf16.msra.mxu1 %v13091_v52  ;;  %v7677_v52 = vld [vmem:[%s17985_s7 + $0xb10] sm:$0xff] }
 0x6ac   :  { %11020 = vmatpush1.bf16.msra.mxu0 %v13093_v17  ;;  %10857 = vmatprep.subr.bf16.mxu1 %v13100_v21  ;;  %v7681_v17 = vld [vmem:[%s17985_s7 + $0xb30] sm:$0xff]  ;;  %v7678_v21 = vld [vmem:[%s17985_s7 + $0xb18] sm:$0xff] }
 0x6ad   :  { %11021 = vmatprep.subr.bf16.mxu0 %v13102_v22  ;;  %v7682_v22 = vld [vmem:[%s17985_s7 + $0xb38] sm:$0xff]  ;;  %v13156_v25 = vcombine.high %v7677_v52, %v7681_v17  ;;  %v13155_v33 = vcombine.low %v7677_v52, %v7681_v17 }
 0x6ae   :  { %v13158_v27 = vcombine.high %v7678_v21, %v7682_v22  ;;  %v13157_v32 = vcombine.low %v7678_v21, %v7682_v22 }
 0x6af   :  { %10858 = vmatpush1.bf16.msra.mxu1 %v13099_v39  ;;  %v7685_v39 = vld [vmem:[%s17985_s7 + $0xb50] sm:$0xff] }
 0x6b0   :  { %11022 = vmatpush1.bf16.msra.mxu0 %v13101_v28  ;;  %10859 = vmatprep.subr.bf16.mxu1 %v13108_v37  ;;  %v7689_v28 = vld [vmem:[%s17985_s7 + $0xb70] sm:$0xff]  ;;  %v7686_v37 = vld [vmem:[%s17985_s7 + $0xb58] sm:$0xff] }
 0x6b1   :  { %11023 = vmatprep.subr.bf16.mxu0 %v13110_v59  ;;  %v7690_v59 = vld [vmem:[%s17985_s7 + $0xb78] sm:$0xff]  ;;  %v13164_v36 = vcombine.high %v7685_v39, %v7689_v28  ;;  %v13163_v56 = vcombine.low %v7685_v39, %v7689_v28 }
 0x6b2   :  { %v13166_v35 = vcombine.high %v7686_v37, %v7690_v59  ;;  %v13165_v57 = vcombine.low %v7686_v37, %v7690_v59  ;;  %v7741_v37 = vld [vmem:[%s17985_s7 + $0xd10] sm:$0xff] }
 0x6b3   :  { %10860 = vmatpush1.bf16.msra.mxu1 %v13107_v44  ;;  %v7693_v44 = vld [vmem:[%s17985_s7 + $0xb90] sm:$0xff] }
 0x6b4   :  { %11024 = vmatpush1.bf16.msra.mxu0 %v13109_v47  ;;  %10861 = vmatprep.subr.bf16.mxu1 %v13116_v45  ;;  %v7697_v47 = vld [vmem:[%s17985_s7 + $0xbb0] sm:$0xff]  ;;  %v7694_v45 = vld [vmem:[%s17985_s7 + $0xb98] sm:$0xff] }
 0x6b5   :  { %11025 = vmatprep.subr.bf16.mxu0 %v13118_v50  ;;  %v7698_v50 = vld [vmem:[%s17985_s7 + $0xbb8] sm:$0xff]  ;;  %v13172_v34 = vcombine.high %v7693_v44, %v7697_v47  ;;  %v13171_v12 = vcombine.low %v7693_v44, %v7697_v47  ;;  %v7745_v59 = vld [vmem:[%s17985_s7 + $0xd30] sm:$0xff] }
 0x6b6   :  { %v13174_v55 = vcombine.high %v7694_v45, %v7698_v50  ;;  %v13173_v0 = vcombine.low %v7694_v45, %v7698_v50  ;;  %v13220_v44 = vcombine.high %v7741_v37, %v7745_v59  ;;  %v7749_v45 = vld [vmem:[%s17985_s7 + $0xd50] sm:$0xff] }
 0x6b7   :  { %10862 = vmatpush1.bf16.msra.mxu1 %v13115_v29  ;;  %v7701_v29 = vld [vmem:[%s17985_s7 + $0xbd0] sm:$0xff] }
 0x6b8   :  { %11026 = vmatpush1.bf16.msra.mxu0 %v13117_v60  ;;  %10863 = vmatprep.subr.bf16.mxu1 %v13124_v38  ;;  %v7705_v60 = vld [vmem:[%s17985_s7 + $0xbf0] sm:$0xff]  ;;  %v7702_v38 = vld [vmem:[%s17985_s7 + $0xbd8] sm:$0xff] }
 0x6b9   :  { %11027 = vmatprep.subr.bf16.mxu0 %v13126_v58  ;;  %v7706_v58 = vld [vmem:[%s17985_s7 + $0xbf8] sm:$0xff]  ;;  %v13180_v16 = vcombine.high %v7701_v29, %v7705_v60  ;;  %v13179_v53 = vcombine.low %v7701_v29, %v7705_v60  ;;  %v7753_v50 = vld [vmem:[%s17985_s7 + $0xd70] sm:$0xff] }
 0x6ba   :  { %v13182_v46 = vcombine.high %v7702_v38, %v7706_v58  ;;  %v13181_v1 = vcombine.low %v7702_v38, %v7706_v58  ;;  %v13228_v29 = vcombine.high %v7749_v45, %v7753_v50  ;;  %v7757_v38 = vld [vmem:[%s17985_s7 + $0xd90] sm:$0xff] }
 0x6bb   :  { %10864 = vmatpush1.bf16.msra.mxu1 %v13123_v61  ;;  %v7709_v61 = vld [vmem:[%s17985_s7 + $0xc10] sm:$0xff] }
 0x6bc   :  { %11028 = vmatpush1.bf16.msra.mxu0 %v13125_v8  ;;  %10865 = vmatprep.subr.bf16.mxu1 %v13132_v51  ;;  %v7713_v8 = vld [vmem:[%s17985_s7 + $0xc30] sm:$0xff]  ;;  %v7710_v51 = vld [vmem:[%s17985_s7 + $0xc18] sm:$0xff] }
 0x6bd   :  { %11029 = vmatprep.subr.bf16.mxu0 %v13134_v63  ;;  %v7714_v63 = vld [vmem:[%s17985_s7 + $0xc38] sm:$0xff]  ;;  %v13188_v2 = vcombine.high %v7709_v61, %v7713_v8  ;;  %v7761_v58 = vld [vmem:[%s17985_s7 + $0xdb0] sm:$0xff] }
 0x6be   :  { %v13190_v14 = vcombine.high %v7710_v51, %v7714_v63  ;;  %v13189_v6 = vcombine.low %v7710_v51, %v7714_v63 }
 0x6bf   :  { %10866 = vmatpush1.bf16.msra.mxu1 %v13131_v3  ;;  %v7717_v3 = vld [vmem:[%s17985_s7 + $0xc50] sm:$0xff] }
 0x6c0   :  { %11030 = vmatpush1.bf16.msra.mxu0 %v13133_v26  ;;  %10867 = vmatprep.subr.bf16.mxu1 %v13140_v4  ;;  %v7721_v26 = vld [vmem:[%s17985_s7 + $0xc70] sm:$0xff]  ;;  %v13187_v4 = vcombine.low %v7709_v61, %v7713_v8  ;;  %v13236_v61 = vcombine.high %v7757_v38, %v7761_v58 }
 0x6c1   :  { %11031 = vmatprep.subr.bf16.mxu0 %v13142_v5  ;;  %v7718_v5 = vld [vmem:[%s17985_s7 + $0xc58] sm:$0xff]  ;;  %v13196_v7 = vcombine.high %v7717_v3, %v7721_v26  ;;  %v13195_v52 = vcombine.low %v7717_v3, %v7721_v26 }
 0x6c2   :  { %v13197_v17 = vcombine.low %v7718_v5, %v7722_v54  ;;  %v7766_v3 = vld [vmem:[%s17985_s7 + $0xdd8] sm:$0xff] }
 0x6c3   :  { %10868 = vmatpush1.bf16.msra.mxu1 %v13139_v9  ;;  %v7729_v9 = vld [vmem:[%s17985_s7 + $0xcb0] sm:$0xff]  ;;  %v7770_v26 = vld [vmem:[%s17985_s7 + $0xdf8] sm:$0xff] }
 0x6c4   :  { %11032 = vmatpush1.bf16.msra.mxu0 %v13141_v10  ;;  %10869 = vmatprep.subr.bf16.mxu1 %v13148_v19  ;;  %v13198_v10 = vcombine.high %v7718_v5, %v7722_v54  ;;  %v7726_v19 = vld [vmem:[%s17985_s7 + $0xc98] sm:$0xff]  ;;  %v13204_v21 = vcombine.high %v7725_v31, %v7729_v9  ;;  %v13235_v54 = vcombine.low %v7757_v38, %v7761_v58 }
 0x6c5   :  { %11033 = vmatprep.subr.bf16.mxu0 %v13150_v11  ;;  %v7730_v11 = vld [vmem:[%s17985_s7 + $0xcb8] sm:$0xff] }
 0x6c6   :  { %v13206_v22 = vcombine.high %v7726_v19, %v7730_v11 }
 0x6c7   :  { %10870 = vmatpush1.bf16.msra.mxu1 %v13147_v23  ;;  %v7733_v23 = vld [vmem:[%s17985_s7 + $0xcd0] sm:$0xff] }
 0x6c8   :  { %11034 = vmatpush1.bf16.msra.mxu0 %v13149_v24  ;;  %10871 = vmatprep.subr.bf16.mxu1 %v13156_v25  ;;  %v7737_v24 = vld [vmem:[%s17985_s7 + $0xcf0] sm:$0xff]  ;;  %v7738_v25 = vld [vmem:[%s17985_s7 + $0xcf8] sm:$0xff] }
 0x6c9   :  { %11035 = vmatprep.subr.bf16.mxu0 %v13158_v27  ;;  %v13205_v27 = vcombine.low %v7726_v19, %v7730_v11  ;;  %v13212_v39 = vcombine.high %v7733_v23, %v7737_v24  ;;  %v7773_v19 = vld [vmem:[%s17985_s7 + $0xe10] sm:$0xff] }
 0x6ca   :  { %v7777_v11 = vld [vmem:[%s17985_s7 + $0xe30] sm:$0xff] }
 0x6cb   :  { %10872 = vmatpush1.bf16.msra.mxu1 %v13155_v33  ;;  %v7742_v33 = vld [vmem:[%s17985_s7 + $0xd18] sm:$0xff] }
 0x6cc   :  { %11036 = vmatpush1.bf16.msra.mxu0 %v13157_v32  ;;  %10873 = vmatprep.subr.bf16.mxu1 %v13164_v36  ;;  %v7746_v32 = vld [vmem:[%s17985_s7 + $0xd38] sm:$0xff]  ;;  %v13211_v36 = vcombine.low %v7733_v23, %v7737_v24  ;;  %v13252_v23 = vcombine.high %v7773_v19, %v7777_v11 }
 0x6cd   :  { %11037 = vmatprep.subr.bf16.mxu0 %v13166_v35  ;;  %v13222_v47 = vcombine.high %v7742_v33, %v7746_v32 }
 0x6cf   :  { %10874 = vmatpush1.bf16.msra.mxu1 %v13163_v56  ;;  %v7750_v56 = vld [vmem:[%s17985_s7 + $0xd58] sm:$0xff] }
 0x6d0   :  { %11038 = vmatpush1.bf16.msra.mxu0 %v13165_v57  ;;  %10875 = vmatprep.subr.bf16.mxu1 %v13172_v34  ;;  %v7754_v57 = vld [vmem:[%s17985_s7 + $0xd78] sm:$0xff]  ;;  %v13219_v34 = vcombine.low %v7741_v37, %v7745_v59 }
 0x6d1   :  { %11039 = vmatprep.subr.bf16.mxu0 %v13174_v55  ;;  %v13221_v55 = vcombine.low %v7742_v33, %v7746_v32  ;;  %v13230_v60 = vcombine.high %v7750_v56, %v7754_v57  ;;  %v7789_v33 = vld [vmem:[%s17985_s7 + $0xe90] sm:$0xff] }
 0x6d2   :  { %v7793_v32 = vld [vmem:[%s17985_s7 + $0xeb0] sm:$0xff] }
 0x6d3   :  { %10876 = vmatpush1.bf16.msra.mxu1 %v13171_v12  ;;  %v7758_v12 = vld [vmem:[%s17985_s7 + $0xd98] sm:$0xff] }
 0x6d4   :  { %11040 = vmatpush1.bf16.msra.mxu0 %v13173_v0  ;;  %10877 = vmatprep.subr.bf16.mxu1 %v13180_v16  ;;  %v7762_v0 = vld [vmem:[%s17985_s7 + $0xdb8] sm:$0xff]  ;;  %v13227_v16 = vcombine.low %v7749_v45, %v7753_v50  ;;  %v13268_v45 = vcombine.high %v7789_v33, %v7793_v32 }
 0x6d5   :  { %11041 = vmatprep.subr.bf16.mxu0 %v13182_v46  ;;  %v13229_v46 = vcombine.low %v7750_v56, %v7754_v57  ;;  %v13238_v63 = vcombine.high %v7758_v12, %v7762_v0  ;;  %v7797_v56 = vld [vmem:[%s17985_s7 + $0xed0] sm:$0xff] }
 0x6d6   :  { %v7801_v57 = vld [vmem:[%s17985_s7 + $0xef0] sm:$0xff] }
 0x6d7   :  { %10878 = vmatpush1.bf16.msra.mxu1 %v13179_v53  ;;  %v7765_v53 = vld [vmem:[%s17985_s7 + $0xdd0] sm:$0xff]  ;;  %v13276_v38 = vcombine.high %v7797_v56, %v7801_v57 }
 0x6d8   :  { %11042 = vmatpush1.bf16.msra.mxu0 %v13181_v1  ;;  %10888 = vmatprep.subr.bf16.mxu1 %v13188_v2  ;;  %v7769_v1 = vld [vmem:[%s17985_s7 + $0xdf0] sm:$0xff] }
 0x6d9   :  { %11052 = vmatprep.subr.bf16.mxu0 %v13190_v14 }
 0x6da   :  { %10880 = vmatmul.mubr.bf16.vlgmr.msra.gmra.mrb[20].mxu1 %v16761_v48 }
 0x6db   :  { %11044 = vmatmul.mubr.bf16.vlgmr.msra.gmra.mrb[24].mxu0 %v16761_v48  ;;  %10889 = vmatpush1.bf16.msra.mxu1 %v13187_v4  ;;  %v7734_v48 = vld [vmem:[%s17985_s7 + $0xcd8] sm:$0xff] }
 0x6dc   :  { %10920 = vmatprep.mubr.bf16.mxu1 %v16777_v13  ;;  %11053 = vmatpush1.bf16.msra.mxu0 %v13189_v6  ;;  %v13214_v28 = vcombine.high %v7734_v48, %v7738_v25  ;;  %v13213_v35 = vcombine.low %v7734_v48, %v7738_v25  ;;  %v7781_v48 = vld [vmem:[%s17985_s7 + $0xe50] sm:$0xff] }
 0x6dd   :  { %11084 = vmatprep.mubr.bf16.mxu0 %v16777_v13  ;;  %10890 = vmatprep.subr.bf16.mxu1 %v13196_v7  ;;  %v13203_v13 = vcombine.low %v7725_v31, %v7729_v9  ;;  %v13237_v31 = vcombine.low %v7758_v12, %v7762_v0  ;;  %v13244_v9 = vcombine.high %v7765_v53, %v7769_v1  ;;  %v7785_v25 = vld [vmem:[%s17985_s7 + $0xe70] sm:$0xff] }
 0x6de   :  { %11054 = vmatprep.subr.bf16.mxu0 %v13198_v10  ;;  %v13246_v10 = vcombine.high %v7766_v3, %v7770_v26  ;;  %v13260_v37 = vcombine.high %v7781_v48, %v7785_v25  ;;  %v7805_v12 = vld [vmem:[%s17985_s7 + $0xf10] sm:$0xff] }
 0x6df   :  { %10891 = vmatpush1.bf16.msra.mxu1 %v13195_v52  ;;  %v7774_v52 = vld [vmem:[%s17985_s7 + $0xe18] sm:$0xff]  ;;  %v7809_v0 = vld [vmem:[%s17985_s7 + $0xf30] sm:$0xff] }
 0x6e0   :  { %11055 = vmatpush1.bf16.msra.mxu0 %v13197_v17  ;;  %10892 = vmatprep.subr.bf16.mxu1 %v13204_v21  ;;  %v7778_v17 = vld [vmem:[%s17985_s7 + $0xe38] sm:$0xff]  ;;  %v13243_v21 = vcombine.low %v7765_v53, %v7769_v1  ;;  %v13284_v53 = vcombine.high %v7805_v12, %v7809_v0 }
 0x6e1   :  { %11056 = vmatprep.subr.bf16.mxu0 %v13206_v22  ;;  %v13245_v22 = vcombine.low %v7766_v3, %v7770_v26  ;;  %v13254_v24 = vcombine.high %v7774_v52, %v7778_v17  ;;  %v7813_v3 = vld [vmem:[%s17985_s7 + $0xf50] sm:$0xff] }
 0x6e2   :  { %v7817_v26 = vld [vmem:[%s17985_s7 + $0xf70] sm:$0xff] }
 0x6e3   :  { %10893 = vmatpush1.bf16.msra.mxu1 %v13203_v13  ;;  %v7782_v13 = vld [vmem:[%s17985_s7 + $0xe58] sm:$0xff] }
 0x6e4   :  { %11057 = vmatpush1.bf16.msra.mxu0 %v13205_v27  ;;  %10894 = vmatprep.subr.bf16.mxu1 %v13212_v39  ;;  %v7786_v27 = vld [vmem:[%s17985_s7 + $0xe78] sm:$0xff]  ;;  %v13251_v39 = vcombine.low %v7773_v19, %v7777_v11 }
 0x6e5   :  { %11058 = vmatprep.subr.bf16.mxu0 %v13214_v28  ;;  %v13253_v28 = vcombine.low %v7774_v52, %v7778_v17  ;;  %v13262_v59 = vcombine.high %v7782_v13, %v7786_v27  ;;  %v7822_v19 = vld [vmem:[%s17985_s7 + $0xf98] sm:$0xff]  ;;  %v13291_v52 = vcombine.low %v7813_v3, %v7817_v26 }
 0x6e6   :  { %v7826_v11 = vld [vmem:[%s17985_s7 + $0xfb8] sm:$0xff] }
 0x6e7   :  { %10895 = vmatpush1.bf16.msra.mxu1 %v13211_v36  ;;  %v7790_v36 = vld [vmem:[%s17985_s7 + $0xe98] sm:$0xff] }
 0x6e8   :  { %11059 = vmatpush1.bf16.msra.mxu0 %v13213_v35  ;;  %10896 = vmatprep.subr.bf16.mxu1 %v13220_v44  ;;  %v7794_v35 = vld [vmem:[%s17985_s7 + $0xeb8] sm:$0xff]  ;;  %v13259_v44 = vcombine.low %v7781_v48, %v7785_v25 }
 0x6e9   :  { %11060 = vmatprep.subr.bf16.mxu0 %v13222_v47  ;;  %v13261_v47 = vcombine.low %v7782_v13, %v7786_v27  ;;  %v13270_v50 = vcombine.high %v7790_v36, %v7794_v35  ;;  %v7830_v48 = vld [vmem:[%s17985_s7 + $0xfd8] sm:$0xff]  ;;  %v17741_v13 = vld [vmem:[%s17986_s8] sm:$0xff] }
 0x6ea   :  { %v7834_v25 = vld [vmem:[%s17985_s7 + $0xff8] sm:$0xff] }
 0x6eb   :  { %10897 = vmatpush1.bf16.msra.mxu1 %v13219_v34  ;;  %v7798_v34 = vld [vmem:[%s17985_s7 + $0xed8] sm:$0xff] }
 0x6ec   :  { %11061 = vmatpush1.bf16.msra.mxu0 %v13221_v55  ;;  %10898 = vmatprep.subr.bf16.mxu1 %v13228_v29  ;;  %v7802_v55 = vld [vmem:[%s17985_s7 + $0xef8] sm:$0xff]  ;;  %v13267_v29 = vcombine.low %v7789_v33, %v7793_v32  ;;  %v13309_v32 = vcombine.low %v7830_v48, %v7834_v25 }
 0x6ed   :  { %v17622_v8 = vpop.f32.mrb[16].mxu1  ;;  %v17624_v51 = vpop.f32.mrb[20].mxu0  ;;  %11062 = vmatprep.subr.bf16.mxu0 %v13230_v60  ;;  %v13269_v60 = vcombine.low %v7790_v36, %v7794_v35  ;;  %v13278_v58 = vcombine.high %v7798_v34, %v7802_v55  ;;  %v14499_v36 = vld [vmem:[%s17987_s9 + $0x40] sm:$0xff]  }
 0x6ee   :  { %v17632_v2 = vpop.f32.mrb[17].mxu1  ;;  %v17634_v14 = vpop.f32.mrb[21].mxu0 }
 0x6ef   :  { %v10598_v4 = vpop.f32.mrb[18].mxu1  ;;  %v10762_v5 = vpop.f32.mrb[22].mxu0  ;;  %10899 = vmatpush1.bf16.msra.mxu1 %v13227_v16  ;;  %v7806_v16 = vld [vmem:[%s17985_s7 + $0xf18] sm:$0xff] }
 0x6f0   :  { %11063 = vmatpush1.bf16.msra.mxu0 %v13229_v46  ;;  %v10599_v6 = vpop.f32.mrb[19].mxu1  ;;  %v10763_v7 = vpop.f32.mrb[23].mxu0  ;;  %10900 = vmatprep.subr.bf16.mxu1 %v13236_v61  ;;  %v7810_v46 = vld [vmem:[%s17985_s7 + $0xf38] sm:$0xff]  ;;  %v13275_v61 = vcombine.low %v7797_v56, %v7801_v57  ;;  %v14507_v57 = vld [vmem:[%s17987_s9 + $0x60] sm:$0xff]  }
 0x6f1   :  { %11064 = vmatprep.subr.bf16.mxu0 %v13238_v63  ;;  %v13277_v63 = vcombine.low %v7798_v34, %v7802_v55  ;;  %v13286_v1 = vcombine.high %v7806_v16, %v7810_v46  ;;  %v7814_v4 = vld [vmem:[%s17985_s7 + $0xf58] sm:$0xff]  ;;  %v13285_v6 = vcombine.low %v7806_v16, %v7810_v46  ;;  %v13292_v7 = vcombine.high %v7813_v3, %v7817_v26  ;;  %v14508_v34 = vld [vmem:[%s17987_s9 + $0x20] sm:$0xff]   ;;  %v14509_v55 = vld [vmem:[%s17987_s9 + $0x68] sm:$0xff]  }
 0x6f2   :  { %v7818_v5 = vld [vmem:[%s17985_s7 + $0xf78] sm:$0xff]  ;;  %v14520_v3 = vld [vmem:[%s17987_s9 + $0x90] sm:$0xff]  }
 0x6f3   :  { %10901 = vmatpush1.bf16.msra.mxu1 %v13235_v54  ;;  %v13283_v54 = vcombine.low %v7805_v12, %v7809_v0  ;;  %v13293_v17 = vcombine.low %v7814_v4, %v7818_v5  ;;  %v14506_v56 = vld [vmem:[%s17987_s9 + $0x18] sm:$0xff]   ;;  %v7852_v0 = vrot.slane %v17741_v13, %v15973_v43 }
 0x6f4   :  { %11065 = vmatpush1.bf16.msra.mxu0 %v13237_v31  ;;  %10902 = vmatprep.subr.bf16.mxu1 %v13244_v9  ;;  %v13294_v31 = vcombine.high %v7814_v4, %v7818_v5  ;;  %v7821_v9 = vld [vmem:[%s17985_s7 + $0xf90] sm:$0xff]  ;;  %v14513_v12 = vld [vmem:[%s17987_s9 + $0x78] sm:$0xff]   ;;  %v14523_v5 = vld [vmem:[%s17987_s9 + $0xe0] sm:$0xff]  }
 0x6f5   :  { %11066 = vmatprep.subr.bf16.mxu0 %v13246_v10  ;;  %v7825_v10 = vld [vmem:[%s17985_s7 + $0xfb0] sm:$0xff]  ;;  %v14514_v16 = vld [vmem:[%s17987_s9 + $0x38] sm:$0xff]  }
 0x6f6   :  { %v13299_v27 = vcombine.low %v7821_v9, %v7825_v10  ;;  %v14521_v26 = vld [vmem:[%s17987_s9 + $0xd8] sm:$0xff]  }
 0x6f7   :  { %10903 = vmatpush1.bf16.msra.mxu1 %v13243_v21  ;;  %v13300_v21 = vcombine.high %v7821_v9, %v7825_v10  ;;  %v14522_v4 = vld [vmem:[%s17987_s9 + $0x98] sm:$0xff]   ;;  %v14528_v9 = vld [vmem:[%s17987_s9 + $0xb0] sm:$0xff]   ;;  %v7848_v10 = vrot.slane %v17741_v13, %v15996_v40  ;;  %v14532_v40 = vld [vmem:[%s17987_s9 + $0x100] sm:$0xff]  }
 0x6f8   :  { %11067 = vmatpush1.bf16.msra.mxu0 %v13245_v22  ;;  %10904 = vmatprep.subr.bf16.mxu1 %v13252_v23  ;;  %v13302_v22 = vcombine.high %v7822_v19, %v7826_v11  ;;  %v7829_v23 = vld [vmem:[%s17985_s7 + $0xfd0] sm:$0xff] }
 0x6f9   :  { %11068 = vmatprep.subr.bf16.mxu0 %v13254_v24  ;;  %v7833_v24 = vld [vmem:[%s17985_s7 + $0xff0] sm:$0xff]  ;;  %s14653_s7 = smov 96  }
 0x6fa   :  { %v13307_v33 = vcombine.low %v7829_v23, %v7833_v24 }
 0x6fb   :  { %10905 = vmatpush1.bf16.msra.mxu1 %v13251_v39  ;;  %v13301_v39 = vcombine.low %v7822_v19, %v7826_v11  ;;  %v14529_v19 = vld [vmem:[%s17987_s9 + $0xf8] sm:$0xff]  }
 0x6fc   :  { %11069 = vmatpush1.bf16.msra.mxu0 %v13253_v28  ;;  %10906 = vmatprep.subr.bf16.mxu1 %v13260_v37  ;;  %v13308_v28 = vcombine.high %v7829_v23, %v7833_v24  ;;  %v13310_v37 = vcombine.high %v7830_v48, %v7834_v25  ;;  %v14530_v11 = vld [vmem:[%s17987_s9 + $0xb8] sm:$0xff]   ;;  %v14535_v23 = vld [vmem:[%s17987_s9 + $0x150] sm:$0xff]  }
 0x6fd   :  { %11070 = vmatprep.subr.bf16.mxu0 %v13262_v59  ;;  %v7844_v59 = vrot.slane %v17741_v13, %v15970_v41  ;;  %v14501_v41 = vld [vmem:[%s17987_s9 + $0x48] sm:$0xff]   ;;  %v14536_v24 = vld [vmem:[%s17987_s9 + $0x110] sm:$0xff]   ;;  %v14537_v48 = vld [vmem:[%s17987_s9 + $0x158] sm:$0xff]  }
 0x6fe   :  { %v14538_v25 = vld [vmem:[%s17987_s9 + $0x118] sm:$0xff]  }
 0x6ff   :  { %10907 = vmatpush1.bf16.msra.mxu1 %v13259_v44  ;;  %v13484_v35 = vadd.f32 %v17632_v2, %v7844_v59  ;;  %v14500_v44 = vld [vmem:[%s17987_s9] sm:$0xff]   ;;  %v14502_v2 = vld [vmem:[%s17987_s9 + $0x8] sm:$0xff]   ;;  %v14543_v59 = vld [vmem:[%s17987_s9 + $0x170] sm:$0xff]  }
 0x700   :  { %11071 = vmatpush1.bf16.msra.mxu0 %v13261_v47  ;;  %10908 = vmatprep.subr.bf16.mxu1 %v13268_v45  ;;  %v14503_v45 = vld [vmem:[%s17987_s9 + $0x50] sm:$0xff]  }
 0x701   :  { %11072 = vmatprep.subr.bf16.mxu0 %v13270_v50  ;;  %v11094_v47 = vpack.c.bf16 %v13484_v35, %v13484_v35  ;;  %v14504_v50 = vld [vmem:[%s17987_s9 + $0x10] sm:$0xff]   ;;  %v14547_v35 = vld [vmem:[%s17987_s9 + $0x1c0] sm:$0xff]  }
 0x703   :  { %10909 = vmatpush1.bf16.msra.mxu1 %v13267_v29  ;;  %v14510_v29 = vld [vmem:[%s17987_s9 + $0x28] sm:$0xff]  }
 0x704   :  { %11073 = vmatpush1.bf16.msra.mxu0 %v13269_v60  ;;  %10910 = vmatprep.subr.bf16.mxu1 %v13276_v38  ;;  %v14511_v60 = vld [vmem:[%s17987_s9 + $0x70] sm:$0xff]  }
 0x705   :  { %11074 = vmatprep.subr.bf16.mxu0 %v13278_v58  ;;  %v14512_v38 = vld [vmem:[%s17987_s9 + $0x30] sm:$0xff]   ;;  %v7840_v58 = vrot.slane %v17741_v13, %v15962_v49  ;;  %v14515_v49 = vld [vmem:[%s17987_s9 + $0xc0] sm:$0xff]  }
 0x707   :  { %10911 = vmatpush1.bf16.msra.mxu1 %v13275_v61  ;;  %v13483_v46 = vadd.f32 %v17622_v8, %v7840_v58  ;;  %v13486_v61 = vadd.f32 %v17634_v14, %v7852_v0  ;;  %v14518_v8 = vld [vmem:[%s17987_s9 + $0x88] sm:$0xff]   ;;  %v14519_v14 = vld [vmem:[%s17987_s9 + $0xd0] sm:$0xff]  }
 0x708   :  { %11075 = vmatpush1.bf16.msra.mxu0 %v13277_v63  ;;  %10912 = vmatprep.subr.bf16.mxu1 %v13284_v53  ;;  %v14516_v63 = vld [vmem:[%s17987_s9 + $0x80] sm:$0xff]   ;;  %v14517_v53 = vld [vmem:[%s17987_s9 + $0xc8] sm:$0xff]  }
 0x709   :  { %11076 = vmatprep.subr.bf16.mxu0 %v13286_v1  ;;  %v11093_v43 = vpack.c.bf16 %v13483_v46, %v13483_v46  ;;  %v11096_v1 = vpack.c.bf16 %v13486_v61, %v13486_v61  ;;  %v14550_v0 = vld [vmem:[%s17987_s9 + $0x188] sm:$0xff]   ;;  %v14552_v46 = vld [vmem:[%s17987_s9 + $0x190] sm:$0xff]   ;;  %v14554_v61 = vld [vmem:[%s17987_s9 + $0x198] sm:$0xff]  }
 0x70b   :  { %10913 = vmatpush1.bf16.msra.mxu1 %v13283_v54  ;;  %v14524_v54 = vld [vmem:[%s17987_s9 + $0xa0] sm:$0xff]  }
 0x70c   :  { %11077 = vmatpush1.bf16.msra.mxu0 %v13285_v6  ;;  %10914 = vmatprep.subr.bf16.mxu1 %v13292_v7  ;;  %v14525_v6 = vld [vmem:[%s17987_s9 + $0xe8] sm:$0xff]  }
 0x70d   :  { %11078 = vmatprep.subr.bf16.mxu0 %v13294_v31  ;;  %v14526_v7 = vld [vmem:[%s17987_s9 + $0xa8] sm:$0xff]   ;;  %v14527_v31 = vld [vmem:[%s17987_s9 + $0xf0] sm:$0xff]  }
 0x70f   :  { %10915 = vmatpush1.bf16.msra.mxu1 %v13291_v52  ;;  %v13485_v52 = vadd.f32 %v17624_v51, %v7848_v10  ;;  %v14534_v51 = vld [vmem:[%s17987_s9 + $0x108] sm:$0xff]  }
 0x710   :  { %11079 = vmatpush1.bf16.msra.mxu0 %v13293_v17  ;;  %10916 = vmatprep.subr.bf16.mxu1 %v13300_v21  ;;  %v14531_v17 = vld [vmem:[%s17987_s9 + $0x140] sm:$0xff]  }
 0x711   :  { %11080 = vmatprep.subr.bf16.mxu0 %v13302_v22  ;;  %v11095_v21 = vpack.c.bf16 %v13485_v52, %v13485_v52  ;;  %v14533_v22 = vld [vmem:[%s17987_s9 + $0x148] sm:$0xff]  }
 0x713   :  { %10917 = vmatpush1.bf16.msra.mxu1 %v13299_v27  ;;  %v14539_v27 = vld [vmem:[%s17987_s9 + $0x160] sm:$0xff]  }
 0x714   :  { %11081 = vmatpush1.bf16.msra.mxu0 %v13301_v39  ;;  %10918 = vmatprep.subr.bf16.mxu1 %v13308_v28  ;;  %v14540_v39 = vld [vmem:[%s17987_s9 + $0x120] sm:$0xff]   ;;  %v14541_v28 = vld [vmem:[%s17987_s9 + $0x168] sm:$0xff]  }
 0x715   :  { %11082 = vmatprep.subr.bf16.mxu0 %v13310_v37  ;;  %v14542_v37 = vld [vmem:[%s17987_s9 + $0x128] sm:$0xff]  }
 0x717   :  { %10919 = vmatpush1.bf16.msra.mxu1 %v13307_v33  ;;  %v14544_v33 = vld [vmem:[%s17987_s9 + $0x130] sm:$0xff]  }
 0x718   :  { %11083 = vmatpush1.bf16.msra.mxu0 %v13309_v32  ;;  %13377 = vmatprep.subr.bf16.mxu1 %v14499_v36  ;;  %v14545_v32 = vld [vmem:[%s17987_s9 + $0x178] sm:$0xff]  }
 0x719   :  { %v14546_v36 = vld [vmem:[%s17987_s9 + $0x138] sm:$0xff]  }
 0x71a   :  { %10921 = vmatmul.mubr.bf16.vlgmr.msra.gmra.mrb[20].mxu1 %v16968_v30 }
 0x71b   :  { %11085 = vmatmul.mubr.bf16.vlgmr.msra.gmra.mrb[24].mxu0 %v16968_v30  ;;  %13378 = vmatpush3.bf16.msra.mxu1 %v14500_v44  ;;  %v14505_v30 = vld [vmem:[%s17987_s9 + $0x58] sm:$0xff]   ;;  %v7856_v44 = vrot.slane %v17741_v13, %v16067_v15  ;;  %v14548_v15 = vld [vmem:[%s17987_s9 + $0x180] sm:$0xff]  }
 0x71c   :  { %11652 = vmatprep.mubr.bf16.mxu1 %v11094_v47  ;;  %13379 = vmatprep.subr.bf16.mxu1 %v14501_v41  ;;  %v7860_v41 = vrot.slane %v17741_v13, %v16070_v20  ;;  %v7868_v47 = vrot.slane %v17741_v13, %v4893_v18  ;;  %v14549_v18 = vld [vmem:[%s17987_s9 + $0x1c8] sm:$0xff]  }
 0x71f   :  { %13380 = vmatpush3.bf16.msra.mxu1 %v14502_v2 }
 0x720   :  { %13381 = vmatprep.subr.bf16.mxu1 %v14503_v45 }
 0x723   :  { %13382 = vmatpush3.bf16.msra.mxu1 %v14504_v50 }
 0x724   :  { %13383 = vmatprep.subr.bf16.mxu1 %v14505_v30 }
 0x727   :  { %13384 = vmatpush3.bf16.msra.mxu1 %v14506_v56 }
 0x728   :  { %13385 = vmatprep.subr.bf16.mxu1 %v14507_v57 }
 0x72b   :  { %13386 = vmatpush3.bf16.msra.mxu1 %v14508_v34 }
 0x72c   :  { %13387 = vmatprep.subr.bf16.mxu1 %v14509_v55 }
 0x72f   :  { %13388 = vmatpush3.bf16.msra.mxu1 %v14510_v29 }
 0x730   :  { %13389 = vmatprep.subr.bf16.mxu1 %v14511_v60 }
 0x733   :  { %13390 = vmatpush3.bf16.msra.mxu1 %v14512_v38 }
 0x734   :  { %13391 = vmatprep.subr.bf16.mxu1 %v14513_v12 }
 0x737   :  { %13392 = vmatpush3.bf16.msra.mxu1 %v14514_v16  ;;  %v14551_v16 = vld [vmem:[%s17987_s9 + $0x1d0] sm:$0xff]  }
 0x738   :  { %13399 = vmatprep.subr.bf16.mxu1 %v14515_v49  ;;  %v14553_v49 = vld [vmem:[%s17987_s9 + $0x1d8] sm:$0xff]  }
 0x73a   :  { %11653 = vmatmul.mubr.bf16.vlgmr.msra.gmra.mrb[24].mxu1 %v11093_v43  ;;  %v14556_v43 = vld [vmem:[%s17987_s9 + $0x1a0] sm:$0xff]  }
 0x73b   :  { %13400 = vmatpush3.bf16.msra.mxu1 %v14516_v63  ;;  %11692 = vmatprep.mubr.bf16.mxu1 %v11096_v1  ;;  %v14555_v63 = vld [vmem:[%s17987_s9 + $0x1e0] sm:$0xff]   ;;  %v14558_v1 = vld [vmem:[%s17987_s9 + $0x1a8] sm:$0xff]  }
 0x73c   :  { %13401 = vmatprep.subr.bf16.mxu1 %v14517_v53  ;;  %v14557_v53 = vld [vmem:[%s17987_s9 + $0x1e8] sm:$0xff]  }
 0x73f   :  { %13402 = vmatpush3.bf16.msra.mxu1 %v14518_v8  ;;  %v14559_v8 = vld [vmem:[%s17987_s9 + $0x1f0] sm:$0xff]  }
 0x740   :  { %13403 = vmatprep.subr.bf16.mxu1 %v14519_v14  ;;  %v14560_v14 = vld [vmem:[%s17987_s9 + $0x1b0] sm:$0xff]  }
 0x743   :  { %13404 = vmatpush3.bf16.msra.mxu1 %v14520_v3  ;;  %v7864_v3 = vrot.slane %v17741_v13, %v4889_v62  ;;  %v13311_v62 = vld [vmem:[%s17988_s10] ss:$0 sm:$0xff] }
 0x744   :  { %13405 = vmatprep.subr.bf16.mxu1 %v14521_v26  ;;  %v14561_v26 = vld [vmem:[%s17987_s9 + $0x1f8] sm:$0xff]  }
 0x747   :  { %13406 = vmatpush3.bf16.msra.mxu1 %v14522_v4 }
 0x748   :  { %13407 = vmatprep.subr.bf16.mxu1 %v14523_v5  ;;  %v14562_v5 = vld [vmem:[%s17987_s9 + $0x1b8] sm:$0xff]  }
 0x74b   :  { %13408 = vmatpush3.bf16.msra.mxu1 %v14524_v54 }
 0x74c   :  { %13409 = vmatprep.subr.bf16.mxu1 %v14525_v6 }
 0x74f   :  { %13410 = vmatpush3.bf16.msra.mxu1 %v14526_v7 }
 0x750   :  { %13411 = vmatprep.subr.bf16.mxu1 %v14527_v31 }
 0x753   :  { %13412 = vmatpush3.bf16.msra.mxu1 %v14528_v9 }
 0x754   :  { %13413 = vmatprep.subr.bf16.mxu1 %v14529_v19 }
 0x757   :  { %13414 = vmatpush3.bf16.msra.mxu1 %v14530_v11 }
 0x758   :  { %13421 = vmatprep.subr.bf16.mxu1 %v14531_v17 }
 0x75a   :  { %11693 = vmatmul.mubr.bf16.vlgmr.msra.gmra.mrb[28].mxu1 %v11095_v21 }
 0x75b   :  { %13422 = vmatpush3.bf16.msra.mxu1 %v14532_v40 }
 0x75c   :  { %13423 = vmatprep.subr.bf16.mxu1 %v14533_v22 }
 0x75f   :  { %13424 = vmatpush3.bf16.msra.mxu1 %v14534_v51 }
 0x760   :  { %13425 = vmatprep.subr.bf16.mxu1 %v14535_v23 }
 0x763   :  { %13426 = vmatpush3.bf16.msra.mxu1 %v14536_v24 }
 0x764   :  { %13427 = vmatprep.subr.bf16.mxu1 %v14537_v48 }
 0x767   :  { %13428 = vmatpush3.bf16.msra.mxu1 %v14538_v25 }
 0x768   :  { %13429 = vmatprep.subr.bf16.mxu1 %v14539_v27 }
 0x76b   :  { %13430 = vmatpush3.bf16.msra.mxu1 %v14540_v39 }
 0x76c   :  { %13431 = vmatprep.subr.bf16.mxu1 %v14541_v28 }
 0x76f   :  { %13432 = vmatpush3.bf16.msra.mxu1 %v14542_v37 }
 0x770   :  { %13433 = vmatprep.subr.bf16.mxu1 %v14543_v59 }
 0x773   :  { %13434 = vmatpush3.bf16.msra.mxu1 %v14544_v33 }
 0x774   :  { %13435 = vmatprep.subr.bf16.mxu1 %v14545_v32 }
 0x777   :  { %13436 = vmatpush3.bf16.msra.mxu1 %v14546_v36 }
 0x778   :  { %13443 = vmatprep.subr.bf16.mxu1 %v14547_v35 }
 0x7ed   :  { %v10922_v2 = vpop.f32.mrb[20].mxu1 }
 0x7ee   :  { %v13487_v45 = vadd.f32 %v10922_v2, %v7856_v44  ;;  %v11086_v50 = vpop.f32.mrb[24].mxu0  ;;  %v10924_v30 = vpop.f32.mrb[21].mxu1 }
 0x7ef   :  { %v13488_v56 = vadd.f32 %v10924_v30, %v7860_v41  ;;  %v11088_v57 = vpop.f32.mrb[25].mxu0  ;;  %v10926_v34 = vpop.f32.mrb[22].mxu1  ;;  %v13489_v54 = vadd.f32 %v11086_v50, %v7864_v3 }
 0x7f0   :  { %v13490_v55 = vadd.f32 %v11088_v57, %v7868_v47  ;;  %v11090_v29 = vpop.f32.mrb[26].mxu0  ;;  %v10927_v60 = vpop.f32.mrb[23].mxu1  ;;  %v11097_v20 = vpack.c.bf16 %v13487_v45, %v13487_v45 }
 0x7f1   :  { %v11098_v38 = vpack.c.bf16 %v13488_v56, %v13488_v56  ;;  %v11091_v58 = vpop.f32.mrb[27].mxu0  ;;  %v11099_v42 = vpack.c.bf16 %v13489_v54, %v13489_v54 }
 0x7f2   :  { %v11100_v12 = vpack.c.bf16 %v13490_v55, %v13490_v55 }
 0x7f3   :  { %11732 = vmatprep.mubr.bf16.mxu1 %v11098_v38 }
 0x7f4   :  { %11733 = vmatmul.mubr.bf16.vlgmr.msra.gmra.mrb[32].mxu1 %v11097_v20 }
 0x7f5   :  { %13444 = vmatpush3.bf16.msra.mxu1 %v14548_v15  ;;  %11772 = vmatprep.mubr.bf16.mxu1 %v11100_v12 }
 0x7f6   :  { %13445 = vmatprep.subr.bf16.mxu1 %v14549_v18 }
 0x7f9   :  { %13446 = vmatpush3.bf16.msra.mxu1 %v14550_v0 }
 0x7fa   :  { %13447 = vmatprep.subr.bf16.mxu1 %v14551_v16 }
 0x7fd   :  { %13448 = vmatpush3.bf16.msra.mxu1 %v14552_v46 }
 0x7fe   :  { %13449 = vmatprep.subr.bf16.mxu1 %v14553_v49 }
 0x801   :  { %13450 = vmatpush3.bf16.msra.mxu1 %v14554_v61 }
 0x802   :  { %13451 = vmatprep.subr.bf16.mxu1 %v14555_v63 }
 0x805   :  { %13452 = vmatpush3.bf16.msra.mxu1 %v14556_v43 }
 0x806   :  { %13453 = vmatprep.subr.bf16.mxu1 %v14557_v53 }
 0x809   :  { %13454 = vmatpush3.bf16.msra.mxu1 %v14558_v1 }
 0x80a   :  { %13455 = vmatprep.subr.bf16.mxu1 %v14559_v8 }
 0x80d   :  { %13456 = vmatpush3.bf16.msra.mxu1 %v14560_v14  ;;  %v13393_v4 = vpop.f32.mrb[24].mxu1 }
 0x80e   :  { %v13394_v6 = vpop.f32.mrb[25].mxu1  ;;  %13457 = vmatprep.subr.bf16.mxu1 %v14561_v26 }
 0x80f   :  { %v13395_v7 = vadd.f32 %v13394_v6, %v13393_v4  ;;  %v13396_v31 = vpop.f32.mrb[26].mxu1 }
 0x810   :  { %v13397_v9 = vpop.f32.mrb[27].mxu1 }
 0x811   :  { %13458 = vmatpush3.bf16.msra.mxu1 %v14562_v5  ;;  %v11655_v19 = vadd.f32 %v13395_v7, %v13311_v62 }
 0x814   :  { %11773 = vmatmul.mubr.bf16.vlgmr.msra.gmra.mrb[36].mxu1 %v11099_v42 }
 0x82d   :  { %v13415_v13 = vpop.f32.mrb[28].mxu1 }
 0x82e   :  { %v13416_v10 = vpop.f32.mrb[29].mxu1 }
 0x82f   :  { %v13417_v11 = vadd.f32 %v13416_v10, %v13415_v13  ;;  %v13418_v52 = vpop.f32.mrb[30].mxu1 }
 0x830   :  { %v13419_v17 = vpop.f32.mrb[31].mxu1 }
 0x831   :  { %v11695_v40 = vadd.f32 %v13417_v11, %v11655_v19 }
 0x8c7   :  { %v13437_v21 = vpop.f32.mrb[32].mxu1 }
 0x8c8   :  { %v13438_v22 = vpop.f32.mrb[33].mxu1 }
 0x8c9   :  { %v13439_v51 = vadd.f32 %v13438_v22, %v13437_v21  ;;  %v13440_v23 = vpop.f32.mrb[34].mxu1 }
 0x8ca   :  { %v13441_v24 = vpop.f32.mrb[35].mxu1 }
 0x8cb   :  { %v11735_v48 = vadd.f32 %v13439_v51, %v11695_v40 }
 0x8e7   :  { %v13459_v25 = vpop.f32.mrb[36].mxu1 }
 0x8e8   :  { %v13460_v27 = vpop.f32.mrb[37].mxu1 }
 0x8e9   :  { %v13461_v39 = vadd.f32 %v13460_v27, %v13459_v25  ;;  %v13462_v28 = vpop.f32.mrb[38].mxu1 }
 0x8ea   :  { %v13463_v37 = vpop.f32.mrb[39].mxu1 }
 0x8eb   :  { %v11775_v59 = vadd.f32 %v13461_v39, %v11735_v48 }
 0x8ed   :  { %11780 = vst [vmem:[%s17989_s11] sm:$0x3] %v11775_v59  ;;  %v11783_v33 = vmul.f32 %v11775_v59, %v11775_v59  ;;  %v11781_v32 = vmul.f32 1.442695, %v11775_v59 }
 0x8ef   :  { %11785 = vrot.lane.b32.xlu0 %v11783_v33, %s14651_s22  ;;  %14583 = vpow2.f32 %v11781_v32 }
 0x8f9   :  { %v14584_v36 = vpop.eup %14583 }
 0x961   :  { %v11786_v35 = vpop.permute.xlu0 %11785 }
 0x962   :  { %v11788_v44 = vadd.f32 %v14584_v36, %v11786_v35 }
 0x964   :  { %v13376_v41 = vadd.f32 -1.0, %v11788_v44 }
 0x966   :  { %v11790_v47 = vsub.f32 %v13376_v41, %v11775_v59 }
 0x968   :  { %11792 = vrot.lane.b32.xlu0 %v11790_v47, %s14653_s7 }
 0x9da   :  { %v11793_v2 = vpop.permute.xlu0 %11792 }
 0x9db   :  { %v11796_v45 = vsel %vm11795_vm10, %v11793_v2, 0.0 }
 0x9dc   :  { %11797 = vadd.xlane.f32.xlu1 %v11796_v45 }
 0xa69   :  { %v11798_v50 = vpop.xlane.xlu1 %11797 }
 0xa6a   :  { %v11799_v30 = vrot.slane %v11798_v50, 4 }
 0xa6c   :  { %v11800_v56 = vadd.f32 %v11799_v30, %v11798_v50 }
 0xa6e   :  { %v11801_v57 = vrot.slane %v11800_v56, 2 }
 0xa70   :  { %v11802_v34 = vadd.f32 %v11801_v57, %v11800_v56 }
 0xa72   :  { %v11803_v55 = vrot.slane %v11802_v34, 1 }
 0xa74   :  { %v11804_v29 = vadd.f32 %v11803_v55, %v11802_v34 }
 0xa76   :  { %13623 = vpush %v11804_v29 }
 0xaa7   :  { %s13624_s11 = spop %13623 }
 0xaa8   :  { %s11806_s22 = smul.f32 0.5, %s13624_s11 }
 0xaaa   :  { %11808 = sst [smem:[#allocation7]] %s11806_s22 }
 0xaab   :  { %14639 = shalt.err (!%p14636_p4)
}
 0xaac   :  { %s14654_s29 = smov [#allocation7]  }
 0xaad   :  { %11818 = dma.smem_to_hbm %s14654_s29, 16, %s17990_s12, [#allocation4]  }
 0xaae   :  { %14644 = dma.done.wait [#allocation4], 16  }
 0xaaf   :  { %14645 = vsyncadd [#allocation4], 4294967280 }
 0xab0   :  { %11824 = sfence }
 0xab1   :  { %11825 = vsyncpa [#allocation3], 1 }
 0xab2   :  { %11826 = vsyncpa [#allocation6], 1 }
 0xab3   :  { %11827 = vsyncpa [#allocation4], 1 }

</bundles_post_ra>
